<compile_context>
chip_gen: v5e
topology: v5e:2x2
jax: 0.10.0
libtpu: 0.0.40
codegen_flags: <defaults>
</compile_context>

<pallas_src>
import functools

import jax
import jax.numpy as jnp
from jax.experimental import pallas as pl
from jax.experimental.pallas import tpu as pltpu

# Zero-padding carried by each stage.  Grids per layer (for HxW image):
#   layer-1 output grid: H+2*_P1, layer-2 output grid: H+2*_P2, layer-3 output: H.
# _P1/_P2 are minimal values that keep every intermediate grid a multiple of 8
# (sublane tiling), so all in-kernel reshapes stay aligned and cheap.
# The wrapper pads the raw input by _P0 = _P1 + 1 before patch extraction.
_P0, _P1, _P2 = 9, 8, 4


def _interior_mask(h, w, c, halo):
    """(h, w, c) bool mask: True on the central (h-2*halo, w-2*halo) region."""
    u = jax.lax.broadcasted_iota(jnp.int32, (h, w, c), 0)
    v = jax.lax.broadcasted_iota(jnp.int32, (h, w, c), 1)
    return (u >= halo) & (u < h - halo) & (v >= halo) & (v < w - halo)


def _esrgan_kernel(p1_ref, w1_ref, b1_ref, w2_ref, b2_ref, w3_ref, b3_ref,
                   o_ref, *, H, W):
    """Fused relu(conv1) -> relu(conv2) -> conv3 for one image per grid step.

    p1_ref: (1, H+2*_P1, W+2*_P1, 27)  layer-1 im2col patches (built in wrapper)
    w1_ref: (27, 64)   im2col-reshaped HWIO weights of conv1
    w2_ref: (576, 64), w3_ref: (576, 3)  im2col-reshaped HWIO weights
    b*_ref: (1, Cout)
    o_ref : (1, H, W, 3)
    """
    h1, w1n = H + 2 * _P1, W + 2 * _P1
    h2, w2n = H + 2 * _P2, W + 2 * _P2

    def conv_im2col(a, w_ref, b_ref, off, oh, ow):
        # One [oh*ow, 9*cin] @ [9*cin, cout] contraction (K=576 for cin=64).
        cin = a.shape[-1]
        cols = [a[off + dy:off + dy + oh,
                  off + dx:off + dx + ow, :].reshape(oh * ow, cin)
                for dy in range(3) for dx in range(3)]
        p = jnp.concatenate(cols, axis=-1)                    # (oh*ow, 9*cin)
        y = jnp.dot(p, w_ref[...], preferred_element_type=jnp.float32)
        return y + b_ref[0][None, :]

    # ---- layer 1: 3 -> 64 over the (h1, w1n) grid, single K=27 matmul -------
    p1 = p1_ref[0].reshape(h1 * w1n, 27)
    a1 = jnp.dot(p1, w1_ref[...], preferred_element_type=jnp.float32)
    a1 = jnp.maximum(a1 + b1_ref[0][None, :], 0.0).reshape(h1, w1n, 64)
    # Zero the halo ring so a1 == relu(conv1(x)) zero-padded by _P1.
    a1 = jnp.where(_interior_mask(h1, w1n, 64, _P1), a1, 0.0)

    # ---- layer 2: 64 -> 64 over the (h2, w2n) grid ---------------------------
    a2 = jnp.maximum(conv_im2col(a1, w2_ref, b2_ref, _P1 - _P2 - 1, h2, w2n), 0.0)
    a2 = a2.reshape(h2, w2n, 64)
    a2 = jnp.where(_interior_mask(h2, w2n, 64, _P2), a2, 0.0)

    # ---- layer 3: 64 -> 3 over the real (H, W) grid, no ReLU -----------------
    y = conv_im2col(a2, w3_ref, b3_ref, _P2 - 1, H, W)
    o_ref[...] = y.reshape(1, H, W, 3).astype(o_ref.dtype)


def esrgan_forward(x_nchw, params):
    """Matches torch ESRGAN.forward: relu(conv1) -> relu(conv2) -> conv3 (f32)."""
    N, C, H, W = x_nchw.shape
    assert C == 3 and H % 8 == 0 and W % 8 == 0
    h1, w1n = H + 2 * _P1, W + 2 * _P1

    x = jnp.transpose(x_nchw, (0, 2, 3, 1))                       # NCHW -> NHWC (tiny)
    xp = jnp.pad(x, ((0, 0), (_P0, _P0), (_P0, _P0), (0, 0)))     # single small pad
    # Layer-1 im2col in the wrapper (only 27 channels -> negligible HBM traffic);
    # ordering (dy, dx, cin) matches the HWIO weight flatten below.
    cols = [xp[:, dy:dy + h1, dx:dx + w1n, :]
            for dy in range(3) for dx in range(3)]
    p1 = jnp.concatenate(cols, axis=-1)                           # (N, h1, w1n, 27)

    w1 = params["w1"].reshape(9 * 3, 64)                          # im2col weight layout
    w2 = params["w2"].reshape(9 * 64, 64)
    w3 = params["w3"].reshape(9 * 64, 3)

    kernel = functools.partial(_esrgan_kernel, H=H, W=W)
    y = pl.pallas_call(
        kernel,
        out_shape=jax.ShapeDtypeStruct((N, H, W, 3), x_nchw.dtype),
        grid_spec=pltpu.PrefetchScalarGridSpec(
            num_scalar_prefetch=0,
            grid=(N,),
            in_specs=[
                pl.BlockSpec((1, h1, w1n, 27), lambda n: (n, 0, 0, 0)),
                pl.BlockSpec((9 * 3, 64), lambda n: (0, 0)),
                pl.BlockSpec((1, 64), lambda n: (0, 0)),
                pl.BlockSpec((9 * 64, 64), lambda n: (0, 0)),
                pl.BlockSpec((1, 64), lambda n: (0, 0)),
                pl.BlockSpec((9 * 64, 3), lambda n: (0, 0)),
                pl.BlockSpec((1, 3), lambda n: (0, 0)),
            ],
            out_specs=pl.BlockSpec((1, H, W, 3), lambda n: (n, 0, 0, 0)),
        ),
        compiler_params=pltpu.CompilerParams(
            dimension_semantics=("parallel",),
        ),
    )(p1, w1, params["b1"], w2, params["b2"], w3, params["b3"])
    return jnp.transpose(y, (0, 3, 1, 2))                         # NHWC -> NCHW


def _conv_ref(x_nhwc, w_hwio, b_1c):
    y = jax.lax.conv_general_dilated(
        x_nhwc, w_hwio, window_strides=(1, 1), padding="SAME",
        dimension_numbers=("NHWC", "HWIO", "NHWC"),
        precision=jax.lax.Precision.HIGHEST,
    )
    return y + b_1c


if __name__ == "__main__":
    key = jax.random.PRNGKey(0)
    ks = jax.random.split(key, 7)

    N, C, H, W = 2, 3, 16, 16
    x = jax.random.normal(ks[0], (N, C, H, W), dtype=jnp.float32)

    def init_conv(kw, kb, cin, cout):
        # Deterministic PyTorch-style uniform init (Conv2d default bound).
        bound = 1.0 / (cin * 3 * 3) ** 0.5
        w_oihw = jax.random.uniform(kw, (cout, cin, 3, 3), jnp.float32, -bound, bound)
        b = jax.random.uniform(kb, (cout,), jnp.float32, -bound, bound)
        w_hwio = jnp.transpose(w_oihw, (2, 3, 1, 0))  # OIHW -> HWIO
        return w_hwio, b.reshape(1, cout)

    w1p, b1 = init_conv(ks[1], ks[2], 3, 64)
    w2p, b2 = init_conv(ks[3], ks[4], 64, 64)
    w3p, b3 = init_conv(ks[5], ks[6], 64, 3)
    params = dict(w1=w1p, b1=b1, w2=w2p, b2=b2, w3=w3p, b3=b3)

    out = jax.jit(esrgan_forward)(x, params)
    out = jax.block_until_ready(out)
    assert out.shape == (N, 3, H, W) and out.dtype == jnp.float32

    # Pure-JAX reference for correctness.
    xh = jnp.transpose(x, (0, 2, 3, 1))
    r = jnp.maximum(_conv_ref(xh, w1p, b1), 0.0)
    r = jnp.maximum(_conv_ref(r, w2p, b2), 0.0)
    r = _conv_ref(r, w3p, b3)
    ref = jnp.transpose(r, (0, 3, 1, 2))
    assert jnp.allclose(out, ref, atol=1e-3, rtol=1e-3), (
        float(jnp.max(jnp.abs(out - ref)))
    )

    print("KERNEL_OK")
</pallas_src>

<mosaic_0001>
module attributes {stable_mosaic.version = 11 : i64} {
  func.func @_esrgan_kernel(%arg0: i32, %arg1: memref<1x32x32x27xf32, #tpu.memory_space<vmem>>, %arg2: memref<27x64xf32, #tpu.memory_space<vmem>>, %arg3: memref<1x64xf32, #tpu.memory_space<vmem>>, %arg4: memref<576x64xf32, #tpu.memory_space<vmem>>, %arg5: memref<1x64xf32, #tpu.memory_space<vmem>>, %arg6: memref<576x3xf32, #tpu.memory_space<vmem>>, %arg7: memref<1x3xf32, #tpu.memory_space<vmem>>, %arg8: memref<1x16x16x3xf32, #tpu.memory_space<vmem>>) attributes {dimension_semantics = [#tpu.dimension_semantics<parallel>], iteration_bounds = array<i64: 2>, scalar_prefetch = 0 : i64, scratch_operands = 0 : i64, tpu.core_type = #tpu.core_type<tc>, window_params = [{transform_indices = @transform_0, window_bounds = array<i64: 1, 32, 32, 27>}, {pipeline_mode = #tpu.pipeline_mode<synchronous>, transform_indices = @transform_1, window_bounds = array<i64: 27, 64>}, {pipeline_mode = #tpu.pipeline_mode<synchronous>, transform_indices = @transform_2, window_bounds = array<i64: 1, 64>}, {pipeline_mode = #tpu.pipeline_mode<synchronous>, transform_indices = @transform_3, window_bounds = array<i64: 576, 64>}, {pipeline_mode = #tpu.pipeline_mode<synchronous>, transform_indices = @transform_4, window_bounds = array<i64: 1, 64>}, {pipeline_mode = #tpu.pipeline_mode<synchronous>, transform_indices = @transform_5, window_bounds = array<i64: 576, 3>}, {pipeline_mode = #tpu.pipeline_mode<synchronous>, transform_indices = @transform_6, window_bounds = array<i64: 1, 3>}, {transform_indices = @transform_7, window_bounds = array<i64: 1, 16, 16, 3>}]} {
    %c0 = arith.constant 0 : index
    %c0_0 = arith.constant 0 : index
    %c0_1 = arith.constant 0 : index
    %c0_2 = arith.constant 0 : index
    %0 = vector.load %arg1[%c0, %c0_0, %c0_1, %c0_2] : memref<1x32x32x27xf32, #tpu.memory_space<vmem>>, vector<1x32x32x27xf32>
    %1 = vector.shape_cast %0 : vector<1x32x32x27xf32> to vector<32x32x27xf32>
    %2 = vector.shape_cast %1 : vector<32x32x27xf32> to vector<1024x27xf32>
    %c0_3 = arith.constant 0 : index
    %c0_4 = arith.constant 0 : index
    %3 = vector.load %arg2[%c0_3, %c0_4] : memref<27x64xf32, #tpu.memory_space<vmem>>, vector<27x64xf32>
    %cst = arith.constant dense<0.000000e+00> : vector<1024x64xf32>
    %4 = tpu.matmul %2, %3, %cst {dimension_numbers = #tpu.dot_dimension_numbers<[1], [0], [0], [1], [0, 0, 1, 1], [], []>} : vector<1024x27xf32>, vector<27x64xf32>, vector<1024x64xf32> -> vector<1024x64xf32>
    %c0_5 = arith.constant 0 : index
    %c0_6 = arith.constant 0 : index
    %5 = vector.load %arg3[%c0_5, %c0_6] : memref<1x64xf32, #tpu.memory_space<vmem>>, vector<1x64xf32>
    %6 = vector.shape_cast %5 : vector<1x64xf32> to vector<64xf32>
    %7 = vector.shape_cast %6 : vector<64xf32> to vector<1x64xf32>
    %8 = vector.broadcast %7 : vector<1x64xf32> to vector<1024x64xf32>
    %9 = arith.addf %4, %8 : vector<1024x64xf32>
    %cst_7 = arith.constant 0.000000e+00 : f32
    %10 = vector.broadcast %cst_7 : f32 to vector<1024x64xf32>
    %11 = arith.maximumf %9, %10 : vector<1024x64xf32>
    %12 = vector.shape_cast %11 : vector<1024x64xf32> to vector<32x32x64xf32>
    %13 = tpu.iota {dimensions = array<i32: 0>} : vector<32x32x64xi32>
    %14 = tpu.iota {dimensions = array<i32: 1>} : vector<32x32x64xi32>
    %c8_i32 = arith.constant 8 : i32
    %15 = vector.broadcast %c8_i32 : i32 to vector<32x32x64xi32>
    %16 = arith.cmpi sge, %13, %15 : vector<32x32x64xi32>
    %c24_i32 = arith.constant 24 : i32
    %17 = vector.broadcast %c24_i32 : i32 to vector<32x32x64xi32>
    %18 = arith.cmpi slt, %13, %17 : vector<32x32x64xi32>
    %19 = arith.andi %16, %18 : vector<32x32x64xi1>
    %c8_i32_8 = arith.constant 8 : i32
    %20 = vector.broadcast %c8_i32_8 : i32 to vector<32x32x64xi32>
    %21 = arith.cmpi sge, %14, %20 : vector<32x32x64xi32>
    %22 = arith.andi %19, %21 : vector<32x32x64xi1>
    %c24_i32_9 = arith.constant 24 : i32
    %23 = vector.broadcast %c24_i32_9 : i32 to vector<32x32x64xi32>
    %24 = arith.cmpi slt, %14, %23 : vector<32x32x64xi32>
    %25 = arith.andi %22, %24 : vector<32x32x64xi1>
    %cst_10 = arith.constant 0.000000e+00 : f32
    %26 = vector.broadcast %cst_10 : f32 to vector<32x32x64xf32>
    %27 = arith.select %25, %12, %26 : vector<32x32x64xi1>, vector<32x32x64xf32>
    %28 = vector.extract_strided_slice %27 {offsets = [3, 3, 0], sizes = [24, 24, 64], strides = [1, 1, 1]} : vector<32x32x64xf32> to vector<24x24x64xf32>
    %29 = vector.shape_cast %28 : vector<24x24x64xf32> to vector<576x64xf32>
    %30 = vector.extract_strided_slice %27 {offsets = [3, 4, 0], sizes = [24, 24, 64], strides = [1, 1, 1]} : vector<32x32x64xf32> to vector<24x24x64xf32>
    %31 = vector.shape_cast %30 : vector<24x24x64xf32> to vector<576x64xf32>
    %32 = vector.extract_strided_slice %27 {offsets = [3, 5, 0], sizes = [24, 24, 64], strides = [1, 1, 1]} : vector<32x32x64xf32> to vector<24x24x64xf32>
    %33 = vector.shape_cast %32 : vector<24x24x64xf32> to vector<576x64xf32>
    %34 = vector.extract_strided_slice %27 {offsets = [4, 3, 0], sizes = [24, 24, 64], strides = [1, 1, 1]} : vector<32x32x64xf32> to vector<24x24x64xf32>
    %35 = vector.shape_cast %34 : vector<24x24x64xf32> to vector<576x64xf32>
    %36 = vector.extract_strided_slice %27 {offsets = [4, 4, 0], sizes = [24, 24, 64], strides = [1, 1, 1]} : vector<32x32x64xf32> to vector<24x24x64xf32>
    %37 = vector.shape_cast %36 : vector<24x24x64xf32> to vector<576x64xf32>
    %38 = vector.extract_strided_slice %27 {offsets = [4, 5, 0], sizes = [24, 24, 64], strides = [1, 1, 1]} : vector<32x32x64xf32> to vector<24x24x64xf32>
    %39 = vector.shape_cast %38 : vector<24x24x64xf32> to vector<576x64xf32>
    %40 = vector.extract_strided_slice %27 {offsets = [5, 3, 0], sizes = [24, 24, 64], strides = [1, 1, 1]} : vector<32x32x64xf32> to vector<24x24x64xf32>
    %41 = vector.shape_cast %40 : vector<24x24x64xf32> to vector<576x64xf32>
    %42 = vector.extract_strided_slice %27 {offsets = [5, 4, 0], sizes = [24, 24, 64], strides = [1, 1, 1]} : vector<32x32x64xf32> to vector<24x24x64xf32>
    %43 = vector.shape_cast %42 : vector<24x24x64xf32> to vector<576x64xf32>
    %44 = vector.extract_strided_slice %27 {offsets = [5, 5, 0], sizes = [24, 24, 64], strides = [1, 1, 1]} : vector<32x32x64xf32> to vector<24x24x64xf32>
    %45 = vector.shape_cast %44 : vector<24x24x64xf32> to vector<576x64xf32>
    %46 = tpu.concatenate %29, %31, %33, %35, %37, %39, %41, %43, %45 in 1 : vector<576x64xf32>, vector<576x64xf32>, vector<576x64xf32>, vector<576x64xf32>, vector<576x64xf32>, vector<576x64xf32>, vector<576x64xf32>, vector<576x64xf32>, vector<576x64xf32> -> vector<576x576xf32>
    %c0_11 = arith.constant 0 : index
    %c0_12 = arith.constant 0 : index
    %47 = vector.load %arg4[%c0_11, %c0_12] : memref<576x64xf32, #tpu.memory_space<vmem>>, vector<576x64xf32>
    %cst_13 = arith.constant dense<0.000000e+00> : vector<576x64xf32>
    %48 = tpu.matmul %46, %47, %cst_13 {dimension_numbers = #tpu.dot_dimension_numbers<[1], [0], [0], [1], [0, 0, 1, 1], [], []>} : vector<576x576xf32>, vector<576x64xf32>, vector<576x64xf32> -> vector<576x64xf32>
    %c0_14 = arith.constant 0 : index
    %c0_15 = arith.constant 0 : index
    %49 = vector.load %arg5[%c0_14, %c0_15] : memref<1x64xf32, #tpu.memory_space<vmem>>, vector<1x64xf32>
    %50 = vector.shape_cast %49 : vector<1x64xf32> to vector<64xf32>
    %51 = vector.shape_cast %50 : vector<64xf32> to vector<1x64xf32>
    %52 = vector.broadcast %51 : vector<1x64xf32> to vector<576x64xf32>
    %53 = arith.addf %48, %52 : vector<576x64xf32>
    %cst_16 = arith.constant 0.000000e+00 : f32
    %54 = vector.broadcast %cst_16 : f32 to vector<576x64xf32>
    %55 = arith.maximumf %53, %54 : vector<576x64xf32>
    %56 = vector.shape_cast %55 : vector<576x64xf32> to vector<24x24x64xf32>
    %57 = tpu.iota {dimensions = array<i32: 0>} : vector<24x24x64xi32>
    %58 = tpu.iota {dimensions = array<i32: 1>} : vector<24x24x64xi32>
    %c4_i32 = arith.constant 4 : i32
    %59 = vector.broadcast %c4_i32 : i32 to vector<24x24x64xi32>
    %60 = arith.cmpi sge, %57, %59 : vector<24x24x64xi32>
    %c20_i32 = arith.constant 20 : i32
    %61 = vector.broadcast %c20_i32 : i32 to vector<24x24x64xi32>
    %62 = arith.cmpi slt, %57, %61 : vector<24x24x64xi32>
    %63 = arith.andi %60, %62 : vector<24x24x64xi1>
    %c4_i32_17 = arith.constant 4 : i32
    %64 = vector.broadcast %c4_i32_17 : i32 to vector<24x24x64xi32>
    %65 = arith.cmpi sge, %58, %64 : vector<24x24x64xi32>
    %66 = arith.andi %63, %65 : vector<24x24x64xi1>
    %c20_i32_18 = arith.constant 20 : i32
    %67 = vector.broadcast %c20_i32_18 : i32 to vector<24x24x64xi32>
    %68 = arith.cmpi slt, %58, %67 : vector<24x24x64xi32>
    %69 = arith.andi %66, %68 : vector<24x24x64xi1>
    %cst_19 = arith.constant 0.000000e+00 : f32
    %70 = vector.broadcast %cst_19 : f32 to vector<24x24x64xf32>
    %71 = arith.select %69, %56, %70 : vector<24x24x64xi1>, vector<24x24x64xf32>
    %72 = vector.extract_strided_slice %71 {offsets = [3, 3, 0], sizes = [16, 16, 64], strides = [1, 1, 1]} : vector<24x24x64xf32> to vector<16x16x64xf32>
    %73 = vector.shape_cast %72 : vector<16x16x64xf32> to vector<256x64xf32>
    %74 = vector.extract_strided_slice %71 {offsets = [3, 4, 0], sizes = [16, 16, 64], strides = [1, 1, 1]} : vector<24x24x64xf32> to vector<16x16x64xf32>
    %75 = vector.shape_cast %74 : vector<16x16x64xf32> to vector<256x64xf32>
    %76 = vector.extract_strided_slice %71 {offsets = [3, 5, 0], sizes = [16, 16, 64], strides = [1, 1, 1]} : vector<24x24x64xf32> to vector<16x16x64xf32>
    %77 = vector.shape_cast %76 : vector<16x16x64xf32> to vector<256x64xf32>
    %78 = vector.extract_strided_slice %71 {offsets = [4, 3, 0], sizes = [16, 16, 64], strides = [1, 1, 1]} : vector<24x24x64xf32> to vector<16x16x64xf32>
    %79 = vector.shape_cast %78 : vector<16x16x64xf32> to vector<256x64xf32>
    %80 = vector.extract_strided_slice %71 {offsets = [4, 4, 0], sizes = [16, 16, 64], strides = [1, 1, 1]} : vector<24x24x64xf32> to vector<16x16x64xf32>
    %81 = vector.shape_cast %80 : vector<16x16x64xf32> to vector<256x64xf32>
    %82 = vector.extract_strided_slice %71 {offsets = [4, 5, 0], sizes = [16, 16, 64], strides = [1, 1, 1]} : vector<24x24x64xf32> to vector<16x16x64xf32>
    %83 = vector.shape_cast %82 : vector<16x16x64xf32> to vector<256x64xf32>
    %84 = vector.extract_strided_slice %71 {offsets = [5, 3, 0], sizes = [16, 16, 64], strides = [1, 1, 1]} : vector<24x24x64xf32> to vector<16x16x64xf32>
    %85 = vector.shape_cast %84 : vector<16x16x64xf32> to vector<256x64xf32>
    %86 = vector.extract_strided_slice %71 {offsets = [5, 4, 0], sizes = [16, 16, 64], strides = [1, 1, 1]} : vector<24x24x64xf32> to vector<16x16x64xf32>
    %87 = vector.shape_cast %86 : vector<16x16x64xf32> to vector<256x64xf32>
    %88 = vector.extract_strided_slice %71 {offsets = [5, 5, 0], sizes = [16, 16, 64], strides = [1, 1, 1]} : vector<24x24x64xf32> to vector<16x16x64xf32>
    %89 = vector.shape_cast %88 : vector<16x16x64xf32> to vector<256x64xf32>
    %90 = tpu.concatenate %73, %75, %77, %79, %81, %83, %85, %87, %89 in 1 : vector<256x64xf32>, vector<256x64xf32>, vector<256x64xf32>, vector<256x64xf32>, vector<256x64xf32>, vector<256x64xf32>, vector<256x64xf32>, vector<256x64xf32>, vector<256x64xf32> -> vector<256x576xf32>
    %c0_20 = arith.constant 0 : index
    %c0_21 = arith.constant 0 : index
    %91 = vector.load %arg6[%c0_20, %c0_21] : memref<576x3xf32, #tpu.memory_space<vmem>>, vector<576x3xf32>
    %cst_22 = arith.constant dense<0.000000e+00> : vector<256x3xf32>
    %92 = tpu.matmul %90, %91, %cst_22 {dimension_numbers = #tpu.dot_dimension_numbers<[1], [0], [0], [1], [0, 0, 1, 1], [], []>} : vector<256x576xf32>, vector<576x3xf32>, vector<256x3xf32> -> vector<256x3xf32>
    %c0_23 = arith.constant 0 : index
    %c0_24 = arith.constant 0 : index
    %93 = vector.load %arg7[%c0_23, %c0_24] : memref<1x3xf32, #tpu.memory_space<vmem>>, vector<1x3xf32>
    %94 = vector.shape_cast %93 : vector<1x3xf32> to vector<3xf32>
    %95 = vector.shape_cast %94 : vector<3xf32> to vector<1x3xf32>
    %96 = vector.broadcast %95 : vector<1x3xf32> to vector<256x3xf32>
    %97 = arith.addf %92, %96 : vector<256x3xf32>
    %98 = vector.shape_cast %97 : vector<256x3xf32> to vector<1x16x16x3xf32>
    %c0_25 = arith.constant 0 : index
    %c0_26 = arith.constant 0 : index
    %c0_27 = arith.constant 0 : index
    %c0_28 = arith.constant 0 : index
    %99 = vector.load %arg8[%c0_25, %c0_26, %c0_27, %c0_28] : memref<1x16x16x3xf32, #tpu.memory_space<vmem>>, vector<1x16x16x3xf32>
    tpu.vector_store %arg8[%c0_25, %c0_26, %c0_27, %c0_28], %98 {strides = array<i32>} : memref<1x16x16x3xf32, #tpu.memory_space<vmem>>, vector<1x16x16x3xf32>,
    return
  }
  func.func @transform_0(%arg0: i32) -> (i32, i32, i32, i32) {
    %c0_i32 = arith.constant 0 : i32
    %c0_i32_0 = arith.constant 0 : i32
    %c0_i32_1 = arith.constant 0 : i32
    %c0_i32_2 = arith.constant 0 : i32
    return %arg0, %c0_i32, %c0_i32_0, %c0_i32_1 : i32, i32, i32, i32
  }
  func.func @transform_1(%arg0: i32) -> (i32, i32) {
    %c0_i32 = arith.constant 0 : i32
    %c0_i32_0 = arith.constant 0 : i32
    %c0_i32_1 = arith.constant 0 : i32
    return %c0_i32, %c0_i32_0 : i32, i32
  }
  func.func @transform_2(%arg0: i32) -> (i32, i32) {
    %c0_i32 = arith.constant 0 : i32
    %c0_i32_0 = arith.constant 0 : i32
    %c0_i32_1 = arith.constant 0 : i32
    return %c0_i32, %c0_i32_0 : i32, i32
  }
  func.func @transform_3(%arg0: i32) -> (i32, i32) {
    %c0_i32 = arith.constant 0 : i32
    %c0_i32_0 = arith.constant 0 : i32
    %c0_i32_1 = arith.constant 0 : i32
    return %c0_i32, %c0_i32_0 : i32, i32
  }
  func.func @transform_4(%arg0: i32) -> (i32, i32) {
    %c0_i32 = arith.constant 0 : i32
    %c0_i32_0 = arith.constant 0 : i32
    %c0_i32_1 = arith.constant 0 : i32
    return %c0_i32, %c0_i32_0 : i32, i32
  }
  func.func @transform_5(%arg0: i32) -> (i32, i32) {
    %c0_i32 = arith.constant 0 : i32
    %c0_i32_0 = arith.constant 0 : i32
    %c0_i32_1 = arith.constant 0 : i32
    return %c0_i32, %c0_i32_0 : i32, i32
  }
  func.func @transform_6(%arg0: i32) -> (i32, i32) {
    %c0_i32 = arith.constant 0 : i32
    %c0_i32_0 = arith.constant 0 : i32
    %c0_i32_1 = arith.constant 0 : i32
    return %c0_i32, %c0_i32_0 : i32, i32
  }
  func.func @transform_7(%arg0: i32) -> (i32, i32, i32, i32) {
    %c0_i32 = arith.constant 0 : i32
    %c0_i32_0 = arith.constant 0 : i32
    %c0_i32_1 = arith.constant 0 : i32
    %c0_i32_2 = arith.constant 0 : i32
    return %arg0, %c0_i32, %c0_i32_0, %c0_i32_1 : i32, i32, i32, i32
  }
}

</mosaic_0001>

<bundles_post_ra>
// kernel: esrgan_forward.1
= control target key start
LH: loop header
LB: loop body
LE: loop exit
PB: predicated region body
PF: predicated region fallthrough
CT: control target
= control target key end

     0   :  { %s6797_s24 = smov 0   ;;  %s12152_s0 = inlined_call_operand.vmem [shape: f32[2,32,32,27], index: 0, kind: input, shape index: {}]   ;;  %s12153_s1 = inlined_call_operand.vmem [shape: f32[27,64], index: 1, kind: input, shape index: {}]   ;;  %s12154_s2 = inlined_call_operand.vmem [shape: f32[1,64], index: 2, kind: input, shape index: {}]   ;;  %s12155_s3 = inlined_call_operand.vmem [shape: f32[576,64], index: 3, kind: input, shape index: {}]   ;;  %s12156_s4 = inlined_call_operand.vmem [shape: f32[1,64], index: 4, kind: input, shape index: {}]   ;;  %s12157_s5 = inlined_call_operand.vmem [shape: f32[576,3], index: 5, kind: input, shape index: {}]   ;;  %s12158_s6 = inlined_call_operand.vmem [shape: f32[1,3], index: 6, kind: input, shape index: {}]   ;;  %s12159_s7 = inlined_call_operand.vmem [shape: f32[2,16,16,3], index: 7, kind: output, shape index: {}]  }
   0x1 LB: > { %s6219_s25 = sadd.s32 4294967295, %s6753_s24   ;;  %p6223_p0 = scmp.ge.s32.totalorder %s6753_s24, 1  ;;  %s6753_s24 = sphi %s6797_s24, %s17_s24  }
   0x2   : > { %p237_p1 = scmp.lt.s32.totalorder %s6753_s24, 3 }
   0x4   : > { %p238_p2 = pnand %p6223_p0, %p237_p1 }
   0x6   : > { %241 = sbr.rel (%p238_p2) target bundleno = 3054 (0xbee), region = 48 }
   0xb   : > { %v410_v0 = vld [vmem:[%s12153_s1 + $0x18] sm:$0x7]  ;;  %vm800_vm0 = vcmask 1042432   ;;  %v409_v1 = vld [vmem:[%s12153_s1 + $0x10] sm:$0xff]  ;;  %p269_p3 = scmp.lt.s32.totalorder %s6219_s25, 1  ;;  %v408_v2 = vld [vmem:[%s12153_s1 + $0x8] sm:$0xff] }
   0xc   : > { %6228 = vmatpush.msk.msra.mxu0 %vm800_vm0, %v410_v0  ;;  %v407_v3 = vld [vmem:[%s12153_s1] sm:$0xff]  ;;  %vm415_vm1 = vcmask 220160   ;;  %vm1755_vm2 = vcmask 1043456   ;;  %vm1514_vm3 = vcmask 1044480   ;;  %s6755_s17 = smov 64   ;;  %vm2958_vm4 = vcmask 523264  }
   0xd   : > { %s13528_s25 = smov (!%p269_p3, %s6219_s25), 1  ;;  %vm6131_vm7 = vcmask 23552  }
   0xe   : > { %817 = vmatpush.msra.mxu0 %v409_v1  ;;  %s6463_s11 = sshll.u32 %s13528_s25, 10  ;;  %s6464_s22 = sshll.u32 %s13528_s25, 8 }
   0xf   : > { %s6824_s14 = scalar_lea.vmem %s12152_s0, %s6463_s11  ;;  %s11957_s26 = scalar_lea.vmem %s12159_s7, %s6464_s22 }
  0x10   : > { %818 = vmatpush.msra.mxu0 %v408_v2  ;;  %v279_v4 = vld [vmem:[%s6824_s14] sm:$0xff]  ;;  %v280_v5 = vld [vmem:[%s6824_s14 + $0x8] sm:$0xff]  ;;  %v281_v6 = vld [vmem:[%s6824_s14 + $0x10] sm:$0xff] }
  0x11   : > { %v282_v7 = vld [vmem:[%s6824_s14 + $0x18] sm:$0xff]  ;;  %v283_v8 = vld [vmem:[%s6824_s14 + $0x20] sm:$0xff]  ;;  %v284_v9 = vld [vmem:[%s6824_s14 + $0x28] sm:$0xff] }
  0x12   : > { %819 = vmatpush.msra.mxu0 %v407_v3  ;;  %v285_v10 = vld [vmem:[%s6824_s14 + $0x30] sm:$0xff]  ;;  %v286_v11 = vld [vmem:[%s6824_s14 + $0x38] sm:$0xff]  ;;  %v287_v12 = vld [vmem:[%s6824_s14 + $0x40] sm:$0xff] }
  0x13   : > { %6229 = vmatmul.msk.f32.vlgmr.msra.gmra.mxu0 %vm415_vm1, %v279_v4  ;;  %v288_v13 = vld [vmem:[%s6824_s14 + $0x48] sm:$0xff]  ;;  %v289_v14 = vld [vmem:[%s6824_s14 + $0x50] sm:$0xff]  ;;  %v290_v15 = vld [vmem:[%s6824_s14 + $0x58] sm:$0xff] }
  0x14   : > { %v291_v16 = vld [vmem:[%s6824_s14 + $0x60] sm:$0xff]  ;;  %v292_v17 = vld [vmem:[%s6824_s14 + $0x68] sm:$0xff]  ;;  %v293_v18 = vld [vmem:[%s6824_s14 + $0x70] sm:$0xff] }
  0x15   : > { %v294_v19 = vld [vmem:[%s6824_s14 + $0x78] sm:$0xff]  ;;  %v295_v21 = vld [vmem:[%s6824_s14 + $0x80] sm:$0xff]  ;;  %v296_v23 = vld [vmem:[%s6824_s14 + $0x88] sm:$0xff] }
  0x16   : > { %v297_v25 = vld [vmem:[%s6824_s14 + $0x90] sm:$0xff]  ;;  %v298_v27 = vld [vmem:[%s6824_s14 + $0x98] sm:$0xff]  ;;  %v299_v29 = vld [vmem:[%s6824_s14 + $0xa0] sm:$0xff] }
  0x17   : > { %v300_v31 = vld [vmem:[%s6824_s14 + $0xa8] sm:$0xff]  ;;  %v301_v33 = vld [vmem:[%s6824_s14 + $0xb0] sm:$0xff]  ;;  %v302_v35 = vld [vmem:[%s6824_s14 + $0xb8] sm:$0xff] }
  0x18   : > { %v303_v37 = vld [vmem:[%s6824_s14 + $0xc0] sm:$0xff]  ;;  %v304_v39 = vld [vmem:[%s6824_s14 + $0xc8] sm:$0xff]  ;;  %v305_v41 = vld [vmem:[%s6824_s14 + $0xd0] sm:$0xff] }
  0x19   : > { %v306_v43 = vld [vmem:[%s6824_s14 + $0xd8] sm:$0xff]  ;;  %v307_v45 = vld [vmem:[%s6824_s14 + $0xe0] sm:$0xff]  ;;  %v308_v47 = vld [vmem:[%s6824_s14 + $0xe8] sm:$0xff] }
  0x1a   : > { %v309_v49 = vld [vmem:[%s6824_s14 + $0xf0] sm:$0xff]  ;;  %v310_v51 = vld [vmem:[%s6824_s14 + $0xf8] sm:$0xff]  ;;  %v311_v53 = vld [vmem:[%s6824_s14 + $0x100] sm:$0xff] }
  0x1b   : > { %6230 = vmatmul.msk.f32.gmra.mxu0 %vm415_vm1, %v280_v5  ;;  %v312_v55 = vld [vmem:[%s6824_s14 + $0x108] sm:$0xff]  ;;  %v313_v57 = vld [vmem:[%s6824_s14 + $0x110] sm:$0xff]  ;;  %v314_v59 = vld [vmem:[%s6824_s14 + $0x118] sm:$0xff] }
  0x1c   : > { %v315_v61 = vld [vmem:[%s6824_s14 + $0x120] sm:$0xff]  ;;  %v316_v63 = vld [vmem:[%s6824_s14 + $0x128] sm:$0xff]  ;;  %v317_v1 = vld [vmem:[%s6824_s14 + $0x130] sm:$0xff] }
  0x1d   : > { %v318_v3 = vld [vmem:[%s6824_s14 + $0x138] sm:$0xff]  ;;  %v319_v5 = vld [vmem:[%s6824_s14 + $0x140] sm:$0xff] }
  0x23   : > { %6231 = vmatmul.msk.f32.gmra.mxu0 %vm415_vm1, %v281_v6 }
  0x2b   : > { %6232 = vmatmul.msk.f32.gmra.mxu0 %vm415_vm1, %v282_v7  ;;  %v320_v7 = vld [vmem:[%s6824_s14 + $0x148] sm:$0xff] }
  0x33   : > { %6233 = vmatmul.msk.f32.gmra.mxu0 %vm415_vm1, %v283_v8 }
  0x3b   : > { %6234 = vmatmul.msk.f32.gmra.mxu0 %vm415_vm1, %v284_v9  ;;  %v321_v9 = vld [vmem:[%s6824_s14 + $0x150] sm:$0xff] }
  0x43   : > { %6235 = vmatmul.msk.f32.gmra.mxu0 %vm415_vm1, %v285_v10 }
  0x4b   : > { %6236 = vmatmul.msk.f32.gmra.mxu0 %vm415_vm1, %v286_v11  ;;  %v322_v11 = vld [vmem:[%s6824_s14 + $0x158] sm:$0xff] }
  0x53   : > { %6237 = vmatmul.msk.f32.gmra.mxu0 %vm415_vm1, %v287_v12 }
  0x5b   : > { %6238 = vmatmul.msk.f32.gmra.mxu0 %vm415_vm1, %v288_v13  ;;  %v323_v13 = vld [vmem:[%s6824_s14 + $0x160] sm:$0xff] }
  0x63   : > { %6239 = vmatmul.msk.f32.gmra.mxu0 %vm415_vm1, %v289_v14 }
  0x6b   : > { %6240 = vmatmul.msk.f32.gmra.mxu0 %vm415_vm1, %v290_v15  ;;  %v324_v15 = vld [vmem:[%s6824_s14 + $0x168] sm:$0xff] }
  0x73   : > { %6241 = vmatmul.msk.f32.gmra.mxu0 %vm415_vm1, %v291_v16 }
  0x7b   : > { %6242 = vmatmul.msk.f32.gmra.mxu0 %vm415_vm1, %v292_v17  ;;  %v325_v17 = vld [vmem:[%s6824_s14 + $0x170] sm:$0xff] }
  0x83   : > { %6243 = vmatmul.msk.f32.gmra.mxu0 %vm415_vm1, %v293_v18 }
  0x8b   : > { %6244 = vmatmul.msk.f32.gmra.mxu0 %vm415_vm1, %v294_v19  ;;  %v326_v19 = vld [vmem:[%s6824_s14 + $0x178] sm:$0xff] }
  0x90   : > { %v821_v20 = vpop.f32.mrf.mxu0 }
  0x93   : > { %6245 = vmatmul.msk.f32.gmra.mxu0 %vm415_vm1, %v295_v21  ;;  %v327_v21 = vld [vmem:[%s6824_s14 + $0x180] sm:$0xff] }
  0x98   : > { %v823_v22 = vpop.f32.mrf.mxu0 }
  0x9b   : > { %6246 = vmatmul.msk.f32.gmra.mxu0 %vm415_vm1, %v296_v23  ;;  %v328_v23 = vld [vmem:[%s6824_s14 + $0x188] sm:$0xff] }
  0xa0   : > { %v825_v24 = vpop.f32.mrf.mxu0 }
  0xa1   : > { %v6928_v24 = vld [vmem:[%s12154_s2] ss:$0 sm:$0xff] }
  0xa3   : > { %6247 = vmatmul.msk.f32.gmra.mxu0 %vm415_vm1, %v297_v25 }
  0xa8   : > { %v827_v26 = vpop.f32.mrf.mxu0 }
  0xab   : > { %6248 = vmatmul.msk.f32.gmra.mxu0 %vm415_vm1, %v298_v27  ;;  %v329_v27 = vld [vmem:[%s6824_s14 + $0x190] sm:$0xff] }
  0xb0   : > { %v829_v28 = vpop.f32.mrf.mxu0 }
  0xb3   : > { %6249 = vmatmul.msk.f32.gmra.mxu0 %vm415_vm1, %v299_v29 }
  0xb8   : > { %v831_v30 = vpop.f32.mrf.mxu0 }
  0xbb   : > { %6250 = vmatmul.msk.f32.gmra.mxu0 %vm415_vm1, %v300_v31 }
  0xc0   : > { %v833_v32 = vpop.f32.mrf.mxu0 }
  0xc3   : > { %6251 = vmatmul.msk.f32.gmra.mxu0 %vm415_vm1, %v301_v33 }
  0xc8   : > { %v835_v34 = vpop.f32.mrf.mxu0 }
  0xcb   : > { %6252 = vmatmul.msk.f32.gmra.mxu0 %vm415_vm1, %v302_v35 }
  0xd0   : > { %v837_v36 = vpop.f32.mrf.mxu0 }
  0xd3   : > { %6253 = vmatmul.msk.f32.gmra.mxu0 %vm415_vm1, %v303_v37  ;;  %v330_v37 = vld [vmem:[%s6824_s14 + $0x198] sm:$0xff] }
  0xd8   : > { %v839_v38 = vpop.f32.mrf.mxu0 }
  0xdb   : > { %6254 = vmatmul.msk.f32.gmra.mxu0 %vm415_vm1, %v304_v39 }
  0xe0   : > { %v841_v40 = vpop.f32.mrf.mxu0 }
  0xe1   : > { %v331_v40 = vld [vmem:[%s6824_s14 + $0x1a0] sm:$0xff] }
  0xe3   : > { %6255 = vmatmul.msk.f32.gmra.mxu0 %vm415_vm1, %v305_v41 }
  0xe8   : > { %v843_v42 = vpop.f32.mrf.mxu0 }
  0xe9   : > { %v332_v42 = vld [vmem:[%s6824_s14 + $0x1a8] sm:$0xff] }
  0xeb   : > { %6256 = vmatmul.msk.f32.gmra.mxu0 %vm415_vm1, %v306_v43 }
  0xf0   : > { %v845_v44 = vpop.f32.mrf.mxu0 }
  0xf3   : > { %6257 = vmatmul.msk.f32.gmra.mxu0 %vm415_vm1, %v307_v45  ;;  %v333_v45 = vld [vmem:[%s6824_s14 + $0x1b0] sm:$0xff] }
  0xf8   : > { %v848_v46 = vpop.f32.mrf.mxu0 }
  0xfb   : > { %6258 = vmatmul.msk.f32.gmra.mxu0 %vm415_vm1, %v308_v47 }
 0x100   : > { %v851_v48 = vpop.f32.mrf.mxu0 }
 0x103   : > { %6259 = vmatmul.msk.f32.gmra.mxu0 %vm415_vm1, %v309_v49 }
 0x108   : > { %v854_v50 = vpop.f32.mrf.mxu0 }
 0x10b   : > { %6260 = vmatmul.msk.f32.gmra.mxu0 %vm415_vm1, %v310_v51 }
 0x110   : > { %v857_v52 = vpop.f32.mrf.mxu0 }
 0x113   : > { %6261 = vmatmul.msk.f32.gmra.mxu0 %vm415_vm1, %v311_v53 }
 0x118   : > { %v860_v54 = vpop.f32.mrf.mxu0 }
 0x11b   : > { %6262 = vmatmul.msk.f32.gmra.mxu0 %vm415_vm1, %v312_v55  ;;  %v334_v55 = vld [vmem:[%s6824_s14 + $0x1b8] sm:$0xff] }
 0x120   : > { %v863_v56 = vpop.f32.mrf.mxu0 }
 0x123   : > { %6263 = vmatmul.msk.f32.gmra.mxu0 %vm415_vm1, %v313_v57 }
 0x128   : > { %v866_v58 = vpop.f32.mrf.mxu0 }
 0x129   : > { %v335_v58 = vld [vmem:[%s6824_s14 + $0x1c0] sm:$0xff] }
 0x12b   : > { %6264 = vmatmul.msk.f32.gmra.mxu0 %vm415_vm1, %v314_v59 }
 0x130   : > { %v869_v60 = vpop.f32.mrf.mxu0 }
 0x131   : > { %v336_v60 = vld [vmem:[%s6824_s14 + $0x1c8] sm:$0xff] }
 0x133   : > { %6265 = vmatmul.msk.f32.gmra.mxu0 %vm415_vm1, %v315_v61 }
 0x138   : > { %v872_v62 = vpop.f32.mrf.mxu0 }
 0x13b   : > { %6266 = vmatmul.msk.f32.gmra.mxu0 %vm415_vm1, %v316_v63  ;;  %v337_v63 = vld [vmem:[%s6824_s14 + $0x1d0] sm:$0xff] }
 0x140   : > { %v875_v0 = vpop.f32.mrf.mxu0 }
 0x143   : > { %6267 = vmatmul.msk.f32.gmra.mxu0 %vm415_vm1, %v317_v1 }
 0x148   : > { %v878_v2 = vpop.f32.mrf.mxu0 }
 0x14b   : > { %6268 = vmatmul.msk.f32.gmra.mxu0 %vm415_vm1, %v318_v3 }
 0x150   : > { %v881_v4 = vpop.f32.mrf.mxu0 }
 0x153   : > { %6269 = vmatmul.msk.f32.gmra.mxu0 %vm415_vm1, %v319_v5 }
 0x158   : > { %v884_v6 = vpop.f32.mrf.mxu0 }
 0x15b   : > { %6270 = vmatmul.msk.f32.gmra.mxu0 %vm415_vm1, %v320_v7 }
 0x160   : > { %v887_v8 = vpop.f32.mrf.mxu0 }
 0x163   : > { %6271 = vmatmul.msk.f32.gmra.mxu0 %vm415_vm1, %v321_v9  ;;  %v338_v9 = vld [vmem:[%s6824_s14 + $0x1d8] sm:$0xff] }
 0x168   : > { %v890_v10 = vpop.f32.mrf.mxu0 }
 0x16b   : > { %6272 = vmatmul.msk.f32.gmra.mxu0 %vm415_vm1, %v322_v11 }
 0x170   : > { %v893_v12 = vpop.f32.mrf.mxu0 }
 0x171   : > { %v339_v12 = vld [vmem:[%s6824_s14 + $0x1e0] sm:$0xff] }
 0x173   : > { %6273 = vmatmul.msk.f32.gmra.mxu0 %vm415_vm1, %v323_v13 }
 0x178   : > { %v896_v14 = vpop.f32.mrf.mxu0 }
 0x179   : > { %v340_v14 = vld [vmem:[%s6824_s14 + $0x1e8] sm:$0xff] }
 0x17b   : > { %6274 = vmatmul.msk.f32.gmra.mxu0 %vm415_vm1, %v324_v15 }
 0x180   : > { %v899_v16 = vpop.f32.mrf.mxu0 }
 0x183   : > { %6275 = vmatmul.msk.f32.gmra.mxu0 %vm415_vm1, %v325_v17  ;;  %v341_v17 = vld [vmem:[%s6824_s14 + $0x1f0] sm:$0xff] }
 0x188   : > { %v902_v18 = vpop.f32.mrf.mxu0 }
 0x18b   : > { %6276 = vmatmul.msk.f32.gmra.mxu0 %vm415_vm1, %v326_v19 }
 0x190   : > { %v905_v20 = vpop.f32.mrf.mxu0 }
 0x193   : > { %6277 = vmatmul.msk.f32.gmra.mxu0 %vm415_vm1, %v327_v21 }
 0x198   : > { %v908_v22 = vpop.f32.mrf.mxu0 }
 0x199   : > { %v909_v25 = vadd.f32 %v6928_v24, %v908_v22 }
 0x19b   : > { %6278 = vmatmul.msk.f32.gmra.mxu0 %vm415_vm1, %v328_v23  ;;  %v6933_v28 = vmax.f32 %v909_v25, 0.0 }
 0x19d   : > { %v12205_v32 = vrot.slane %v6933_v28, 4  ;;  %v12175_v34 = vrot.slane %v6933_v28, 5 }
 0x1a0   : > { %v911_v26 = vpop.f32.mrf.mxu0 }
 0x1a1   : > { %v912_v29 = vadd.f32 %v6928_v24, %v911_v26 }
 0x1a3   : > { %v6936_v30 = vmax.f32 %v912_v29, 0.0  ;;  %6279 = vmatmul.msk.f32.gmra.mxu0 %vm415_vm1, %v329_v27  ;;  %v342_v29 = vld [vmem:[%s6824_s14 + $0x1f8] sm:$0xff] }
 0x1a5   : > { %v12174_v31 = vrot.slane %v6936_v30, 5  ;;  %v12201_v33 = vrot.slane %v6936_v30, 4 }
 0x1a7   : > { %v6948_v35 = vsel %vm1755_vm2, %v12205_v32, %v12201_v33  ;;  %v6956_v38 = vsel %vm800_vm0, %v12175_v34, %v12174_v31  ;;  %v364_v31 = vld [vmem:[%s6824_s14 + $0x2a8] sm:$0xff] }
 0x1a8   : > { %12551 = vst [vmem:[#allocation2_spill] sm:$0xff] %v6948_v35  ;;  %v914_v36 = vpop.f32.mrf.mxu0 }
 0x1a9   : > { %12552 = vst [vmem:[#allocation3_spill] sm:$0xff] %v6956_v38 }
 0x1ab   : > { %6280 = vmatmul.msk.f32.gmra.mxu0 %vm415_vm1, %v330_v37 }
 0x1b0   : > { %v917_v39 = vpop.f32.mrf.mxu0 }
 0x1b1   : > { %v343_v39 = vld [vmem:[%s6824_s14 + $0x200] sm:$0xff] }
 0x1b3   : > { %6281 = vmatmul.msk.f32.gmra.mxu0 %vm415_vm1, %v331_v40 }
 0x1b8   : > { %v920_v41 = vpop.f32.mrf.mxu0 }
 0x1b9   : > { %v921_v43 = vadd.f32 %v6928_v24, %v920_v41  ;;  %v344_v41 = vld [vmem:[%s6824_s14 + $0x208] sm:$0xff] }
 0x1bb   : > { %6282 = vmatmul.msk.f32.gmra.mxu0 %vm415_vm1, %v332_v42  ;;  %v6965_v46 = vmax.f32 %v921_v43, 0.0 }
 0x1bd   : > { %v12204_v50 = vrot.slane %v6965_v46, 4  ;;  %v12169_v52 = vrot.slane %v6965_v46, 5 }
 0x1c0   : > { %v923_v44 = vpop.f32.mrf.mxu0 }
 0x1c1   : > { %v924_v47 = vadd.f32 %v6928_v24, %v923_v44  ;;  %v345_v44 = vld [vmem:[%s6824_s14 + $0x210] sm:$0xff] }
 0x1c3   : > { %v6968_v48 = vmax.f32 %v924_v47, 0.0  ;;  %6283 = vmatmul.msk.f32.gmra.mxu0 %vm415_vm1, %v333_v45 }
 0x1c5   : > { %v12168_v49 = vrot.slane %v6968_v48, 5  ;;  %v12199_v51 = vrot.slane %v6968_v48, 4 }
 0x1c7   : > { %v6980_v53 = vsel %vm1755_vm2, %v12204_v50, %v12199_v51  ;;  %v6988_v56 = vsel %vm800_vm0, %v12169_v52, %v12168_v49  ;;  %v361_v49 = vld [vmem:[%s6824_s14 + $0x290] sm:$0xff] }
 0x1c8   : > { %12553 = vst [vmem:[#allocation4_spill] sm:$0xff] %v6980_v53  ;;  %v926_v54 = vpop.f32.mrf.mxu0 }
 0x1c9   : > { %12554 = vst [vmem:[#allocation5_spill] sm:$0xff] %v6988_v56  ;;  %v3203_v56 = vld [vmem:[%s12155_s3 + $0xb0] sm:$0xff] }
 0x1cb   : > { %6284 = vmatmul.msk.f32.gmra.mxu0 %vm415_vm1, %v334_v55 }
 0x1d0   : > { %v929_v57 = vpop.f32.mrf.mxu0 }
 0x1d3   : > { %6285 = vmatmul.msk.f32.gmra.mxu0 %vm415_vm1, %v335_v58 }
 0x1d8   : > { %v932_v59 = vpop.f32.mrf.mxu0 }
 0x1d9   : > { %v933_v61 = vadd.f32 %v6928_v24, %v932_v59 }
 0x1db   : > { %6286 = vmatmul.msk.f32.gmra.mxu0 %vm415_vm1, %v336_v60  ;;  %v6997_v0 = vmax.f32 %v933_v61, 0.0 }
 0x1dd   : > { %v12200_v4 = vrot.slane %v6997_v0, 4  ;;  %v12173_v6 = vrot.slane %v6997_v0, 5 }
 0x1e0   : > { %v935_v62 = vpop.f32.mrf.mxu0 }
 0x1e1   : > { %v936_v1 = vadd.f32 %v6928_v24, %v935_v62  ;;  %v346_v62 = vld [vmem:[%s6824_s14 + $0x218] sm:$0xff] }
 0x1e3   : > { %v7000_v2 = vmax.f32 %v936_v1, 0.0  ;;  %6287 = vmatmul.msk.f32.gmra.mxu0 %vm415_vm1, %v337_v63 }
 0x1e5   : > { %v12172_v3 = vrot.slane %v7000_v2, 5  ;;  %v12195_v5 = vrot.slane %v7000_v2, 4 }
 0x1e7   : > { %v7012_v7 = vsel %vm1755_vm2, %v12200_v4, %v12195_v5  ;;  %v7020_v10 = vsel %vm800_vm0, %v12173_v6, %v12172_v3  ;;  %v363_v3 = vld [vmem:[%s6824_s14 + $0x2a0] sm:$0xff] }
 0x1e8   : > { %12555 = vst [vmem:[#allocation6_spill] sm:$0xff] %v7012_v7  ;;  %v938_v8 = vpop.f32.mrf.mxu0 }
 0x1e9   : > { %12556 = vst [vmem:[#allocation7_spill] sm:$0xff] %v7020_v10  ;;  %v347_v8 = vld [vmem:[%s6824_s14 + $0x220] sm:$0xff] }
 0x1eb   : > { %6288 = vmatmul.msk.f32.gmra.mxu0 %vm415_vm1, %v338_v9 }
 0x1f0   : > { %v941_v11 = vpop.f32.mrf.mxu0 }
 0x1f1   : > { %v348_v11 = vld [vmem:[%s6824_s14 + $0x228] sm:$0xff] }
 0x1f3   : > { %6289 = vmatmul.msk.f32.gmra.mxu0 %vm415_vm1, %v339_v12 }
 0x1f8   : > { %v944_v13 = vpop.f32.mrf.mxu0 }
 0x1f9   : > { %v945_v15 = vadd.f32 %v6928_v24, %v944_v13 }
 0x1fb   : > { %6290 = vmatmul.msk.f32.gmra.mxu0 %vm415_vm1, %v340_v14  ;;  %v7029_v18 = vmax.f32 %v945_v15, 0.0  ;;  %v349_v14 = vld [vmem:[%s6824_s14 + $0x230] sm:$0xff] }
 0x1fd   : > { %v12196_v22 = vrot.slane %v7029_v18, 4  ;;  %v12165_v25 = vrot.slane %v7029_v18, 5 }
 0x200   : > { %v947_v16 = vpop.f32.mrf.mxu0 }
 0x201   : > { %v948_v19 = vadd.f32 %v6928_v24, %v947_v16 }
 0x203   : > { %v7032_v20 = vmax.f32 %v948_v19, 0.0  ;;  %6291 = vmatmul.msk.f32.gmra.mxu0 %vm415_vm1, %v341_v17 }
 0x205   : > { %v12163_v21 = vrot.slane %v7032_v20, 5  ;;  %v12189_v23 = vrot.slane %v7032_v20, 4 }
 0x207   : > { %v7044_v26 = vsel %vm1755_vm2, %v12196_v22, %v12189_v23  ;;  %v7052_v36 = vsel %vm800_vm0, %v12165_v25, %v12163_v21  ;;  %v373_v23 = vld [vmem:[%s6824_s14 + $0x2f0] sm:$0xff] }
 0x208   : > { %12557 = vst [vmem:[#allocation8_spill] sm:$0xff] %v7044_v26  ;;  %v950_v27 = vpop.f32.mrf.mxu0 }
 0x209   : > { %12558 = vst [vmem:[#allocation9_spill] sm:$0xff] %v7052_v36 }
 0x20b   : > { %6292 = vmatmul.msk.f32.gmra.mxu0 %vm415_vm1, %v342_v29 }
 0x210   : > { %v953_v37 = vpop.f32.mrf.mxu0 }
 0x213   : > { %6293 = vmatmul.msk.f32.gmra.mxu0 %vm415_vm1, %v343_v39 }
 0x218   : > { %v956_v40 = vpop.f32.mrf.mxu0 }
 0x219   : > { %v957_v42 = vadd.f32 %v6928_v24, %v956_v40 }
 0x21b   : > { %6294 = vmatmul.msk.f32.gmra.mxu0 %vm415_vm1, %v344_v41  ;;  %v7061_v45 = vmax.f32 %v957_v42, 0.0  ;;  %v350_v41 = vld [vmem:[%s6824_s14 + $0x238] sm:$0xff] }
 0x21d   : > { %v12190_v55 = vrot.slane %v7061_v45, 4  ;;  %v12167_v59 = vrot.slane %v7061_v45, 5 }
 0x220   : > { %v959_v43 = vpop.f32.mrf.mxu0 }
 0x221   : > { %v960_v47 = vadd.f32 %v6928_v24, %v959_v43 }
 0x223   : > { %v7064_v54 = vmax.f32 %v960_v47, 0.0  ;;  %6295 = vmatmul.msk.f32.gmra.mxu0 %vm415_vm1, %v345_v44  ;;  %v351_v44 = vld [vmem:[%s6824_s14 + $0x240] sm:$0xff] }
 0x225   : > { %v12182_v57 = vrot.slane %v7064_v54, 4  ;;  %v12161_v58 = vrot.slane %v7064_v54, 5 }
 0x227   : > { %v7076_v60 = vsel %vm1755_vm2, %v12190_v55, %v12182_v57  ;;  %v7084_v63 = vsel %vm800_vm0, %v12167_v59, %v12161_v58  ;;  %v368_v57 = vld [vmem:[%s6824_s14 + $0x2c8] sm:$0xff] }
 0x228   : > { %12559 = vst [vmem:[#allocation10_spill] sm:$0xff] %v7076_v60  ;;  %v962_v61 = vpop.f32.mrf.mxu0 }
 0x229   : > { %12560 = vst [vmem:[#allocation11_spill] sm:$0xff] %v7084_v63  ;;  %v352_v61 = vld [vmem:[%s6824_s14 + $0x248] sm:$0xff]  ;;  %v3207_v63 = vld [vmem:[%s12155_s3 + $0xd0] sm:$0xff] }
 0x22b   : > { %6296 = vmatmul.msk.f32.gmra.mxu0 %vm415_vm1, %v346_v62 }
 0x230   : > { %v965_v1 = vpop.f32.mrf.mxu0 }
 0x233   : > { %6297 = vmatmul.msk.f32.gmra.mxu0 %vm415_vm1, %v347_v8  ;;  %v353_v8 = vld [vmem:[%s6824_s14 + $0x250] sm:$0xff] }
 0x238   : > { %v968_v9 = vpop.f32.mrf.mxu0 }
 0x239   : > { %v969_v12 = vadd.f32 %v6928_v24, %v968_v9 }
 0x23b   : > { %6298 = vmatmul.msk.f32.gmra.mxu0 %vm415_vm1, %v348_v11  ;;  %v7093_v15 = vmax.f32 %v969_v12, 0.0 }
 0x23d   : > { %v12194_v19 = vrot.slane %v7093_v15, 4  ;;  %v12166_v37 = vrot.slane %v7093_v15, 5 }
 0x240   : > { %v971_v13 = vpop.f32.mrf.mxu0 }
 0x241   : > { %v972_v16 = vadd.f32 %v6928_v24, %v971_v13 }
 0x243   : > { %v7096_v17 = vmax.f32 %v972_v16, 0.0  ;;  %6299 = vmatmul.msk.f32.gmra.mxu0 %vm415_vm1, %v349_v14 }
 0x245   : > { %v12180_v27 = vrot.slane %v7096_v17, 4  ;;  %v12160_v29 = vrot.slane %v7096_v17, 5  ;;  %v1588_v10 = vrot.slane %v7096_v17, 3 }
 0x247   : > { %v7108_v39 = vsel %vm1755_vm2, %v12194_v19, %v12180_v27  ;;  %v7116_v42 = vsel %vm800_vm0, %v12166_v37, %v12160_v29  ;;  %v357_v29 = vld [vmem:[%s6824_s14 + $0x270] sm:$0xff]  ;;  %v360_v37 = vld [vmem:[%s6824_s14 + $0x288] sm:$0xff]  ;;  %v367_v27 = vld [vmem:[%s6824_s14 + $0x2c0] sm:$0xff] }
 0x248   : > { %12561 = vst [vmem:[#allocation12_spill] sm:$0xff] %v7108_v39  ;;  %v974_v40 = vpop.f32.mrf.mxu0 }
 0x249   : > { %12562 = vst [vmem:[#allocation13_spill] sm:$0xff] %v7116_v42 }
 0x24b   : > { %6300 = vmatmul.msk.f32.gmra.mxu0 %vm415_vm1, %v350_v41 }
 0x250   : > { %v977_v43 = vpop.f32.mrf.mxu0 }
 0x253   : > { %6301 = vmatmul.msk.f32.gmra.mxu0 %vm415_vm1, %v351_v44  ;;  %v354_v44 = vld [vmem:[%s6824_s14 + $0x258] sm:$0xff] }
 0x258   : > { %v980_v47 = vpop.f32.mrf.mxu0 }
 0x259   : > { %v981_v62 = vadd.f32 %v6928_v24, %v980_v47 }
 0x25b   : > { %6302 = vmatmul.msk.f32.gmra.mxu0 %vm415_vm1, %v352_v61  ;;  %v7125_v9 = vmax.f32 %v981_v62, 0.0  ;;  %v355_v62 = vld [vmem:[%s6824_s14 + $0x260] sm:$0xff] }
 0x25d   : > { %v12191_v13 = vrot.slane %v7125_v9, 4  ;;  %v12164_v40 = vrot.slane %v7125_v9, 5 }
 0x260   : > { %v983_v1 = vpop.f32.mrf.mxu0 }
 0x261   : > { %v984_v11 = vadd.f32 %v6928_v24, %v983_v1 }
 0x263   : > { %v7128_v12 = vmax.f32 %v984_v11, 0.0  ;;  %6303 = vmatmul.msk.f32.gmra.mxu0 %vm415_vm1, %v353_v8  ;;  %v356_v8 = vld [vmem:[%s6824_s14 + $0x268] sm:$0xff] }
 0x265   : > { %v12177_v14 = vrot.slane %v7128_v12, 4  ;;  %v12162_v16 = vrot.slane %v7128_v12, 5 }
 0x267   : > { %v7140_v41 = vsel %vm1755_vm2, %v12191_v13, %v12177_v14  ;;  %v7148_v47 = vsel %vm800_vm0, %v12164_v40, %v12162_v16  ;;  %v359_v40 = vld [vmem:[%s6824_s14 + $0x280] sm:$0xff] }
 0x268   : > { %12563 = vst [vmem:[#allocation14_spill] sm:$0xff] %v7140_v41  ;;  %v986_v43 = vpop.f32.mrf.mxu0 }
 0x269   : > { %12564 = vst [vmem:[#allocation15_spill] sm:$0xff] %v7148_v47  ;;  %v3183_v47 = vld [vmem:[%s12155_s3 + $0x10] sm:$0xff] }
 0x26b   : > { %6304 = vmatmul.msk.f32.gmra.mxu0 %vm415_vm1, %v354_v44 }
 0x270   : > { %v989_v61 = vpop.f32.mrf.mxu0 }
 0x273   : > { %6305 = vmatmul.msk.f32.gmra.mxu0 %vm415_vm1, %v355_v62 }
 0x278   : > { %v992_v1 = vpop.f32.mrf.mxu0 }
 0x279   : > { %v993_v11 = vadd.f32 %v6928_v24, %v992_v1 }
 0x27b   : > { %6306 = vmatmul.msk.f32.gmra.mxu0 %vm415_vm1, %v356_v8  ;;  %v7157_v58 = vmax.f32 %v993_v11, 0.0 }
 0x27d   : > { %v12188_v61 = vrot.slane %v7157_v58, 4  ;;  %v12171_v1 = vrot.slane %v7157_v58, 5 }
 0x280   : > { %v995_v43 = vpop.f32.mrf.mxu0 }
 0x281   : > { %v996_v16 = vadd.f32 %v6928_v24, %v995_v43  ;;  %v358_v43 = vld [vmem:[%s6824_s14 + $0x278] sm:$0xff] }
 0x283   : > { %v7160_v44 = vmax.f32 %v996_v16, 0.0  ;;  %6307 = vmatmul.msk.f32.gmra.mxu0 %vm415_vm1, %v357_v29 }
 0x285   : > { %v12176_v62 = vrot.slane %v7160_v44, 4  ;;  %v12170_v8 = vrot.slane %v7160_v44, 5 }
 0x287   : > { %v7172_v11 = vsel %vm1755_vm2, %v12188_v61, %v12176_v62  ;;  %v7180_v29 = vsel %vm800_vm0, %v12171_v1, %v12170_v8  ;;  %v365_v62 = vld [vmem:[%s6824_s14 + $0x2b0] sm:$0xff] }
 0x288   : > { %12565 = vst [vmem:[#allocation16_spill] sm:$0xff] %v7172_v11  ;;  %v998_v16 = vpop.f32.mrf.mxu0 }
 0x289   : > { %12566 = vst [vmem:[#allocation17_spill] sm:$0xff] %v7180_v29  ;;  %v1558_v29 = vrot.slane %v6965_v46, 3 }
 0x28b   : > { %6308 = vmatmul.msk.f32.gmra.mxu0 %vm415_vm1, %v358_v43 }
 0x290   : > { %v1001_v21 = vpop.f32.mrf.mxu0 }
 0x293   : > { %6309 = vmatmul.msk.f32.gmra.mxu0 %vm415_vm1, %v359_v40 }
 0x298   : > { %v1004_v25 = vpop.f32.mrf.mxu0 }
 0x299   : > { %v1005_v16 = vadd.f32 %v6928_v24, %v1004_v25 }
 0x29b   : > { %6310 = vmatmul.msk.f32.gmra.mxu0 %vm415_vm1, %v360_v37  ;;  %v7189_v52 = vmax.f32 %v1005_v16, 0.0  ;;  %v362_v16 = vld [vmem:[%s6824_s14 + $0x298] sm:$0xff] }
 0x29d   : > { %v12187_v21 = vrot.slane %v7189_v52, 4  ;;  %v12179_v25 = vrot.slane %v7189_v52, 5 }
 0x2a0   : > { %v1007_v59 = vpop.f32.mrf.mxu0 }
 0x2a1   : > { %v1008_v8 = vadd.f32 %v6928_v24, %v1007_v59 }
 0x2a3   : > { %v7192_v43 = vmax.f32 %v1008_v8, 0.0  ;;  %6311 = vmatmul.msk.f32.gmra.mxu0 %vm415_vm1, %v361_v49 }
 0x2a5   : > { %v12181_v40 = vrot.slane %v7192_v43, 4  ;;  %v12178_v37 = vrot.slane %v7192_v43, 5 }
 0x2a7   : > { %v7204_v59 = vsel %vm1755_vm2, %v12187_v21, %v12181_v40  ;;  %v7212_v49 = vsel %vm800_vm0, %v12179_v25, %v12178_v37 }
 0x2a8   : > { %12567 = vst [vmem:[#allocation18_spill] sm:$0xff] %v7204_v59  ;;  %v1010_v8 = vpop.f32.mrf.mxu0 }
 0x2a9   : > { %12568 = vst [vmem:[#allocation19_spill] sm:$0xff] %v7212_v49  ;;  %v3184_v49 = vld [vmem:[%s12155_s3 + $0x18] sm:$0xff] }
 0x2ab   : > { %6312 = vmatmul.msk.f32.gmra.mxu0 %vm415_vm1, %v362_v16 }
 0x2b0   : > { %v1013_v1 = vpop.f32.mrf.mxu0 }
 0x2b3   : > { %6313 = vmatmul.msk.f32.gmra.mxu0 %vm415_vm1, %v363_v3 }
 0x2b8   : > { %v1016_v6 = vpop.f32.mrf.mxu0 }
 0x2b9   : > { %v1017_v8 = vadd.f32 %v6928_v24, %v1016_v6 }
 0x2bb   : > { %6314 = vmatmul.msk.f32.gmra.mxu0 %vm415_vm1, %v364_v31  ;;  %v7221_v14 = vmax.f32 %v1017_v8, 0.0  ;;  %v366_v8 = vld [vmem:[%s6824_s14 + $0x2b8] sm:$0xff] }
 0x2bd   : > { %v12184_v3 = vrot.slane %v7221_v14, 4  ;;  %v12186_v6 = vrot.slane %v7221_v14, 5 }
 0x2c0   : > { %v1019_v34 = vpop.f32.mrf.mxu0 }
 0x2c1   : > { %v1020_v37 = vadd.f32 %v6928_v24, %v1019_v34 }
 0x2c3   : > { %v7224_v16 = vmax.f32 %v1020_v37, 0.0  ;;  %6315 = vmatmul.msk.f32.gmra.mxu0 %vm415_vm1, %v365_v62 }
 0x2c5   : > { %v12183_v1 = vrot.slane %v7224_v16, 4  ;;  %v12185_v31 = vrot.slane %v7224_v16, 5 }
 0x2c7   : > { %v7236_v34 = vsel %vm1755_vm2, %v12184_v3, %v12183_v1  ;;  %v7244_v62 = vsel %vm800_vm0, %v12186_v6, %v12185_v31  ;;  %v369_v3 = vld [vmem:[%s6824_s14 + $0x2d0] sm:$0xff] }
 0x2c8   : > { %12569 = vst [vmem:[#allocation20_spill] sm:$0xff] %v7236_v34  ;;  %v1022_v37 = vpop.f32.mrf.mxu0 }
 0x2c9   : > { %12570 = vst [vmem:[#allocation21_spill] sm:$0xff] %v7244_v62 }
 0x2cb   : > { %6316 = vmatmul.msk.f32.gmra.mxu0 %vm415_vm1, %v366_v8 }
 0x2d0   : > { %v1025_v25 = vpop.f32.mrf.mxu0 }
 0x2d3   : > { %6317 = vmatmul.msk.f32.gmra.mxu0 %vm415_vm1, %v367_v27 }
 0x2d8   : > { %v1028_v40 = vpop.f32.mrf.mxu0 }
 0x2d9   : > { %v1029_v37 = vadd.f32 %v6928_v24, %v1028_v40 }
 0x2db   : > { %6318 = vmatmul.msk.f32.gmra.mxu0 %vm415_vm1, %v368_v57  ;;  %v7254_v6 = vmax.f32 %v1029_v37, 0.0  ;;  %v370_v57 = vld [vmem:[%s6824_s14 + $0x2d8] sm:$0xff]  ;;  %v372_v37 = vld [vmem:[%s6824_s14 + $0x2e8] sm:$0xff] }
 0x2dd   : > { %v12193_v25 = vrot.slane %v7254_v6, 5 }
 0x2e0   : > { %v1031_v1 = vpop.f32.mrf.mxu0 }
 0x2e1   : > { %v1032_v31 = vadd.f32 %v6928_v24, %v1031_v1 }
 0x2e3   : > { %v7256_v8 = vmax.f32 %v1032_v31, 0.0  ;;  %6319 = vmatmul.msk.f32.gmra.mxu0 %vm415_vm1, %v369_v3  ;;  %v371_v31 = vld [vmem:[%s6824_s14 + $0x2e0] sm:$0xff] }
 0x2e5   : > { %v12192_v27 = vrot.slane %v7256_v8, 5 }
 0x2e7   : > { %v7267_v40 = vsel %vm800_vm0, %v12193_v25, %v12192_v27 }
 0x2e8   : > { %v1034_v21 = vpop.f32.mrf.mxu0  ;;  %12571 = vst [vmem:[#allocation22_spill] sm:$0xff] %v7267_v40 }
 0x2eb   : > { %6320 = vmatmul.msk.f32.gmra.mxu0 %vm415_vm1, %v370_v57 }
 0x2f0   : > { %v1037_v1 = vpop.f32.mrf.mxu0 }
 0x2f3   : > { %6321 = vmatmul.msk.f32.gmra.mxu0 %vm415_vm1, %v371_v31 }
 0x2f8   : > { %v1040_v3 = vpop.f32.mrf.mxu0 }
 0x2f9   : > { %v1041_v21 = vadd.f32 %v6928_v24, %v1040_v3 }
 0x2fb   : > { %6322 = vmatmul.msk.f32.gmra.mxu0 %vm415_vm1, %v372_v37  ;;  %v7277_v13 = vmax.f32 %v1041_v21, 0.0 }
 0x2fd   : > { %v12198_v1 = vrot.slane %v7277_v13, 5 }
 0x300   : > { %v1043_v61 = vpop.f32.mrf.mxu0 }
 0x301   : > { %v1044_v55 = vadd.f32 %v6928_v24, %v1043_v61 }
 0x303   : > { %v7279_v27 = vmax.f32 %v1044_v55, 0.0  ;;  %6323 = vmatmul.msk.f32.gmra.mxu0 %vm415_vm1, %v373_v23 }
 0x305   : > { %v12197_v57 = vrot.slane %v7279_v27, 5 }
 0x307   : > { %v7289_v3 = vsel %vm800_vm0, %v12198_v1, %v12197_v57 }
 0x308   : > { %v1046_v31 = vpop.f32.mrf.mxu0  ;;  %12572 = vst [vmem:[#allocation23_spill] sm:$0xff] %v7289_v3 }
 0x310   : > { %v1049_v37 = vpop.f32.mrf.mxu0 }
 0x318   : > { %v1052_v61 = vpop.f32.mrf.mxu0 }
 0x319   : > { %v1053_v21 = vadd.f32 %v6928_v24, %v1052_v61 }
 0x31b   : > { %v7293_v23 = vmax.f32 %v1053_v21, 0.0 }
 0x31d   : > { %v12203_v5 = vrot.slane %v7293_v23, 5 }
 0x320   : > { %v1055_v55 = vpop.f32.mrf.mxu0 }
 0x321   : > { %v1056_v25 = vadd.f32 %v6928_v24, %v1055_v55 }
 0x323   : > { %v7295_v19 = vmax.f32 %v1056_v25, 0.0 }
 0x325   : > { %v12202_v31 = vrot.slane %v7295_v19, 5 }
 0x327   : > { %v7304_v37 = vsel %vm800_vm0, %v12203_v5, %v12202_v31 }
 0x328   : > { %v1058_v22 = vpop.f32.mrf.mxu0  ;;  %12573 = vst [vmem:[#allocation24_spill] sm:$0xff] %v7304_v37 }
 0x330   : > { %v1061_v61 = vpop.f32.mrf.mxu0 }
 0x338   : > { %v1064_v57 = vpop.f32.mrf.mxu0 }
 0x339   : > { %v1065_v55 = vadd.f32 %v6928_v24, %v1064_v57 }
 0x33b   : > { %v7308_v1 = vmax.f32 %v1065_v55, 0.0 }
 0x33d   : > { %v12208_v4 = vrot.slane %v7308_v1, 5 }
 0x340   : > { %v1067_v21 = vpop.f32.mrf.mxu0 }
 0x341   : > { %v1068_v25 = vadd.f32 %v6928_v24, %v1067_v21 }
 0x343   : > { %v7310_v51 = vmax.f32 %v1068_v25, 0.0 }
 0x345   : > { %v12207_v22 = vrot.slane %v7310_v51, 5 }
 0x347   : > { %v7319_v61 = vsel %vm800_vm0, %v12208_v4, %v12207_v22 }
 0x348   : > { %v1070_v33 = vpop.f32.mrf.mxu0  ;;  %12574 = vst [vmem:[#allocation25_spill] sm:$0xff] %v7319_v61 }
 0x350   : > { %v1073_v57 = vpop.f32.mrf.mxu0 }
 0x358   : > { %v1076_v31 = vpop.f32.mrf.mxu0 }
 0x359   : > { %v1077_v21 = vadd.f32 %v6928_v24, %v1076_v31 }
 0x35b   : > { %v7322_v55 = vmax.f32 %v1077_v21, 0.0 }
 0x35d   : > { %v12211_v33 = vrot.slane %v7322_v55, 3  ;;  %v12209_v22 = vrot.slane %v7322_v55, 4  ;;  %v12215_v4 = vrot.slane %v7322_v55, 5 }
 0x360   : > { %v1079_v25 = vpop.f32.mrf.mxu0 }
 0x361   : > { %v1080_v5 = vadd.f32 %v6928_v24, %v1079_v25 }
 0x363   : > { %v7325_v50 = vmax.f32 %v1080_v5, 0.0 }
 0x365   : > { %12575 = vst [vmem:[#allocation26_spill] sm:$0xff] %v7325_v50  ;;  %v12212_v32 = vrot.slane %v7325_v50, 3  ;;  %v12214_v37 = vrot.slane %v7325_v50, 5  ;;  %v1892_v57 = vrot.slane %v7325_v50, 4 }
 0x367   : > { %v7336_v31 = vsel %vm1755_vm2, %v12209_v22, %v1892_v57  ;;  %v7343_v5 = vsel %vm1514_vm3, %v12211_v33, %v12212_v32  ;;  %v7352_v25 = vsel %vm800_vm0, %v12215_v4, %v12214_v37  ;;  %v12216_v22 = vmov 0.0  }
 0x368   : > { %12576 = vst [vmem:[#allocation27_spill] sm:$0xff] %v7336_v31  ;;  %v1082_v21 = vpop.f32.mrf.mxu0  ;;  %2408 = vrot.lane.b32.xlu0 %v7336_v31, %s6755_s17  ;;  %v7355_v61 = vrot.slane %v12216_v22, 4 }
 0x369   : > { %12577 = vst [vmem:[#allocation28_spill] sm:$0xff] %v7352_v25 }
 0x36a   : > { %12578 = vst [vmem:[#allocation29_spill] sm:$0xff] %v7355_v61  ;;  %v7359_v33 = vsel %vm1755_vm2, %v1892_v57, %v7355_v61 }
 0x36b   : > { %12579 = vst [vmem:[#allocation30_spill] sm:$0xff] %v7359_v33 }
 0x370   : > { %v1085_v21 = vpop.f32.mrf.mxu0  ;;  %2410 = vrot.lane.b32.xlu0 %v7359_v33, %s6755_s17 }
 0x378   : > { %v1088_v32 = vpop.f32.mrf.mxu0  ;;  %2420 = vrot.lane.b32.xlu0 %v7355_v61, %s6755_s17 }
 0x379   : > { %v1089_v31 = vadd.f32 %v6928_v24, %v1088_v32 }
 0x37b   : > { %v7366_v37 = vmax.f32 %v1089_v31, 0.0 }
 0x37d   : > { %12580 = vst [vmem:[#allocation31_spill] sm:$0xff] %v7366_v37  ;;  %v1897_v4 = vrot.slane %v7366_v37, 4  ;;  %v12227_v32 = vrot.slane %v7366_v37, 3  ;;  %v12225_v40 = vrot.slane %v7366_v37, 5 }
 0x37f   : > { %v7371_v22 = vsel %vm1755_vm2, %v7355_v61, %v1897_v4 }
 0x380   : > { %12581 = vst [vmem:[#allocation32_spill] sm:$0xff] %v7371_v22  ;;  %v1091_v57 = vpop.f32.mrf.mxu0  ;;  %2412 = vrot.lane.b32.xlu1 %v7371_v22, %s6755_s17  ;;  %2426 = vrot.lane.b32.xlu0 %v7355_v61, %s6755_s17 }
 0x381   : > { %v1092_v21 = vadd.f32 %v6928_v24, %v1091_v57 }
 0x383   : > { %v7378_v33 = vmax.f32 %v1092_v21, 0.0  ;;  %v3196_v21 = vld [vmem:[%s12155_s3 + $0x78] sm:$0xff] }
 0x384   : > { %6465 = vmatpush.msra.mxu2 %v3196_v21  ;;  %3401 = vmatpush.msra.mxu1 %v3196_v21  ;;  %v3191_v21 = vld [vmem:[%s12155_s3 + $0x50] sm:$0xff] }
 0x385   : > { %12582 = vst [vmem:[#allocation33_spill] sm:$0xff] %v7378_v33  ;;  %v12226_v31 = vrot.slane %v7378_v33, 3  ;;  %v12224_v25 = vrot.slane %v7378_v33, 5  ;;  %v1899_v3 = vrot.slane %v7378_v33, 4 }
 0x387   : > { %v7387_v22 = vsel %vm1755_vm2, %v1899_v3, %v7355_v61  ;;  %v7390_v62 = vsel %vm1755_vm2, %v1897_v4, %v1899_v3  ;;  %v7397_v24 = vsel %vm1514_vm3, %v12227_v32, %v12226_v31  ;;  %v7408_v4 = vsel %vm800_vm0, %v12225_v40, %v12224_v25  ;;  %v3195_v25 = vld [vmem:[%s12155_s3 + $0x70] sm:$0xff]  ;;  %v3194_v40 = vld [vmem:[%s12155_s3 + $0x68] sm:$0xff]  ;;  %v3193_v31 = vld [vmem:[%s12155_s3 + $0x60] sm:$0xff] }
 0x388   : > { %12583 = vst [vmem:[#allocation34_spill] sm:$0xff] %v7387_v22  ;;  %2416 = vrot.lane.b32.xlu2 %v7387_v22, %s6755_s17  ;;  %2414 = vrot.lane.b32.xlu1 %v7390_v62, %s6755_s17  ;;  %v12587_v3 = vmov 0.0   ;;  %v3188_v32 = vld [vmem:[%s12155_s3 + $0x38] sm:$0xff]  ;;  %v1551_v22 = vrot.slane %v6933_v28, 3 }
 0x389   : > { %12584 = vst [vmem:[#allocation35_spill] sm:$0xff] %v7390_v62  ;;  %2432 = vrot.lane.b32.xlu0 %v7355_v61, %s6755_s17  ;;  %v7413_v57 = vrot.slane %v12587_v3, 3  ;;  %6466 = vmatpush.msra.mxu2 %v3195_v25  ;;  %v3187_v62 = vld [vmem:[%s12155_s3 + $0x30] sm:$0xff] }
 0x38a   : > { %12585 = vst [vmem:[#allocation36_spill] sm:$0xff] %v7397_v24  ;;  %3402 = vmatpush.msra.mxu1 %v3195_v25  ;;  %v3192_v25 = vld [vmem:[%s12155_s3 + $0x58] sm:$0xff] }
 0x38b   : > { %12586 = vst [vmem:[#allocation37_spill] sm:$0xff] %v7408_v4  ;;  %6467 = vmatpush.msra.mxu2 %v3194_v40  ;;  %v1560_v4 = vrot.slane %v6968_v48, 3  ;;  %v7526_v42 = vsel %vm1514_vm3, %v7413_v57, %v1551_v22 }
 0x38c   : > { %12588 = vst [vmem:[#allocation38_spill] sm:$0xff] %v7413_v57  ;;  %3403 = vmatpush.msra.mxu1 %v3194_v40  ;;  %v3190_v40 = vld [vmem:[%s12155_s3 + $0x48] sm:$0xff] }
 0x38d   : > { %6468 = vmatpush.msra.mxu2 %v3193_v31  ;;  %12592 = vst [vmem:[#allocation42_spill] sm:$0xff] %v7526_v42 }
 0x38e   : > { %3404 = vmatpush.msra.mxu1 %v3193_v31  ;;  %v3189_v31 = vld [vmem:[%s12155_s3 + $0x40] sm:$0xff] }
 0x38f   : > { %6469 = vmatpush.msra.mxu2 %v3192_v25 }
 0x390   : > { %2418 = vrot.lane.b32.xlu2 %v7355_v61, %s6755_s17  ;;  %2422 = vrot.lane.b32.xlu1 %v7355_v61, %s6755_s17 }
 0x391   : > { %2510 = vrot.lane.b32.xlu0 %v7413_v57, %s6755_s17  ;;  %3405 = vmatpush.msra.mxu1 %v3192_v25  ;;  %v1553_v25 = vrot.slane %v6936_v30, 3 }
 0x392   : > { %6470 = vmatpush.msra.mxu2 %v3191_v21 }
 0x393   : > { %3406 = vmatpush.msra.mxu1 %v3191_v21  ;;  %v7476_v21 = vsel %vm1514_vm3, %v1551_v22, %v1553_v25  ;;  %v7542_v22 = vsel %vm1514_vm3, %v7413_v57, %v1558_v29 }
 0x394   : > { %6471 = vmatpush.msra.mxu2 %v3190_v40  ;;  %12589 = vst [vmem:[#allocation39_spill] sm:$0xff] %v7476_v21 }
 0x395   : > { %3407 = vmatpush.msra.mxu1 %v3190_v40  ;;  %v3186_v40 = vld [vmem:[%s12155_s3 + $0x28] sm:$0xff]  ;;  %12594 = vst [vmem:[#allocation44_spill] sm:$0xff] %v7542_v22 }
 0x396   : > { %6472 = vmatpush.msra.mxu2 %v3189_v31 }
 0x397   : > { %3408 = vmatpush.msra.mxu1 %v3189_v31  ;;  %v3185_v31 = vld [vmem:[%s12155_s3 + $0x20] sm:$0xff] }
 0x398   : > { %2424 = vrot.lane.b32.xlu2 %v7355_v61, %s6755_s17  ;;  %2428 = vrot.lane.b32.xlu1 %v7355_v61, %s6755_s17 }
 0x399   : > { %2516 = vrot.lane.b32.xlu0 %v7413_v57, %s6755_s17  ;;  %6473 = vmatpush.msra.mxu2 %v3188_v32 }
 0x39a   : > { %3409 = vmatpush.msra.mxu1 %v3188_v32  ;;  %v7499_v32 = vsel %vm1514_vm3, %v1558_v29, %v1560_v4 }
 0x39b   : > { %6474 = vmatpush.msra.mxu2 %v3187_v62  ;;  %12590 = vst [vmem:[#allocation40_spill] sm:$0xff] %v7499_v32 }
 0x39c   : > { %3410 = vmatpush.msra.mxu1 %v3187_v62  ;;  %v3182_v62 = vld [vmem:[%s12155_s3 + $0x8] sm:$0xff] }
 0x39d   : > { %6475 = vmatpush.msra.mxu2 %v3186_v40 }
 0x39e   : > { %3411 = vmatpush.msra.mxu1 %v3186_v40  ;;  %v3181_v40 = vld [vmem:[%s12155_s3] sm:$0xff] }
 0x39f   : > { %6476 = vmatpush.msra.mxu2 %v3185_v31 }
 0x3a0   : > { %2430 = vrot.lane.b32.xlu2 %v7355_v61, %s6755_s17  ;;  %2434 = vrot.lane.b32.xlu1 %v7355_v61, %s6755_s17 }
 0x3a1   : > { %2522 = vrot.lane.b32.xlu0 %v7413_v57, %s6755_s17  ;;  %6477 = vmatpush.msra.mxu2 %v3184_v49 }
 0x3a2   : > { %3412 = vmatpush.msra.mxu1 %v3185_v31  ;;  %v3212_v31 = vld [vmem:[%s12155_s3 + $0xf8] sm:$0xff] }
 0x3a3   : > { %6478 = vmatpush.msra.mxu2 %v3183_v47 }
 0x3a4   : > { %3413 = vmatpush.msra.mxu1 %v3184_v49  ;;  %v7522_v49 = vsel %vm1514_vm3, %v1553_v25, %v7413_v57  ;;  %v3211_v25 = vld [vmem:[%s12155_s3 + $0xf0] sm:$0xff] }
 0x3a5   : > { %6479 = vmatpush.msra.mxu2 %v3182_v62  ;;  %12591 = vst [vmem:[#allocation41_spill] sm:$0xff] %v7522_v49 }
 0x3a6   : > { %3414 = vmatpush.msra.mxu1 %v3183_v47  ;;  %v1565_v47 = vrot.slane %v6997_v0, 3 }
 0x3a7   : > { %6480 = vmatpush.msra.mxu2 %v3181_v40 }
 0x3a8   : > { %2508 = vrot.lane.b32.xlu2 %v7413_v57, %s6755_s17  ;;  %2512 = vrot.lane.b32.xlu1 %v7413_v57, %s6755_s17  ;;  %v7557_v29 = vsel %vm1514_vm3, %v7413_v57, %v1565_v47 }
 0x3a9   : > { %2528 = vrot.lane.b32.xlu0 %v7413_v57, %s6755_s17  ;;  %3415 = vmatpush.msra.mxu1 %v3182_v62  ;;  %12595 = vst [vmem:[#allocation45_spill] sm:$0xff] %v7557_v29 }
 0x3aa   : > { %3616 = vmatpush.msrb.mxu2 %v3212_v31  ;;  %v1574_v31 = vrot.slane %v7032_v20, 3 }
 0x3ab   : > { %3416 = vmatpush.msra.mxu1 %v3181_v40  ;;  %v3210_v40 = vld [vmem:[%s12155_s3 + $0xe8] sm:$0xff] }
 0x3ac   : > { %3617 = vmatpush.msrb.mxu2 %v3211_v25  ;;  %v1572_v25 = vrot.slane %v7029_v18, 3  ;;  %v7657_v36 = vsel %vm1514_vm3, %v1574_v31, %v7413_v57 }
 0x3ad   : > { %12608 = vst [vmem:[#allocation56_spill] sm:$0xff] %v7657_v36 }
 0x3ae   : > { %3618 = vmatpush.msrb.mxu2 %v3210_v40 }
 0x3b0   : > { %2514 = vrot.lane.b32.xlu2 %v7413_v57, %s6755_s17  ;;  %2518 = vrot.lane.b32.xlu1 %v7413_v57, %s6755_s17 }
 0x3b1   : > { %2534 = vrot.lane.b32.xlu0 %v7476_v21, %s6755_s17 }
 0x3b8   : > { %2520 = vrot.lane.b32.xlu2 %v7413_v57, %s6755_s17  ;;  %2524 = vrot.lane.b32.xlu1 %v7413_v57, %s6755_s17 }
 0x3b9   : > { %2540 = vrot.lane.b32.xlu0 %v7499_v32, %s6755_s17  ;;  %v1567_v32 = vrot.slane %v7000_v2, 3 }
 0x3bb   : > { %v7531_v62 = vsel %vm1514_vm3, %v1565_v47, %v1567_v32  ;;  %v3209_v47 = vld [vmem:[%s12155_s3 + $0xe0] sm:$0xff] }
 0x3bc   : > { %12593 = vst [vmem:[#allocation43_spill] sm:$0xff] %v7531_v62  ;;  %3619 = vmatpush.msrb.mxu2 %v3209_v47 }
 0x3c0   : > { %2526 = vrot.lane.b32.xlu2 %v7413_v57, %s6755_s17  ;;  %2530 = vrot.lane.b32.xlu1 %v7413_v57, %s6755_s17 }
 0x3c1   : > { %2294 = vrot.lane.b32.xlu0 %v7355_v61, %s6755_s17 }
 0x3c8   : > { %2536 = vrot.lane.b32.xlu1 %v7522_v49, %s6755_s17  ;;  %2532 = vrot.lane.b32.xlu2 %v7526_v42, %s6755_s17  ;;  %v1579_v49 = vrot.slane %v7061_v45, 3  ;;  %v3205_v42 = vld [vmem:[%s12155_s3 + $0xc0] sm:$0xff] }
 0x3c9   : > { %2546 = vrot.lane.b32.xlu0 %v7531_v62, %s6755_s17  ;;  %v7561_v62 = vsel %vm1514_vm3, %v1560_v4, %v7413_v57 }
 0x3ca   : > { %12596 = vst [vmem:[#allocation46_spill] sm:$0xff] %v7561_v62 }
 0x3d0   : > { %2292 = vrot.lane.b32.xlu1 %v7355_v61, %s6755_s17  ;;  %2538 = vrot.lane.b32.xlu2 %v7542_v22, %s6755_s17  ;;  %v7566_v22 = vsel %vm1514_vm3, %v1572_v25, %v1574_v31 }
 0x3d1   : > { %2300 = vrot.lane.b32.xlu0 %v7355_v61, %s6755_s17  ;;  %12597 = vst [vmem:[#allocation47_spill] sm:$0xff] %v7566_v22 }
 0x3d8   : > { %2544 = vrot.lane.b32.xlu1 %v7557_v29, %s6755_s17  ;;  %2542 = vrot.lane.b32.xlu2 %v7561_v62, %s6755_s17  ;;  %v3208_v29 = vld [vmem:[%s12155_s3 + $0xd8] sm:$0xff]  ;;  %v1581_v62 = vrot.slane %v7064_v54, 3 }
 0x3d9   : > { %2552 = vrot.lane.b32.xlu0 %v7566_v22, %s6755_s17  ;;  %3620 = vmatpush.msrb.mxu2 %v3208_v29 }
 0x3da   : > { %v2409_v40 = vpop.permute.xlu0 %2408 }
 0x3db   : > { %v7577_v4 = vsel %vm2958_vm4, %v7343_v5, %v2409_v40  ;;  %v12599_v40 = vrot.slane %v7325_v50, 3  ;;  %3621 = vmatpush.msrb.mxu2 %v3207_v63  ;;  %v7607_v50 = vsel %vm1514_vm3, %v7413_v57, %v1572_v25  ;;  %v3206_v25 = vld [vmem:[%s12155_s3 + $0xc8] sm:$0xff] }
 0x3dc   : > { %12598 = vst [vmem:[#allocation48_spill] sm:$0xff] %v7577_v4  ;;  %3582 = vmatmul.f32.vlgmr.msra.gmra.mxu2 %v7577_v4 }
 0x3dd   : > { %v7593_v4 = vsel %vm1514_vm3, %v12599_v40, %v7413_v57  ;;  %12601 = vst [vmem:[#allocation50_spill] sm:$0xff] %v7607_v50  ;;  %v7611_v40 = vsel %vm1514_vm3, %v1567_v32, %v7413_v57  ;;  %3622 = vmatpush.msrb.mxu2 %v3206_v25 }
 0x3de   : > { %12602 = vst [vmem:[#allocation51_spill] sm:$0xff] %v7611_v40 }
 0x3df   : > { %3623 = vmatpush.msrb.mxu2 %v3205_v42 }
 0x3e0   : > { %2298 = vrot.lane.b32.xlu1 %v7355_v61, %s6755_s17  ;;  %2296 = vrot.lane.b32.xlu2 %v7355_v61, %s6755_s17 }
 0x3e1   : > { %2306 = vrot.lane.b32.xlu0 %v7355_v61, %s6755_s17 }
 0x3e2   : > { %v2417_v47 = vpop.permute.xlu2 %2416  ;;  %v2411_v22 = vpop.permute.xlu0 %2410 }
 0x3e3   : > { %v7597_v29 = vsel %vm2958_vm4, %v7593_v4, %v2411_v22  ;;  %v7616_v22 = vsel %vm1514_vm3, %v1579_v49, %v1581_v62 }
 0x3e4   : > { %12600 = vst [vmem:[#allocation49_spill] sm:$0xff] %v7597_v29  ;;  %3585 = vmatmul.f32.gmra.mxu2 %v7597_v29 }
 0x3e5   : > { %12603 = vst [vmem:[#allocation52_spill] sm:$0xff] %v7616_v22 }
 0x3e8   : > { %2550 = vrot.lane.b32.xlu1 %v7607_v50, %s6755_s17  ;;  %2548 = vrot.lane.b32.xlu2 %v7611_v40, %s6755_s17 }
 0x3e9   : > { %2558 = vrot.lane.b32.xlu0 %v7616_v22, %s6755_s17  ;;  %v12604_v22 = vrot.slane %v7366_v37, 3  ;;  %v1586_v37 = vrot.slane %v7093_v15, 3 }
 0x3ea   : > { %v2419_v63 = vpop.permute.xlu2 %2418  ;;  %v2421_v29 = vpop.permute.xlu0 %2420 }
 0x3eb   : > { %v7637_v40 = vsel %vm1514_vm3, %v7413_v57, %v12604_v22  ;;  %v7653_v22 = vsel %vm1514_vm3, %v7413_v57, %v1579_v49 }
 0x3ec   : > { %12605 = vst [vmem:[#allocation53_spill] sm:$0xff] %v7637_v40 }
 0x3ed   : > { %12607 = vst [vmem:[#allocation55_spill] sm:$0xff] %v7653_v22 }
 0x3f0   : > { %2304 = vrot.lane.b32.xlu1 %v7355_v61, %s6755_s17  ;;  %2302 = vrot.lane.b32.xlu2 %v7355_v61, %s6755_s17 }
 0x3f1   : > { %2312 = vrot.lane.b32.xlu0 %v7355_v61, %s6755_s17 }
 0x3f2   : > { %v7631_v32 = vpop.permute.xlu2 %2424  ;;  %v2413_v50 = vpop.permute.xlu1 %2412 }
 0x3f3   : > { %v7639_v21 = vpop.permute.xlu0 %2426  ;;  %v7643_v25 = vsel %vm2958_vm4, %v7637_v40, %v2413_v50  ;;  %v7662_v50 = vsel %vm1514_vm3, %v1586_v37, %v1588_v10  ;;  %v7712_v40 = vsel %vm1514_vm3, %v1581_v62, %v7413_v57 }
 0x3f4   : > { %12606 = vst [vmem:[#allocation54_spill] sm:$0xff] %v7643_v25  ;;  %3588 = vmatmul.f32.gmra.mxu2 %v7643_v25 }
 0x3f5   : > { %12609 = vst [vmem:[#allocation57_spill] sm:$0xff] %v7662_v50 }
 0x3f6   : > { %12615 = vst [vmem:[#allocation62_spill] sm:$0xff] %v7712_v40 }
 0x3f8   : > { %2556 = vrot.lane.b32.xlu1 %v7653_v22, %s6755_s17  ;;  %2554 = vrot.lane.b32.xlu2 %v7657_v36, %s6755_s17  ;;  %v3204_v22 = vld [vmem:[%s12155_s3 + $0xb8] sm:$0xff] }
 0x3f9   : > { %2564 = vrot.lane.b32.xlu0 %v7662_v50, %s6755_s17  ;;  %3624 = vmatpush.msrb.mxu2 %v3204_v22 }
 0x3fa   : > { %v7668_v42 = vpop.permute.xlu2 %2430  ;;  %v2415_v49 = vpop.permute.xlu1 %2414 }
 0x3fb   : > { %v7670_v25 = vpop.permute.xlu0 %2432  ;;  %v7674_v31 = vsel %vm2958_vm4, %v7397_v24, %v2415_v49  ;;  %v1595_v24 = vrot.slane %v7128_v12, 3  ;;  %3625 = vmatpush.msrb.mxu2 %v3203_v56  ;;  %v7725_v56 = vsel %vm2958_vm4, %v7413_v57, %v2419_v63  ;;  %v7745_v63 = vsel %vm2958_vm4, %v7413_v57, %v2421_v29  ;;  %v3200_v29 = vld [vmem:[%s12155_s3 + $0x98] sm:$0xff] }
 0x3fc   : > { %12610 = vst [vmem:[#allocation58_spill] sm:$0xff] %v7674_v31  ;;  %3591 = vmatmul.f32.gmra.mxu2 %v7674_v31  ;;  %v12611_v31 = vrot.slane %v7378_v33, 3  ;;  %v1593_v33 = vrot.slane %v7125_v9, 3 }
 0x3fd   : > { %12617 = vst [vmem:[#allocation64_spill] sm:$0xff] %v7725_v56 }
 0x3fe   : > { %v7692_v36 = vsel %vm1514_vm3, %v12611_v31, %v7413_v57  ;;  %v7708_v31 = vsel %vm1514_vm3, %v7413_v57, %v1586_v37  ;;  %v3202_v37 = vld [vmem:[%s12155_s3 + $0xa8] sm:$0xff]  ;;  %12618 = vst [vmem:[#allocation65_spill] sm:$0xff] %v7745_v63  ;;  %v7764_v59 = vsel %vm1514_vm3, %v7413_v57, %v1593_v33 }
 0x3ff   : > { %12612 = vst [vmem:[#allocation59_spill] sm:$0xff] %v7692_v36  ;;  %v7698_v22 = vsel %vm2958_vm4, %v7692_v36, %v2417_v47  ;;  %v7717_v47 = vsel %vm1514_vm3, %v1593_v33, %v1595_v24  ;;  %3626 = vmatpush.msrb.mxu2 %v3202_v37  ;;  %v3201_v37 = vld [vmem:[%s12155_s3 + $0xa0] sm:$0xff]  ;;  %v1602_v36 = vrot.slane %v7160_v44, 3 }
 0x400   : > { %2310 = vrot.lane.b32.xlu1 %v7355_v61, %s6755_s17  ;;  %2308 = vrot.lane.b32.xlu2 %v7355_v61, %s6755_s17  ;;  %12613 = vst [vmem:[#allocation60_spill] sm:$0xff] %v7698_v22 }
 0x401   : > { %2318 = vrot.lane.b32.xlu0 %v7355_v61, %s6755_s17  ;;  %12614 = vst [vmem:[#allocation61_spill] sm:$0xff] %v7708_v31  ;;  %3627 = vmatpush.msrb.mxu2 %v3201_v37  ;;  %v7768_v37 = vsel %vm1514_vm3, %v1588_v10, %v7413_v57 }
 0x402   : > { %v7686_v50 = vpop.permute.xlu2 %2508  ;;  %v2423_v49 = vpop.permute.xlu1 %2422  ;;  %12616 = vst [vmem:[#allocation63_spill] sm:$0xff] %v7717_v47 }
 0x403   : > { %v7694_v38 = vpop.permute.xlu0 %2510  ;;  %3628 = vmatpush.msrb.mxu2 %v3200_v29  ;;  %12620 = vst [vmem:[#allocation67_spill] sm:$0xff] %v7764_v59  ;;  %v7781_v33 = vsel %vm2958_vm4, %v7413_v57, %v2423_v49  ;;  %v7808_v49 = vsel %vm2958_vm4, %v7413_v57, %v7631_v32 }
 0x404   : > { %3594 = vmatmul.f32.gmra.mxu2 %v7698_v22  ;;  %12621 = vst [vmem:[#allocation68_spill] sm:$0xff] %v7768_v37 }
 0x405   : > { %12623 = vst [vmem:[#allocation70_spill] sm:$0xff] %v7781_v33 }
 0x406   : > { %12627 = vst [vmem:[#allocation73_spill] sm:$0xff] %v7808_v49 }
 0x408   : > { %2562 = vrot.lane.b32.xlu1 %v7708_v31, %s6755_s17  ;;  %2560 = vrot.lane.b32.xlu2 %v7712_v40, %s6755_s17 }
 0x409   : > { %2570 = vrot.lane.b32.xlu0 %v7717_v47, %s6755_s17 }
 0x40a   : > { %v7730_v62 = vpop.permute.xlu2 %2514  ;;  %v7732_v22 = vpop.permute.xlu1 %2428 }
 0x40b   : > { %v7734_v31 = vpop.permute.xlu0 %2516 }
 0x40c   : > { %3597 = vmatmul.f32.gmra.mxu2 %v7725_v56 }
 0x410   : > { %2316 = vrot.lane.b32.xlu1 %v7355_v61, %s6755_s17  ;;  %2314 = vrot.lane.b32.xlu2 %v7355_v61, %s6755_s17 }
 0x411   : > { %2324 = vrot.lane.b32.xlu0 %v6948_v35, %s6755_s17  ;;  %v1600_v35 = vrot.slane %v7157_v58, 3 }
 0x412   : > { %v7750_v47 = vpop.permute.xlu2 %2520  ;;  %v7752_v56 = vpop.permute.xlu1 %2434 }
 0x413   : > { %v7754_v40 = vpop.permute.xlu0 %2522  ;;  %v7824_v32 = vsel %vm1514_vm3, %v7413_v57, %v1600_v35 }
 0x414   : > { %12619 = vst [vmem:[#allocation66_spill] sm:$0xff] %v7754_v40  ;;  %3599 = vmatmul.f32.gmra.mxu2 %v7745_v63  ;;  %v7773_v63 = vsel %vm1514_vm3, %v1600_v35, %v1602_v36  ;;  %v7842_v35 = vsel %vm2958_vm4, %v7413_v57, %v7639_v21  ;;  %v12638_v21 = vrot.slane %v6936_v30, 4 }
 0x415   : > { %12622 = vst [vmem:[#allocation69_spill] sm:$0xff] %v7773_v63 }
 0x416   : > { %12630 = vst [vmem:[#allocation76_spill] sm:$0xff] %v7824_v32 }
 0x417   : > { %12633 = vst [vmem:[#allocation79_spill] sm:$0xff] %v7842_v35 }
 0x418   : > { %2568 = vrot.lane.b32.xlu1 %v7764_v59, %s6755_s17  ;;  %2566 = vrot.lane.b32.xlu2 %v7768_v37, %s6755_s17  ;;  %v3199_v59 = vld [vmem:[%s12155_s3 + $0x90] sm:$0xff]  ;;  %v12625_v37 = vrot.slane %v6933_v28, 4 }
 0x419   : > { %2576 = vrot.lane.b32.xlu0 %v7773_v63, %s6755_s17  ;;  %3629 = vmatpush.msrb.mxu2 %v3199_v59 }
 0x41a   : > { %v7783_v29 = vpop.permute.xlu2 %2526  ;;  %v7785_v10 = vpop.permute.xlu1 %2512  ;;  %v7797_v63 = vsel %vm1755_vm2, %v7355_v61, %v12625_v37 }
 0x41b   : > { %v7787_v40 = vpop.permute.xlu0 %2528  ;;  %12626 = vst [vmem:[#allocation72_spill] sm:$0xff] %v7797_v63 }
 0x41c   : > { %12624 = vst [vmem:[#allocation71_spill] sm:$0xff] %v7787_v40  ;;  %3601 = vmatmul.f32.gmra.mxu2 %v7781_v33  ;;  %v3198_v40 = vld [vmem:[%s12155_s3 + $0x88] sm:$0xff] }
 0x41d   : > { %3630 = vmatpush.msrb.mxu2 %v3198_v40 }
 0x420   : > { %2322 = vrot.lane.b32.xlu1 %v7797_v63, %s6755_s17  ;;  %2320 = vrot.lane.b32.xlu2 %v7355_v61, %s6755_s17  ;;  %v1609_v63 = vrot.slane %v7192_v43, 3 }
 0x421   : > { %2330 = vrot.lane.b32.xlu0 %v6980_v53, %s6755_s17  ;;  %v1607_v53 = vrot.slane %v7189_v52, 3 }
 0x422   : > { %v7810_v59 = vpop.permute.xlu1 %2518  ;;  %v7812_v33 = vpop.permute.xlu2 %2532 }
 0x423   : > { %12628 = vst [vmem:[#allocation74_spill] sm:$0xff] %v7812_v33  ;;  %v7814_v37 = vpop.permute.xlu0 %2534  ;;  %v7828_v33 = vsel %vm1514_vm3, %v1595_v24, %v7413_v57 }
 0x424   : > { %12629 = vst [vmem:[#allocation75_spill] sm:$0xff] %v7814_v37  ;;  %3603 = vmatmul.f32.gmra.mxu2 %v7808_v49  ;;  %v7833_v49 = vsel %vm1514_vm3, %v1607_v53, %v1609_v63 }
 0x425   : > { %12631 = vst [vmem:[#allocation77_spill] sm:$0xff] %v7828_v33 }
 0x426   : > { %12632 = vst [vmem:[#allocation78_spill] sm:$0xff] %v7833_v49 }
 0x428   : > { %2574 = vrot.lane.b32.xlu1 %v7824_v32, %s6755_s17  ;;  %2572 = vrot.lane.b32.xlu2 %v7828_v33, %s6755_s17  ;;  %v3197_v32 = vld [vmem:[%s12155_s3 + $0x80] sm:$0xff] }
 0x429   : > { %2582 = vrot.lane.b32.xlu0 %v7833_v49, %s6755_s17  ;;  %3631 = vmatpush.msrb.mxu2 %v3197_v32  ;;  %v12636_v49 = vrot.slane %v6965_v46, 4 }
 0x42a   : > { %v7844_v40 = vpop.permute.xlu1 %2524  ;;  %v7846_v24 = vpop.permute.xlu2 %2538 }
 0x42b   : > { %12634 = vst [vmem:[#allocation80_spill] sm:$0xff] %v7846_v24  ;;  %v7848_v37 = vpop.permute.xlu0 %2540  ;;  %v7858_v33 = vsel %vm1755_vm2, %v7355_v61, %v12636_v49  ;;  %v7864_v24 = vsel %vm1755_vm2, %v12638_v21, %v7355_v61  ;;  %v7875_v49 = vsel %vm2958_vm4, %v7413_v57, %v7732_v22  ;;  %v7889_v22 = vsel %vm1514_vm3, %v7413_v57, %v1607_v53 }
 0x42c   : > { %12635 = vst [vmem:[#allocation81_spill] sm:$0xff] %v7848_v37  ;;  %3605 = vmatmul.f32.gmra.mxu2 %v7842_v35  ;;  %v7909_v53 = vsel %vm2958_vm4, %v7413_v57, %v7668_v42  ;;  %v7937_v42 = vsel %vm2958_vm4, %v7413_v57, %v7670_v25  ;;  %v7954_v25 = vsel %vm1514_vm3, %v1609_v63, %v7413_v57 }
 0x42d   : > { %12637 = vst [vmem:[#allocation82_spill] sm:$0xff] %v7858_v33  ;;  %v7972_v63 = vsel %vm2958_vm4, %v7413_v57, %v7752_v56  ;;  %v12660_v56 = vrot.slane %v7000_v2, 4 }
 0x42e   : > { %12639 = vst [vmem:[#allocation83_spill] sm:$0xff] %v7864_v24 }
 0x42f   : > { %12640 = vst [vmem:[#allocation84_spill] sm:$0xff] %v7875_v49 }
 0x430   : > { %2328 = vrot.lane.b32.xlu1 %v7858_v33, %s6755_s17  ;;  %2326 = vrot.lane.b32.xlu2 %v7864_v24, %s6755_s17  ;;  %v12289_v33 = vrot.slane %v7224_v16, 3  ;;  %v3228_v24 = vld [vmem:[%s12155_s3 + $0x178] sm:$0xff]  ;;  %12642 = vst [vmem:[#allocation86_spill] sm:$0xff] %v7889_v22 }
 0x431   : > { %2336 = vrot.lane.b32.xlu0 %v7012_v7, %s6755_s17  ;;  %6481 = vmatpush.msra.mxu2 %v3228_v24  ;;  %v1614_v7 = vrot.slane %v7221_v14, 3  ;;  %12645 = vst [vmem:[#allocation89_spill] sm:$0xff] %v7909_v53 }
 0x432   : > { %v7877_v32 = vpop.permute.xlu1 %2530  ;;  %v7879_v35 = vpop.permute.xlu2 %2542  ;;  %6482 = vmatpush.msra.mxu3 %v3228_v24  ;;  %3831 = vmatpush.msrb.mxu0 %v3228_v24  ;;  %12651 = vst [vmem:[#allocation93_spill] sm:$0xff] %v7937_v42 }
 0x433   : > { %12641 = vst [vmem:[#allocation85_spill] sm:$0xff] %v7879_v35  ;;  %v2295_v21 = vpop.permute.xlu0 %2294  ;;  %v7893_v35 = vsel %vm1514_vm3, %v1602_v36, %v7413_v57 }
 0x434   : > { %3607 = vmatmul.f32.gmra.mxu2 %v7875_v49  ;;  %12643 = vst [vmem:[#allocation87_spill] sm:$0xff] %v7893_v35  ;;  %v7900_v49 = vsel %vm1514_vm3, %v1614_v7, %v12289_v33  ;;  %v12647_v33 = vrot.slane %v6997_v0, 4 }
 0x435   : > { %12644 = vst [vmem:[#allocation88_spill] sm:$0xff] %v7900_v49 }
 0x436   : > { %12653 = vst [vmem:[#allocation95_spill] sm:$0xff] %v7954_v25 }
 0x437   : > { %12655 = vst [vmem:[#allocation97_spill] sm:$0xff] %v7972_v63 }
 0x438   : > { %2580 = vrot.lane.b32.xlu1 %v7889_v22, %s6755_s17  ;;  %2578 = vrot.lane.b32.xlu2 %v7893_v35, %s6755_s17  ;;  %v7920_v35 = vsel %vm1755_vm2, %v7355_v61, %v12647_v33 }
 0x439   : > { %2588 = vrot.lane.b32.xlu0 %v7900_v49, %s6755_s17  ;;  %12648 = vst [vmem:[#allocation91_spill] sm:$0xff] %v7920_v35  ;;  %v12649_v49 = vrot.slane %v6968_v48, 4 }
 0x43a   : > { %v7911_v36 = vpop.permute.xlu1 %2536  ;;  %v2297_v24 = vpop.permute.xlu2 %2296 }
 0x43b   : > { %v7913_v22 = vpop.permute.xlu0 %2546  ;;  %v7926_v37 = vsel %vm1755_vm2, %v12649_v49, %v7355_v61 }
 0x43c   : > { %12646 = vst [vmem:[#allocation90_spill] sm:$0xff] %v7913_v22  ;;  %3609 = vmatmul.f32.gmra.mxu2 %v7909_v53 }
 0x43d   : > { %12650 = vst [vmem:[#allocation92_spill] sm:$0xff] %v7926_v37 }
 0x440   : > { %2334 = vrot.lane.b32.xlu1 %v7920_v35, %s6755_s17  ;;  %2332 = vrot.lane.b32.xlu2 %v7926_v37, %s6755_s17  ;;  %v12297_v35 = vrot.slane %v7256_v8, 3  ;;  %v7950_v37 = vsel %vm1514_vm3, %v7413_v57, %v1614_v7  ;;  %v2960_v7 = vsel %vm2958_vm4, %v7413_v57, %v2295_v21 }
 0x441   : > { %2342 = vrot.lane.b32.xlu0 %v7044_v26, %s6755_s17  ;;  %v1621_v26 = vrot.slane %v7254_v6, 3  ;;  %12652 = vst [vmem:[#allocation94_spill] sm:$0xff] %v7950_v37 }
 0x442   : > { %v2293_v33 = vpop.permute.xlu1 %2292  ;;  %v7939_v53 = vpop.permute.xlu2 %2548 }
 0x443   : > { %v7941_v22 = vpop.permute.xlu0 %2300  ;;  %v2959_v49 = vsel %vm2958_vm4, %v7413_v57, %v2293_v33  ;;  %v7961_v33 = vsel %vm1514_vm3, %v1621_v26, %v12297_v35 }
 0x444   : > { %3417 = vmatmul.f32.vlgmr.msra.gmra.mxu1 %v2959_v49  ;;  %3611 = vmatmul.f32.gmra.mxu2 %v7937_v42  ;;  %12654 = vst [vmem:[#allocation96_spill] sm:$0xff] %v7961_v33 }
 0x448   : > { %2586 = vrot.lane.b32.xlu1 %v7950_v37, %s6755_s17  ;;  %2584 = vrot.lane.b32.xlu2 %v7954_v25, %s6755_s17  ;;  %v7982_v37 = vrot.slane %v12587_v3, 5  ;;  %v7994_v25 = vsel %vm1755_vm2, %v12660_v56, %v7355_v61  ;;  %v2961_v3 = vsel %vm2958_vm4, %v7413_v57, %v2297_v24 }
 0x449   : > { %2594 = vrot.lane.b32.xlu0 %v7961_v33, %s6755_s17  ;;  %v12658_v33 = vrot.slane %v7029_v18, 4  ;;  %12661 = vst [vmem:[#allocation101_spill] sm:$0xff] %v7994_v25 }
 0x44a   : > { %v7974_v49 = vpop.permute.xlu1 %2544  ;;  %v7976_v42 = vpop.permute.xlu2 %2302  ;;  %12657 = vst [vmem:[#allocation99_spill] sm:$0xff] %v7982_v37 }
 0x44b   : > { %v7978_v35 = vpop.permute.xlu0 %2552  ;;  %v7988_v21 = vsel %vm1755_vm2, %v7355_v61, %v12658_v33  ;;  %v3031_v33 = vsel %vm2958_vm4, %v7982_v37, %v7686_v50  ;;  %v8026_v50 = vsel %vm1514_vm3, %v7413_v57, %v1621_v26 }
 0x44c   : > { %12656 = vst [vmem:[#allocation98_spill] sm:$0xff] %v7978_v35  ;;  %3419 = vmatmul.f32.gmra.mxu1 %v2960_v7  ;;  %3613 = vmatmul.f32.gmra.mxu2 %v7972_v63  ;;  %v12663_v63 = vrot.slane %v7279_v27, 3 }
 0x44d   : > { %12659 = vst [vmem:[#allocation100_spill] sm:$0xff] %v7988_v21 }
 0x44e   : > { %12667 = vst [vmem:[#allocation105_spill] sm:$0xff] %v8026_v50 }
 0x450   : > { %2340 = vrot.lane.b32.xlu1 %v7988_v21, %s6755_s17  ;;  %2338 = vrot.lane.b32.xlu2 %v7994_v25, %s6755_s17  ;;  %v8016_v21 = vsel %vm1514_vm3, %v12663_v63, %v7413_v57  ;;  %v3227_v63 = vld [vmem:[%s12155_s3 + $0x170] sm:$0xff] }
 0x451   : > { %2348 = vrot.lane.b32.xlu0 %v7076_v60, %s6755_s17  ;;  %12664 = vst [vmem:[#allocation103_spill] sm:$0xff] %v8016_v21  ;;  %v12665_v60 = vrot.slane %v7093_v15, 4  ;;  %6483 = vmatpush.msra.mxu2 %v3227_v63 }
 0x452   : > { %v2299_v7 = vpop.permute.xlu1 %2298  ;;  %v8008_v56 = vpop.permute.xlu2 %2554  ;;  %6484 = vmatpush.msra.mxu3 %v3227_v63  ;;  %3832 = vmatpush.msrb.mxu0 %v3227_v63 }
 0x453   : > { %12662 = vst [vmem:[#allocation102_spill] sm:$0xff] %v8008_v56  ;;  %v8010_v35 = vpop.permute.xlu0 %2306  ;;  %v8022_v24 = vsel %vm1755_vm2, %v7355_v61, %v12665_v60  ;;  %v2962_v26 = vsel %vm2958_vm4, %v7413_v57, %v2299_v7 }
 0x454   : > { %3421 = vmatmul.f32.gmra.mxu1 %v2961_v3  ;;  %3632 = vmatmul.f32.vlgmr.msrb.gmra.mxu2 %v3031_v33  ;;  %12666 = vst [vmem:[#allocation104_spill] sm:$0xff] %v8022_v24  ;;  %v6528_v3 = vpack.i.bf16 %v8016_v21, %v8022_v24  ;;  %v12668_v33 = vrot.slane %v7224_v16, 3 }
 0x456   : > { %v8034_v25 = vsel %vm1514_vm3, %v12668_v33, %v7413_v57  ;;  %v3032_v33 = vsel %vm2958_vm4, %v7982_v37, %v7694_v38 }
 0x457   : > { %12669 = vst [vmem:[#allocation106_spill] sm:$0xff] %v8034_v25 }
 0x458   : > { %2592 = vrot.lane.b32.xlu1 %v8026_v50, %s6755_s17  ;;  %2590 = vrot.lane.b32.xlu2 %v8034_v25, %s6755_s17  ;;  %v12674_v50 = vrot.slane %v7125_v9, 4  ;;  %v12676_v25 = vrot.slane %v7061_v45, 4 }
 0x459   : > { %6529 = vrot.lane.b32.xlu0 %v6528_v3, %s6755_s17  ;;  %v12672_v3 = vrot.slane %v7295_v19, 3 }
 0x45a   : > { %v8050_v21 = vpop.permute.xlu1 %2550  ;;  %v8052_v24 = vpop.permute.xlu2 %2308  ;;  %v8066_v38 = vsel %vm1755_vm2, %v7355_v61, %v12674_v50  ;;  %v8072_v63 = vsel %vm1755_vm2, %v7355_v61, %v12676_v25  ;;  %v2963_v25 = vsel %vm2958_vm4, %v7413_v57, %v7941_v22  ;;  %v3033_v50 = vsel %vm2958_vm4, %v7982_v37, %v7785_v10 }
 0x45b   : > { %12670 = vst [vmem:[#allocation107_spill] sm:$0xff] %v8050_v21  ;;  %v8054_v60 = vpop.permute.xlu0 %2558  ;;  %v8060_v7 = vsel %vm1514_vm3, %v12672_v3, %v7413_v57 }
 0x45c   : > { %12671 = vst [vmem:[#allocation108_spill] sm:$0xff] %v8054_v60  ;;  %3423 = vmatmul.f32.gmra.mxu1 %v2962_v26  ;;  %3634 = vmatmul.f32.gmra.mxu2 %v3032_v33  ;;  %v6543_v26 = vpack.i.bf16 %v8060_v7, %v8066_v38  ;;  %v12678_v33 = vrot.slane %v7032_v20, 4 }
 0x45d   : > { %12673 = vst [vmem:[#allocation109_spill] sm:$0xff] %v8060_v7 }
 0x45e   : > { %12675 = vst [vmem:[#allocation110_spill] sm:$0xff] %v8066_v38  ;;  %v8080_v3 = vsel %vm1755_vm2, %v12678_v33, %v7355_v61  ;;  %v1628_v38 = vrot.slane %v7277_v13, 3 }
 0x45f   : > { %12677 = vst [vmem:[#allocation111_spill] sm:$0xff] %v8072_v63  ;;  %v8105_v22 = vpop.f32.mrf.mxu2 }
 0x460   : > { %12679 = vst [vmem:[#allocation112_spill] sm:$0xff] %v8080_v3  ;;  %2346 = vrot.lane.b32.xlu1 %v8072_v63, %s6755_s17  ;;  %2344 = vrot.lane.b32.xlu2 %v8080_v3, %s6755_s17  ;;  %v12684_v3 = vrot.slane %v7157_v58, 4 }
 0x461   : > { %6544 = vrot.lane.b32.xlu0 %v6543_v26, %s6755_s17  ;;  %v12681_v26 = vrot.slane %v7310_v51, 3  ;;  %12683 = vst [vmem:[#allocation115_spill] sm:$0xff] %v8105_v22 }
 0x462   : > { %v2305_v33 = vpop.permute.xlu1 %2304  ;;  %v8094_v7 = vpop.permute.xlu2 %2560  ;;  %v8111_v10 = vsel %vm1755_vm2, %v7355_v61, %v12684_v3  ;;  %v2964_v3 = vsel %vm2958_vm4, %v7413_v57, %v7976_v42  ;;  %v12693_v42 = vrot.slane %v7189_v52, 4 }
 0x463   : > { %12680 = vst [vmem:[#allocation113_spill] sm:$0xff] %v8094_v7  ;;  %v8096_v60 = vpop.permute.xlu0 %2312  ;;  %v8103_v63 = vsel %vm1514_vm3, %v12681_v26, %v7413_v57  ;;  %v1635_v7 = vrot.slane %v7293_v23, 3  ;;  %v12687_v26 = vrot.slane %v7256_v8, 3 }
 0x464   : > { %3425 = vmatmul.f32.gmra.mxu1 %v2963_v25  ;;  %3636 = vmatmul.f32.gmra.mxu2 %v3033_v50  ;;  %12682 = vst [vmem:[#allocation114_spill] sm:$0xff] %v8103_v63  ;;  %v8116_v25 = vsel %vm1514_vm3, %v7413_v57, %v1628_v38  ;;  %v6558_v50 = vpack.i.bf16 %v8103_v63, %v8111_v10 }
 0x465   : > { %12685 = vst [vmem:[#allocation116_spill] sm:$0xff] %v8111_v10  ;;  %v8124_v22 = vsel %vm1514_vm3, %v12687_v26, %v7413_v57  ;;  %v3034_v63 = vsel %vm2958_vm4, %v7982_v37, %v7730_v62  ;;  %v8156_v62 = vsel %vm1755_vm2, %v7355_v61, %v12693_v42 }
 0x466   : > { %12686 = vst [vmem:[#allocation117_spill] sm:$0xff] %v8116_v25  ;;  %v6573_v42 = vpack.i.bf16 %v7982_v37, %v8156_v62 }
 0x467   : > { %12688 = vst [vmem:[#allocation118_spill] sm:$0xff] %v8124_v22 }
 0x468   : > { %2598 = vrot.lane.b32.xlu1 %v8116_v25, %s6755_s17  ;;  %2596 = vrot.lane.b32.xlu2 %v8124_v22, %s6755_s17  ;;  %v8143_v25 = vsel %vm1514_vm3, %v7413_v57, %v1635_v7  ;;  %v12691_v22 = vrot.slane %v7279_v27, 3  ;;  %12694 = vst [vmem:[#allocation122_spill] sm:$0xff] %v8156_v62 }
 0x469   : > { %6559 = vrot.lane.b32.xlu0 %v6558_v50, %s6755_s17  ;;  %12690 = vst [vmem:[#allocation120_spill] sm:$0xff] %v8143_v25 }
 0x46a   : > { %v8137_v10 = vpop.permute.xlu2 %2314  ;;  %v8148_v50 = vsel %vm1514_vm3, %v1628_v38, %v12691_v22  ;;  %v8150_v56 = vpop.permute.xlu1 %2556  ;;  %v6533_v38 = vpack.i.bf16 %v8143_v25, %v7108_v39  ;;  %v3035_v25 = vsel %vm2958_vm4, %v7982_v37, %v7734_v31 }
 0x46b   : > { %v8139_v26 = vpop.permute.xlu0 %2564  ;;  %12692 = vst [vmem:[#allocation121_spill] sm:$0xff] %v8148_v50 }
 0x46c   : > { %12689 = vst [vmem:[#allocation119_spill] sm:$0xff] %v8139_v26  ;;  %3427 = vmatmul.f32.gmra.mxu1 %v2964_v3  ;;  %3638 = vmatmul.f32.gmra.mxu2 %v3034_v63  ;;  %v12695_v26 = vrot.slane %v7064_v54, 4  ;;  %v1642_v63 = vrot.slane %v7308_v1, 3  ;;  %v8169_v3 = vpop.f32.mrf.mxu2 }
 0x46d   : > { %12697 = vst [vmem:[#allocation124_spill] sm:$0xff] %v8169_v3 }
 0x46e   : > { %v8162_v21 = vsel %vm1755_vm2, %v12695_v26, %v7355_v61  ;;  %v8178_v26 = vsel %vm2958_vm4, %v7413_v57, %v2305_v33  ;;  %v8189_v62 = vsel %vm1514_vm3, %v7413_v57, %v1642_v63  ;;  %v12702_v33 = vrot.slane %v7192_v43, 4 }
 0x46f   : > { %12696 = vst [vmem:[#allocation123_spill] sm:$0xff] %v8162_v21  ;;  %v6523_v22 = vpack.i.bf16 %v8148_v50, %v8162_v21 }
 0x470   : > { %6534 = vrot.lane.b32.xlu1 %v6533_v38, %s6755_s17  ;;  %12698 = vst [vmem:[#allocation125_spill] sm:$0xff] %v8178_v26  ;;  %v12700_v38 = vrot.slane %v7295_v19, 3  ;;  %v8201_v31 = vsel %vm1755_vm2, %v12702_v33, %v7355_v61  ;;  %v8221_v33 = vsel %vm2958_vm4, %v7413_v57, %v8010_v35  ;;  %v12712_v35 = vrot.slane %v7128_v12, 4 }
 0x471   : > { %6524 = vrot.lane.b32.xlu2 %v6523_v22, %s6755_s17  ;;  %6574 = vrot.lane.b32.xlu0 %v6573_v42, %s6755_s17  ;;  %12699 = vst [vmem:[#allocation126_spill] sm:$0xff] %v8189_v62  ;;  %v12704_v42 = vrot.slane %v7096_v17, 4 }
 0x472   : > { %v8183_v50 = vpop.permute.xlu2 %2566  ;;  %v8194_v22 = vsel %vm1514_vm3, %v1635_v7, %v12700_v38  ;;  %12703 = vst [vmem:[#allocation128_spill] sm:$0xff] %v8201_v31  ;;  %v2311_v21 = vpop.permute.xlu1 %2310  ;;  %v6548_v7 = vpack.i.bf16 %v8189_v62, %v7140_v41 }
 0x473   : > { %v8185_v3 = vpop.permute.xlu0 %2318  ;;  %12701 = vst [vmem:[#allocation127_spill] sm:$0xff] %v8194_v22  ;;  %v8207_v39 = vsel %vm1755_vm2, %v12704_v42, %v7355_v61  ;;  %v3036_v42 = vsel %vm2958_vm4, %v7982_v37, %v7810_v59  ;;  %v3226_v59 = vld [vmem:[%s12155_s3 + $0x168] sm:$0xff] }
 0x474   : > { %3429 = vmatmul.f32.gmra.mxu1 %v8178_v26  ;;  %3640 = vmatmul.f32.gmra.mxu2 %v3035_v25  ;;  %12705 = vst [vmem:[#allocation129_spill] sm:$0xff] %v8207_v39  ;;  %v6538_v38 = vpack.i.bf16 %v8194_v22, %v8207_v39  ;;  %v6588_v26 = vpack.i.bf16 %v7982_v37, %v8201_v31  ;;  %v12708_v31 = vrot.slane %v7322_v55, 3  ;;  %v12340_v39 = vrot.slane %v7279_v27, 4 }
 0x475   : > { %12706 = vst [vmem:[#allocation130_spill] sm:$0xff] %v8221_v33  ;;  %v8249_v22 = vsel %vm1755_vm2, %v12712_v35, %v7355_v61  ;;  %6485 = vmatpush.msra.mxu2 %v3226_v59  ;;  %6486 = vmatpush.msra.mxu3 %v3226_v59  ;;  %v8266_v35 = vsel %vm2958_vm4, %v7413_v57, %v8052_v24  ;;  %v12718_v24 = vrot.slane %v7160_v44, 4 }
 0x476   : > { %12713 = vst [vmem:[#allocation134_spill] sm:$0xff] %v8249_v22  ;;  %3833 = vmatpush.msrb.mxu0 %v3226_v59  ;;  %v3037_v59 = vsel %vm2958_vm4, %v7982_v37, %v7750_v47 }
 0x477   : > { %v3589_v25 = vpop.f32.mrf.mxu2  ;;  %12714 = vst [vmem:[#allocation135_spill] sm:$0xff] %v8266_v35 }
 0x478   : > { %6549 = vrot.lane.b32.xlu1 %v6548_v7, %s6755_s17  ;;  %v8234_v7 = vsel %vm1514_vm3, %v7413_v57, %v12708_v31 }
 0x479   : > { %6539 = vrot.lane.b32.xlu2 %v6538_v38, %s6755_s17  ;;  %6589 = vrot.lane.b32.xlu0 %v6588_v26, %s6755_s17  ;;  %12709 = vst [vmem:[#allocation132_spill] sm:$0xff] %v8234_v7  ;;  %v12710_v26 = vrot.slane %v7310_v51, 3  ;;  %v6563_v31 = vpack.i.bf16 %v8234_v7, %v7172_v11  ;;  %v12720_v7 = vld [vmem:[#allocation18_spill] sm:$0xff]  ;;  %v1864_v11 = vrot.slane %v7256_v8, 4 }
 0x47a   : > { %v8226_v62 = vpop.permute.xlu2 %2320  ;;  %v8258_v41 = vpop.permute.xlu1 %2562 }
 0x47b   : > { %v8228_v25 = vpop.permute.xlu0 %2570  ;;  %v8239_v38 = vsel %vm1514_vm3, %v1642_v63, %v12710_v26  ;;  %v6603_v26 = vpack.i.bf16 %v7982_v37, %v7236_v34 }
 0x47c   : > { %12707 = vst [vmem:[#allocation131_spill] sm:$0xff] %v8228_v25  ;;  %3431 = vmatmul.f32.gmra.mxu1 %v8221_v33  ;;  %3642 = vmatmul.f32.gmra.mxu2 %v3036_v42  ;;  %v6553_v63 = vpack.i.bf16 %v8239_v38, %v8249_v22  ;;  %v3220_v25 = vld [vmem:[%s12155_s3 + $0x138] sm:$0xff] }
 0x47d   : > { %12711 = vst [vmem:[#allocation133_spill] sm:$0xff] %v8239_v38  ;;  %v6578_v38 = vpack.i.bf16 %v12720_v7, %v7593_v4 }
 0x47f   : > { %v3592_v42 = vpop.f32.mrf.mxu2 }
 0x480   : > { %6564 = vrot.lane.b32.xlu1 %v6563_v31, %s6755_s17  ;;  %v12716_v31 = vrot.slane %v7254_v6, 4 }
 0x481   : > { %6554 = vrot.lane.b32.xlu2 %v6553_v63, %s6755_s17  ;;  %6604 = vrot.lane.b32.xlu0 %v6603_v26, %s6755_s17  ;;  %v8286_v26 = vsel %vm1755_vm2, %v12718_v24, %v7355_v61 }
 0x482   : > { %v8271_v42 = vpop.permute.xlu2 %2572  ;;  %v8280_v63 = vsel %vm1755_vm2, %v7355_v61, %v12716_v31  ;;  %12719 = vst [vmem:[#allocation138_spill] sm:$0xff] %v8286_v26  ;;  %v6568_v47 = vpack.i.bf16 %v7343_v5, %v8286_v26  ;;  %v8306_v5 = vsel %vm2958_vm4, %v7413_v57, %v2311_v21  ;;  %v2317_v24 = vpop.permute.xlu1 %2316 }
 0x483   : > { %12715 = vst [vmem:[#allocation136_spill] sm:$0xff] %v8271_v42  ;;  %v8273_v33 = vpop.permute.xlu0 %2324 }
 0x484   : > { %3433 = vmatmul.f32.gmra.mxu1 %v8266_v35  ;;  %3644 = vmatmul.f32.gmra.mxu2 %v3037_v59  ;;  %12717 = vst [vmem:[#allocation137_spill] sm:$0xff] %v8280_v63  ;;  %v12721_v59 = vrot.slane %v6933_v28, 5  ;;  %v12724_v28 = vld [vmem:[#allocation66_spill] sm:$0xff] }
 0x485   : > { %12723 = vst [vmem:[#allocation140_spill] sm:$0xff] %v8306_v5  ;;  %v3038_v4 = vsel %vm2958_vm4, %v7982_v37, %v12724_v28 }
 0x486   : > { %v8296_v35 = vsel %vm800_vm0, %v7982_v37, %v12721_v59 }
 0x487   : > { %12722 = vst [vmem:[#allocation139_spill] sm:$0xff] %v8296_v35  ;;  %v3595_v31 = vpop.f32.mrf.mxu2  ;;  %v6618_v34 = vpack.i.bf16 %v8296_v35, %v8280_v63  ;;  %v12730_v63 = vld [vmem:[#allocation36_spill] sm:$0xff] }
 0x488   : > { %6579 = vrot.lane.b32.xlu1 %v6578_v38, %s6755_s17  ;;  %v8318_v38 = vsel %vm1755_vm2, %v1864_v11, %v7355_v61 }
 0x489   : > { %6569 = vrot.lane.b32.xlu2 %v6568_v47, %s6755_s17  ;;  %6619 = vrot.lane.b32.xlu0 %v6618_v34, %s6755_s17  ;;  %12726 = vst [vmem:[#allocation141_spill] sm:$0xff] %v8318_v38  ;;  %v12727_v34 = vrot.slane %v7221_v14, 4  ;;  %v12729_v47 = vld [vmem:[#allocation53_spill] sm:$0xff] }
 0x48a   : > { %v8311_v59 = vpop.permute.xlu2 %2326  ;;  %v6583_v28 = vpack.i.bf16 %v12729_v47, %v7982_v37  ;;  %v8361_v47 = vpop.permute.xlu1 %2568 }
 0x48b   : > { %v8313_v31 = vpop.permute.xlu0 %2576  ;;  %v8324_v21 = vsel %vm1755_vm2, %v7355_v61, %v12727_v34  ;;  %12737 = vst [vmem:[#allocation145_spill] sm:$0xff] %v8361_v47 }
 0x48c   : > { %12725 = vst [vmem:[#allocation66_spill] sm:$0xff] %v8313_v31  ;;  %3435 = vmatmul.f32.gmra.mxu1 %v8306_v5  ;;  %3646 = vmatmul.f32.gmra.mxu2 %v3038_v4  ;;  %v6593_v7 = vpack.i.bf16 %v8324_v21, %v12730_v63  ;;  %v12731_v5 = vrot.slane %v6936_v30, 5  ;;  %v8345_v63 = vsel %vm2958_vm4, %v7413_v57, %v8096_v60  ;;  %v12739_v60 = vld [vmem:[#allocation59_spill] sm:$0xff]  ;;  %v12743_v31 = vrot.slane %v7254_v6, 4 }
 0x48d   : > { %12728 = vst [vmem:[#allocation142_spill] sm:$0xff] %v8324_v21  ;;  %v3039_v30 = vsel %vm2958_vm4, %v7982_v37, %v7844_v40 }
 0x48e   : > { %v8334_v4 = vsel %vm800_vm0, %v12731_v5, %v7982_v37  ;;  %12733 = vst [vmem:[#allocation36_spill] sm:$0xff] %v8345_v63 }
 0x48f   : > { %12732 = vst [vmem:[#allocation53_spill] sm:$0xff] %v8334_v4  ;;  %v3598_v26 = vpop.f32.mrf.mxu2  ;;  %v6633_v22 = vpack.i.bf16 %v8334_v4, %v8318_v38 }
 0x490   : > { %6594 = vrot.lane.b32.xlu1 %v6593_v7, %s6755_s17  ;;  %v1869_v26 = vrot.slane %v7277_v13, 4  ;;  %v12735_v7 = vrot.slane %v7224_v16, 4 }
 0x491   : > { %6584 = vrot.lane.b32.xlu2 %v6583_v28, %s6755_s17  ;;  %6634 = vrot.lane.b32.xlu0 %v6633_v22, %s6755_s17  ;;  %v6598_v28 = vpack.i.bf16 %v12739_v60, %v7982_v37 }
 0x492   : > { %v8351_v5 = vpop.permute.xlu2 %2578  ;;  %v8359_v22 = vsel %vm1755_vm2, %v12735_v7, %v7355_v61  ;;  %v8367_v40 = vsel %vm1755_vm2, %v1869_v26, %v12340_v39  ;;  %v12740_v7 = vld [vmem:[#allocation5_spill] sm:$0xff] }
 0x493   : > { %12734 = vst [vmem:[#allocation143_spill] sm:$0xff] %v8351_v5  ;;  %v8353_v34 = vpop.permute.xlu0 %2330  ;;  %v6608_v38 = vpack.i.bf16 %v8359_v22, %v7413_v57  ;;  %v6648_v5 = vpack.i.bf16 %v12740_v7, %v8367_v40 }
 0x494   : > { %12736 = vst [vmem:[#allocation144_spill] sm:$0xff] %v8359_v22  ;;  %3438 = vmatmul.f32.gmra.mxu1 %v8345_v63  ;;  %3648 = vmatmul.f32.gmra.mxu2 %v3039_v30  ;;  %v8382_v30 = vsel %vm2958_vm4, %v7413_v57, %v8137_v10 }
 0x495   : > { %12738 = vst [vmem:[#allocation146_spill] sm:$0xff] %v8367_v40  ;;  %v1878_v40 = vrot.slane %v7295_v19, 4 }
 0x496   : > { %12741 = vst [vmem:[#allocation59_spill] sm:$0xff] %v8382_v30 }
 0x497   : > { %v3600_v21 = vpop.f32.mrf.mxu2 }
 0x498   : > { %6609 = vrot.lane.b32.xlu1 %v6608_v38, %s6755_s17  ;;  %v3040_v21 = vsel %vm2958_vm4, %v7982_v37, %v7783_v29  ;;  %v8394_v38 = vsel %vm1755_vm2, %v12743_v31, %v1864_v11  ;;  %v6613_v29 = vpack.i.bf16 %v7413_v57, %v7982_v37  ;;  %v12747_v11 = vrot.slane %v6997_v0, 5 }
 0x499   : > { %6599 = vrot.lane.b32.xlu2 %v6598_v28, %s6755_s17  ;;  %6649 = vrot.lane.b32.xlu0 %v6648_v5, %s6755_s17  ;;  %12744 = vst [vmem:[#allocation148_spill] sm:$0xff] %v8394_v38  ;;  %v12745_v5 = vrot.slane %v7293_v23, 4  ;;  %v8405_v28 = vpop.permute.xlu1 %2322  ;;  %v6623_v63 = vpack.i.bf16 %v8394_v38, %v7413_v57  ;;  %v8426_v0 = vsel %vm2958_vm4, %v7413_v57, %v2317_v24 }
 0x49a   : > { %v8387_v60 = vpop.permute.xlu2 %2332  ;;  %v8413_v31 = vsel %vm800_vm0, %v7982_v37, %v12747_v11  ;;  %12749 = vst [vmem:[#allocation151_spill] sm:$0xff] %v8426_v0  ;;  %v12750_v11 = vld [vmem:[#allocation71_spill] sm:$0xff]  ;;  %v8442_v24 = vsel %vm1755_vm2, %v1878_v40, %v7355_v61 }
 0x49b   : > { %v8389_v39 = vpop.permute.xlu0 %2582  ;;  %v8401_v10 = vsel %vm1755_vm2, %v7355_v61, %v12745_v5  ;;  %12748 = vst [vmem:[#allocation150_spill] sm:$0xff] %v8413_v31  ;;  %v3225_v5 = vld [vmem:[%s12155_s3 + $0x160] sm:$0xff] }
 0x49c   : > { %12742 = vst [vmem:[#allocation147_spill] sm:$0xff] %v8389_v39  ;;  %3441 = vmatmul.f32.gmra.mxu1 %v8382_v30  ;;  %3650 = vmatmul.f32.gmra.mxu2 %v3040_v21  ;;  %v6663_v30 = vpack.i.bf16 %v8413_v31, %v8401_v10 }
 0x49d   : > { %12746 = vst [vmem:[#allocation149_spill] sm:$0xff] %v8401_v10  ;;  %6487 = vmatpush.msra.mxu2 %v3225_v5  ;;  %6488 = vmatpush.msra.mxu3 %v3225_v5 }
 0x49e   : > { %3834 = vmatpush.msrb.mxu0 %v3225_v5  ;;  %12753 = vst [vmem:[#allocation153_spill] sm:$0xff] %v8442_v24 }
 0x49f   : > { %v3602_v21 = vpop.f32.mrf.mxu2 }
 0x4a0   : > { %6624 = vrot.lane.b32.xlu1 %v6623_v63, %s6755_s17  ;;  %v3041_v21 = vsel %vm2958_vm4, %v7982_v37, %v12750_v11  ;;  %v8437_v63 = vsel %vm1755_vm2, %v7355_v61, %v1869_v26  ;;  %v12756_v11 = vld [vmem:[#allocation3_spill] sm:$0xff] }
 0x4a1   : > { %6614 = vrot.lane.b32.xlu2 %v6613_v29, %s6755_s17  ;;  %6664 = vrot.lane.b32.xlu0 %v6663_v30, %s6755_s17  ;;  %12752 = vst [vmem:[#allocation152_spill] sm:$0xff] %v8437_v63  ;;  %v6638_v30 = vpack.i.bf16 %v8437_v63, %v7413_v57  ;;  %v12754_v29 = vrot.slane %v7000_v2, 5  ;;  %v6628_v26 = vpack.i.bf16 %v7413_v57, %v12756_v11 }
 0x4a2   : > { %v8431_v10 = vpop.permute.xlu2 %2584  ;;  %v8465_v2 = vsel %vm2958_vm4, %v7413_v57, %v8185_v3 }
 0x4a3   : > { %12751 = vst [vmem:[#allocation71_spill] sm:$0xff] %v8431_v10  ;;  %v8433_v38 = vpop.permute.xlu0 %2336  ;;  %v8450_v5 = vsel %vm800_vm0, %v12754_v29, %v7982_v37  ;;  %v8457_v10 = vpop.permute.xlu1 %2574  ;;  %v1883_v29 = vrot.slane %v7308_v1, 4 }
 0x4a4   : > { %3444 = vmatmul.f32.gmra.mxu1 %v8426_v0  ;;  %3653 = vmatmul.f32.gmra.mxu2 %v3041_v21  ;;  %12755 = vst [vmem:[#allocation154_spill] sm:$0xff] %v8450_v5  ;;  %v6678_v21 = vpack.i.bf16 %v8450_v5, %v8442_v24 }
 0x4a5   : > { %12757 = vst [vmem:[#allocation155_spill] sm:$0xff] %v8457_v10 }
 0x4a6   : > { %12758 = vst [vmem:[#allocation156_spill] sm:$0xff] %v8465_v2 }
 0x4a7   : > { %v3604_v22 = vpop.f32.mrf.mxu2 }
 0x4a8   : > { %6639 = vrot.lane.b32.xlu1 %v6638_v30, %s6755_s17  ;;  %v3042_v22 = vsel %vm2958_vm4, %v7982_v37, %v7877_v32  ;;  %v12760_v30 = vrot.slane %v7279_v27, 4  ;;  %v12764_v32 = vrot.slane %v7310_v51, 4 }
 0x4a9   : > { %6629 = vrot.lane.b32.xlu2 %v6628_v26, %s6755_s17  ;;  %6679 = vrot.lane.b32.xlu0 %v6678_v21, %s6755_s17  ;;  %v12762_v21 = vrot.slane %v6965_v46, 5  ;;  %v12766_v46 = vld [vmem:[#allocation9_spill] sm:$0xff] }
 0x4aa   : > { %v8471_v0 = vpop.permute.xlu2 %2338  ;;  %v8479_v26 = vsel %vm1755_vm2, %v12760_v30, %v7355_v61  ;;  %v8491_v63 = vsel %vm1755_vm2, %v1883_v29, %v12764_v32 }
 0x4ab   : > { %v8473_v24 = vpop.permute.xlu0 %2588  ;;  %12761 = vst [vmem:[#allocation158_spill] sm:$0xff] %v8479_v26  ;;  %v8485_v3 = vsel %vm800_vm0, %v7982_v37, %v12762_v21  ;;  %v6693_v10 = vpack.i.bf16 %v12766_v46, %v8491_v63  ;;  %v3224_v21 = vld [vmem:[%s12155_s3 + $0x158] sm:$0xff]  ;;  %v8513_v32 = vpop.permute.xlu1 %2328 }
 0x4ac   : > { %12759 = vst [vmem:[#allocation157_spill] sm:$0xff] %v8473_v24  ;;  %3447 = vmatmul.f32.gmra.mxu1 %v8465_v2  ;;  %3656 = vmatmul.f32.gmra.mxu2 %v3042_v22  ;;  %v6653_v24 = vpack.i.bf16 %v8479_v26, %v7413_v57  ;;  %v6643_v30 = vpack.i.bf16 %v7413_v57, %v8485_v3  ;;  %v12772_v26 = vrot.slane %v6968_v48, 5  ;;  %v3221_v48 = vld [vmem:[%s12155_s3 + $0x140] sm:$0xff] }
 0x4ad   : > { %12763 = vst [vmem:[#allocation159_spill] sm:$0xff] %v8485_v3  ;;  %v8508_v22 = vsel %vm2958_vm4, %v7413_v57, %v8226_v62  ;;  %6490 = vmatpush.msra.mxu3 %v3224_v21  ;;  %6489 = vmatpush.msra.mxu2 %v3224_v21  ;;  %v12770_v62 = vrot.slane %v7293_v23, 4 }
 0x4ae   : > { %12765 = vst [vmem:[#allocation160_spill] sm:$0xff] %v8491_v63  ;;  %3835 = vmatpush.msrb.mxu0 %v3224_v21  ;;  %v8531_v42 = vsel %vm800_vm0, %v12772_v26, %v7982_v37  ;;  %v3222_v21 = vld [vmem:[%s12155_s3 + $0x148] sm:$0xff] }
 0x4af   : > { %v3606_v39 = vpop.f32.mrf.mxu2  ;;  %12767 = vst [vmem:[#allocation161_spill] sm:$0xff] %v8508_v22  ;;  %v8525_v2 = vsel %vm1755_vm2, %v12770_v62, %v1878_v40  ;;  %v12776_v62 = vrot.slane %v7061_v45, 5  ;;  %v3244_v45 = vld [vmem:[%s12155_s3 + $0x1f8] sm:$0xff] }
 0x4b0   : > { %6654 = vrot.lane.b32.xlu1 %v6653_v24, %s6755_s17  ;;  %v3223_v39 = vld [vmem:[%s12155_s3 + $0x150] sm:$0xff]  ;;  %12773 = vst [vmem:[#allocation163_spill] sm:$0xff] %v8531_v42  ;;  %v6668_v26 = vpack.i.bf16 %v8525_v2, %v7413_v57  ;;  %4046 = vmatpush.msrb.mxu1 %v3244_v45  ;;  %v3218_v45 = vld [vmem:[%s12155_s3 + $0x128] sm:$0xff] }
 0x4b1   : > { %6644 = vrot.lane.b32.xlu2 %v6643_v30, %s6755_s17  ;;  %6694 = vrot.lane.b32.xlu0 %v6693_v10, %s6755_s17  ;;  %v12769_v30 = vld [vmem:[#allocation74_spill] sm:$0xff] }
 0x4b2   : > { %v8515_v63 = vpop.permute.xlu2 %2590  ;;  %v3043_v10 = vsel %vm2958_vm4, %v7982_v37, %v12769_v30  ;;  %12771 = vst [vmem:[#allocation74_spill] sm:$0xff] %v8525_v2  ;;  %6492 = vmatpush.msra.mxu3 %v3223_v39  ;;  %v12774_v30 = vrot.slane %v7322_v55, 4  ;;  %6491 = vmatpush.msra.mxu2 %v3223_v39 }
 0x4b3   : > { %12768 = vst [vmem:[#allocation162_spill] sm:$0xff] %v8515_v63  ;;  %v8517_v24 = vpop.permute.xlu0 %2342  ;;  %3836 = vmatpush.msrb.mxu0 %v3223_v39  ;;  %v3219_v39 = vld [vmem:[%s12155_s3 + $0x130] sm:$0xff] }
 0x4b4   : > { %3450 = vmatmul.f32.gmra.mxu1 %v8508_v22  ;;  %3659 = vmatmul.f32.gmra.mxu2 %v3043_v10  ;;  %v8541_v40 = vsel %vm1755_vm2, %v7355_v61, %v12774_v30  ;;  %v8552_v10 = vsel %vm800_vm0, %v7982_v37, %v12776_v62  ;;  %v6658_v22 = vpack.i.bf16 %v7413_v57, %v8531_v42 }
 0x4b5   : > { %12775 = vst [vmem:[#allocation164_spill] sm:$0xff] %v8541_v40  ;;  %6494 = vmatpush.msra.mxu3 %v3222_v21  ;;  %v6708_v63 = vpack.i.bf16 %v8552_v10, %v8541_v40  ;;  %6493 = vmatpush.msra.mxu2 %v3222_v21  ;;  %v12779_v40 = vld [vmem:[#allocation42_spill] sm:$0xff] }
 0x4b6   : > { %12777 = vst [vmem:[#allocation165_spill] sm:$0xff] %v8552_v10  ;;  %v8577_v2 = vsel %vm2958_vm4, %v12779_v40, %v8405_v28  ;;  %3837 = vmatpush.msrb.mxu0 %v3222_v21  ;;  %v3217_v28 = vld [vmem:[%s12155_s3 + $0x120] sm:$0xff]  ;;  %v12784_v40 = vld [vmem:[#allocation7_spill] sm:$0xff]  ;;  %v3216_v21 = vld [vmem:[%s12155_s3 + $0x118] sm:$0xff] }
 0x4b7   : > { %v3608_v30 = vpop.f32.mrf.mxu2  ;;  %6496 = vmatpush.msra.mxu3 %v3221_v48  ;;  %6495 = vmatpush.msra.mxu2 %v3221_v48  ;;  %12780 = vst [vmem:[#allocation42_spill] sm:$0xff] %v8577_v2 }
 0x4b8   : > { %6669 = vrot.lane.b32.xlu1 %v6668_v26, %s6755_s17  ;;  %v12781_v26 = vld [vmem:[#allocation75_spill] sm:$0xff]  ;;  %3838 = vmatpush.msrb.mxu0 %v3221_v48  ;;  %v3215_v48 = vld [vmem:[%s12155_s3 + $0x110] sm:$0xff] }
 0x4b9   : > { %6659 = vrot.lane.b32.xlu2 %v6658_v22, %s6755_s17  ;;  %6709 = vrot.lane.b32.xlu0 %v6708_v63, %s6755_s17  ;;  %v3044_v63 = vsel %vm2958_vm4, %v7982_v37, %v12781_v26  ;;  %v8584_v22 = vsel %vm1755_vm2, %v7355_v61, %v1883_v29  ;;  %v6673_v26 = vpack.i.bf16 %v7413_v57, %v12784_v40 }
 0x4ba   : > { %6498 = vmatpush.msra.mxu3 %v3220_v25  ;;  %v8570_v62 = vpop.permute.xlu2 %2344  ;;  %12782 = vst [vmem:[#allocation75_spill] sm:$0xff] %v8584_v22  ;;  %6497 = vmatpush.msra.mxu2 %v3220_v25  ;;  %v6683_v29 = vpack.i.bf16 %v8584_v22, %v7413_v57 }
 0x4bb   : > { %v8572_v30 = vpop.permute.xlu0 %2594  ;;  %3839 = vmatpush.msrb.mxu0 %v3220_v25 }
 0x4bc   : > { %12778 = vst [vmem:[#allocation166_spill] sm:$0xff] %v8572_v30  ;;  %6500 = vmatpush.msra.mxu3 %v3219_v39  ;;  %v8589_v30 = vpop.permute.xlu1 %2580  ;;  %3453 = vmatmul.f32.gmra.mxu1 %v8577_v2 }
 0x4bd   : > { %12783 = vst [vmem:[#allocation167_spill] sm:$0xff] %v8589_v30  ;;  %3662 = vmatmul.f32.gmra.mxu2 %v3044_v63  ;;  %v12785_v63 = vrot.slane %v7093_v15, 5  ;;  %3840 = vmatpush.msrb.mxu0 %v3219_v39 }
 0x4be   : > { %6502 = vmatpush.msra.mxu3 %v3218_v45  ;;  %6499 = vmatpush.msra.mxu2 %v3219_v39 }
 0x4bf   : > { %v3610_v47 = vpop.f32.mrf.mxu2  ;;  %v8607_v2 = vsel %vm800_vm0, %v7982_v37, %v12785_v63  ;;  %3841 = vmatpush.msrb.mxu0 %v3218_v45 }
 0x4c0   : > { %6504 = vmatpush.msra.mxu3 %v3217_v28  ;;  %6684 = vrot.lane.b32.xlu1 %v6683_v29, %s6755_s17  ;;  %12786 = vst [vmem:[#allocation168_spill] sm:$0xff] %v8607_v2  ;;  %v12788_v29 = vld [vmem:[#allocation39_spill] sm:$0xff] }
 0x4c1   : > { %6674 = vrot.lane.b32.xlu2 %v6673_v26, %s6755_s17  ;;  %2778 = vrot.lane.b32.xlu0 %v8607_v2, %s6755_s17  ;;  %v3418_v47 = vpop.f32.mrf.mxu1  ;;  %v8622_v63 = vsel %vm2958_vm4, %v12788_v29, %v8273_v33  ;;  %v3045_v26 = vsel %vm2958_vm4, %v7982_v37, %v7911_v36  ;;  %v3214_v33 = vld [vmem:[%s12155_s3 + $0x108] sm:$0xff]  ;;  %v3213_v36 = vld [vmem:[%s12155_s3 + $0x100] sm:$0xff] }
 0x4c2   : > { %6506 = vmatpush.msra.mxu3 %v3216_v21  ;;  %v8615_v22 = vpop.permute.xlu2 %2596  ;;  %6501 = vmatpush.msra.mxu2 %v3218_v45  ;;  %12789 = vst [vmem:[#allocation39_spill] sm:$0xff] %v8622_v63  ;;  %v12790_v47 = vrot.slane %v7310_v51, 4 }
 0x4c3   : > { %12787 = vst [vmem:[#allocation169_spill] sm:$0xff] %v8615_v22  ;;  %v8617_v15 = vpop.permute.xlu0 %2348  ;;  %v12792_v22 = vrot.slane %v7029_v18, 5  ;;  %3842 = vmatpush.msrb.mxu0 %v3217_v28 }
 0x4c4   : > { %v8631_v30 = vsel %vm1755_vm2, %v12790_v47, %v7355_v61  ;;  %6508 = vmatpush.msra.mxu3 %v3215_v48  ;;  %3456 = vmatmul.f32.gmra.mxu1 %v8622_v63  ;;  %v8646_v29 = vpop.permute.xlu1 %2334 }
 0x4c5   : > { %12791 = vst [vmem:[#allocation170_spill] sm:$0xff] %v8631_v30  ;;  %v8637_v25 = vsel %vm800_vm0, %v7982_v37, %v12792_v22  ;;  %3665 = vmatmul.f32.gmra.mxu2 %v3045_v26  ;;  %v6698_v18 = vpack.i.bf16 %v8631_v30, %v7982_v37  ;;  %v12794_v26 = vrot.slane %v7125_v9, 5  ;;  %3843 = vmatpush.msrb.mxu0 %v3216_v21 }
 0x4c6   : > { %12793 = vst [vmem:[#allocation171_spill] sm:$0xff] %v8637_v25  ;;  %6510 = vmatpush.msra.mxu3 %v3214_v33  ;;  %6503 = vmatpush.msra.mxu2 %v3217_v28  ;;  %v6688_v22 = vpack.i.bf16 %v7413_v57, %v8637_v25 }
 0x4c7   : > { %v3612_v47 = vpop.f32.mrf.mxu2  ;;  %v8657_v63 = vsel %vm800_vm0, %v7982_v37, %v12794_v26  ;;  %3844 = vmatpush.msrb.mxu0 %v3215_v48 }
 0x4c8   : > { %6512 = vmatpush.msra.mxu3 %v3213_v36  ;;  %6505 = vmatpush.msra.mxu2 %v3216_v21  ;;  %12795 = vst [vmem:[#allocation172_spill] sm:$0xff] %v8657_v63  ;;  %v12798_v47 = vld [vmem:[#allocation80_spill] sm:$0xff] }
 0x4c9   : > { %6699 = vrot.lane.b32.xlu1 %v6698_v18, %s6755_s17  ;;  %6689 = vrot.lane.b32.xlu2 %v6688_v22, %s6755_s17  ;;  %v3420_v30 = vpop.f32.mrf.mxu1  ;;  %v12796_v18 = vld [vmem:[#allocation41_spill] sm:$0xff]  ;;  %v3046_v26 = vsel %vm2958_vm4, %v8296_v35, %v12798_v47  ;;  %v12799_v22 = vrot.slane %v7032_v20, 5  ;;  %v12801_v47 = vld [vmem:[#allocation11_spill] sm:$0xff]  ;;  %v12802_v20 = vrot.slane %v7157_v58, 5 }
 0x4ca   : > { %2784 = vrot.lane.b32.xlu0 %v8657_v63, %s6755_s17  ;;  %6507 = vmatpush.msra.mxu2 %v3215_v48  ;;  %v8669_v9 = vsel %vm2958_vm4, %v12796_v18, %v8311_v59  ;;  %v12807_v58 = vld [vmem:[#allocation81_spill] sm:$0xff]  ;;  %v3243_v48 = vld [vmem:[%s12155_s3 + $0x1f0] sm:$0xff] }
 0x4cb   : > { %v8662_v57 = vpop.permute.xlu2 %6524  ;;  %v8664_v39 = vpop.permute.xlu0 %6529  ;;  %12797 = vst [vmem:[#allocation41_spill] sm:$0xff] %v8669_v9  ;;  %v8678_v30 = vsel %vm800_vm0, %v12799_v22, %v7982_v37  ;;  %v8691_v22 = vsel %vm800_vm0, %v7982_v37, %v12802_v20  ;;  %v3047_v20 = vsel %vm2958_vm4, %v12756_v11, %v12807_v58  ;;  %3845 = vmatpush.msrb.mxu0 %v3214_v33 }
 0x4cc   : > { %12800 = vst [vmem:[#allocation80_spill] sm:$0xff] %v8678_v30  ;;  %6509 = vmatpush.msra.mxu2 %v3214_v33  ;;  %3459 = vmatmul.f32.gmra.mxu1 %v8669_v9  ;;  %v6703_v59 = vpack.i.bf16 %v7982_v37, %v8678_v30  ;;  %v8683_v18 = vpop.permute.xlu1 %2586  ;;  %v12811_v33 = vrot.slane %v7189_v52, 5  ;;  %v12820_v9 = vld [vmem:[#allocation15_spill] sm:$0xff] }
 0x4cd   : > { %3668 = vmatmul.f32.gmra.mxu2 %v3046_v26  ;;  %12803 = vst [vmem:[#allocation173_spill] sm:$0xff] %v8691_v22  ;;  %4047 = vmatpush.msrb.mxu1 %v3243_v48 }
 0x4ce   : > { %6511 = vmatpush.msra.mxu2 %v3213_v36  ;;  %3846 = vmatpush.msrb.mxu0 %v3213_v36  ;;  %v8724_v58 = vsel %vm800_vm0, %v7982_v37, %v12811_v33 }
 0x4cf   : > { %v3614_v45 = vpop.f32.mrf.mxu2  ;;  %12812 = vst [vmem:[#allocation175_spill] sm:$0xff] %v8724_v58 }
 0x4d0   : > { %v12805_v45 = vld [vmem:[#allocation44_spill] sm:$0xff] }
 0x4d1   : > { %2774 = vrot.lane.b32.xlu1 %v12801_v47, %s6755_s17  ;;  %6704 = vrot.lane.b32.xlu2 %v6703_v59, %s6755_s17  ;;  %v3422_v28 = vpop.f32.mrf.mxu1  ;;  %v8703_v35 = vsel %vm2958_vm4, %v12805_v45, %v8513_v32  ;;  %v12810_v45 = vld [vmem:[#allocation13_spill] sm:$0xff] }
 0x4d2   : > { %2790 = vrot.lane.b32.xlu0 %v8691_v22, %s6755_s17  ;;  %12806 = vst [vmem:[#allocation44_spill] sm:$0xff] %v8703_v35  ;;  %v12808_v28 = vrot.slane %v7064_v54, 5 }
 0x4d3   : > { %v8696_v26 = vpop.permute.xlu2 %6539  ;;  %v8698_v21 = vpop.permute.xlu0 %6544 }
 0x4d4   : > { %12804 = vst [vmem:[#allocation174_spill] sm:$0xff] %v8698_v21  ;;  %3462 = vmatmul.f32.gmra.mxu1 %v8703_v35  ;;  %v8716_v32 = vsel %vm800_vm0, %v12808_v28, %v7982_v37  ;;  %v8730_v54 = vpop.permute.xlu1 %2340  ;;  %v12817_v28 = vld [vmem:[#allocation85_spill] sm:$0xff] }
 0x4d5   : > { %3671 = vmatmul.f32.gmra.mxu2 %v3047_v20  ;;  %12809 = vst [vmem:[#allocation81_spill] sm:$0xff] %v8716_v32  ;;  %v3048_v33 = vsel %vm2958_vm4, %v8334_v4, %v12817_v28 }
 0x4d7   : > { %v3633_v59 = vpop.f32.mrf.mxu2 }
 0x4d8   : > { %v12815_v59 = vld [vmem:[#allocation40_spill] sm:$0xff] }
 0x4d9   : > { %2780 = vrot.lane.b32.xlu1 %v12810_v45, %s6755_s17  ;;  %2776 = vrot.lane.b32.xlu2 %v8716_v32, %s6755_s17  ;;  %v3424_v36 = vpop.f32.mrf.mxu1  ;;  %v8739_v52 = vsel %vm2958_vm4, %v12815_v59, %v8353_v34  ;;  %v12821_v34 = vrot.slane %v7221_v14, 5  ;;  %v3049_v14 = vsel %vm2958_vm4, %v8485_v3, %v7974_v49  ;;  %v12828_v49 = vld [vmem:[#allocation17_spill] sm:$0xff]  ;;  %v12829_v3 = vrot.slane %v7254_v6, 5  ;;  %v12834_v6 = vld [vmem:[#allocation90_spill] sm:$0xff] }
 0x4da   : > { %2796 = vrot.lane.b32.xlu0 %v8724_v58, %s6755_s17  ;;  %12816 = vst [vmem:[#allocation40_spill] sm:$0xff] %v8739_v52  ;;  %v12818_v36 = vrot.slane %v7096_v17, 5 }
 0x4db   : > { %v8732_v20 = vpop.permute.xlu2 %6554  ;;  %v8734_v48 = vpop.permute.xlu0 %6559  ;;  %v8757_v59 = vsel %vm800_vm0, %v7982_v37, %v12821_v34 }
 0x4dc   : > { %12813 = vst [vmem:[#allocation176_spill] sm:$0xff] %v8732_v20  ;;  %3465 = vmatmul.f32.gmra.mxu1 %v8739_v52  ;;  %v8749_v35 = vsel %vm800_vm0, %v12818_v36, %v7982_v37  ;;  %v8775_v34 = vpop.permute.xlu1 %2592 }
 0x4dd   : > { %12814 = vst [vmem:[#allocation177_spill] sm:$0xff] %v8734_v48  ;;  %3674 = vmatmul.f32.gmra.mxu2 %v3048_v33  ;;  %v12824_v33 = vld [vmem:[#allocation46_spill] sm:$0xff] }
 0x4de   : > { %12819 = vst [vmem:[#allocation85_spill] sm:$0xff] %v8749_v35  ;;  %v8770_v36 = vsel %vm2958_vm4, %v12824_v33, %v8387_v60  ;;  %v12826_v60 = vrot.slane %v7128_v12, 5 }
 0x4df   : > { %v3635_v11 = vpop.f32.mrf.mxu2  ;;  %12822 = vst [vmem:[#allocation178_spill] sm:$0xff] %v8757_v59 }
 0x4e0   : > { %12825 = vst [vmem:[#allocation46_spill] sm:$0xff] %v8770_v36  ;;  %v8785_v33 = vsel %vm800_vm0, %v12826_v60, %v7982_v37 }
 0x4e1   : > { %2786 = vrot.lane.b32.xlu1 %v12820_v9, %s6755_s17  ;;  %2782 = vrot.lane.b32.xlu2 %v8749_v35, %s6755_s17  ;;  %v3426_v11 = vpop.f32.mrf.mxu1  ;;  %12827 = vst [vmem:[#allocation180_spill] sm:$0xff] %v8785_v33 }
 0x4e2   : > { %2802 = vrot.lane.b32.xlu0 %v8757_v59, %s6755_s17 }
 0x4e3   : > { %v8763_v17 = vpop.permute.xlu2 %6569  ;;  %v8765_v28 = vpop.permute.xlu0 %6574 }
 0x4e4   : > { %12823 = vst [vmem:[#allocation179_spill] sm:$0xff] %v8763_v17  ;;  %v6577_v4 = vunpack.i.h.bf16 %v8765_v28  ;;  %3468 = vmatmul.f32.gmra.mxu1 %v8770_v36  ;;  %v8793_v36 = vsel %vm800_vm0, %v7982_v37, %v12829_v3  ;;  %v3050_v3 = vsel %vm2958_vm4, %v12740_v7, %v12834_v6  ;;  %v12837_v6 = vld [vmem:[#allocation19_spill] sm:$0xff] }
 0x4e5   : > { %3677 = vmatmul.f32.gmra.mxu2 %v3049_v14  ;;  %12830 = vst [vmem:[#allocation181_spill] sm:$0xff] %v8793_v36  ;;  %v12832_v14 = vld [vmem:[#allocation45_spill] sm:$0xff] }
 0x4e6   : > { %v3109_v11 = vsel %vm2958_vm4, %v7355_v61, %v6577_v4 }
 0x4e7   : > { %3859 = vmatmul.f32.vlgmr.msra.gmra.mxu3 %v3109_v11  ;;  %v3637_v52 = vpop.f32.mrf.mxu2  ;;  %v8805_v11 = vsel %vm2958_vm4, %v12832_v14, %v8646_v29  ;;  %v12835_v29 = vrot.slane %v7160_v44, 5  ;;  %v3242_v44 = vld [vmem:[%s12155_s3 + $0x1e8] sm:$0xff] }
 0x4e8   : > { %12833 = vst [vmem:[#allocation45_spill] sm:$0xff] %v8805_v11  ;;  %4048 = vmatpush.msrb.mxu1 %v3242_v44  ;;  %v12843_v44 = vrot.slane %v7192_v43, 5 }
 0x4e9   : > { %2792 = vrot.lane.b32.xlu1 %v12828_v49, %s6755_s17  ;;  %2788 = vrot.lane.b32.xlu2 %v8785_v33, %s6755_s17  ;;  %v3428_v4 = vpop.f32.mrf.mxu1  ;;  %v8821_v14 = vsel %vm800_vm0, %v12835_v29, %v7982_v37 }
 0x4ea   : > { %2808 = vrot.lane.b32.xlu0 %v8793_v36, %s6755_s17  ;;  %v8813_v4 = vpop.permute.xlu1 %2346  ;;  %12836 = vst [vmem:[#allocation90_spill] sm:$0xff] %v8821_v14 }
 0x4eb   : > { %v8799_v12 = vpop.permute.xlu2 %6584  ;;  %v8815_v36 = vpop.permute.xlu0 %6589 }
 0x4ec   : > { %12831 = vst [vmem:[#allocation182_spill] sm:$0xff] %v8799_v12  ;;  %v6586_v52 = vunpack.i.l.bf16 %v8799_v12  ;;  %3471 = vmatmul.f32.gmra.mxu1 %v8805_v11 }
 0x4ed   : > { %3680 = vmatmul.f32.gmra.mxu2 %v3050_v3  ;;  %v12838_v3 = vrot.slane %v7277_v13, 5  ;;  %v12840_v13 = vld [vmem:[#allocation43_spill] sm:$0xff] }
 0x4ee   : > { %v3110_v60 = vsel %vm2958_vm4, %v7355_v61, %v6586_v52  ;;  %v8842_v29 = vsel %vm2958_vm4, %v12840_v13, %v8433_v38  ;;  %v8856_v38 = vsel %vm800_vm0, %v12843_v44, %v7982_v37 }
 0x4ef   : > { %3861 = vmatmul.f32.gmra.mxu3 %v3110_v60  ;;  %v3639_v12 = vpop.f32.mrf.mxu2  ;;  %v8829_v52 = vsel %vm800_vm0, %v7982_v37, %v12838_v3  ;;  %v6592_v60 = vunpack.i.h.bf16 %v8815_v36  ;;  %12841 = vst [vmem:[#allocation43_spill] sm:$0xff] %v8842_v29  ;;  %v3051_v3 = vsel %vm2958_vm4, %v8531_v42, %v7939_v53  ;;  %v12845_v53 = vld [vmem:[#allocation21_spill] sm:$0xff]  ;;  %v12850_v42 = vld [vmem:[#allocation107_spill] sm:$0xff] }
 0x4f0   : > { %12839 = vst [vmem:[#allocation183_spill] sm:$0xff] %v8829_v52 }
 0x4f1   : > { %2798 = vrot.lane.b32.xlu1 %v12837_v6, %s6755_s17  ;;  %2794 = vrot.lane.b32.xlu2 %v8821_v14, %s6755_s17  ;;  %v3430_v12 = vpop.f32.mrf.mxu1  ;;  %12844 = vst [vmem:[#allocation185_spill] sm:$0xff] %v8856_v38 }
 0x4f2   : > { %2814 = vrot.lane.b32.xlu0 %v8829_v52, %s6755_s17  ;;  %v3111_v12 = vsel %vm2958_vm4, %v7355_v61, %v6592_v60  ;;  %v8858_v13 = vpop.permute.xlu1 %2598 }
 0x4f3   : > { %v8850_v7 = vpop.permute.xlu2 %6599 }
 0x4f4   : > { %3474 = vmatmul.f32.gmra.mxu1 %v8842_v29  ;;  %12842 = vst [vmem:[#allocation184_spill] sm:$0xff] %v8850_v7  ;;  %v8884_v29 = vpop.permute.xlu0 %6604 }
 0x4f5   : > { %3683 = vmatmul.f32.gmra.mxu2 %v3051_v3  ;;  %v12846_v3 = vrot.slane %v7293_v23, 5  ;;  %v3052_v23 = vsel %vm2958_vm4, %v8413_v31, %v12850_v42  ;;  %v12854_v42 = vrot.slane %v7308_v1, 5  ;;  %v12858_v1 = vld [vmem:[#allocation98_spill] sm:$0xff] }
 0x4f7   : > { %3863 = vmatmul.f32.gmra.mxu3 %v3111_v12  ;;  %v3641_v11 = vpop.f32.mrf.mxu2  ;;  %v8866_v60 = vsel %vm800_vm0, %v7982_v37, %v12846_v3  ;;  %v12848_v12 = vld [vmem:[#allocation51_spill] sm:$0xff] }
 0x4f8   : > { %12847 = vst [vmem:[#allocation186_spill] sm:$0xff] %v8866_v60  ;;  %v6601_v11 = vunpack.i.l.bf16 %v8850_v7  ;;  %v8876_v44 = vsel %vm2958_vm4, %v12848_v12, %v8471_v0  ;;  %v12851_v7 = vrot.slane %v7224_v16, 5  ;;  %v12853_v12 = vld [vmem:[#allocation22_spill] sm:$0xff] }
 0x4f9   : > { %2804 = vrot.lane.b32.xlu1 %v12845_v53, %s6755_s17  ;;  %2800 = vrot.lane.b32.xlu2 %v8856_v38, %s6755_s17  ;;  %v3432_v43 = vpop.f32.mrf.mxu1  ;;  %12849 = vst [vmem:[#allocation51_spill] sm:$0xff] %v8876_v44 }
 0x4fa   : > { %2820 = vrot.lane.b32.xlu0 %v8866_v60, %s6755_s17  ;;  %v3112_v3 = vsel %vm2958_vm4, %v7355_v61, %v6601_v11  ;;  %v8890_v0 = vsel %vm800_vm0, %v12851_v7, %v7982_v37  ;;  %v8904_v16 = vpop.permute.xlu1 %6534  ;;  %v6607_v7 = vunpack.i.h.bf16 %v8884_v29 }
 0x4fb   : > { %12852 = vst [vmem:[#allocation107_spill] sm:$0xff] %v8890_v0 }
 0x4fc   : > { %3477 = vmatmul.f32.gmra.mxu1 %v8876_v44  ;;  %v3113_v31 = vsel %vm2958_vm4, %v7355_v61, %v6607_v7 }
 0x4fd   : > { %3686 = vmatmul.f32.gmra.mxu2 %v3052_v23  ;;  %v8898_v23 = vsel %vm800_vm0, %v7982_v37, %v12854_v42  ;;  %v3053_v42 = vsel %vm2958_vm4, %v12784_v40, %v12858_v1  ;;  %v12862_v1 = vld [vmem:[#allocation23_spill] sm:$0xff] }
 0x4fe   : > { %12855 = vst [vmem:[#allocation187_spill] sm:$0xff] %v8898_v23 }
 0x4ff   : > { %3865 = vmatmul.f32.gmra.mxu3 %v3112_v3  ;;  %v3643_v43 = vpop.f32.mrf.mxu2  ;;  %v12856_v3 = vld [vmem:[#allocation50_spill] sm:$0xff] }
 0x500   : > { %v8910_v43 = vsel %vm2958_vm4, %v12856_v3, %v8730_v54 }
 0x501   : > { %2810 = vrot.lane.b32.xlu1 %v12853_v12, %s6755_s17  ;;  %2806 = vrot.lane.b32.xlu2 %v8890_v0, %s6755_s17  ;;  %v3434_v11 = vpop.f32.mrf.mxu1  ;;  %12857 = vst [vmem:[#allocation50_spill] sm:$0xff] %v8910_v43 }
 0x502   : > { %2826 = vrot.lane.b32.xlu0 %v8898_v23, %s6755_s17  ;;  %v8918_v11 = vpop.permute.xlu2 %6614  ;;  %v12860_v23 = vrot.slane %v7256_v8, 5  ;;  %v8947_v40 = vpop.permute.xlu1 %6549 }
 0x503   : > { %12859 = vst [vmem:[#allocation98_spill] sm:$0xff] %v8918_v11  ;;  %v6616_v3 = vunpack.i.l.bf16 %v8918_v11  ;;  %v12878_v11 = vld [vmem:[#allocation72_spill] sm:$0xff] }
 0x504   : > { %3480 = vmatmul.f32.gmra.mxu1 %v8910_v43  ;;  %v8924_v54 = vsel %vm800_vm0, %v12860_v23, %v7982_v37  ;;  %v12867_v23 = vld [vmem:[#allocation102_spill] sm:$0xff]  ;;  %v8952_v43 = vpop.permute.xlu0 %6619 }
 0x505   : > { %3689 = vmatmul.f32.gmra.mxu2 %v3053_v42  ;;  %12861 = vst [vmem:[#allocation188_spill] sm:$0xff] %v8924_v54  ;;  %v12863_v42 = vrot.slane %v7322_v55, 5  ;;  %v3054_v55 = vsel %vm2958_vm4, %v8450_v5, %v12867_v23  ;;  %v3241_v23 = vld [vmem:[%s12155_s3 + $0x1e0] sm:$0xff]  ;;  %v12871_v5 = vld [vmem:[#allocation24_spill] sm:$0xff] }
 0x506   : > { %12868 = vst [vmem:[#allocation102_spill] sm:$0xff] %v8947_v40  ;;  %4049 = vmatpush.msrb.mxu1 %v3241_v23 }
 0x507   : > { %3868 = vmatmul.f32.gmra.mxu3 %v3113_v31  ;;  %v3645_v44 = vpop.f32.mrf.mxu2  ;;  %v8933_v7 = vsel %vm800_vm0, %v7982_v37, %v12863_v42  ;;  %v12865_v31 = vld [vmem:[#allocation47_spill] sm:$0xff]  ;;  %v3114_v42 = vsel %vm2958_vm4, %v7355_v61, %v6616_v3 }
 0x508   : > { %12864 = vst [vmem:[#allocation189_spill] sm:$0xff] %v8933_v7  ;;  %v8942_v44 = vsel %vm2958_vm4, %v12865_v31, %v8517_v24  ;;  %v12869_v24 = vrot.slane %v7279_v27, 5 }
 0x509   : > { %2816 = vrot.lane.b32.xlu1 %v12862_v1, %s6755_s17  ;;  %2812 = vrot.lane.b32.xlu2 %v8924_v54, %s6755_s17  ;;  %v3436_v8 = vpop.f32.mrf.mxu1  ;;  %12866 = vst [vmem:[#allocation47_spill] sm:$0xff] %v8942_v44 }
 0x50a   : > { %2832 = vrot.lane.b32.xlu0 %v8933_v7, %s6755_s17  ;;  %v8958_v31 = vsel %vm800_vm0, %v12869_v24, %v7982_v37  ;;  %v8989_v23 = vpop.permute.xlu2 %6629 }
 0x50b   : > { %12870 = vst [vmem:[#allocation190_spill] sm:$0xff] %v8958_v31 }
 0x50c   : > { %3483 = vmatmul.f32.gmra.mxu1 %v8942_v44  ;;  %12879 = vst [vmem:[#allocation72_spill] sm:$0xff] %v8989_v23 }
 0x50d   : > { %3692 = vmatmul.f32.gmra.mxu2 %v3054_v55  ;;  %v12872_v55 = vld [vmem:[#allocation31_spill] sm:$0xff] }
 0x50e   : > { %v12873_v44 = vrot.slane %v12872_v55, 5  ;;  %v8985_v55 = vpop.permute.xlu1 %6564 }
 0x50f   : > { %3871 = vmatmul.f32.gmra.mxu3 %v3114_v42  ;;  %v3647_v8 = vpop.f32.mrf.mxu2  ;;  %v6622_v42 = vunpack.i.h.bf16 %v8952_v43  ;;  %12877 = vst [vmem:[#allocation191_spill] sm:$0xff] %v8985_v55 }
 0x510   : > { %v8969_v3 = vsel %vm800_vm0, %v7982_v37, %v12873_v44  ;;  %v12875_v8 = vld [vmem:[#allocation56_spill] sm:$0xff]  ;;  %v3055_v44 = vsel %vm2958_vm4, %v8637_v25, %v8150_v56  ;;  %v12882_v56 = vld [vmem:[#allocation25_spill] sm:$0xff]  ;;  %v9015_v25 = vpop.permute.xlu0 %6634 }
 0x511   : > { %2822 = vrot.lane.b32.xlu1 %v12871_v5, %s6755_s17  ;;  %12874 = vst [vmem:[#allocation31_spill] sm:$0xff] %v8969_v3  ;;  %2818 = vrot.lane.b32.xlu2 %v8958_v31, %s6755_s17  ;;  %v3439_v27 = vpop.f32.mrf.mxu1  ;;  %v8979_v24 = vsel %vm2958_vm4, %v12875_v8, %v8570_v62  ;;  %v12880_v62 = vrot.slane %v7295_v19, 5  ;;  %v12885_v19 = vld [vmem:[#allocation108_spill] sm:$0xff] }
 0x512   : > { %2838 = vrot.lane.b32.xlu0 %v8969_v3, %s6755_s17  ;;  %12876 = vst [vmem:[#allocation56_spill] sm:$0xff] %v8979_v24  ;;  %v3115_v27 = vsel %vm2958_vm4, %v12878_v11, %v6622_v42  ;;  %v6631_v11 = vunpack.i.l.bf16 %v8989_v23  ;;  %v12887_v23 = vrot.slane %v7310_v51, 5  ;;  %v12890_v51 = vld [vmem:[#allocation52_spill] sm:$0xff] }
 0x513   : > { %v8995_v8 = vsel %vm800_vm0, %v12880_v62, %v7982_v37  ;;  %v12886_v62 = vld [vmem:[#allocation2_spill] sm:$0xff] }
 0x514   : > { %3486 = vmatmul.f32.gmra.mxu1 %v8979_v24  ;;  %12881 = vst [vmem:[#allocation192_spill] sm:$0xff] %v8995_v8 }
 0x515   : > { %3695 = vmatmul.f32.gmra.mxu2 %v3055_v44 }
 0x517   : > { %3874 = vmatmul.f32.gmra.mxu3 %v3115_v27  ;;  %v3649_v3 = vpop.f32.mrf.mxu2  ;;  %v3056_v27 = vsel %vm2958_vm4, %v12766_v46, %v12885_v19  ;;  %v12889_v19 = vld [vmem:[#allocation28_spill] sm:$0xff] }
 0x518   : > { %v12883_v3 = vld [vmem:[#allocation55_spill] sm:$0xff] }
 0x519   : > { %2828 = vrot.lane.b32.xlu1 %v12882_v56, %s6755_s17  ;;  %2824 = vrot.lane.b32.xlu2 %v8995_v8, %s6755_s17  ;;  %v3442_v44 = vpop.f32.mrf.mxu1  ;;  %v9007_v42 = vsel %vm2958_vm4, %v12883_v3, %v8813_v4  ;;  %v9021_v4 = vsel %vm800_vm0, %v12887_v23, %v7982_v37  ;;  %v9023_v3 = vpop.permute.xlu1 %6579  ;;  %v9037_v23 = vsel %vm2958_vm4, %v12890_v51, %v8617_v15 }
 0x51a   : > { %2844 = vrot.lane.b32.xlu0 %v7982_v37, %s6755_s17  ;;  %12884 = vst [vmem:[#allocation55_spill] sm:$0xff] %v9007_v42  ;;  %v3116_v44 = vsel %vm2958_vm4, %v12886_v62, %v6631_v11  ;;  %v12892_v11 = vld [vmem:[#allocation113_spill] sm:$0xff] }
 0x51b   : > { %12888 = vst [vmem:[#allocation108_spill] sm:$0xff] %v9021_v4  ;;  %v3057_v62 = vsel %vm2958_vm4, %v8678_v30, %v12892_v11  ;;  %v12898_v11 = vld [vmem:[#allocation37_spill] sm:$0xff]  ;;  %v12902_v30 = vld [vmem:[#allocation82_spill] sm:$0xff] }
 0x51c   : > { %3489 = vmatmul.f32.gmra.mxu1 %v9007_v42  ;;  %12891 = vst [vmem:[#allocation2_spill] sm:$0xff] %v9037_v23  ;;  %v6526_v42 = vunpack.i.l.bf16 %v8662_v57 }
 0x51d   : > { %3698 = vmatmul.f32.gmra.mxu2 %v3056_v27 }
 0x51f   : > { %3877 = vmatmul.f32.gmra.mxu3 %v3116_v44  ;;  %v3651_v24 = vpop.f32.mrf.mxu2  ;;  %v12893_v44 = vld [vmem:[#allocation83_spill] sm:$0xff] }
 0x520   : > { %v6637_v24 = vunpack.i.h.bf16 %v9015_v25 }
 0x521   : > { %2834 = vrot.lane.b32.xlu1 %v12889_v19, %s6755_s17  ;;  %2830 = vrot.lane.b32.xlu2 %v9021_v4, %s6755_s17  ;;  %v9029_v27 = vpop.f32.mrf.mxu1  ;;  %v9046_v19 = vpop.permute.xlu2 %6644  ;;  %v12895_v4 = vld [vmem:[#allocation26_spill] sm:$0xff] }
 0x522   : > { %2850 = vrot.lane.b32.xlu0 %v7982_v37, %s6755_s17  ;;  %v3117_v46 = vsel %vm2958_vm4, %v12893_v44, %v6637_v24  ;;  %12894 = vst [vmem:[#allocation52_spill] sm:$0xff] %v9046_v19  ;;  %v12896_v15 = vrot.slane %v12895_v4, 5  ;;  %v9062_v24 = vpop.permute.xlu1 %6594  ;;  %v3058_v44 = vsel %vm2958_vm4, %v8552_v10, %v8258_v41 }
 0x523   : > { %12899 = vst [vmem:[#allocation83_spill] sm:$0xff] %v9062_v24 }
 0x524   : > { %3492 = vmatmul.f32.gmra.mxu1 %v9037_v23  ;;  %v9052_v51 = vsel %vm800_vm0, %v12896_v15, %v7982_v37  ;;  %v3240_v15 = vld [vmem:[%s12155_s3 + $0x1d8] sm:$0xff] }
 0x525   : > { %3701 = vmatmul.f32.gmra.mxu2 %v3057_v62  ;;  %12897 = vst [vmem:[#allocation113_spill] sm:$0xff] %v9052_v51  ;;  %4050 = vmatpush.msrb.mxu1 %v3240_v15  ;;  %v12908_v15 = vld [vmem:[#allocation119_spill] sm:$0xff] }
 0x527   : > { %3880 = vmatmul.f32.gmra.mxu3 %v3117_v46  ;;  %v3654_v7 = vpop.f32.mrf.mxu2  ;;  %v6646_v46 = vunpack.i.l.bf16 %v9046_v19  ;;  %v6531_v19 = vunpack.i.l.bf16 %v8664_v39 }
 0x528   : > { %v12900_v7 = vld [vmem:[#allocation62_spill] sm:$0xff] }
 0x529   : > { %2840 = vrot.lane.b32.xlu1 %v12898_v11, %s6755_s17  ;;  %2836 = vrot.lane.b32.xlu2 %v9052_v51, %s6755_s17  ;;  %v9058_v62 = vpop.f32.mrf.mxu1  ;;  %v9067_v4 = vsel %vm2958_vm4, %v12900_v7, %v6526_v42  ;;  %v3118_v23 = vsel %vm2958_vm4, %v12902_v30, %v6646_v46  ;;  %v9079_v11 = vpop.permute.xlu0 %6649  ;;  %v12903_v7 = vld [vmem:[#allocation33_spill] sm:$0xff] }
 0x52a   : > { %2856 = vrot.lane.b32.xlu0 %v7982_v37, %s6755_s17  ;;  %12901 = vst [vmem:[#allocation26_spill] sm:$0xff] %v9067_v4  ;;  %v12904_v41 = vrot.slane %v12903_v7, 5  ;;  %v6652_v30 = vunpack.i.h.bf16 %v9079_v11  ;;  %v9103_v7 = vpop.permute.xlu1 %6609  ;;  %v9109_v51 = vpop.permute.xlu2 %6659 }
 0x52b   : > { %12910 = vst [vmem:[#allocation33_spill] sm:$0xff] %v9109_v51 }
 0x52c   : > { %3495 = vmatmul.f32.gmra.mxu1 %v9067_v4  ;;  %v9085_v10 = vsel %vm800_vm0, %v12904_v41, %v7982_v37  ;;  %v12909_v41 = vld [vmem:[#allocation4_spill] sm:$0xff] }
 0x52d   : > { %3704 = vmatmul.f32.gmra.mxu2 %v3058_v44  ;;  %12905 = vst [vmem:[#allocation62_spill] sm:$0xff] %v9085_v10  ;;  %v3119_v4 = vsel %vm2958_vm4, %v12909_v41, %v6652_v30  ;;  %v6661_v30 = vunpack.i.l.bf16 %v9109_v51  ;;  %v12913_v41 = vld [vmem:[#allocation92_spill] sm:$0xff] }
 0x52f   : > { %3883 = vmatmul.f32.gmra.mxu3 %v3118_v23  ;;  %v3657_v42 = vpop.f32.mrf.mxu2  ;;  %v12906_v23 = vld [vmem:[#allocation61_spill] sm:$0xff] }
 0x530   : > { %v9098_v46 = vsel %vm2958_vm4, %v12906_v23, %v6531_v19  ;;  %v3059_v42 = vsel %vm2958_vm4, %v12801_v47, %v12908_v15  ;;  %v12911_v23 = vld [vmem:[#allocation57_spill] sm:$0xff]  ;;  %v3120_v47 = vsel %vm2958_vm4, %v12913_v41, %v6661_v30  ;;  %v12917_v41 = vld [vmem:[#allocation91_spill] sm:$0xff] }
 0x531   : > { %2842 = vrot.lane.b32.xlu2 %v9085_v10, %s6755_s17  ;;  %2846 = vrot.lane.b32.xlu1 %v7982_v37, %s6755_s17  ;;  %v9091_v44 = vpop.f32.mrf.mxu1  ;;  %12907 = vst [vmem:[#allocation82_spill] sm:$0xff] %v9098_v46  ;;  %v6536_v10 = vunpack.i.l.bf16 %v8904_v16  ;;  %v9135_v8 = vpop.permute.xlu0 %6664 }
 0x532   : > { %2862 = vrot.lane.b32.xlu0 %v7982_v37, %s6755_s17  ;;  %v9157_v5 = vpop.permute.xlu2 %6674 }
 0x533   : > { %v9124_v15 = vsel %vm2958_vm4, %v12911_v23, %v6536_v10  ;;  %v6667_v10 = vunpack.i.h.bf16 %v9135_v8  ;;  %v12914_v23 = vld [vmem:[#allocation68_spill] sm:$0xff]  ;;  %12918 = vst [vmem:[#allocation4_spill] sm:$0xff] %v9157_v5 }
 0x534   : > { %3498 = vmatmul.f32.gmra.mxu1 %v9098_v46  ;;  %12912 = vst [vmem:[#allocation61_spill] sm:$0xff] %v9124_v15  ;;  %v6541_v46 = vunpack.i.l.bf16 %v8696_v26 }
 0x535   : > { %3707 = vmatmul.f32.gmra.mxu2 %v3059_v42  ;;  %v9130_v42 = vpop.permute.xlu1 %6624 }
 0x536   : > { %v9148_v30 = vsel %vm2958_vm4, %v12914_v23, %v6541_v46 }
 0x537   : > { %3886 = vmatmul.f32.gmra.mxu3 %v3119_v4  ;;  %v9111_v56 = vpop.f32.mrf.mxu2  ;;  %v3060_v4 = vsel %vm2958_vm4, %v8716_v32, %v8183_v50  ;;  %12915 = vst [vmem:[#allocation119_spill] sm:$0xff] %v9148_v30  ;;  %v3121_v32 = vsel %vm2958_vm4, %v12917_v41, %v6667_v10  ;;  %v3239_v10 = vld [vmem:[%s12155_s3 + $0x1d0] sm:$0xff]  ;;  %v12921_v41 = vld [vmem:[#allocation131_spill] sm:$0xff] }
 0x538   : > { %4051 = vmatpush.msrb.mxu1 %v3239_v10 }
 0x539   : > { %2852 = vrot.lane.b32.xlu1 %v7982_v37, %s6755_s17  ;;  %2848 = vrot.lane.b32.xlu2 %v7982_v37, %s6755_s17  ;;  %v9117_v19 = vpop.f32.mrf.mxu1 }
 0x53a   : > { %5026 = vrot.lane.b32.xlu0 %v7355_v61, %s6755_s17 }
 0x53c   : > { %3501 = vmatmul.f32.gmra.mxu1 %v9124_v15  ;;  %v6546_v15 = vunpack.i.l.bf16 %v8698_v21  ;;  %v9184_v21 = vpop.permute.xlu0 %6679 }
 0x53d   : > { %3710 = vmatmul.f32.gmra.mxu2 %v3060_v4  ;;  %v12916_v4 = vld [vmem:[#allocation145_spill] sm:$0xff]  ;;  %v9165_v46 = vpop.permute.xlu1 %6639  ;;  %12923 = vst [vmem:[#allocation92_spill] sm:$0xff] %v9184_v21 }
 0x53f   : > { %3889 = vmatmul.f32.gmra.mxu3 %v3120_v47  ;;  %v3061_v47 = vsel %vm2958_vm4, %v8607_v2, %v12916_v4  ;;  %v6676_v4 = vunpack.i.l.bf16 %v9157_v5  ;;  %v3062_v2 = vsel %vm2958_vm4, %v12810_v45, %v12921_v41  ;;  %v6551_v5 = vunpack.i.l.bf16 %v8947_v40  ;;  %v12927_v41 = vld [vmem:[#allocation101_spill] sm:$0xff] }
 0x540   : > { %v9137_v51 = vpop.f32.mrf.mxu2 }
 0x541   : > { %2858 = vrot.lane.b32.xlu1 %v7982_v37, %s6755_s17  ;;  %2854 = vrot.lane.b32.xlu2 %v7982_v37, %s6755_s17  ;;  %v9143_v50 = vpop.f32.mrf.mxu1 }
 0x544   : > { %3504 = vmatmul.f32.gmra.mxu1 %v9148_v30  ;;  %v12922_v30 = vld [vmem:[#allocation6_spill] sm:$0xff] }
 0x545   : > { %3713 = vmatmul.f32.gmra.mxu2 %v3061_v47  ;;  %v12919_v47 = vld [vmem:[#allocation67_spill] sm:$0xff]  ;;  %v3122_v31 = vsel %vm2958_vm4, %v12922_v30, %v6676_v4  ;;  %v9195_v10 = vpop.permute.xlu1 %6654 }
 0x546   : > { %v12924_v30 = vld [vmem:[#allocation63_spill] sm:$0xff] }
 0x547   : > { %3892 = vmatmul.f32.gmra.mxu3 %v3121_v32  ;;  %v9175_v32 = vsel %vm2958_vm4, %v12919_v47, %v6546_v15  ;;  %v9199_v4 = vsel %vm2958_vm4, %v12924_v30, %v6551_v5  ;;  %v12926_v47 = vld [vmem:[#allocation136_spill] sm:$0xff]  ;;  %v12929_v30 = vld [vmem:[#allocation77_spill] sm:$0xff] }
 0x548   : > { %v9159_v60 = vpop.f32.mrf.mxu2  ;;  %12920 = vst [vmem:[#allocation57_spill] sm:$0xff] %v9175_v32 }
 0x549   : > { %2864 = vrot.lane.b32.xlu1 %v7982_v37, %s6755_s17  ;;  %2860 = vrot.lane.b32.xlu2 %v7982_v37, %s6755_s17  ;;  %v9167_v23 = vpop.f32.mrf.mxu1  ;;  %12925 = vst [vmem:[#allocation68_spill] sm:$0xff] %v9199_v4 }
 0x54c   : > { %3507 = vmatmul.f32.gmra.mxu1 %v9175_v32  ;;  %v6556_v32 = vunpack.i.l.bf16 %v8732_v20  ;;  %v9228_v20 = vpop.permute.xlu0 %6694 }
 0x54d   : > { %3716 = vmatmul.f32.gmra.mxu2 %v3062_v2  ;;  %v6682_v2 = vunpack.i.h.bf16 %v9184_v21  ;;  %12933 = vst [vmem:[#allocation67_spill] sm:$0xff] %v9228_v20 }
 0x54f   : > { %3895 = vmatmul.f32.gmra.mxu3 %v3122_v31  ;;  %v3063_v31 = vsel %vm2958_vm4, %v8749_v35, %v12926_v47  ;;  %v3123_v45 = vsel %vm2958_vm4, %v12927_v41, %v6682_v2  ;;  %v9217_v47 = vsel %vm2958_vm4, %v12929_v30, %v6556_v32  ;;  %v12931_v35 = vld [vmem:[#allocation155_spill] sm:$0xff]  ;;  %v9223_v2 = vpop.permute.xlu1 %6669  ;;  %v6697_v30 = vunpack.i.h.bf16 %v9228_v20 }
 0x550   : > { %v9186_v1 = vpop.f32.mrf.mxu2  ;;  %12930 = vst [vmem:[#allocation91_spill] sm:$0xff] %v9217_v47 }
 0x551   : > { %5028 = vrot.lane.b32.xlu1 %v7355_v61, %s6755_s17  ;;  %2866 = vrot.lane.b32.xlu2 %v7982_v37, %s6755_s17  ;;  %v9192_v15 = vpop.f32.mrf.mxu1  ;;  %v9208_v61 = vpop.permute.xlu2 %6689 }
 0x552   : > { %12928 = vst [vmem:[#allocation145_spill] sm:$0xff] %v9208_v61  ;;  %v6691_v5 = vunpack.i.l.bf16 %v9208_v61 }
 0x554   : > { %3510 = vmatmul.f32.gmra.mxu1 %v9199_v4  ;;  %v6561_v4 = vunpack.i.l.bf16 %v8734_v48  ;;  %v6566_v48 = vunpack.i.l.bf16 %v8985_v55 }
 0x555   : > { %3719 = vmatmul.f32.gmra.mxu2 %v3063_v31  ;;  %v3064_v31 = vsel %vm2958_vm4, %v8657_v63, %v12931_v35  ;;  %v12934_v35 = vld [vmem:[#allocation76_spill] sm:$0xff] }
 0x556   : > { %v9237_v63 = vsel %vm2958_vm4, %v12934_v35, %v6561_v4  ;;  %v3238_v4 = vld [vmem:[%s12155_s3 + $0x1c8] sm:$0xff] }
 0x557   : > { %3898 = vmatmul.f32.gmra.mxu3 %v3123_v45  ;;  %v12932_v45 = vld [vmem:[#allocation100_spill] sm:$0xff]  ;;  %12935 = vst [vmem:[#allocation131_spill] sm:$0xff] %v9237_v63  ;;  %v9248_v40 = vpop.permute.xlu1 %6684  ;;  %4052 = vmatpush.msrb.mxu1 %v3238_v4  ;;  %v6571_v4 = vunpack.i.l.bf16 %v8763_v17  ;;  %v6576_v17 = vunpack.i.l.bf16 %v8765_v28 }
 0x558   : > { %v9210_v37 = vpop.f32.mrf.mxu2  ;;  %v3124_v41 = vsel %vm2958_vm4, %v12932_v45, %v6691_v5  ;;  %v12938_v45 = vld [vmem:[#allocation8_spill] sm:$0xff]  ;;  %12939 = vst [vmem:[#allocation63_spill] sm:$0xff] %v9248_v40  ;;  %v9269_v40 = vpop.permute.xlu0 %6709 }
 0x559   : > { %v9212_v21 = vpop.f32.mrf.mxu1  ;;  %v9243_v5 = vpop.permute.xlu2 %6704  ;;  %12944 = vst [vmem:[#allocation101_spill] sm:$0xff] %v9269_v40 }
 0x55a   : > { %12937 = vst [vmem:[#allocation6_spill] sm:$0xff] %v9243_v5 }
 0x55c   : > { %3513 = vmatmul.f32.gmra.mxu1 %v9217_v47 }
 0x55d   : > { %3722 = vmatmul.f32.gmra.mxu2 %v3064_v31  ;;  %v12936_v31 = vld [vmem:[#allocation66_spill] sm:$0xff] }
 0x55e   : > { %v3065_v47 = vsel %vm2958_vm4, %v12820_v9, %v12936_v31  ;;  %v12940_v9 = vld [vmem:[#allocation69_spill] sm:$0xff] }
 0x55f   : > { %3901 = vmatmul.f32.gmra.mxu3 %v3124_v41  ;;  %v3125_v41 = vsel %vm2958_vm4, %v12938_v45, %v6697_v30  ;;  %v9260_v30 = vsel %vm2958_vm4, %v12940_v9, %v6566_v48  ;;  %v12942_v45 = vld [vmem:[#allocation143_spill] sm:$0xff]  ;;  %v6712_v48 = vunpack.i.h.bf16 %v9269_v40 }
 0x560   : > { %v9230_v61 = vpop.f32.mrf.mxu2  ;;  %12941 = vst [vmem:[#allocation136_spill] sm:$0xff] %v9260_v30 }
 0x561   : > { %v9232_v32 = vpop.f32.mrf.mxu1 }
 0x564   : > { %3516 = vmatmul.f32.gmra.mxu1 %v9237_v63  ;;  %v12943_v63 = vld [vmem:[#allocation112_spill] sm:$0xff] }
 0x565   : > { %3725 = vmatmul.f32.gmra.mxu2 %v3065_v47  ;;  %v6706_v47 = vunpack.i.l.bf16 %v9243_v5  ;;  %v9273_v5 = vpop.permute.xlu1 %6699 }
 0x566   : > { %12945 = vst [vmem:[#allocation77_spill] sm:$0xff] %v9273_v5 }
 0x567   : > { %3904 = vmatmul.f32.gmra.mxu3 %v3125_v41  ;;  %v3066_v41 = vsel %vm2958_vm4, %v8785_v33, %v12942_v45  ;;  %v3126_v55 = vsel %vm2958_vm4, %v12943_v63, %v6706_v47  ;;  %v12947_v33 = vld [vmem:[#allocation87_spill] sm:$0xff] }
 0x568   : > { %v9250_v20 = vpop.f32.mrf.mxu2 }
 0x569   : > { %v9255_v35 = vpop.f32.mrf.mxu1 }
 0x56a   : > { %v3860_v31 = vpop.f32.mrf.mxu3 }
 0x56c   : > { %3519 = vmatmul.f32.gmra.mxu1 %v9260_v30  ;;  %v12949_v30 = vld [vmem:[#allocation167_spill] sm:$0xff] }
 0x56d   : > { %3728 = vmatmul.f32.gmra.mxu2 %v3066_v41  ;;  %v9280_v41 = vsel %vm2958_vm4, %v12947_v33, %v6571_v4  ;;  %v3067_v63 = vsel %vm2958_vm4, %v8691_v22, %v12949_v30  ;;  %v2775_v33 = vpop.permute.xlu1 %2774  ;;  %v12951_v4 = vld [vmem:[#allocation86_spill] sm:$0xff]  ;;  %v12953_v30 = vld [vmem:[#allocation147_spill] sm:$0xff] }
 0x56e   : > { %12948 = vst [vmem:[#allocation100_spill] sm:$0xff] %v9280_v41 }
 0x56f   : > { %3907 = vmatmul.f32.gmra.mxu3 %v3126_v55  ;;  %v12950_v55 = vld [vmem:[#allocation111_spill] sm:$0xff] }
 0x570   : > { %v9271_v31 = vpop.f32.mrf.mxu2  ;;  %v3127_v47 = vsel %vm2958_vm4, %v12950_v55, %v6712_v48  ;;  %v12954_v48 = vld [vmem:[#allocation10_spill] sm:$0xff]  ;;  %v6582_v55 = vunpack.i.h.bf16 %v9023_v3 }
 0x571   : > { %v9275_v9 = vpop.f32.mrf.mxu1  ;;  %v3128_v28 = vsel %vm2958_vm4, %v12954_v48, %v2775_v33  ;;  %v3237_v33 = vld [vmem:[%s12155_s3 + $0x1c0] sm:$0xff]  ;;  %v12958_v48 = vld [vmem:[#allocation123_spill] sm:$0xff] }
 0x572   : > { %12946 = vst [vmem:[#allocation155_spill] sm:$0xff] %v9275_v9  ;;  %v3862_v45 = vpop.f32.mrf.mxu3  ;;  %v9295_v9 = vsel %vm2958_vm4, %v12951_v4, %v6576_v17  ;;  %v2777_v17 = vpop.permute.xlu2 %2776  ;;  %v12955_v4 = vld [vmem:[#allocation78_spill] sm:$0xff]  ;;  %4053 = vmatpush.msrb.mxu1 %v3237_v33  ;;  %v6597_v33 = vunpack.i.h.bf16 %v9062_v24 }
 0x573   : > { %12952 = vst [vmem:[#allocation76_spill] sm:$0xff] %v9295_v9 }
 0x574   : > { %3522 = vmatmul.f32.gmra.mxu1 %v9280_v41  ;;  %v9310_v41 = vsel %vm2958_vm4, %v12955_v4, %v6582_v55 }
 0x575   : > { %3731 = vmatmul.f32.gmra.mxu2 %v3067_v63  ;;  %v3068_v63 = vsel %vm2958_vm4, %v12828_v49, %v12953_v30  ;;  %12956 = vst [vmem:[#allocation66_spill] sm:$0xff] %v9310_v41  ;;  %v12957_v30 = vld [vmem:[#allocation71_spill] sm:$0xff] }
 0x577   : > { %3910 = vmatmul.f32.gmra.mxu3 %v3127_v47 }
 0x578   : > { %v9289_v5 = vpop.f32.mrf.mxu2 }
 0x579   : > { %v9291_v45 = vpop.f32.mrf.mxu1 }
 0x57a   : > { %v3864_v40 = vpop.f32.mrf.mxu3 }
 0x57c   : > { %3525 = vmatmul.f32.gmra.mxu1 %v9295_v9 }
 0x57d   : > { %3734 = vmatmul.f32.gmra.mxu2 %v3068_v63  ;;  %v3069_v63 = vsel %vm2958_vm4, %v8821_v14, %v12957_v30  ;;  %v2779_v30 = vpop.permute.xlu0 %2778  ;;  %v12959_v14 = vld [vmem:[#allocation95_spill] sm:$0xff] }
 0x57f   : > { %3913 = vmatmul.f32.gmra.mxu3 %v3128_v28  ;;  %v6591_v28 = vunpack.i.l.bf16 %v8815_v36 }
 0x580   : > { %v9304_v47 = vpop.f32.mrf.mxu2 }
 0x581   : > { %v9306_v40 = vpop.f32.mrf.mxu1  ;;  %v9328_v9 = vsel %vm2958_vm4, %v12959_v14, %v6591_v28  ;;  %v9344_v14 = vld [vmem:[%s12156_s4] ss:$0 sm:$0xff] }
 0x582   : > { %v3866_v22 = vpop.f32.mrf.mxu3  ;;  %12960 = vst [vmem:[#allocation8_spill] sm:$0xff] %v9328_v9  ;;  %v12962_v28 = vld [vmem:[#allocation94_spill] sm:$0xff] }
 0x583   : > { %v3129_v22 = vsel %vm2958_vm4, %v12958_v48, %v2777_v17  ;;  %v12961_v17 = vld [vmem:[#allocation104_spill] sm:$0xff] }
 0x584   : > { %3528 = vmatmul.f32.gmra.mxu1 %v9310_v41  ;;  %v3130_v36 = vsel %vm2958_vm4, %v12961_v17, %v2779_v30  ;;  %v3446_v17 = vadd.f32 %v9344_v14, %v9029_v27  ;;  %v12967_v27 = vld [vmem:[#allocation162_spill] sm:$0xff] }
 0x585   : > { %3737 = vmatmul.f32.gmra.mxu2 %v3069_v63  ;;  %v3070_v63 = vsel %vm2958_vm4, %v8724_v58, %v8683_v18  ;;  %v2781_v18 = vpop.permute.xlu1 %2780  ;;  %v12964_v58 = vld [vmem:[#allocation157_spill] sm:$0xff] }
 0x586   : > { %v3071_v30 = vsel %vm2958_vm4, %v12837_v6, %v12964_v58  ;;  %v2783_v58 = vpop.permute.xlu2 %2782 }
 0x587   : > { %3916 = vmatmul.f32.gmra.mxu3 %v3129_v22 }
 0x588   : > { %v9322_v55 = vpop.f32.mrf.mxu2 }
 0x589   : > { %v9324_v4 = vpop.f32.mrf.mxu1 }
 0x58a   : > { %v3869_v49 = vpop.f32.mrf.mxu3 }
 0x58c   : > { %3531 = vmatmul.f32.gmra.mxu1 %v9328_v9  ;;  %v6606_v9 = vunpack.i.l.bf16 %v8884_v29  ;;  %v3449_v29 = vadd.f32 %v9344_v14, %v9058_v62 }
 0x58d   : > { %3740 = vmatmul.f32.gmra.mxu2 %v3070_v63  ;;  %v9348_v63 = vsel %vm2958_vm4, %v12962_v28, %v6597_v33  ;;  %v3661_v33 = vadd.f32 %v9111_v56, %v3446_v17  ;;  %v12968_v56 = vld [vmem:[#allocation129_spill] sm:$0xff] }
 0x58e   : > { %12963 = vst [vmem:[#allocation69_spill] sm:$0xff] %v9348_v63  ;;  %v3132_v17 = vsel %vm2958_vm4, %v12968_v56, %v2783_v58  ;;  %v3073_v56 = vsel %vm2958_vm4, %v8757_v59, %v8775_v34  ;;  %v2787_v34 = vpop.permute.xlu1 %2786 }
 0x58f   : > { %3919 = vmatmul.f32.gmra.mxu3 %v3130_v36  ;;  %v12965_v36 = vld [vmem:[#allocation12_spill] sm:$0xff] }
 0x590   : > { %v9337_v48 = vpop.f32.mrf.mxu2 }
 0x591   : > { %v9339_v49 = vpop.f32.mrf.mxu1 }
 0x592   : > { %v3872_v22 = vpop.f32.mrf.mxu3 }
 0x593   : > { %v3131_v22 = vsel %vm2958_vm4, %v12965_v36, %v2781_v18  ;;  %v3072_v18 = vsel %vm2958_vm4, %v8856_v38, %v12967_v27  ;;  %v2785_v27 = vpop.permute.xlu0 %2784 }
 0x594   : > { %3534 = vmatmul.f32.gmra.mxu1 %v9348_v63 }
 0x595   : > { %3743 = vmatmul.f32.gmra.mxu2 %v3071_v30  ;;  %v12966_v30 = vld [vmem:[#allocation88_spill] sm:$0xff] }
 0x596   : > { %v9368_v63 = vsel %vm2958_vm4, %v12966_v30, %v6606_v9  ;;  %v3236_v9 = vld [vmem:[%s12155_s3 + $0x1b8] sm:$0xff] }
 0x597   : > { %3922 = vmatmul.f32.gmra.mxu3 %v3131_v22  ;;  %v3664_v22 = vadd.f32 %v9137_v51, %v3449_v29  ;;  %4054 = vmatpush.msrb.mxu1 %v3236_v9  ;;  %v3452_v51 = vadd.f32 %v9344_v14, %v9091_v44  ;;  %v12970_v29 = vld [vmem:[#allocation110_spill] sm:$0xff]  ;;  %v6621_v9 = vunpack.i.l.bf16 %v8952_v43 }
 0x598   : > { %v9359_v41 = vpop.f32.mrf.mxu2  ;;  %v12972_v44 = vld [vmem:[#allocation166_spill] sm:$0xff] }
 0x599   : > { %v9362_v28 = vpop.f32.mrf.mxu1  ;;  %v12973_v43 = vld [vmem:[#allocation14_spill] sm:$0xff] }
 0x59a   : > { %v3875_v24 = vpop.f32.mrf.mxu3 }
 0x59b   : > { %v9364_v6 = vadd.f32 %v3875_v24, %v3661_v33  ;;  %v6612_v24 = vunpack.i.h.bf16 %v9103_v7 }
 0x59c   : > { %3537 = vmatmul.f32.gmra.mxu1 %v9368_v63 }
 0x59d   : > { %3746 = vmatmul.f32.gmra.mxu2 %v3072_v18  ;;  %v12969_v18 = vld [vmem:[#allocation106_spill] sm:$0xff] }
 0x59e   : > { %v9391_v58 = vsel %vm2958_vm4, %v12969_v18, %v6612_v24  ;;  %v3667_v24 = vadd.f32 %v9159_v60, %v3452_v51  ;;  %v3134_v60 = vsel %vm2958_vm4, %v12973_v43, %v2787_v34  ;;  %v6627_v51 = vunpack.i.h.bf16 %v9130_v42  ;;  %v12976_v34 = vld [vmem:[#allocation169_spill] sm:$0xff] }
 0x59f   : > { %3925 = vmatmul.f32.gmra.mxu3 %v3132_v17  ;;  %v3133_v17 = vsel %vm2958_vm4, %v12970_v29, %v2785_v27  ;;  %v3074_v27 = vsel %vm2958_vm4, %v12845_v53, %v12972_v44  ;;  %v3455_v29 = vadd.f32 %v9344_v14, %v9117_v19  ;;  %v3075_v43 = vsel %vm2958_vm4, %v8890_v0, %v12976_v34  ;;  %v12977_v19 = vld [vmem:[#allocation134_spill] sm:$0xff]  ;;  %v2791_v34 = vpop.permute.xlu0 %2790 }
 0x5a0   : > { %v9379_v36 = vpop.f32.mrf.mxu2 }
 0x5a1   : > { %v9385_v33 = vpop.f32.mrf.mxu1 }
 0x5a2   : > { %v3878_v30 = vpop.f32.mrf.mxu3 }
 0x5a3   : > { %v9387_v62 = vadd.f32 %v3878_v30, %v3664_v22 }
 0x5a4   : > { %3540 = vmatmul.f32.gmra.mxu1 %v9391_v58 }
 0x5a5   : > { %3749 = vmatmul.f32.gmra.mxu2 %v3073_v56  ;;  %v12971_v56 = vld [vmem:[#allocation105_spill] sm:$0xff] }
 0x5a6   : > { %v9411_v38 = vsel %vm2958_vm4, %v12971_v56, %v6621_v9  ;;  %v3670_v9 = vadd.f32 %v9186_v1, %v3455_v29  ;;  %v2789_v56 = vpop.permute.xlu2 %2788  ;;  %v3458_v29 = vadd.f32 %v9344_v14, %v9143_v50  ;;  %v12980_v50 = vld [vmem:[#allocation116_spill] sm:$0xff] }
 0x5a7   : > { %3928 = vmatmul.f32.gmra.mxu3 %v3133_v17  ;;  %v3135_v1 = vsel %vm2958_vm4, %v12977_v19, %v2789_v56  ;;  %v3136_v19 = vsel %vm2958_vm4, %v12980_v50, %v2791_v34 }
 0x5a8   : > { %v9402_v22 = vpop.f32.mrf.mxu2 }
 0x5a9   : > { %v9405_v30 = vpop.f32.mrf.mxu1 }
 0x5aa   : > { %v3881_v18 = vpop.f32.mrf.mxu3 }
 0x5ab   : > { %v9407_v59 = vadd.f32 %v3881_v18, %v3667_v24 }
 0x5ac   : > { %3543 = vmatmul.f32.gmra.mxu1 %v9411_v38 }
 0x5ad   : > { %3752 = vmatmul.f32.gmra.mxu2 %v3074_v27  ;;  %v12975_v27 = vld [vmem:[#allocation96_spill] sm:$0xff] }
 0x5ae   : > { %v9431_v53 = vsel %vm2958_vm4, %v12975_v27, %v6627_v51  ;;  %v3673_v51 = vadd.f32 %v9210_v37, %v3458_v29  ;;  %v3235_v37 = vld [vmem:[%s12155_s3 + $0x1b0] sm:$0xff]  ;;  %v3461_v29 = vadd.f32 %v9344_v14, %v9167_v23 }
 0x5af   : > { %3931 = vmatmul.f32.gmra.mxu3 %v3134_v60  ;;  %v6636_v60 = vunpack.i.l.bf16 %v9015_v25  ;;  %v12979_v25 = vld [vmem:[#allocation181_spill] sm:$0xff]  ;;  %4055 = vmatpush.msrb.mxu1 %v3235_v37  ;;  %v12982_v23 = vld [vmem:[#allocation16_spill] sm:$0xff] }
 0x5b0   : > { %v9422_v17 = vpop.f32.mrf.mxu2  ;;  %v3076_v56 = vsel %vm2958_vm4, %v12979_v25, %v8858_v13  ;;  %v12981_v25 = vld [vmem:[#allocation117_spill] sm:$0xff] }
 0x5b1   : > { %v9425_v24 = vpop.f32.mrf.mxu1 }
 0x5b2   : > { %v3884_v18 = vpop.f32.mrf.mxu3 }
 0x5b3   : > { %v9427_v44 = vadd.f32 %v3884_v18, %v3670_v9 }
 0x5b4   : > { %3546 = vmatmul.f32.gmra.mxu1 %v9431_v53 }
 0x5b5   : > { %12974 = vst [vmem:[#allocation143_spill] sm:$0xff] %v9427_v44  ;;  %3755 = vmatmul.f32.gmra.mxu2 %v3075_v43  ;;  %v12978_v43 = vld [vmem:[#allocation118_spill] sm:$0xff] }
 0x5b6   : > { %v9451_v44 = vsel %vm2958_vm4, %v12978_v43, %v6636_v60  ;;  %v6642_v60 = vunpack.i.h.bf16 %v9165_v46 }
 0x5b7   : > { %3934 = vmatmul.f32.gmra.mxu3 %v3135_v1  ;;  %v6527_v1 = vunpack.i.h.bf16 %v8662_v57 }
 0x5b8   : > { %v9442_v9 = vpop.f32.mrf.mxu2  ;;  %v9475_v34 = vsel %vm2958_vm4, %v12981_v25, %v6642_v60 }
 0x5b9   : > { %v9445_v18 = vpop.f32.mrf.mxu1  ;;  %v3077_v57 = vsel %vm2958_vm4, %v12853_v12, %v6527_v1  ;;  %v12984_v12 = vld [vmem:[#allocation121_spill] sm:$0xff] }
 0x5ba   : > { %v3887_v27 = vpop.f32.mrf.mxu3 }
 0x5bb   : > { %v9447_v0 = vadd.f32 %v3887_v27, %v3673_v51  ;;  %v3676_v51 = vadd.f32 %v9230_v61, %v3461_v29  ;;  %v6532_v61 = vunpack.i.h.bf16 %v8664_v39  ;;  %v3464_v29 = vadd.f32 %v9344_v14, %v9192_v15 }
 0x5bc   : > { %3549 = vmatmul.f32.gmra.mxu1 %v9451_v44 }
 0x5bd   : > { %3758 = vmatmul.f32.gmra.mxu2 %v3076_v56  ;;  %v2793_v56 = vpop.permute.xlu1 %2792  ;;  %v3679_v25 = vadd.f32 %v9250_v20, %v3464_v29  ;;  %v3078_v39 = vsel %vm2958_vm4, %v8924_v54, %v6532_v61  ;;  %v6537_v20 = vunpack.i.h.bf16 %v8904_v16  ;;  %v12996_v54 = vld [vmem:[#allocation127_spill] sm:$0xff] }
 0x5be   : > { %v3137_v50 = vsel %vm2958_vm4, %v12982_v23, %v2793_v56  ;;  %v6657_v23 = vunpack.i.h.bf16 %v9195_v10 }
 0x5bf   : > { %3937 = vmatmul.f32.gmra.mxu3 %v3136_v19  ;;  %v6651_v19 = vunpack.i.l.bf16 %v9079_v11  ;;  %v12985_v11 = vld [vmem:[#allocation138_spill] sm:$0xff]  ;;  %v3079_v16 = vsel %vm2958_vm4, %v8829_v52, %v6537_v20  ;;  %v12990_v52 = vld [vmem:[#allocation120_spill] sm:$0xff] }
 0x5c0   : > { %v9466_v13 = vpop.f32.mrf.mxu2 }
 0x5c1   : > { %v9469_v27 = vpop.f32.mrf.mxu1  ;;  %v9495_v56 = vsel %vm2958_vm4, %v12984_v12, %v6651_v19 }
 0x5c2   : > { %v3890_v43 = vpop.f32.mrf.mxu3 }
 0x5c3   : > { %v9471_v37 = vadd.f32 %v3890_v43, %v3676_v51  ;;  %v2795_v43 = vpop.permute.xlu2 %2794 }
 0x5c4   : > { %3552 = vmatmul.f32.gmra.mxu1 %v9475_v34  ;;  %v3138_v15 = vsel %vm2958_vm4, %v12985_v11, %v2795_v43 }
 0x5c5   : > { %3761 = vmatmul.f32.gmra.mxu2 %v3077_v57 }
 0x5c7   : > { %3940 = vmatmul.f32.gmra.mxu3 %v3137_v50  ;;  %v3467_v50 = vadd.f32 %v9344_v14, %v9212_v21  ;;  %v12988_v21 = vld [vmem:[#allocation122_spill] sm:$0xff] }
 0x5c8   : > { %v9486_v51 = vpop.f32.mrf.mxu2 }
 0x5c9   : > { %v9489_v60 = vpop.f32.mrf.mxu1  ;;  %v3682_v12 = vadd.f32 %v9271_v31, %v3467_v50  ;;  %v6542_v31 = vunpack.i.h.bf16 %v8696_v26  ;;  %v3470_v50 = vadd.f32 %v9344_v14, %v9232_v32  ;;  %v12991_v26 = vld [vmem:[#allocation23_spill] sm:$0xff] }
 0x5ca   : > { %v3893_v1 = vpop.f32.mrf.mxu3  ;;  %v3234_v32 = vld [vmem:[%s12155_s3 + $0x1a8] sm:$0xff] }
 0x5cb   : > { %v9491_v57 = vadd.f32 %v3893_v1, %v3679_v25  ;;  %v2797_v25 = vpop.permute.xlu0 %2796  ;;  %4056 = vmatpush.msrb.mxu1 %v3234_v32 }
 0x5cc   : > { %3555 = vmatmul.f32.gmra.mxu1 %v9495_v56  ;;  %v3139_v11 = vsel %vm2958_vm4, %v12988_v21, %v2797_v25 }
 0x5cd   : > { %12983 = vst [vmem:[#allocation112_spill] sm:$0xff] %v9491_v57  ;;  %3764 = vmatmul.f32.gmra.mxu2 %v3078_v39  ;;  %v12987_v39 = vld [vmem:[#allocation103_spill] sm:$0xff]  ;;  %v13018_v57 = vld [vmem:[#allocation133_spill] sm:$0xff] }
 0x5ce   : > { %v9515_v43 = vsel %vm2958_vm4, %v12987_v39, %v6657_v23  ;;  %v3685_v23 = vadd.f32 %v9289_v5, %v3470_v50  ;;  %v2799_v39 = vpop.permute.xlu1 %2798  ;;  %v12992_v5 = vld [vmem:[#allocation18_spill] sm:$0xff] }
 0x5cf   : > { %3943 = vmatmul.f32.gmra.mxu3 %v3138_v15  ;;  %v6666_v15 = vunpack.i.l.bf16 %v9135_v8  ;;  %v3080_v8 = vsel %vm2958_vm4, %v12991_v26, %v6542_v31  ;;  %v3140_v21 = vsel %vm2958_vm4, %v12992_v5, %v2799_v39  ;;  %v12997_v5 = vld [vmem:[#allocation190_spill] sm:$0xff] }
 0x5d0   : > { %v9506_v29 = vpop.f32.mrf.mxu2 }
 0x5d1   : > { %v9509_v19 = vpop.f32.mrf.mxu1  ;;  %v9535_v25 = vsel %vm2958_vm4, %v12990_v52, %v6666_v15  ;;  %v3473_v52 = vadd.f32 %v9344_v14, %v9255_v35  ;;  %v12998_v35 = vld [vmem:[#allocation128_spill] sm:$0xff] }
 0x5d2   : > { %v3896_v61 = vpop.f32.mrf.mxu3 }
 0x5d3   : > { %v9511_v1 = vadd.f32 %v3896_v61, %v3682_v12  ;;  %v3688_v15 = vadd.f32 %v9304_v47, %v3473_v52  ;;  %v12999_v47 = vld [vmem:[#allocation102_spill] sm:$0xff] }
 0x5d4   : > { %3558 = vmatmul.f32.gmra.mxu1 %v9515_v43  ;;  %v6552_v52 = vunpack.i.h.bf16 %v12999_v47 }
 0x5d5   : > { %12986 = vst [vmem:[#allocation87_spill] sm:$0xff] %v9511_v1  ;;  %3767 = vmatmul.f32.gmra.mxu2 %v3079_v16  ;;  %v13001_v1 = vld [vmem:[#allocation155_spill] sm:$0xff] }
 0x5d7   : > { %3946 = vmatmul.f32.gmra.mxu3 %v3139_v11  ;;  %v12993_v11 = vld [vmem:[#allocation174_spill] sm:$0xff] }
 0x5d8   : > { %v9526_v12 = vpop.f32.mrf.mxu2  ;;  %v6547_v50 = vunpack.i.h.bf16 %v12993_v11 }
 0x5d9   : > { %v9529_v61 = vpop.f32.mrf.mxu1 }
 0x5da   : > { %v3899_v20 = vpop.f32.mrf.mxu3  ;;  %v3081_v11 = vsel %vm2958_vm4, %v12997_v5, %v6547_v50  ;;  %v2803_v5 = vpop.permute.xlu0 %2802 }
 0x5db   : > { %v9531_v16 = vadd.f32 %v3899_v20, %v3685_v23  ;;  %v6672_v23 = vunpack.i.h.bf16 %v9223_v2 }
 0x5dc   : > { %3561 = vmatmul.f32.gmra.mxu1 %v9535_v25 }
 0x5dd   : > { %12989 = vst [vmem:[#allocation167_spill] sm:$0xff] %v9531_v16  ;;  %3770 = vmatmul.f32.gmra.mxu2 %v3080_v8  ;;  %v2801_v8 = vpop.permute.xlu2 %2800  ;;  %v9558_v39 = vsel %vm2958_vm4, %v12996_v54, %v6672_v23 }
 0x5df   : > { %3949 = vmatmul.f32.gmra.mxu3 %v3140_v21  ;;  %v3141_v21 = vsel %vm2958_vm4, %v12998_v35, %v2801_v8  ;;  %v13005_v35 = vld [vmem:[#allocation186_spill] sm:$0xff] }
 0x5e0   : > { %v9549_v31 = vpop.f32.mrf.mxu2 }
 0x5e1   : > { %v9552_v20 = vpop.f32.mrf.mxu1 }
 0x5e2   : > { %12994 = vst [vmem:[#allocation111_spill] sm:$0xff] %v9552_v20  ;;  %v3902_v26 = vpop.f32.mrf.mxu3  ;;  %v13000_v20 = vld [vmem:[#allocation92_spill] sm:$0xff] }
 0x5e3   : > { %v9554_v32 = vadd.f32 %v3902_v26, %v3688_v15  ;;  %v6681_v16 = vunpack.i.l.bf16 %v13000_v20  ;;  %v3476_v26 = vadd.f32 %v9344_v14, %v13001_v1  ;;  %v3082_v20 = vsel %vm2958_vm4, %v13005_v35, %v6552_v52  ;;  %v3233_v1 = vld [vmem:[%s12155_s3 + $0x1a0] sm:$0xff]  ;;  %v13012_v35 = vld [vmem:[#allocation24_spill] sm:$0xff] }
 0x5e4   : > { %3564 = vmatmul.f32.gmra.mxu1 %v9558_v39  ;;  %v3479_v52 = vadd.f32 %v9344_v14, %v9291_v45 }
 0x5e5   : > { %12995 = vst [vmem:[#allocation86_spill] sm:$0xff] %v9554_v32  ;;  %3773 = vmatmul.f32.gmra.mxu2 %v3081_v11  ;;  %v3691_v54 = vadd.f32 %v9322_v55, %v3476_v26  ;;  %v13004_v32 = vld [vmem:[#allocation109_spill] sm:$0xff]  ;;  %4057 = vmatpush.msrb.mxu1 %v3233_v1  ;;  %v13008_v26 = vld [vmem:[#allocation63_spill] sm:$0xff] }
 0x5e6   : > { %v9578_v8 = vsel %vm2958_vm4, %v13004_v32, %v6681_v16  ;;  %v3232_v55 = vld [vmem:[%s12155_s3 + $0x198] sm:$0xff]  ;;  %v13007_v16 = vld [vmem:[#allocation176_spill] sm:$0xff]  ;;  %v3694_v1 = vadd.f32 %v9337_v48, %v3479_v52  ;;  %v3229_v48 = vld [vmem:[%s12155_s3 + $0x180] sm:$0xff] }
 0x5e7   : > { %3952 = vmatmul.f32.gmra.mxu3 %v3141_v21  ;;  %v13006_v21 = vld [vmem:[#allocation142_spill] sm:$0xff]  ;;  %v6557_v32 = vunpack.i.h.bf16 %v13007_v16  ;;  %4058 = vmatpush.msrb.mxu1 %v3232_v55  ;;  %v2805_v16 = vpop.permute.xlu1 %2804  ;;  %v13013_v52 = vld [vmem:[#allocation20_spill] sm:$0xff] }
 0x5e8   : > { %v9569_v15 = vpop.f32.mrf.mxu2  ;;  %v3142_v47 = vsel %vm2958_vm4, %v13006_v21, %v2803_v5  ;;  %v3230_v21 = vld [vmem:[%s12155_s3 + $0x188] sm:$0xff] }
 0x5e9   : > { %v9572_v23 = vpop.f32.mrf.mxu1 }
 0x5ea   : > { %13002 = vst [vmem:[#allocation147_spill] sm:$0xff] %v9572_v23  ;;  %v3905_v50 = vpop.f32.mrf.mxu3 }
 0x5eb   : > { %v9574_v11 = vadd.f32 %v3905_v50, %v3691_v54  ;;  %v6687_v54 = vunpack.i.h.bf16 %v13008_v26 }
 0x5ec   : > { %3567 = vmatmul.f32.gmra.mxu1 %v9578_v8 }
 0x5ed   : > { %13003 = vst [vmem:[#allocation10_spill] sm:$0xff] %v9574_v11  ;;  %3776 = vmatmul.f32.gmra.mxu2 %v3082_v20  ;;  %v3231_v20 = vld [vmem:[%s12155_s3 + $0x190] sm:$0xff]  ;;  %v3083_v11 = vsel %vm2958_vm4, %v13012_v35, %v6557_v32 }
 0x5ee   : > { %4059 = vmatpush.msrb.mxu1 %v3231_v20  ;;  %v3143_v20 = vsel %vm2958_vm4, %v13013_v52, %v2805_v16  ;;  %v13019_v52 = vld [vmem:[#allocation192_spill] sm:$0xff] }
 0x5ef   : > { %3955 = vmatmul.f32.gmra.mxu3 %v3142_v47  ;;  %v13011_v47 = vld [vmem:[#allocation126_spill] sm:$0xff] }
 0x5f0   : > { %v9595_v50 = vpop.f32.mrf.mxu2  ;;  %v9610_v55 = vsel %vm2958_vm4, %v13011_v47, %v6687_v54  ;;  %4060 = vmatpush.msrb.mxu1 %v3230_v21  ;;  %v3482_v47 = vadd.f32 %v9344_v14, %v9306_v40  ;;  %v13020_v40 = vld [vmem:[#allocation144_spill] sm:$0xff] }
 0x5f1   : > { %v9601_v23 = vpop.f32.mrf.mxu1 }
 0x5f2   : > { %13009 = vst [vmem:[#allocation78_spill] sm:$0xff] %v9601_v23  ;;  %v3908_v5 = vpop.f32.mrf.mxu3  ;;  %4061 = vmatpush.msrb.mxu1 %v3229_v48  ;;  %v13015_v23 = vld [vmem:[#allocation67_spill] sm:$0xff]  ;;  %v3697_v21 = vadd.f32 %v9359_v41, %v3482_v47  ;;  %v13022_v47 = vld [vmem:[#allocation77_spill] sm:$0xff] }
 0x5f3   : > { %v9606_v45 = vadd.f32 %v3908_v5, %v3694_v1  ;;  %v13014_v1 = vld [vmem:[#allocation177_spill] sm:$0xff]  ;;  %v6696_v54 = vunpack.i.l.bf16 %v13015_v23  ;;  %v13021_v41 = vld [vmem:[#allocation191_spill] sm:$0xff] }
 0x5f4   : > { %3570 = vmatmul.f32.gmra.mxu1 %v9610_v55  ;;  %v6562_v5 = vunpack.i.h.bf16 %v13014_v1  ;;  %v6567_v1 = vunpack.i.h.bf16 %v13021_v41 }
 0x5f5   : > { %13010 = vst [vmem:[#allocation71_spill] sm:$0xff] %v9606_v45  ;;  %3779 = vmatmul.f32.gmra.mxu2 %v3083_v11  ;;  %v2807_v11 = vpop.permute.xlu2 %2806  ;;  %v9633_v16 = vsel %vm2958_vm4, %v13018_v57, %v6696_v54 }
 0x5f6   : > { %v3084_v23 = vsel %vm2958_vm4, %v13019_v52, %v6562_v5  ;;  %v13026_v52 = vld [vmem:[#allocation114_spill] sm:$0xff] }
 0x5f7   : > { %3958 = vmatmul.f32.gmra.mxu3 %v3143_v20  ;;  %v3144_v20 = vsel %vm2958_vm4, %v13020_v40, %v2807_v11  ;;  %v13027_v40 = vld [vmem:[#allocation187_spill] sm:$0xff] }
 0x5f8   : > { %v9624_v32 = vpop.f32.mrf.mxu2  ;;  %v3085_v41 = vsel %vm2958_vm4, %v13027_v40, %v6567_v1  ;;  %v2811_v40 = vpop.permute.xlu1 %2810 }
 0x5f9   : > { %13016 = vst [vmem:[#allocation123_spill] sm:$0xff] %v9624_v32  ;;  %v9627_v35 = vpop.f32.mrf.mxu1  ;;  %v2809_v32 = vpop.permute.xlu0 %2808 }
 0x5fa   : > { %13017 = vst [vmem:[#allocation95_spill] sm:$0xff] %v9627_v35  ;;  %v3911_v45 = vpop.f32.mrf.mxu3  ;;  %v6702_v35 = vunpack.i.h.bf16 %v13022_v47 }
 0x5fb   : > { %v9629_v48 = vadd.f32 %v3911_v45, %v3697_v21  ;;  %v3485_v45 = vadd.f32 %v9344_v14, %v9324_v4  ;;  %v13028_v4 = vld [vmem:[#allocation137_spill] sm:$0xff] }
 0x5fc   : > { %3573 = vmatmul.f32.gmra.mxu1 %v9633_v16  ;;  %v9653_v11 = vsel %vm2958_vm4, %v13026_v52, %v6702_v35 }
 0x5fd   : > { %3782 = vmatmul.f32.gmra.mxu2 %v3084_v23  ;;  %v3700_v57 = vadd.f32 %v9379_v36, %v3485_v45  ;;  %v13029_v36 = vld [vmem:[#allocation179_spill] sm:$0xff] }
 0x5fe   : > { %v6572_v45 = vunpack.i.h.bf16 %v13029_v36  ;;  %v3491_v36 = vadd.f32 %v9344_v14, %v9362_v28 }
 0x5ff   : > { %3961 = vmatmul.f32.gmra.mxu3 %v3144_v20  ;;  %v3145_v20 = vsel %vm2958_vm4, %v13028_v4, %v2809_v32  ;;  %v13033_v4 = vld [vmem:[#allocation25_spill] sm:$0xff] }
 0x600   : > { %v9644_v21 = vpop.f32.mrf.mxu2 }
 0x601   : > { %13023 = vst [vmem:[#allocation104_spill] sm:$0xff] %v9644_v21  ;;  %v9647_v54 = vpop.f32.mrf.mxu1 }
 0x602   : > { %13024 = vst [vmem:[#allocation94_spill] sm:$0xff] %v9647_v54  ;;  %v3914_v5 = vpop.f32.mrf.mxu3  ;;  %v13030_v54 = vld [vmem:[#allocation101_spill] sm:$0xff] }
 0x603   : > { %v9649_v23 = vadd.f32 %v3914_v5, %v3700_v57  ;;  %v6711_v21 = vunpack.i.l.bf16 %v13030_v54  ;;  %v3488_v57 = vadd.f32 %v9344_v14, %v9339_v49  ;;  %v3086_v54 = vsel %vm2958_vm4, %v13033_v4, %v6572_v45  ;;  %v13034_v49 = vld [vmem:[#allocation148_spill] sm:$0xff]  ;;  %v2813_v45 = vpop.permute.xlu2 %2812 }
 0x604   : > { %3576 = vmatmul.f32.gmra.mxu1 %v9653_v11 }
 0x605   : > { %13025 = vst [vmem:[#allocation157_spill] sm:$0xff] %v9649_v23  ;;  %3785 = vmatmul.f32.gmra.mxu2 %v3085_v41  ;;  %v3703_v35 = vadd.f32 %v9402_v22, %v3488_v57  ;;  %v13032_v23 = vld [vmem:[#allocation132_spill] sm:$0xff]  ;;  %v6581_v22 = vunpack.i.l.bf16 %v9023_v3  ;;  %v13039_v3 = vld [vmem:[#allocation141_spill] sm:$0xff] }
 0x606   : > { %v9673_v32 = vsel %vm2958_vm4, %v13032_v23, %v6711_v21  ;;  %v3706_v21 = vadd.f32 %v9422_v17, %v3491_v36  ;;  %v3147_v28 = vsel %vm2958_vm4, %v13039_v3, %v2813_v45  ;;  %v3494_v17 = vadd.f32 %v9344_v14, %v9385_v33  ;;  %v13044_v45 = vld [vmem:[#allocation130_spill] sm:$0xff]  ;;  %v13045_v3 = vld [vmem:[#allocation152_spill] sm:$0xff] }
 0x607   : > { %3964 = vmatmul.f32.gmra.mxu3 %v3145_v20  ;;  %v3146_v20 = vsel %vm2958_vm4, %v13034_v49, %v2811_v40  ;;  %v13038_v40 = vld [vmem:[#allocation125_spill] sm:$0xff]  ;;  %v13040_v49 = vld [vmem:[#allocation182_spill] sm:$0xff] }
 0x608   : > { %v9664_v5 = vpop.f32.mrf.mxu2 }
 0x609   : > { %v9667_v52 = vpop.f32.mrf.mxu1 }
 0x60a   : > { %13031 = vst [vmem:[#allocation12_spill] sm:$0xff] %v9667_v52  ;;  %v3917_v1 = vpop.f32.mrf.mxu3 }
 0x60b   : > { %v9669_v41 = vadd.f32 %v3917_v1, %v3703_v35 }
 0x60c   : > { %3579 = vmatmul.f32.gmra.mxu1 %v9673_v32 }
 0x60d   : > { %3788 = vmatmul.f32.gmra.mxu2 %v3086_v54  ;;  %v13037_v54 = vld [vmem:[#allocation108_spill] sm:$0xff] }
 0x60e   : > { %v3087_v52 = vsel %vm2958_vm4, %v13037_v54, %v6581_v22  ;;  %v2815_v22 = vpop.permute.xlu0 %2814 }
 0x60f   : > { %3967 = vmatmul.f32.gmra.mxu3 %v3146_v20  ;;  %v6587_v20 = vunpack.i.h.bf16 %v13040_v49  ;;  %v3148_v33 = vsel %vm2958_vm4, %v13045_v3, %v2815_v22  ;;  %v13050_v22 = vld [vmem:[#allocation135_spill] sm:$0xff]  ;;  %v13051_v3 = vld [vmem:[#allocation146_spill] sm:$0xff] }
 0x610   : > { %v9683_v57 = vpop.f32.mrf.mxu2 }
 0x611   : > { %13035 = vst [vmem:[#allocation88_spill] sm:$0xff] %v9683_v57  ;;  %v9686_v23 = vpop.f32.mrf.mxu1 }
 0x612   : > { %13036 = vst [vmem:[#allocation162_spill] sm:$0xff] %v9686_v23  ;;  %v3920_v35 = vpop.f32.mrf.mxu3 }
 0x613   : > { %v9688_v1 = vadd.f32 %v3920_v35, %v3706_v21  ;;  %v3709_v21 = vadd.f32 %v9442_v9, %v3494_v17  ;;  %v3497_v9 = vadd.f32 %v9344_v14, %v9405_v30 }
 0x614   : > { %4062 = vmatmul.f32.vlgmr.msrb.gmra.mxu1 %v13038_v40  ;;  %v13043_v40 = vld [vmem:[#allocation189_spill] sm:$0xff] }
 0x615   : > { %3791 = vmatmul.f32.gmra.mxu2 %v3087_v52  ;;  %v3088_v57 = vsel %vm2958_vm4, %v13043_v40, %v6587_v20  ;;  %v2817_v20 = vpop.permute.xlu1 %2816 }
 0x616   : > { %v3149_v30 = vsel %vm2958_vm4, %v13051_v3, %v2817_v20  ;;  %v13056_v20 = vld [vmem:[#allocation140_spill] sm:$0xff]  ;;  %v13057_v3 = vld [vmem:[#allocation158_spill] sm:$0xff] }
 0x617   : > { %3970 = vmatmul.f32.gmra.mxu3 %v3147_v28  ;;  %v13046_v28 = vld [vmem:[#allocation83_spill] sm:$0xff] }
 0x618   : > { %v9698_v36 = vpop.f32.mrf.mxu2  ;;  %v6596_v49 = vunpack.i.l.bf16 %v13046_v28 }
 0x619   : > { %13041 = vst [vmem:[#allocation129_spill] sm:$0xff] %v9698_v36  ;;  %v9701_v35 = vpop.f32.mrf.mxu1 }
 0x61a   : > { %13042 = vst [vmem:[#allocation106_spill] sm:$0xff] %v9701_v35  ;;  %v3923_v23 = vpop.f32.mrf.mxu3 }
 0x61b   : > { %v9703_v52 = vadd.f32 %v3923_v23, %v3709_v21  ;;  %v3712_v23 = vadd.f32 %v9466_v13, %v3497_v9  ;;  %v3500_v13 = vadd.f32 %v9344_v14, %v9425_v24 }
 0x61c   : > { %4064 = vmatmul.f32.gmra.mxu1 %v13044_v45  ;;  %v13049_v45 = vld [vmem:[#allocation28_spill] sm:$0xff] }
 0x61d   : > { %3794 = vmatmul.f32.gmra.mxu2 %v3088_v57  ;;  %v3089_v36 = vsel %vm2958_vm4, %v13049_v45, %v6596_v49  ;;  %v2819_v49 = vpop.permute.xlu2 %2818 }
 0x61e   : > { %v3150_v24 = vsel %vm2958_vm4, %v13057_v3, %v2819_v49  ;;  %v13061_v49 = vld [vmem:[#allocation36_spill] sm:$0xff]  ;;  %v13063_v3 = vld [vmem:[#allocation98_spill] sm:$0xff] }
 0x61f   : > { %3973 = vmatmul.f32.gmra.mxu3 %v3148_v33  ;;  %v13052_v33 = vld [vmem:[#allocation184_spill] sm:$0xff] }
 0x620   : > { %v9713_v17 = vpop.f32.mrf.mxu2  ;;  %v6602_v28 = vunpack.i.h.bf16 %v13052_v33 }
 0x621   : > { %13047 = vst [vmem:[#allocation110_spill] sm:$0xff] %v9713_v17  ;;  %v9716_v21 = vpop.f32.mrf.mxu1 }
 0x622   : > { %13048 = vst [vmem:[#allocation105_spill] sm:$0xff] %v9716_v21  ;;  %v3926_v35 = vpop.f32.mrf.mxu3 }
 0x623   : > { %v9718_v57 = vadd.f32 %v3926_v35, %v3712_v23  ;;  %v3715_v35 = vadd.f32 %v9486_v51, %v3500_v13  ;;  %v3503_v51 = vadd.f32 %v9344_v14, %v9445_v18 }
 0x624   : > { %4066 = vmatmul.f32.gmra.mxu1 %v13050_v22  ;;  %v13055_v22 = vld [vmem:[#allocation113_spill] sm:$0xff] }
 0x625   : > { %3797 = vmatmul.f32.gmra.mxu2 %v3089_v36  ;;  %v3090_v17 = vsel %vm2958_vm4, %v13055_v22, %v6602_v28  ;;  %v2821_v28 = vpop.permute.xlu0 %2820 }
 0x627   : > { %3976 = vmatmul.f32.gmra.mxu3 %v3149_v30  ;;  %v6611_v30 = vunpack.i.l.bf16 %v9103_v7  ;;  %v13062_v7 = vld [vmem:[#allocation149_spill] sm:$0xff] }
 0x628   : > { %v9728_v9 = vpop.f32.mrf.mxu2  ;;  %v3151_v18 = vsel %vm2958_vm4, %v13062_v7, %v2821_v28  ;;  %v13067_v28 = vld [vmem:[#allocation59_spill] sm:$0xff]  ;;  %v13068_v7 = vld [vmem:[#allocation74_spill] sm:$0xff] }
 0x629   : > { %13053 = vst [vmem:[#allocation166_spill] sm:$0xff] %v9728_v9  ;;  %v9731_v23 = vpop.f32.mrf.mxu1 }
 0x62a   : > { %13054 = vst [vmem:[#allocation14_spill] sm:$0xff] %v9731_v23  ;;  %v3929_v21 = vpop.f32.mrf.mxu3 }
 0x62b   : > { %v9733_v36 = vadd.f32 %v3929_v21, %v3715_v35  ;;  %v3718_v21 = vadd.f32 %v9506_v29, %v3503_v51  ;;  %v3506_v29 = vadd.f32 %v9344_v14, %v9469_v27  ;;  %v5441_v27 = vld [vmem:[%s12157_s5 + $0x78] sm:$0xff] }
 0x62c   : > { %4068 = vmatmul.f32.gmra.mxu1 %v13056_v20  ;;  %v13060_v20 = vld [vmem:[#allocation31_spill] sm:$0xff]  ;;  %5566 = vmatpush.msrb.mxu3 %v5441_v27  ;;  %v13071_v27 = vld [vmem:[#allocation62_spill] sm:$0xff] }
 0x62d   : > { %3800 = vmatmul.f32.gmra.mxu2 %v3090_v17  ;;  %v3091_v23 = vsel %vm2958_vm4, %v13060_v20, %v6611_v30  ;;  %v2823_v30 = vpop.permute.xlu1 %2822 }
 0x62f   : > { %3979 = vmatmul.f32.gmra.mxu3 %v3150_v24  ;;  %v6617_v24 = vunpack.i.h.bf16 %v13063_v3 }
 0x630   : > { %v9743_v33 = vpop.f32.mrf.mxu2 }
 0x631   : > { %13058 = vst [vmem:[#allocation96_spill] sm:$0xff] %v9743_v33  ;;  %v9746_v13 = vpop.f32.mrf.mxu1 }
 0x632   : > { %13059 = vst [vmem:[#allocation169_spill] sm:$0xff] %v9746_v13  ;;  %v3932_v35 = vpop.f32.mrf.mxu3 }
 0x633   : > { %v9748_v17 = vadd.f32 %v3932_v35, %v3718_v21  ;;  %v3721_v21 = vadd.f32 %v9526_v12, %v3506_v29  ;;  %v3152_v12 = vsel %vm2958_vm4, %v13068_v7, %v2823_v30  ;;  %v13072_v30 = vld [vmem:[#allocation151_spill] sm:$0xff]  ;;  %v13074_v7 = vld [vmem:[#allocation72_spill] sm:$0xff] }
 0x634   : > { %4070 = vmatmul.f32.gmra.mxu1 %v13061_v49  ;;  %v13066_v49 = vld [vmem:[#allocation37_spill] sm:$0xff] }
 0x635   : > { %3803 = vmatmul.f32.gmra.mxu2 %v3091_v23  ;;  %v3092_v33 = vsel %vm2958_vm4, %v13066_v49, %v6617_v24 }
 0x637   : > { %3982 = vmatmul.f32.gmra.mxu3 %v3151_v18  ;;  %v6626_v18 = vunpack.i.l.bf16 %v9130_v42  ;;  %v13073_v42 = vld [vmem:[#allocation153_spill] sm:$0xff] }
 0x638   : > { %v9758_v51 = vpop.f32.mrf.mxu2 }
 0x639   : > { %13064 = vst [vmem:[#allocation134_spill] sm:$0xff] %v9758_v51  ;;  %v9761_v35 = vpop.f32.mrf.mxu1 }
 0x63a   : > { %13065 = vst [vmem:[#allocation118_spill] sm:$0xff] %v9761_v35  ;;  %v3935_v13 = vpop.f32.mrf.mxu3  ;;  %v3093_v35 = vsel %vm2958_vm4, %v13071_v27, %v6626_v18  ;;  %v2827_v18 = vpop.permute.xlu0 %2826 }
 0x63b   : > { %v9763_v23 = vadd.f32 %v3935_v13, %v3721_v21  ;;  %v3509_v13 = vadd.f32 %v9344_v14, %v9489_v60  ;;  %v2825_v21 = vpop.permute.xlu2 %2824 }
 0x63c   : > { %4072 = vmatmul.f32.gmra.mxu1 %v13067_v28  ;;  %v3153_v60 = vsel %vm2958_vm4, %v13073_v42, %v2825_v21  ;;  %v13078_v21 = vld [vmem:[#allocation156_spill] sm:$0xff]  ;;  %v13079_v42 = vld [vmem:[#allocation75_spill] sm:$0xff] }
 0x63d   : > { %3806 = vmatmul.f32.gmra.mxu2 %v3092_v33  ;;  %v3724_v33 = vadd.f32 %v9549_v31, %v3509_v13  ;;  %v3512_v31 = vadd.f32 %v9344_v14, %v9509_v19  ;;  %v3154_v19 = vsel %vm2958_vm4, %v13079_v42, %v2827_v18  ;;  %v13082_v18 = vld [vmem:[#allocation161_spill] sm:$0xff] }
 0x63f   : > { %3985 = vmatmul.f32.gmra.mxu3 %v3152_v12  ;;  %v6632_v12 = vunpack.i.h.bf16 %v13074_v7 }
 0x640   : > { %v9776_v3 = vpop.f32.mrf.mxu2 }
 0x641   : > { %13069 = vst [vmem:[#allocation116_spill] sm:$0xff] %v9776_v3  ;;  %v9779_v24 = vpop.f32.mrf.mxu1 }
 0x642   : > { %13070 = vst [vmem:[#allocation117_spill] sm:$0xff] %v9779_v24  ;;  %v3938_v29 = vpop.f32.mrf.mxu3 }
 0x643   : > { %v9781_v28 = vadd.f32 %v3938_v29, %v3724_v33  ;;  %v3727_v33 = vadd.f32 %v9569_v15, %v3512_v31  ;;  %v3515_v15 = vadd.f32 %v9344_v14, %v9529_v61  ;;  %v13084_v61 = vld [vmem:[#allocation52_spill] sm:$0xff] }
 0x644   : > { %4074 = vmatmul.f32.gmra.mxu1 %v13072_v30  ;;  %v13077_v30 = vld [vmem:[#allocation99_spill] sm:$0xff]  ;;  %v6647_v42 = vunpack.i.h.bf16 %v13084_v61  ;;  %v2833_v61 = vpop.permute.xlu0 %2832 }
 0x645   : > { %3809 = vmatmul.f32.gmra.mxu2 %v3093_v35  ;;  %v3094_v3 = vsel %vm2958_vm4, %v13077_v30, %v6632_v12  ;;  %v2829_v12 = vpop.permute.xlu1 %2828 }
 0x647   : > { %3988 = vmatmul.f32.gmra.mxu3 %v3153_v60  ;;  %v6641_v60 = vunpack.i.l.bf16 %v9165_v46  ;;  %v13083_v46 = vld [vmem:[#allocation160_spill] sm:$0xff] }
 0x648   : > { %v9791_v13 = vpop.f32.mrf.mxu2  ;;  %v3155_v14 = vsel %vm2958_vm4, %v13083_v46, %v2829_v12  ;;  %v13088_v12 = vld [vmem:[#allocation170_spill] sm:$0xff] }
 0x649   : > { %13075 = vst [vmem:[#allocation16_spill] sm:$0xff] %v9791_v13  ;;  %v9794_v29 = vpop.f32.mrf.mxu1 }
 0x64a   : > { %13076 = vst [vmem:[#allocation121_spill] sm:$0xff] %v9794_v29  ;;  %v3941_v24 = vpop.f32.mrf.mxu3  ;;  %v13147_v29 = vld [vmem:[#allocation76_spill] sm:$0xff] }
 0x64b   : > { %v9796_v35 = vadd.f32 %v3941_v24, %v3727_v33  ;;  %v3730_v24 = vadd.f32 %v9595_v50, %v3515_v15  ;;  %v2831_v15 = vpop.permute.xlu2 %2830 }
 0x64c   : > { %4076 = vmatmul.f32.gmra.mxu1 %v13078_v21  ;;  %v3095_v21 = vsel %vm2958_vm4, %v13077_v30, %v6641_v60  ;;  %v5440_v60 = vld [vmem:[%s12157_s5 + $0x70] sm:$0xff] }
 0x64d   : > { %3812 = vmatmul.f32.gmra.mxu2 %v3094_v3  ;;  %5567 = vmatpush.msrb.mxu3 %v5440_v60 }
 0x64f   : > { %3991 = vmatmul.f32.gmra.mxu3 %v3154_v19 }
 0x650   : > { %v9806_v7 = vpop.f32.mrf.mxu2 }
 0x651   : > { %13080 = vst [vmem:[#allocation138_spill] sm:$0xff] %v9806_v7  ;;  %v9809_v31 = vpop.f32.mrf.mxu1 }
 0x652   : > { %13081 = vst [vmem:[#allocation103_spill] sm:$0xff] %v9809_v31  ;;  %v3944_v33 = vpop.f32.mrf.mxu3 }
 0x653   : > { %v9811_v3 = vadd.f32 %v3944_v33, %v3730_v24  ;;  %v3096_v24 = vsel %vm2958_vm4, %v13077_v30, %v6647_v42  ;;  %v13087_v33 = vld [vmem:[#allocation42_spill] sm:$0xff] }
 0x654   : > { %4078 = vmatmul.f32.gmra.mxu1 %v13082_v18  ;;  %v6656_v18 = vunpack.i.l.bf16 %v9195_v10 }
 0x655   : > { %3814 = vmatmul.f32.gmra.mxu2 %v3095_v21  ;;  %v3156_v21 = vsel %vm2958_vm4, %v13088_v12, %v2831_v15  ;;  %v2835_v12 = vpop.permute.xlu1 %2834 }
 0x656   : > { %v3097_v42 = vsel %vm2958_vm4, %v13077_v30, %v6656_v18  ;;  %v13097_v18 = vld [vmem:[#allocation27_spill] sm:$0xff] }
 0x657   : > { %3994 = vmatmul.f32.gmra.mxu3 %v3155_v14 }
 0x658   : > { %v9819_v19 = vpop.f32.mrf.mxu2 }
 0x659   : > { %13085 = vst [vmem:[#allocation122_spill] sm:$0xff] %v9819_v19  ;;  %v9821_v50 = vpop.f32.mrf.mxu1  ;;  %v13148_v19 = vld [vmem:[#allocation150_spill] sm:$0xff] }
 0x65a   : > { %13086 = vst [vmem:[#allocation120_spill] sm:$0xff] %v9821_v50  ;;  %v13093_v50 = vld [vmem:[#allocation33_spill] sm:$0xff] }
 0x65b   : > { %v6662_v31 = vunpack.i.h.bf16 %v13093_v50 }
 0x65c   : > { %4080 = vmatmul.f32.gmra.mxu1 %v13087_v33  ;;  %v13092_v33 = vld [vmem:[#allocation164_spill] sm:$0xff] }
 0x65d   : > { %3816 = vmatmul.f32.gmra.mxu2 %v3096_v24  ;;  %v13091_v24 = vld [vmem:[#allocation39_spill] sm:$0xff]  ;;  %v3157_v60 = vsel %vm2958_vm4, %v13092_v33, %v2833_v61  ;;  %v2837_v33 = vpop.permute.xlu2 %2836 }
 0x65f   : > { %3997 = vmatmul.f32.gmra.mxu3 %v3156_v21  ;;  %v3098_v21 = vsel %vm2958_vm4, %v13077_v30, %v6662_v31  ;;  %v3252_v31 = vld [vmem:[%s12155_s3 + $0x238] sm:$0xff] }
 0x660   : > { %v9832_v46 = vpop.f32.mrf.mxu2  ;;  %4269 = vmatpush.msrb.mxu2 %v3252_v31 }
 0x661   : > { %13089 = vst [vmem:[#allocation18_spill] sm:$0xff] %v9832_v46  ;;  %v9834_v14 = vpop.f32.mrf.mxu1  ;;  %v13144_v46 = vld [vmem:[#allocation100_spill] sm:$0xff] }
 0x662   : > { %13090 = vst [vmem:[#allocation174_spill] sm:$0xff] %v9834_v14  ;;  %v13096_v14 = vld [vmem:[#allocation41_spill] sm:$0xff] }
 0x664   : > { %4083 = vmatmul.f32.gmra.mxu1 %v13091_v24  ;;  %v6671_v24 = vunpack.i.l.bf16 %v9223_v2  ;;  %v3251_v2 = vld [vmem:[%s12155_s3 + $0x230] sm:$0xff] }
 0x665   : > { %3818 = vmatmul.f32.gmra.mxu2 %v3097_v42  ;;  %v3158_v42 = vsel %vm2958_vm4, %v13097_v18, %v2835_v12 }
 0x666   : > { %4270 = vmatpush.msrb.mxu2 %v3251_v2  ;;  %v3248_v2 = vld [vmem:[%s12155_s3 + $0x218] sm:$0xff] }
 0x667   : > { %4000 = vmatmul.f32.gmra.mxu3 %v3157_v60  ;;  %v3099_v60 = vsel %vm2958_vm4, %v13077_v30, %v6671_v24 }
 0x668   : > { %v9842_v15 = vpop.f32.mrf.mxu2 }
 0x669   : > { %13094 = vst [vmem:[#allocation127_spill] sm:$0xff] %v9842_v15  ;;  %v9844_v10 = vpop.f32.mrf.mxu1 }
 0x66a   : > { %13095 = vst [vmem:[#allocation128_spill] sm:$0xff] %v9844_v10  ;;  %v13100_v10 = vld [vmem:[#allocation44_spill] sm:$0xff] }
 0x66c   : > { %4086 = vmatmul.f32.gmra.mxu1 %v13096_v14  ;;  %v13101_v14 = vld [vmem:[#allocation30_spill] sm:$0xff] }
 0x66d   : > { %3820 = vmatmul.f32.gmra.mxu2 %v3098_v21  ;;  %v3159_v12 = vsel %vm2958_vm4, %v13101_v14, %v2837_v33  ;;  %v13102_v21 = vld [vmem:[#allocation4_spill] sm:$0xff]  ;;  %v3249_v33 = vld [vmem:[%s12155_s3 + $0x220] sm:$0xff] }
 0x66e   : > { %v6677_v18 = vunpack.i.h.bf16 %v13102_v21  ;;  %v13105_v14 = vld [vmem:[#allocation40_spill] sm:$0xff] }
 0x66f   : > { %4003 = vmatmul.f32.gmra.mxu3 %v3158_v42  ;;  %v13106_v21 = vld [vmem:[#allocation32_spill] sm:$0xff] }
 0x670   : > { %v9852_v61 = vpop.f32.mrf.mxu2  ;;  %v3100_v31 = vsel %vm2958_vm4, %v13077_v30, %v6677_v18 }
 0x671   : > { %13098 = vst [vmem:[#allocation102_spill] sm:$0xff] %v9852_v61  ;;  %v9854_v50 = vpop.f32.mrf.mxu1 }
 0x672   : > { %13099 = vst [vmem:[#allocation92_spill] sm:$0xff] %v9854_v50 }
 0x674   : > { %4089 = vmatmul.f32.gmra.mxu1 %v13100_v10  ;;  %v3250_v10 = vld [vmem:[%s12155_s3 + $0x228] sm:$0xff] }
 0x675   : > { %3822 = vmatmul.f32.gmra.mxu2 %v3099_v60  ;;  %v2839_v60 = vpop.permute.xlu0 %2838 }
 0x676   : > { %4271 = vmatpush.msrb.mxu2 %v3250_v10  ;;  %v3160_v18 = vsel %vm2958_vm4, %v13106_v21, %v2839_v60  ;;  %v3247_v10 = vld [vmem:[%s12155_s3 + $0x210] sm:$0xff] }
 0x677   : > { %4006 = vmatmul.f32.gmra.mxu3 %v3159_v12  ;;  %v5439_v12 = vld [vmem:[%s12157_s5 + $0x68] sm:$0xff] }
 0x678   : > { %v9868_v42 = vpop.f32.mrf.mxu2  ;;  %4272 = vmatpush.msrb.mxu2 %v3249_v33  ;;  %5568 = vmatpush.msrb.mxu3 %v5439_v12  ;;  %v2841_v33 = vpop.permute.xlu1 %2840  ;;  %v13109_v12 = vld [vmem:[#allocation46_spill] sm:$0xff] }
 0x679   : > { %13103 = vst [vmem:[#allocation155_spill] sm:$0xff] %v9868_v42  ;;  %v9873_v24 = vpop.f32.mrf.mxu1  ;;  %v13114_v42 = vld [vmem:[#allocation45_spill] sm:$0xff] }
 0x67a   : > { %13104 = vst [vmem:[#allocation109_spill] sm:$0xff] %v9873_v24  ;;  %4273 = vmatpush.msrb.mxu2 %v3248_v2  ;;  %v3246_v24 = vld [vmem:[%s12155_s3 + $0x208] sm:$0xff] }
 0x67b   : > { %v13110_v2 = vld [vmem:[#allocation35_spill] sm:$0xff] }
 0x67c   : > { %4092 = vmatmul.f32.gmra.mxu1 %v13105_v14  ;;  %4274 = vmatpush.msrb.mxu2 %v3247_v10  ;;  %v3161_v21 = vsel %vm2958_vm4, %v13110_v2, %v2841_v33 }
 0x67d   : > { %3824 = vmatmul.f32.gmra.mxu2 %v3100_v31  ;;  %v6686_v31 = vunpack.i.l.bf16 %v13008_v26  ;;  %v3245_v26 = vld [vmem:[%s12155_s3 + $0x200] sm:$0xff] }
 0x67e   : > { %4275 = vmatpush.msrb.mxu2 %v3246_v24 }
 0x67f   : > { %4009 = vmatmul.f32.gmra.mxu3 %v3160_v18  ;;  %v3101_v60 = vsel %vm2958_vm4, %v13077_v30, %v6686_v31  ;;  %v13111_v18 = vld [vmem:[#allocation145_spill] sm:$0xff]  ;;  %v2843_v31 = vpop.permute.xlu2 %2842 }
 0x680   : > { %v9893_v14 = vpop.f32.mrf.mxu2  ;;  %4276 = vmatpush.msrb.mxu2 %v3245_v26 }
 0x681   : > { %13107 = vst [vmem:[#allocation142_spill] sm:$0xff] %v9893_v14  ;;  %v9898_v50 = vpop.f32.mrf.mxu1  ;;  %v6692_v14 = vunpack.i.h.bf16 %v13111_v18 }
 0x682   : > { %13108 = vst [vmem:[#allocation176_spill] sm:$0xff] %v9898_v50 }
 0x683   : > { %v3102_v24 = vsel %vm2958_vm4, %v13077_v30, %v6692_v14 }
 0x684   : > { %4095 = vmatmul.f32.gmra.mxu1 %v13109_v12  ;;  %v6701_v12 = vunpack.i.l.bf16 %v13022_v47  ;;  %v13121_v47 = vld [vmem:[#allocation51_spill] sm:$0xff] }
 0x685   : > { %3826 = vmatmul.f32.gmra.mxu2 %v3101_v60  ;;  %v13115_v60 = vld [vmem:[#allocation34_spill] sm:$0xff] }
 0x686   : > { %v3162_v26 = vsel %vm2958_vm4, %v13115_v60, %v2843_v31 }
 0x687   : > { %4012 = vmatmul.f32.gmra.mxu3 %v3161_v21  ;;  %v13117_v21 = vld [vmem:[#allocation29_spill] sm:$0xff] }
 0x688   : > { %v9909_v10 = vpop.f32.mrf.mxu2  ;;  %v3107_v18 = vsel %vm2958_vm4, %v13117_v21, %v6701_v12 }
 0x689   : > { %13112 = vst [vmem:[#allocation63_spill] sm:$0xff] %v9909_v10  ;;  %v9911_v50 = vpop.f32.mrf.mxu1  ;;  %v13119_v10 = vld [vmem:[#allocation6_spill] sm:$0xff] }
 0x68a   : > { %13113 = vst [vmem:[#allocation126_spill] sm:$0xff] %v9911_v50  ;;  %v13118_v50 = vld [vmem:[#allocation43_spill] sm:$0xff]  ;;  %v6707_v14 = vunpack.i.h.bf16 %v13119_v10 }
 0x68c   : > { %4098 = vmatmul.f32.gmra.mxu1 %v13114_v42  ;;  %v3108_v31 = vsel %vm2958_vm4, %v13117_v21, %v6707_v14 }
 0x68d   : > { %3828 = vmatmul.f32.gmra.mxu2 %v3102_v24 }
 0x68f   : > { %4015 = vmatmul.f32.gmra.mxu3 %v3162_v26  ;;  %v5438_v26 = vld [vmem:[%s12157_s5 + $0x60] sm:$0xff] }
 0x690   : > { %v9919_v33 = vpop.f32.mrf.mxu2  ;;  %5569 = vmatpush.msrb.mxu3 %v5438_v26 }
 0x691   : > { %13116 = vst [vmem:[#allocation20_spill] sm:$0xff] %v9919_v33  ;;  %v4063_v2 = vpop.f32.mrf.mxu1 }
 0x694   : > { %4101 = vmatmul.f32.gmra.mxu1 %v13118_v50  ;;  %v13123_v50 = vld [vmem:[#allocation50_spill] sm:$0xff] }
 0x695   : > { %3855 = vmatmul.f32.vlgmr.msra.gmra.mxu2 %v3107_v18  ;;  %v13125_v18 = vld [vmem:[#allocation47_spill] sm:$0xff] }
 0x698   : > { %v9925_v24 = vpop.f32.mrf.mxu2 }
 0x699   : > { %13120 = vst [vmem:[#allocation177_spill] sm:$0xff] %v9925_v24  ;;  %v4065_v42 = vpop.f32.mrf.mxu1 }
 0x69c   : > { %4104 = vmatmul.f32.gmra.mxu1 %v13121_v47 }
 0x69d   : > { %3857 = vmatmul.f32.gmra.mxu2 %v3108_v31  ;;  %v13127_v31 = vld [vmem:[#allocation56_spill] sm:$0xff] }
 0x6a0   : > { %v9930_v60 = vpop.f32.mrf.mxu2 }
 0x6a1   : > { %13122 = vst [vmem:[#allocation67_spill] sm:$0xff] %v9930_v60  ;;  %v4067_v12 = vpop.f32.mrf.mxu1  ;;  %v9980_v60 = vpop.f32.mrf.mxu3 }
 0x6a2   : > { %v13128_v12 = vld [vmem:[#allocation55_spill] sm:$0xff] }
 0x6a4   : > { %4107 = vmatmul.f32.gmra.mxu1 %v13123_v50 }
 0x6a5   : > { %6357 = vmatmul.msk.f32.vlgmr.msrb.gmra.mxu2 %vm2958_vm4, %v13077_v30 }
 0x6a8   : > { %v9938_v10 = vpop.f32.mrf.mxu2 }
 0x6a9   : > { %13124 = vst [vmem:[#allocation133_spill] sm:$0xff] %v9938_v10  ;;  %v4069_v2 = vpop.f32.mrf.mxu1  ;;  %v13137_v10 = vld [vmem:[#allocation3_spill] sm:$0xff] }
 0x6aa   : > { %v5437_v2 = vld [vmem:[%s12157_s5 + $0x58] sm:$0xff] }
 0x6ab   : > { %5570 = vmatpush.msrb.mxu3 %v5437_v2 }
 0x6ac   : > { %4110 = vmatmul.f32.gmra.mxu1 %v13125_v18 }
 0x6ad   : > { %6358 = vmatmul.msk.f32.gmra.mxu2 %vm2958_vm4, %v13077_v30 }
 0x6b0   : > { %v9943_v14 = vpop.f32.mrf.mxu2 }
 0x6b1   : > { %13126 = vst [vmem:[#allocation144_spill] sm:$0xff] %v9943_v14  ;;  %v4071_v42 = vpop.f32.mrf.mxu1  ;;  %v13131_v14 = vld [vmem:[#allocation82_spill] sm:$0xff] }
 0x6b2   : > { %v13129_v42 = vld [vmem:[#allocation2_spill] sm:$0xff] }
 0x6b4   : > { %4113 = vmatmul.f32.gmra.mxu1 %v13127_v31 }
 0x6b5   : > { %6359 = vmatmul.msk.f32.gmra.mxu2 %vm2958_vm4, %v13077_v30 }
 0x6b8   : > { %v3804_v47 = vpop.f32.mrf.mxu2 }
 0x6b9   : > { %v4073_v26 = vpop.f32.mrf.mxu1 }
 0x6ba   : > { %v13130_v26 = vld [vmem:[#allocation26_spill] sm:$0xff] }
 0x6bc   : > { %4116 = vmatmul.f32.gmra.mxu1 %v13128_v12 }
 0x6bd   : > { %6360 = vmatmul.msk.f32.gmra.mxu2 %vm2958_vm4, %v13077_v30 }
 0x6c0   : > { %v3807_v50 = vpop.f32.mrf.mxu2 }
 0x6c1   : > { %v4075_v18 = vpop.f32.mrf.mxu1 }
 0x6c4   : > { %4119 = vmatmul.f32.gmra.mxu1 %v13129_v42  ;;  %v13132_v42 = vld [vmem:[#allocation61_spill] sm:$0xff] }
 0x6c5   : > { %6361 = vmatmul.msk.f32.gmra.mxu2 %vm2958_vm4, %v13077_v30 }
 0x6c8   : > { %v3810_v31 = vpop.f32.mrf.mxu2 }
 0x6c9   : > { %v4077_v47 = vpop.f32.mrf.mxu1 }
 0x6cc   : > { %4122 = vmatmul.f32.gmra.mxu1 %v13130_v26  ;;  %v5436_v26 = vld [vmem:[%s12157_s5 + $0x50] sm:$0xff] }
 0x6cd   : > { %6362 = vmatmul.msk.f32.gmra.mxu2 %vm2958_vm4, %v13077_v30  ;;  %5571 = vmatpush.msrb.mxu3 %v5436_v26  ;;  %v13138_v26 = vld [vmem:[#allocation91_spill] sm:$0xff] }
 0x6d0   : > { %v3813_v12 = vpop.f32.mrf.mxu2 }
 0x6d1   : > { %v4079_v50 = vpop.f32.mrf.mxu1  ;;  %v13133_v12 = vld [vmem:[#allocation119_spill] sm:$0xff] }
 0x6d4   : > { %4125 = vmatmul.f32.gmra.mxu1 %v13131_v14 }
 0x6d5   : > { %6363 = vmatmul.msk.f32.gmra.mxu2 %vm2958_vm4, %v13077_v30 }
 0x6d8   : > { %v3815_v2 = vpop.f32.mrf.mxu2 }
 0x6d9   : > { %v4081_v18 = vpop.f32.mrf.mxu1  ;;  %v13134_v2 = vld [vmem:[#allocation57_spill] sm:$0xff] }
 0x6da   : > { %v13135_v18 = vld [vmem:[#allocation139_spill] sm:$0xff] }
 0x6dc   : > { %4128 = vmatmul.f32.gmra.mxu1 %v13132_v42 }
 0x6dd   : > { %6364 = vmatmul.msk.f32.gmra.mxu2 %vm2958_vm4, %v13077_v30 }
 0x6e0   : > { %v3817_v31 = vpop.f32.mrf.mxu2 }
 0x6e1   : > { %v4084_v47 = vpop.f32.mrf.mxu1 }
 0x6e2   : > { %v13136_v47 = vld [vmem:[#allocation68_spill] sm:$0xff] }
 0x6e4   : > { %4131 = vmatmul.f32.gmra.mxu1 %v13133_v12 }
 0x6e5   : > { %6365 = vmatmul.msk.f32.gmra.mxu2 %vm2958_vm4, %v13077_v30 }
 0x6e8   : > { %v3819_v14 = vpop.f32.mrf.mxu2 }
 0x6e9   : > { %v4087_v50 = vpop.f32.mrf.mxu1  ;;  %v13139_v14 = vld [vmem:[#allocation53_spill] sm:$0xff] }
 0x6ec   : > { %4134 = vmatmul.f32.gmra.mxu1 %v13134_v2 }
 0x6ed   : > { %6366 = vmatmul.msk.f32.gmra.mxu2 %vm2958_vm4, %v13135_v18  ;;  %v9989_v18 = vpop.f32.mrf.mxu3 }
 0x6f0   : > { %v3821_v42 = vpop.f32.mrf.mxu2 }
 0x6f1   : > { %v9975_v31 = vpop.f32.mrf.mxu1  ;;  %v5435_v42 = vld [vmem:[%s12157_s5 + $0x48] sm:$0xff] }
 0x6f2   : > { %5572 = vmatpush.msrb.mxu3 %v5435_v42  ;;  %v13145_v42 = vld [vmem:[#allocation163_spill] sm:$0xff] }
 0x6f4   : > { %4137 = vmatmul.f32.gmra.mxu1 %v13136_v47  ;;  %v13141_v47 = vld [vmem:[#allocation159_spill] sm:$0xff] }
 0x6f5   : > { %6367 = vmatmul.msk.f32.gmra.mxu2 %vm2958_vm4, %v13137_v10  ;;  %v13140_v10 = vld [vmem:[#allocation131_spill] sm:$0xff]  ;;  %v9999_v33 = vpop.f32.mrf.mxu3 }
 0x6f8   : > { %v3823_v12 = vpop.f32.mrf.mxu2 }
 0x6f9   : > { %v9982_v24 = vpop.f32.mrf.mxu1 }
 0x6fc   : > { %4140 = vmatmul.f32.gmra.mxu1 %v13138_v26 }
 0x6fd   : > { %6368 = vmatmul.msk.f32.gmra.mxu2 %vm2958_vm4, %v13139_v14  ;;  %v13142_v14 = vld [vmem:[#allocation136_spill] sm:$0xff] }
 0x700   : > { %v3825_v50 = vpop.f32.mrf.mxu2 }
 0x701   : > { %v9987_v2 = vpop.f32.mrf.mxu1  ;;  %v13143_v50 = vld [vmem:[#allocation5_spill] sm:$0xff] }
 0x704   : > { %4143 = vmatmul.f32.gmra.mxu1 %v13140_v10  ;;  %v10009_v10 = vpop.f32.mrf.mxu3 }
 0x705   : > { %6369 = vmatmul.msk.f32.gmra.mxu2 %vm2958_vm4, %v13141_v47  ;;  %13146 = vst [vmem:[#allocation191_spill] sm:$0xff] %v10009_v10 }
 0x708   : > { %v3827_v12 = vpop.f32.mrf.mxu2 }
 0x709   : > { %v9997_v26 = vpop.f32.mrf.mxu1 }
 0x70c   : > { %4146 = vmatmul.f32.gmra.mxu1 %v13142_v14 }
 0x70d   : > { %6370 = vmatmul.msk.f32.gmra.mxu2 %vm2958_vm4, %v13143_v50  ;;  %v10016_v50 = vpop.f32.mrf.mxu3 }
 0x70e   : > { %13149 = vst [vmem:[#allocation77_spill] sm:$0xff] %v10016_v50 }
 0x710   : > { %v3829_v61 = vpop.f32.mrf.mxu2 }
 0x711   : > { %v10004_v15 = vpop.f32.mrf.mxu1 }
 0x714   : > { %4149 = vmatmul.f32.gmra.mxu1 %v13144_v46  ;;  %v5434_v46 = vld [vmem:[%s12157_s5 + $0x40] sm:$0xff] }
 0x715   : > { %6371 = vmatmul.msk.f32.gmra.mxu2 %vm2958_vm4, %v13145_v42  ;;  %5573 = vmatpush.msrb.mxu3 %v5434_v46  ;;  %v13150_v42 = vld [vmem:[#allocation66_spill] sm:$0xff]  ;;  %v10028_v13 = vpop.f32.mrf.mxu3  ;;  %v13156_v46 = vld [vmem:[#allocation69_spill] sm:$0xff] }
 0x716   : > { %13152 = vst [vmem:[#allocation114_spill] sm:$0xff] %v10028_v13  ;;  %v13158_v13 = vld [vmem:[#allocation9_spill] sm:$0xff] }
 0x718   : > { %v3856_v47 = vpop.f32.mrf.mxu2 }
 0x719   : > { %v10011_v12 = vpop.f32.mrf.mxu1  ;;  %v13151_v47 = vld [vmem:[#allocation7_spill] sm:$0xff] }
 0x71c   : > { %4152 = vmatmul.f32.gmra.mxu1 %v13147_v29 }
 0x71d   : > { %6372 = vmatmul.msk.f32.gmra.mxu2 %vm2958_vm4, %v13148_v19  ;;  %v13153_v19 = vld [vmem:[#allocation8_spill] sm:$0xff]  ;;  %v10035_v30 = vpop.f32.mrf.mxu3 }
 0x71e   : > { %13155 = vst [vmem:[#allocation137_spill] sm:$0xff] %v10035_v30  ;;  %v13160_v30 = vld [vmem:[#allocation80_spill] sm:$0xff] }
 0x720   : > { %v3858_v14 = vpop.f32.mrf.mxu2 }
 0x721   : > { %v10018_v61 = vpop.f32.mrf.mxu1  ;;  %v13154_v14 = vld [vmem:[#allocation154_spill] sm:$0xff] }
 0x724   : > { %4155 = vmatmul.f32.gmra.mxu1 %v13150_v42  ;;  %v13157_v42 = vld [vmem:[#allocation171_spill] sm:$0xff] }
 0x725   : > { %6373 = vmatmul.msk.f32.gmra.mxu2 %vm2958_vm4, %v13151_v47 }
 0x728   : > { %v4278_v7 = vpop.f32.mrf.mxu2 }
 0x729   : > { %v10026_v29 = vpop.f32.mrf.mxu1 }
 0x72c   : > { %4158 = vmatmul.f32.gmra.mxu1 %v13153_v19  ;;  %v10045_v19 = vpop.f32.mrf.mxu3 }
 0x72d   : > { %6374 = vmatmul.msk.f32.gmra.mxu2 %vm2958_vm4, %v13154_v14  ;;  %13159 = vst [vmem:[#allocation179_spill] sm:$0xff] %v10045_v19 }
 0x730   : > { %v4280_v51 = vpop.f32.mrf.mxu2 }
 0x731   : > { %v10033_v9 = vpop.f32.mrf.mxu1 }
 0x734   : > { %4161 = vmatmul.f32.gmra.mxu1 %v13156_v46  ;;  %v5433_v46 = vld [vmem:[%s12157_s5 + $0x38] sm:$0xff] }
 0x735   : > { %6375 = vmatmul.msk.f32.gmra.mxu2 %vm2958_vm4, %v13157_v42  ;;  %5574 = vmatpush.msrb.mxu3 %v5433_v46 }
 0x738   : > { %v4282_v7 = vpop.f32.mrf.mxu2 }
 0x739   : > { %v10040_v47 = vpop.f32.mrf.mxu1 }
 0x73c   : > { %4164 = vmatmul.f32.gmra.mxu1 %v9368_v63  ;;  %v10055_v63 = vpop.f32.mrf.mxu3 }
 0x73d   : > { %6376 = vmatmul.msk.f32.gmra.mxu2 %vm2958_vm4, %v13158_v13  ;;  %13161 = vst [vmem:[#allocation101_spill] sm:$0xff] %v10055_v63  ;;  %v13162_v13 = vld [vmem:[#allocation165_spill] sm:$0xff] }
 0x740   : > { %v4284_v51 = vpop.f32.mrf.mxu2 }
 0x741   : > { %v10047_v14 = vpop.f32.mrf.mxu1 }
 0x744   : > { %4167 = vmatmul.f32.gmra.mxu1 %v9391_v58  ;;  %v10064_v19 = vpop.f32.mrf.mxu3 }
 0x745   : > { %6377 = vmatmul.msk.f32.gmra.mxu2 %vm2958_vm4, %v13160_v30  ;;  %13163 = vst [vmem:[#allocation132_spill] sm:$0xff] %v10064_v19  ;;  %v13164_v30 = vld [vmem:[#allocation11_spill] sm:$0xff] }
 0x748   : > { %v4286_v42 = vpop.f32.mrf.mxu2 }
 0x749   : > { %v10057_v7 = vpop.f32.mrf.mxu1 }
 0x74c   : > { %4170 = vmatmul.f32.gmra.mxu1 %v9411_v38  ;;  %v10071_v63 = vpop.f32.mrf.mxu3  ;;  %v13166_v38 = vld [vmem:[#allocation81_spill] sm:$0xff] }
 0x74d   : > { %6378 = vmatmul.msk.f32.gmra.mxu2 %vm2958_vm4, %v13162_v13  ;;  %13165 = vst [vmem:[#allocation25_spill] sm:$0xff] %v10071_v63  ;;  %v2847_v63 = vpop.permute.xlu1 %2846 }
 0x750   : > { %v4288_v51 = vpop.f32.mrf.mxu2 }
 0x751   : > { %v10062_v58 = vpop.f32.mrf.mxu1  ;;  %v2845_v51 = vpop.permute.xlu0 %2844 }
 0x754   : > { %4173 = vmatmul.f32.gmra.mxu1 %v9431_v53  ;;  %v3163_v53 = vsel %vm2958_vm4, %v13117_v21, %v2845_v51  ;;  %v13169_v51 = vld [vmem:[#allocation13_spill] sm:$0xff] }
 0x755   : > { %6379 = vmatmul.msk.f32.gmra.mxu2 %vm2958_vm4, %v13164_v30  ;;  %4018 = vmatmul.f32.gmra.mxu3 %v3163_v53  ;;  %v13167_v30 = vld [vmem:[#allocation168_spill] sm:$0xff] }
 0x758   : > { %v4290_v46 = vpop.f32.mrf.mxu2 }
 0x759   : > { %v10069_v42 = vpop.f32.mrf.mxu1  ;;  %v10086_v46 = vpop.f32.mrf.mxu3 }
 0x75a   : > { %13168 = vst [vmem:[#allocation148_spill] sm:$0xff] %v10086_v46 }
 0x75c   : > { %4176 = vmatmul.f32.gmra.mxu1 %v9451_v44  ;;  %v5432_v44 = vld [vmem:[%s12157_s5 + $0x30] sm:$0xff] }
 0x75d   : > { %6380 = vmatmul.msk.f32.gmra.mxu2 %vm2958_vm4, %v13166_v38  ;;  %5575 = vmatpush.msrb.mxu3 %v5432_v44  ;;  %v2849_v44 = vpop.permute.xlu2 %2848 }
 0x760   : > { %v4292_v13 = vpop.f32.mrf.mxu2 }
 0x761   : > { %v10076_v27 = vpop.f32.mrf.mxu1 }
 0x764   : > { %4179 = vmatmul.f32.gmra.mxu1 %v9475_v34  ;;  %v3164_v34 = vsel %vm2958_vm4, %v13117_v21, %v2847_v63 }
 0x765   : > { %6381 = vmatmul.msk.f32.gmra.mxu2 %vm2958_vm4, %v13167_v30  ;;  %4021 = vmatmul.f32.gmra.mxu3 %v3164_v34  ;;  %v10095_v30 = vpop.f32.mrf.mxu3  ;;  %v2851_v34 = vpop.permute.xlu0 %2850 }
 0x766   : > { %13170 = vst [vmem:[#allocation108_spill] sm:$0xff] %v10095_v30 }
 0x768   : > { %v4294_v38 = vpop.f32.mrf.mxu2 }
 0x769   : > { %v10088_v13 = vpop.f32.mrf.mxu1  ;;  %v13171_v38 = vld [vmem:[#allocation85_spill] sm:$0xff] }
 0x76c   : > { %4182 = vmatmul.f32.gmra.mxu1 %v9495_v56  ;;  %v3165_v56 = vsel %vm2958_vm4, %v13117_v21, %v2849_v44  ;;  %v2853_v44 = vpop.permute.xlu1 %2852 }
 0x76d   : > { %6382 = vmatmul.msk.f32.gmra.mxu2 %vm2958_vm4, %v13169_v51  ;;  %4024 = vmatmul.f32.gmra.mxu3 %v3165_v56  ;;  %v10106_v63 = vpop.f32.mrf.mxu3 }
 0x76e   : > { %13172 = vst [vmem:[#allocation125_spill] sm:$0xff] %v10106_v63  ;;  %v1285_v63 = vlaneseq }
 0x770   : > { %v4296_v53 = vpop.f32.mrf.mxu2 }
 0x771   : > { %v10097_v19 = vpop.f32.mrf.mxu1  ;;  %v13173_v53 = vld [vmem:[#allocation172_spill] sm:$0xff] }
 0x774   : > { %4185 = vmatmul.f32.gmra.mxu1 %v9515_v43  ;;  %v3166_v43 = vsel %vm2958_vm4, %v13117_v21, %v2851_v34  ;;  %v5431_v34 = vld [vmem:[%s12157_s5 + $0x28] sm:$0xff] }
 0x775   : > { %6383 = vmatmul.msk.f32.gmra.mxu2 %vm2958_vm4, %v13171_v38  ;;  %4027 = vmatmul.f32.gmra.mxu3 %v3166_v43  ;;  %v10115_v56 = vpop.f32.mrf.mxu3 }
 0x776   : > { %13174 = vst [vmem:[#allocation141_spill] sm:$0xff] %v10115_v56  ;;  %5576 = vmatpush.msrb.mxu3 %v5431_v34  ;;  %v10127_v56 = vshrl.u32 %v1285_v63, 7 }
 0x778   : > { %v4299_v51 = vpop.f32.mrf.mxu2  ;;  %vm4530_vm5 = vcmp.ge.s32.totalorder %v10127_v56, 4 }
 0x779   : > { %v10104_v46 = vpop.f32.mrf.mxu1  ;;  %v13175_v51 = vld [vmem:[#allocation15_spill] sm:$0xff] }
 0x77c   : > { %4188 = vmatmul.f32.gmra.mxu1 %v9535_v25  ;;  %v3167_v25 = vsel %vm2958_vm4, %v13117_v21, %v2853_v44  ;;  %v13176_v44 = vld [vmem:[#allocation180_spill] sm:$0xff] }
 0x77d   : > { %6384 = vmatmul.msk.f32.gmra.mxu2 %vm2958_vm4, %v13173_v53  ;;  %4029 = vmatmul.f32.gmra.mxu3 %v3167_v25  ;;  %v4091_v53 = vadd.f32 %v9975_v31, %v9364_v6  ;;  %v10137_v6 = vpop.f32.mrf.mxu3  ;;  %v4094_v31 = vadd.f32 %v9982_v24, %v9387_v62  ;;  %v10151_v24 = vadd.s32 16, %v10127_v56 }
 0x77e   : > { %13177 = vst [vmem:[#allocation182_spill] sm:$0xff] %v10137_v6  ;;  %v13178_v6 = vld [vmem:[#allocation173_spill] sm:$0xff] }
 0x77f   : > { %vm4541_vm6 = vcmp.lt.s32.totalorder %v10151_v24, 20 }
 0x780   : > { %v4302_v38 = vpop.f32.mrf.mxu2 }
 0x781   : > { %v10113_v30 = vpop.f32.mrf.mxu1 }
 0x784   : > { %4191 = vmatmul.f32.gmra.mxu1 %v9558_v39 }
 0x785   : > { %6385 = vmatmul.msk.f32.gmra.mxu2 %vm2958_vm4, %v13175_v51  ;;  %v2855_v51 = vpop.permute.xlu2 %2854 }
 0x786   : > { %v3168_v25 = vsel %vm2958_vm4, %v13117_v21, %v2855_v51  ;;  %v2857_v51 = vpop.permute.xlu0 %2856 }
 0x787   : > { %4031 = vmatmul.f32.gmra.mxu3 %v3168_v25  ;;  %v3169_v62 = vsel %vm2958_vm4, %v13117_v21, %v2857_v51 }
 0x788   : > { %v4305_v43 = vpop.f32.mrf.mxu2 }
 0x789   : > { %v4306_v38 = vadd.f32 %v4305_v43, %v4091_v53  ;;  %v10129_v39 = vpop.f32.mrf.mxu1 }
 0x78b   : > { %v4479_v50 = vmax.f32 %v4306_v38, 0.0 }
 0x78c   : > { %4194 = vmatmul.f32.gmra.mxu1 %v9578_v8 }
 0x78d   : > { %6386 = vmatmul.msk.f32.gmra.mxu2 %vm2958_vm4, %v13176_v44  ;;  %v4551_v34 = vsel %vm4530_vm5, %v4479_v50, 0.0  ;;  %v4097_v50 = vadd.f32 %v9987_v2, %v9407_v59  ;;  %v2859_v2 = vpop.permute.xlu1 %2858 }
 0x78e   : > { %v4655_v38 = vrot.slane %v4551_v34, 3  ;;  %v4767_v44 = vrot.slane %v4551_v34, 4  ;;  %v4847_v49 = vrot.slane %v4551_v34, 5  ;;  %v10166_v34 = vpop.f32.mrf.mxu3 }
 0x78f   : > { %4033 = vmatmul.f32.gmra.mxu3 %v3169_v62  ;;  %13181 = vst [vmem:[#allocation152_spill] sm:$0xff] %v10166_v34 }
 0x790   : > { %v4308_v63 = vpop.f32.mrf.mxu2 }
 0x791   : > { %v4309_v53 = vadd.f32 %v4308_v63, %v4094_v31  ;;  %v10143_v8 = vpop.f32.mrf.mxu1 }
 0x793   : > { %v4480_v43 = vmax.f32 %v4309_v53, 0.0 }
 0x794   : > { %4197 = vmatmul.f32.gmra.mxu1 %v9610_v55 }
 0x795   : > { %v4656_v10 = vrot.slane %v4480_v43, 3  ;;  %v4768_v20 = vrot.slane %v4480_v43, 4  ;;  %v4848_v25 = vrot.slane %v4480_v43, 5  ;;  %6387 = vmatmul.msk.f32.gmra.mxu2 %vm2958_vm4, %v13178_v6 }
 0x797   : > { %v10156_v31 = vsel %vm1755_vm2, %v4767_v44, %v4768_v20  ;;  %v10159_v63 = vsel %vm1514_vm3, %v4655_v38, %v4656_v10  ;;  %v10162_v55 = vsel %vm800_vm0, %v4847_v49, %v4848_v25  ;;  %v13182_v49 = vld [vmem:[#allocation17_spill] sm:$0xff]  ;;  %v3170_v44 = vsel %vm2958_vm4, %v13117_v21, %v2859_v2 }
 0x798   : > { %13179 = vst [vmem:[#allocation189_spill] sm:$0xff] %v10156_v31  ;;  %v4311_v6 = vpop.f32.mrf.mxu2  ;;  %5030 = vrot.lane.b32.xlu2 %v10156_v31, %s6755_s17  ;;  %4035 = vmatmul.f32.gmra.mxu3 %v3170_v44  ;;  %v2861_v44 = vpop.permute.xlu2 %2860 }
 0x799   : > { %13180 = vst [vmem:[#allocation130_spill] sm:$0xff] %v10162_v55  ;;  %v4312_v53 = vadd.f32 %v4311_v6, %v4097_v50  ;;  %v10169_v43 = vpop.f32.mrf.mxu1  ;;  %v13183_v6 = vld [vmem:[#allocation143_spill] sm:$0xff] }
 0x79a   : > { %v4100_v31 = vadd.f32 %v9997_v26, %v13183_v6 }
 0x79b   : > { %v4481_v59 = vmax.f32 %v4312_v53, 0.0 }
 0x79c   : > { %4200 = vmatmul.f32.gmra.mxu1 %v9633_v16 }
 0x79d   : > { %v4553_v38 = vsel %vm4541_vm6, %v4481_v59, 0.0  ;;  %6388 = vmatmul.msk.f32.gmra.mxu2 %vm2958_vm4, %v13182_v49 }
 0x79e   : > { %v4658_v51 = vrot.slane %v4553_v38, 3  ;;  %v4770_v62 = vrot.slane %v4553_v38, 4  ;;  %v4850_v50 = vrot.slane %v4553_v38, 5  ;;  %v10193_v38 = vpop.f32.mrf.mxu3 }
 0x79f   : > { %13186 = vst [vmem:[#allocation135_spill] sm:$0xff] %v10193_v38 }
 0x7a0   : > { %v4314_v53 = vpop.f32.mrf.mxu2  ;;  %v10181_v55 = vsel %vm1755_vm2, %v4768_v20, %v4770_v62  ;;  %v10184_v59 = vsel %vm1514_vm3, %v4656_v10, %v4658_v51  ;;  %v10187_v16 = vsel %vm800_vm0, %v4848_v25, %v4850_v50  ;;  %v13187_v20 = vld [vmem:[#allocation90_spill] sm:$0xff]  ;;  %v3171_v10 = vsel %vm2958_vm4, %v13117_v21, %v2861_v44 }
 0x7a1   : > { %13184 = vst [vmem:[#allocation83_spill] sm:$0xff] %v10181_v55  ;;  %v4315_v49 = vadd.f32 %v4314_v53, %v4100_v31  ;;  %5032 = vrot.lane.b32.xlu0 %v10181_v55, %s6755_s17  ;;  %v10191_v2 = vpop.f32.mrf.mxu1  ;;  %4037 = vmatmul.f32.gmra.mxu3 %v3171_v10  ;;  %v4103_v25 = vadd.f32 %v10004_v15, %v9447_v0  ;;  %v2863_v55 = vpop.permute.xlu0 %2862  ;;  %v13189_v0 = vld [vmem:[#allocation175_spill] sm:$0xff] }
 0x7a2   : > { %13185 = vst [vmem:[#allocation28_spill] sm:$0xff] %v10187_v16  ;;  %v3172_v15 = vsel %vm2958_vm4, %v13117_v21, %v2863_v55 }
 0x7a3   : > { %v4482_v26 = vmax.f32 %v4315_v49, 0.0 }
 0x7a4   : > { %4203 = vmatmul.f32.gmra.mxu1 %v9653_v11 }
 0x7a5   : > { %6389 = vmatmul.msk.f32.gmra.mxu2 %vm2958_vm4, %v13187_v20  ;;  %v4554_v51 = vsel %vm4530_vm5, %v4482_v26, 0.0  ;;  %v5430_v26 = vld [vmem:[%s12157_s5 + $0x20] sm:$0xff] }
 0x7a6   : > { %v4660_v53 = vrot.slane %v4554_v51, 3  ;;  %v4772_v11 = vrot.slane %v4554_v51, 4  ;;  %v4852_v49 = vrot.slane %v4554_v51, 5  ;;  %v10206_v20 = vpop.f32.mrf.mxu3  ;;  %5577 = vmatpush.msrb.mxu3 %v5430_v26 }
 0x7a7   : > { %13188 = vst [vmem:[#allocation146_spill] sm:$0xff] %v10206_v20  ;;  %v13198_v20 = vld [vmem:[#allocation49_spill] sm:$0xff] }
 0x7a8   : > { %v4317_v31 = vpop.f32.mrf.mxu2 }
 0x7a9   : > { %v4318_v62 = vadd.f32 %v4317_v31, %v4103_v25  ;;  %v10204_v50 = vpop.f32.mrf.mxu1  ;;  %4039 = vmatmul.f32.gmra.mxu3 %v3172_v15  ;;  %v4106_v25 = vadd.f32 %v10011_v12, %v9471_v37  ;;  %v2865_v15 = vpop.permute.xlu1 %2864  ;;  %v13192_v12 = vld [vmem:[#allocation48_spill] sm:$0xff] }
 0x7ab   : > { %v4483_v6 = vmax.f32 %v4318_v62, 0.0 }
 0x7ac   : > { %4206 = vmatmul.f32.gmra.mxu1 %v9673_v32 }
 0x7ad   : > { %v4661_v16 = vrot.slane %v4483_v6, 3  ;;  %v4773_v44 = vrot.slane %v4483_v6, 4  ;;  %v4853_v10 = vrot.slane %v4483_v6, 5  ;;  %6390 = vmatmul.msk.f32.gmra.mxu2 %vm2958_vm4, %v13189_v0 }
 0x7af   : > { %v10219_v31 = vsel %vm1755_vm2, %v4772_v11, %v4773_v44  ;;  %v10222_v32 = vsel %vm1514_vm3, %v4660_v53, %v4661_v16  ;;  %v10225_v51 = vsel %vm800_vm0, %v4852_v49, %v4853_v10  ;;  %v13193_v11 = vld [vmem:[#allocation19_spill] sm:$0xff]  ;;  %v3173_v53 = vsel %vm2958_vm4, %v13117_v21, %v2865_v15 }
 0x7b0   : > { %13190 = vst [vmem:[#allocation184_spill] sm:$0xff] %v10219_v31  ;;  %v4320_v62 = vpop.f32.mrf.mxu2  ;;  %5034 = vrot.lane.b32.xlu1 %v10219_v31, %s6755_s17 }
 0x7b1   : > { %13191 = vst [vmem:[#allocation113_spill] sm:$0xff] %v10225_v51  ;;  %v4321_v55 = vadd.f32 %v4320_v62, %v4106_v25  ;;  %v10229_v6 = vpop.f32.mrf.mxu1  ;;  %4041 = vmatmul.f32.gmra.mxu3 %v3173_v53  ;;  %v10238_v25 = vpop.f32.mrf.mxu3  ;;  %v13195_v62 = vld [vmem:[#allocation112_spill] sm:$0xff] }
 0x7b2   : > { %13194 = vst [vmem:[#allocation140_spill] sm:$0xff] %v10238_v25  ;;  %v2867_v53 = vpop.permute.xlu2 %2866 }
 0x7b3   : > { %v4484_v0 = vmax.f32 %v4321_v55, 0.0  ;;  %v4109_v55 = vadd.f32 %v10018_v61, %v13195_v62  ;;  %v13199_v61 = vld [vmem:[#allocation185_spill] sm:$0xff] }
 0x7b4   : > { %4209 = vmatmul.f32.gmra.mxu1 %v13192_v12 }
 0x7b5   : > { %v4556_v37 = vsel %vm4541_vm6, %v4484_v0, 0.0  ;;  %6391 = vmatmul.msk.f32.gmra.mxu2 %vm2958_vm4, %v13193_v11 }
 0x7b6   : > { %v4663_v49 = vrot.slane %v4556_v37, 3  ;;  %v4775_v26 = vrot.slane %v4556_v37, 4  ;;  %v4855_v51 = vrot.slane %v4556_v37, 5 }
 0x7b8   : > { %v4323_v31 = vpop.f32.mrf.mxu2  ;;  %v10243_v0 = vsel %vm1755_vm2, %v4773_v44, %v4775_v26  ;;  %v10246_v12 = vsel %vm1514_vm3, %v4661_v16, %v4663_v49  ;;  %v10249_v11 = vsel %vm800_vm0, %v4853_v10, %v4855_v51  ;;  %v3174_v16 = vsel %vm2958_vm4, %v13117_v21, %v2867_v53  ;;  %v5429_v44 = vld [vmem:[%s12157_s5 + $0x18] sm:$0xff]  ;;  %v5428_v10 = vld [vmem:[%s12157_s5 + $0x10] sm:$0xff] }
 0x7b9   : > { %13196 = vst [vmem:[#allocation158_spill] sm:$0xff] %v10243_v0  ;;  %v4324_v15 = vadd.f32 %v4323_v31, %v4109_v55  ;;  %5036 = vrot.lane.b32.xlu2 %v10243_v0, %s6755_s17  ;;  %v10253_v37 = vpop.f32.mrf.mxu1  ;;  %4043 = vmatmul.f32.gmra.mxu3 %v3174_v16  ;;  %v13200_v31 = vld [vmem:[#allocation87_spill] sm:$0xff]  ;;  %v10268_v49 = vpop.f32.mrf.mxu3 }
 0x7ba   : > { %13197 = vst [vmem:[#allocation36_spill] sm:$0xff] %v10249_v11  ;;  %v4112_v51 = vadd.f32 %v10026_v29, %v13200_v31  ;;  %5578 = vmatpush.msrb.mxu3 %v5429_v44  ;;  %v5027_v44 = vpop.permute.xlu0 %5026  ;;  %v5426_v31 = vld [vmem:[%s12157_s5] sm:$0xff] }
 0x7bb   : > { %v4485_v25 = vmax.f32 %v4324_v15, 0.0  ;;  %13201 = vst [vmem:[#allocation149_spill] sm:$0xff] %v10268_v49  ;;  %v5427_v15 = vld [vmem:[%s12157_s5 + $0x8] sm:$0xff]  ;;  %v13204_v11 = vld [vmem:[#allocation38_spill] sm:$0xff] }
 0x7bc   : > { %4212 = vmatmul.f32.gmra.mxu1 %v13198_v20  ;;  %5579 = vmatpush.msrb.mxu3 %v5428_v10  ;;  %v13202_v10 = vld [vmem:[#allocation54_spill] sm:$0xff] }
 0x7bd   : > { %6392 = vmatmul.msk.f32.gmra.mxu2 %vm2958_vm4, %v13199_v61  ;;  %v4557_v26 = vsel %vm4530_vm5, %v4485_v25, 0.0 }
 0x7be   : > { %5580 = vmatpush.msrb.mxu3 %v5427_v15  ;;  %v4665_v61 = vrot.slane %v4557_v26, 3  ;;  %v4777_v16 = vrot.slane %v4557_v26, 4  ;;  %v4857_v29 = vrot.slane %v4557_v26, 5  ;;  %v13205_v15 = vld [vmem:[#allocation167_spill] sm:$0xff] }
 0x7bf   : > { %v4115_v26 = vadd.f32 %v10033_v9, %v13205_v15  ;;  %v5029_v15 = vpop.permute.xlu1 %5028 }
 0x7c0   : > { %v4326_v20 = vpop.f32.mrf.mxu2  ;;  %5581 = vmatpush.msrb.mxu3 %v5426_v31 }
 0x7c1   : > { %v4327_v62 = vadd.f32 %v4326_v20, %v4112_v51  ;;  %v10272_v55 = vpop.f32.mrf.mxu1  ;;  %v13203_v20 = vld [vmem:[#allocation178_spill] sm:$0xff]  ;;  %v10300_v31 = vpop.f32.mrf.mxu3 }
 0x7c2   : > { %13208 = vst [vmem:[#allocation74_spill] sm:$0xff] %v10300_v31 }
 0x7c3   : > { %v4486_v53 = vmax.f32 %v4327_v62, 0.0  ;;  %v5326_v62 = vsel %vm2958_vm4, %v13204_v11, %v5027_v44 }
 0x7c4   : > { %4215 = vmatmul.f32.gmra.mxu1 %v13202_v10  ;;  %5582 = vmatmul.f32.vlgmr.msrb.gmra.mxu3 %v5326_v62  ;;  %v13209_v62 = vld [vmem:[#allocation58_spill] sm:$0xff] }
 0x7c5   : > { %v4666_v0 = vrot.slane %v4486_v53, 3  ;;  %v4778_v25 = vrot.slane %v4486_v53, 4  ;;  %v4858_v51 = vrot.slane %v4486_v53, 5  ;;  %6393 = vmatmul.msk.f32.gmra.mxu2 %vm2958_vm4, %v13203_v20 }
 0x7c7   : > { %v10288_v21 = vsel %vm1755_vm2, %v4777_v16, %v4778_v25  ;;  %v10291_v49 = vsel %vm1514_vm3, %v4665_v61, %v4666_v0  ;;  %v10294_v53 = vsel %vm800_vm0, %v4857_v29, %v4858_v51  ;;  %v13210_v61 = vld [vmem:[#allocation21_spill] sm:$0xff]  ;;  %v5327_v29 = vsel %vm2958_vm4, %v13204_v11, %v5029_v15 }
 0x7c8   : > { %13206 = vst [vmem:[#allocation98_spill] sm:$0xff] %v10288_v21  ;;  %v4329_v10 = vpop.f32.mrf.mxu2  ;;  %5038 = vrot.lane.b32.xlu0 %v10288_v21, %s6755_s17 }
 0x7c9   : > { %13207 = vst [vmem:[#allocation59_spill] sm:$0xff] %v10294_v53  ;;  %v4330_v20 = vadd.f32 %v4329_v10, %v4115_v26  ;;  %v10298_v44 = vpop.f32.mrf.mxu1  ;;  %v13211_v10 = vld [vmem:[#allocation86_spill] sm:$0xff] }
 0x7ca   : > { %v4118_v38 = vadd.f32 %v10040_v47, %v13211_v10  ;;  %v13216_v10 = vld [vmem:[#allocation107_spill] sm:$0xff] }
 0x7cb   : > { %v4487_v9 = vmax.f32 %v4330_v20, 0.0 }
 0x7cc   : > { %4218 = vmatmul.f32.gmra.mxu1 %v13209_v62  ;;  %5585 = vmatmul.f32.gmra.mxu3 %v5327_v29  ;;  %v13215_v29 = vld [vmem:[#allocation60_spill] sm:$0xff] }
 0x7cd   : > { %v4559_v16 = vsel %vm4541_vm6, %v4487_v9, 0.0  ;;  %6394 = vmatmul.msk.f32.gmra.mxu2 %vm2958_vm4, %v13210_v61 }
 0x7ce   : > { %v4668_v53 = vrot.slane %v4559_v16, 3  ;;  %v4780_v21 = vrot.slane %v4559_v16, 4  ;;  %v4860_v26 = vrot.slane %v4559_v16, 5  ;;  %v10324_v16 = vpop.f32.mrf.mxu3 }
 0x7cf   : > { %13214 = vst [vmem:[#allocation72_spill] sm:$0xff] %v10324_v16  ;;  %v13218_v16 = vld [vmem:[#allocation64_spill] sm:$0xff] }
 0x7d0   : > { %v4332_v20 = vpop.f32.mrf.mxu2  ;;  %v10312_v31 = vsel %vm1755_vm2, %v4778_v25, %v4780_v21  ;;  %v10315_v9 = vsel %vm1514_vm3, %v4666_v0, %v4668_v53  ;;  %v10318_v62 = vsel %vm800_vm0, %v4858_v51, %v4860_v26  ;;  %v13217_v21 = vld [vmem:[#allocation10_spill] sm:$0xff] }
 0x7d1   : > { %13212 = vst [vmem:[#allocation151_spill] sm:$0xff] %v10312_v31  ;;  %v4333_v61 = vadd.f32 %v4332_v20, %v4118_v38  ;;  %5040 = vrot.lane.b32.xlu1 %v10312_v31, %s6755_s17  ;;  %v10322_v15 = vpop.f32.mrf.mxu1  ;;  %v4121_v0 = vadd.f32 %v10047_v14, %v13217_v21  ;;  %v13221_v21 = vld [vmem:[#allocation71_spill] sm:$0xff] }
 0x7d2   : > { %13213 = vst [vmem:[#allocation153_spill] sm:$0xff] %v10318_v62 }
 0x7d3   : > { %v4488_v47 = vmax.f32 %v4333_v61, 0.0 }
 0x7d4   : > { %4221 = vmatmul.f32.gmra.mxu1 %v13215_v29 }
 0x7d5   : > { %6395 = vmatmul.msk.f32.gmra.mxu2 %vm2958_vm4, %v13216_v10  ;;  %v4560_v38 = vsel %vm4530_vm5, %v4488_v47, 0.0  ;;  %v13219_v10 = vld [vmem:[#allocation181_spill] sm:$0xff]  ;;  %v4124_v47 = vadd.f32 %v10057_v7, %v13221_v21 }
 0x7d6   : > { %v4670_v20 = vrot.slane %v4560_v38, 3  ;;  %v4782_v31 = vrot.slane %v4560_v38, 4  ;;  %v4862_v11 = vrot.slane %v4560_v38, 5  ;;  %v10338_v14 = vpop.f32.mrf.mxu3  ;;  %v13224_v21 = vld [vmem:[#allocation65_spill] sm:$0xff] }
 0x7d7   : > { %13220 = vst [vmem:[#allocation156_spill] sm:$0xff] %v10338_v14 }
 0x7d8   : > { %v4335_v25 = vpop.f32.mrf.mxu2 }
 0x7d9   : > { %v4336_v51 = vadd.f32 %v4335_v25, %v4121_v0  ;;  %v10333_v53 = vpop.f32.mrf.mxu1 }
 0x7db   : > { %v4489_v26 = vmax.f32 %v4336_v51, 0.0 }
 0x7dc   : > { %4224 = vmatmul.f32.gmra.mxu1 %v13218_v16 }
 0x7dd   : > { %v4671_v61 = vrot.slane %v4489_v26, 3  ;;  %v4783_v62 = vrot.slane %v4489_v26, 4  ;;  %v4863_v29 = vrot.slane %v4489_v26, 5  ;;  %6396 = vmatmul.msk.f32.gmra.mxu2 %vm2958_vm4, %v13219_v10 }
 0x7de   : > { %v4019_v34 = vpop.f32.mrf.mxu3 }
 0x7df   : > { %v10343_v0 = vsel %vm1755_vm2, %v4782_v31, %v4783_v62  ;;  %v10346_v25 = vsel %vm1514_vm3, %v4670_v20, %v4671_v61  ;;  %v10349_v38 = vsel %vm800_vm0, %v4862_v11, %v4863_v29  ;;  %v13225_v31 = vld [vmem:[#allocation22_spill] sm:$0xff] }
 0x7e0   : > { %13222 = vst [vmem:[#allocation75_spill] sm:$0xff] %v10343_v0  ;;  %v4338_v51 = vpop.f32.mrf.mxu2  ;;  %5042 = vrot.lane.b32.xlu2 %v10343_v0, %s6755_s17 }
 0x7e1   : > { %13223 = vst [vmem:[#allocation161_spill] sm:$0xff] %v10349_v38  ;;  %v4339_v16 = vadd.f32 %v4338_v51, %v4124_v47  ;;  %v10353_v26 = vpop.f32.mrf.mxu1  ;;  %v4127_v38 = vadd.f32 %v10062_v58, %v9629_v48  ;;  %v13230_v48 = vld [vmem:[#allocation188_spill] sm:$0xff]  ;;  %v13231_v58 = vld [vmem:[#allocation157_spill] sm:$0xff] }
 0x7e2   : > { %v4130_v34 = vadd.f32 %v10069_v42, %v13231_v58  ;;  %v13232_v58 = vld [vmem:[#allocation73_spill] sm:$0xff] }
 0x7e3   : > { %v4490_v10 = vmax.f32 %v4339_v16, 0.0 }
 0x7e4   : > { %4227 = vmatmul.f32.gmra.mxu1 %v13224_v21 }
 0x7e5   : > { %v4562_v7 = vsel %vm4541_vm6, %v4490_v10, 0.0  ;;  %6397 = vmatmul.msk.f32.gmra.mxu2 %vm2958_vm4, %v13225_v31  ;;  %v13229_v31 = vld [vmem:[#allocation70_spill] sm:$0xff] }
 0x7e6   : > { %v4673_v20 = vrot.slane %v4562_v7, 3  ;;  %v4785_v14 = vrot.slane %v4562_v7, 4  ;;  %v4865_v11 = vrot.slane %v4562_v7, 5 }
 0x7e8   : > { %v4341_v0 = vpop.f32.mrf.mxu2  ;;  %v10363_v47 = vsel %vm1755_vm2, %v4783_v62, %v4785_v14  ;;  %v10366_v51 = vsel %vm1514_vm3, %v4671_v61, %v4673_v20  ;;  %v10369_v16 = vsel %vm800_vm0, %v4863_v29, %v4865_v11  ;;  %v4022_v14 = vpop.f32.mrf.mxu3 }
 0x7e9   : > { %13226 = vst [vmem:[#allocation160_spill] sm:$0xff] %v10363_v47  ;;  %v4342_v10 = vadd.f32 %v4341_v0, %v4127_v38  ;;  %5044 = vrot.lane.b32.xlu0 %v10363_v47, %s6755_s17  ;;  %v10373_v21 = vpop.f32.mrf.mxu1 }
 0x7ea   : > { %13227 = vst [vmem:[#allocation52_spill] sm:$0xff] %v10369_v16 }
 0x7eb   : > { %13228 = vst [vmem:[#allocation42_spill] sm:$0xff] %v10373_v21  ;;  %v4491_v7 = vmax.f32 %v4342_v10, 0.0  ;;  %v13233_v21 = vld [vmem:[#allocation183_spill] sm:$0xff] }
 0x7ec   : > { %4230 = vmatmul.f32.gmra.mxu1 %v13229_v31 }
 0x7ed   : > { %6398 = vmatmul.msk.f32.gmra.mxu2 %vm2958_vm4, %v13230_v48  ;;  %v4563_v61 = vsel %vm4530_vm5, %v4491_v7, 0.0  ;;  %v4133_v7 = vadd.f32 %v10076_v27, %v9669_v41  ;;  %v13236_v27 = vld [vmem:[#allocation79_spill] sm:$0xff] }
 0x7ee   : > { %v4675_v10 = vrot.slane %v4563_v61, 3  ;;  %v4787_v31 = vrot.slane %v4563_v61, 4  ;;  %v4867_v48 = vrot.slane %v4563_v61, 5 }
 0x7f0   : > { %v4344_v62 = vpop.f32.mrf.mxu2 }
 0x7f1   : > { %v4345_v29 = vadd.f32 %v4344_v62, %v4130_v34  ;;  %v10382_v0 = vpop.f32.mrf.mxu1 }
 0x7f2   : > { %v5031_v38 = vpop.permute.xlu2 %5030 }
 0x7f3   : > { %v4492_v20 = vmax.f32 %v4345_v29, 0.0  ;;  %v5328_v11 = vsel %vm2958_vm4, %v10159_v63, %v5031_v38  ;;  %v4025_v38 = vpop.f32.mrf.mxu3 }
 0x7f4   : > { %5588 = vmatmul.f32.gmra.mxu3 %v5328_v11  ;;  %4233 = vmatmul.f32.gmra.mxu1 %v13232_v58  ;;  %v13237_v11 = vld [vmem:[#allocation23_spill] sm:$0xff]  ;;  %v4136_v58 = vadd.f32 %v10088_v13, %v9688_v1  ;;  %v13240_v1 = vld [vmem:[#allocation190_spill] sm:$0xff]  ;;  %v4139_v13 = vadd.f32 %v10097_v19, %v9703_v52  ;;  %v4142_v52 = vadd.f32 %v10104_v46, %v9718_v57 }
 0x7f5   : > { %v4676_v47 = vrot.slane %v4492_v20, 3  ;;  %v4788_v16 = vrot.slane %v4492_v20, 4  ;;  %v4868_v42 = vrot.slane %v4492_v20, 5  ;;  %6399 = vmatmul.msk.f32.gmra.mxu2 %vm2958_vm4, %v13233_v21 }
 0x7f7   : > { %v10392_v34 = vsel %vm1755_vm2, %v4787_v31, %v4788_v16  ;;  %v10395_v62 = vsel %vm1514_vm3, %v4675_v10, %v4676_v47  ;;  %v10398_v29 = vsel %vm800_vm0, %v4867_v48, %v4868_v42 }
 0x7f8   : > { %13234 = vst [vmem:[#allocation170_spill] sm:$0xff] %v10392_v34  ;;  %v4347_v61 = vpop.f32.mrf.mxu2  ;;  %5046 = vrot.lane.b32.xlu1 %v10392_v34, %s6755_s17 }
 0x7f9   : > { %13235 = vst [vmem:[#allocation39_spill] sm:$0xff] %v10398_v29  ;;  %v4348_v14 = vadd.f32 %v4347_v61, %v4133_v7  ;;  %v10402_v20 = vpop.f32.mrf.mxu1  ;;  %v13241_v29 = vld [vmem:[#allocation89_spill] sm:$0xff] }
 0x7fb   : > { %v4493_v21 = vmax.f32 %v4348_v14, 0.0 }
 0x7fc   : > { %4236 = vmatmul.f32.gmra.mxu1 %v13236_v27 }
 0x7fd   : > { %v4565_v41 = vsel %vm4541_vm6, %v4493_v21, 0.0  ;;  %6400 = vmatmul.msk.f32.gmra.mxu2 %vm2958_vm4, %v13237_v11  ;;  %v4028_v21 = vpop.f32.mrf.mxu3  ;;  %v13239_v11 = vld [vmem:[#allocation84_spill] sm:$0xff] }
 0x7fe   : > { %v4678_v10 = vrot.slane %v4565_v41, 3  ;;  %v4790_v31 = vrot.slane %v4565_v41, 4  ;;  %v4870_v48 = vrot.slane %v4565_v41, 5 }
 0x800   : > { %v4350_v34 = vpop.f32.mrf.mxu2  ;;  %v10412_v7 = vsel %vm1755_vm2, %v4788_v16, %v4790_v31  ;;  %v10415_v61 = vsel %vm1514_vm3, %v4676_v47, %v4678_v10  ;;  %v10418_v14 = vsel %vm800_vm0, %v4868_v42, %v4870_v48 }
 0x801   : > { %13238 = vst [vmem:[#allocation164_spill] sm:$0xff] %v10412_v7  ;;  %v4351_v38 = vadd.f32 %v4350_v34, %v4136_v58  ;;  %5048 = vrot.lane.b32.xlu2 %v10412_v7, %s6755_s17  ;;  %v10422_v27 = vpop.f32.mrf.mxu1 }
 0x803   : > { %v4494_v41 = vmax.f32 %v4351_v38, 0.0 }
 0x804   : > { %4239 = vmatmul.f32.gmra.mxu1 %v13239_v11 }
 0x805   : > { %6401 = vmatmul.msk.f32.gmra.mxu2 %vm2958_vm4, %v13240_v1  ;;  %v4566_v16 = vsel %vm4530_vm5, %v4494_v41, 0.0  ;;  %v4030_v34 = vpop.f32.mrf.mxu3  ;;  %v13242_v1 = vld [vmem:[#allocation186_spill] sm:$0xff] }
 0x806   : > { %v4680_v48 = vrot.slane %v4566_v16, 3  ;;  %v4792_v58 = vrot.slane %v4566_v16, 4  ;;  %v4872_v38 = vrot.slane %v4566_v16, 5 }
 0x808   : > { %v4353_v47 = vpop.f32.mrf.mxu2 }
 0x809   : > { %v4354_v42 = vadd.f32 %v4353_v47, %v4139_v13  ;;  %v10431_v10 = vpop.f32.mrf.mxu1 }
 0x80b   : > { %v4495_v31 = vmax.f32 %v4354_v42, 0.0 }
 0x80c   : > { %4242 = vmatmul.f32.gmra.mxu1 %v13241_v29 }
 0x80d   : > { %v4681_v21 = vrot.slane %v4495_v31, 3  ;;  %v4793_v11 = vrot.slane %v4495_v31, 4  ;;  %v4873_v7 = vrot.slane %v4495_v31, 5  ;;  %6402 = vmatmul.msk.f32.gmra.mxu2 %vm2958_vm4, %v13242_v1  ;;  %v4032_v16 = vpop.f32.mrf.mxu3 }
 0x80f   : > { %v10439_v19 = vsel %vm1755_vm2, %v4792_v58, %v4793_v11  ;;  %v10442_v41 = vsel %vm1514_vm3, %v4680_v48, %v4681_v21  ;;  %v10445_v13 = vsel %vm800_vm0, %v4872_v38, %v4873_v7  ;;  %v13244_v48 = vld [vmem:[#allocation93_spill] sm:$0xff]  ;;  %v13245_v58 = vld [vmem:[#allocation24_spill] sm:$0xff] }
 0x810   : > { %13243 = vst [vmem:[#allocation33_spill] sm:$0xff] %v10439_v19  ;;  %v4356_v47 = vpop.f32.mrf.mxu2  ;;  %5050 = vrot.lane.b32.xlu0 %v10439_v19, %s6755_s17 }
 0x811   : > { %v4357_v29 = vadd.f32 %v4356_v47, %v4142_v52  ;;  %v10449_v42 = vpop.f32.mrf.mxu1  ;;  %v5497_v52 = vld [vmem:[%s12157_s5 + $0x238] sm:$0xff]  ;;  %v4145_v47 = vadd.f32 %v10113_v30, %v9733_v36  ;;  %v13249_v30 = vld [vmem:[#allocation192_spill] sm:$0xff] }
 0x812   : > { %6026 = vmatpush.msra.mxu1 %v5497_v52  ;;  %v13248_v36 = vld [vmem:[#allocation97_spill] sm:$0xff] }
 0x813   : > { %v4496_v34 = vmax.f32 %v4357_v29, 0.0  ;;  %v5033_v31 = vpop.permute.xlu0 %5032 }
 0x814   : > { %v5329_v57 = vsel %vm2958_vm4, %v10184_v59, %v5033_v31  ;;  %4244 = vmatmul.f32.gmra.mxu1 %v13244_v48 }
 0x815   : > { %v4568_v46 = vsel %vm4541_vm6, %v4496_v34, 0.0  ;;  %6403 = vmatmul.msk.f32.gmra.mxu2 %vm2958_vm4, %v13245_v58  ;;  %5591 = vmatmul.f32.gmra.mxu3 %v5329_v57  ;;  %v4034_v57 = vpop.f32.mrf.mxu3 }
 0x816   : > { %v4683_v38 = vrot.slane %v4568_v46, 3  ;;  %v4795_v1 = vrot.slane %v4568_v46, 4  ;;  %v4875_v19 = vrot.slane %v4568_v46, 5 }
 0x818   : > { %v4359_v29 = vpop.f32.mrf.mxu2  ;;  %v10464_v16 = vsel %vm1755_vm2, %v4793_v11, %v4795_v1  ;;  %v10467_v34 = vsel %vm1514_vm3, %v4681_v21, %v4683_v38  ;;  %v10470_v31 = vsel %vm800_vm0, %v4873_v7, %v4875_v19  ;;  %v4148_v21 = vadd.f32 %v10129_v39, %v9748_v17 }
 0x819   : > { %13246 = vst [vmem:[#allocation41_spill] sm:$0xff] %v10464_v16  ;;  %v4360_v46 = vadd.f32 %v4359_v29, %v4145_v47  ;;  %5052 = vrot.lane.b32.xlu1 %v10464_v16, %s6755_s17  ;;  %v10474_v48 = vpop.f32.mrf.mxu1  ;;  %v13251_v16 = vld [vmem:[#allocation187_spill] sm:$0xff] }
 0x81a   : > { %13247 = vst [vmem:[#allocation27_spill] sm:$0xff] %v10470_v31 }
 0x81b   : > { %v4497_v58 = vmax.f32 %v4360_v46, 0.0 }
 0x81c   : > { %4246 = vmatmul.f32.gmra.mxu1 %v13248_v36 }
 0x81d   : > { %6404 = vmatmul.msk.f32.gmra.mxu2 %vm2958_vm4, %v13249_v30  ;;  %v4569_v7 = vsel %vm4530_vm5, %v4497_v58, 0.0  ;;  %v4036_v38 = vpop.f32.mrf.mxu3  ;;  %v4151_v58 = vadd.f32 %v10143_v8, %v9763_v23 }
 0x81e   : > { %v4685_v46 = vrot.slane %v4569_v7, 3  ;;  %v4797_v57 = vrot.slane %v4569_v7, 4  ;;  %v4877_v36 = vrot.slane %v4569_v7, 5  ;;  %v5037_v38 = vpop.permute.xlu2 %5036 }
 0x81f   : > { %v10509_v23 = vsel %vm2958_vm4, %v10246_v12, %v5037_v38 }
 0x820   : > { %v4362_v11 = vpop.f32.mrf.mxu2  ;;  %13253 = vst [vmem:[#allocation4_spill] sm:$0xff] %v10509_v23 }
 0x821   : > { %v4363_v19 = vadd.f32 %v4362_v11, %v4148_v21  ;;  %v10483_v1 = vpop.f32.mrf.mxu1 }
 0x822   : > { %v5035_v52 = vpop.permute.xlu1 %5034 }
 0x823   : > { %v4498_v47 = vmax.f32 %v4363_v19, 0.0  ;;  %v10487_v29 = vsel %vm2958_vm4, %v10222_v32, %v5035_v52 }
 0x824   : > { %13250 = vst [vmem:[#allocation44_spill] sm:$0xff] %v10487_v29  ;;  %5594 = vmatmul.f32.gmra.mxu3 %v10487_v29 }
 0x825   : > { %v4686_v17 = vrot.slane %v4498_v47, 3  ;;  %v4798_v39 = vrot.slane %v4498_v47, 4  ;;  %v4878_v30 = vrot.slane %v4498_v47, 5  ;;  %6405 = vmatmul.msk.f32.gmra.mxu2 %vm2958_vm4, %v13251_v16  ;;  %v4038_v47 = vpop.f32.mrf.mxu3 }
 0x827   : > { %v10495_v21 = vsel %vm1755_vm2, %v4797_v57, %v4798_v39  ;;  %v10498_v11 = vsel %vm1514_vm3, %v4685_v46, %v4686_v17  ;;  %v10501_v19 = vsel %vm800_vm0, %v4877_v36, %v4878_v30 }
 0x828   : > { %13252 = vst [vmem:[#allocation30_spill] sm:$0xff] %v10495_v21  ;;  %v4365_v7 = vpop.f32.mrf.mxu2  ;;  %5054 = vrot.lane.b32.xlu2 %v10495_v21, %s6755_s17 }
 0x829   : > { %v4366_v52 = vadd.f32 %v4365_v7, %v4151_v58  ;;  %v10505_v16 = vpop.f32.mrf.mxu1  ;;  %v4154_v58 = vadd.f32 %v10169_v43, %v9781_v28  ;;  %v4157_v28 = vadd.f32 %v10191_v2, %v9796_v35 }
 0x82b   : > { %v4499_v29 = vmax.f32 %v4366_v52, 0.0 }
 0x82c   : > { %5597 = vmatmul.f32.gmra.mxu3 %v10509_v23 }
 0x82d   : > { %v4571_v8 = vsel %vm4541_vm6, %v4499_v29, 0.0  ;;  %6406 = vmatmul.msk.f32.gmra.mxu2 %vm2958_vm4, %v13033_v4  ;;  %v4040_v4 = vpop.f32.mrf.mxu3 }
 0x82e   : > { %v4688_v46 = vrot.slane %v4571_v8, 3  ;;  %v4800_v57 = vrot.slane %v4571_v8, 4  ;;  %v4880_v36 = vrot.slane %v4571_v8, 5 }
 0x830   : > { %v4368_v7 = vpop.f32.mrf.mxu2  ;;  %v10519_v52 = vsel %vm1755_vm2, %v4798_v39, %v4800_v57  ;;  %v10522_v38 = vsel %vm1514_vm3, %v4686_v17, %v4688_v46  ;;  %v10525_v47 = vsel %vm800_vm0, %v4878_v30, %v4880_v36 }
 0x831   : > { %13254 = vst [vmem:[#allocation40_spill] sm:$0xff] %v10519_v52  ;;  %v4369_v29 = vadd.f32 %v4368_v7, %v4154_v58  ;;  %5056 = vrot.lane.b32.xlu0 %v10519_v52, %s6755_s17  ;;  %v10529_v23 = vpop.f32.mrf.mxu1 }
 0x833   : > { %v4500_v8 = vmax.f32 %v4369_v29, 0.0 }
 0x835   : > { %6407 = vmatmul.msk.f32.gmra.mxu2 %vm2958_vm4, %v13037_v54  ;;  %v4572_v17 = vsel %vm4530_vm5, %v4500_v8, 0.0  ;;  %v4042_v30 = vpop.f32.mrf.mxu3  ;;  %v4160_v8 = vadd.f32 %v10204_v50, %v9811_v3 }
 0x836   : > { %v4690_v7 = vrot.slane %v4572_v17, 3  ;;  %v4802_v29 = vrot.slane %v4572_v17, 4  ;;  %v4882_v54 = vrot.slane %v4572_v17, 5  ;;  %v13258_v17 = vld [vmem:[#allocation111_spill] sm:$0xff] }
 0x838   : > { %v4371_v43 = vpop.f32.mrf.mxu2 }
 0x839   : > { %v4372_v39 = vadd.f32 %v4371_v43, %v4157_v28  ;;  %v10537_v46 = vpop.f32.mrf.mxu1 }
 0x83a   : > { %v5039_v57 = vpop.permute.xlu0 %5038 }
 0x83b   : > { %v4501_v36 = vmax.f32 %v4372_v39, 0.0  ;;  %v10541_v58 = vsel %vm2958_vm4, %v10291_v49, %v5039_v57 }
 0x83c   : > { %13255 = vst [vmem:[#allocation32_spill] sm:$0xff] %v10541_v58  ;;  %5600 = vmatmul.f32.gmra.mxu3 %v10541_v58 }
 0x83d   : > { %v4691_v35 = vrot.slane %v4501_v36, 3  ;;  %v4803_v2 = vrot.slane %v4501_v36, 4  ;;  %v4883_v4 = vrot.slane %v4501_v36, 5  ;;  %6408 = vmatmul.msk.f32.gmra.mxu2 %vm2958_vm4, %v13043_v40  ;;  %v10562_v40 = vld [vmem:[%s12156_s4] ss:$0 sm:$0xff]  ;;  %v4044_v57 = vpop.f32.mrf.mxu3 }
 0x83e   : > { %v3518_v3 = vadd.f32 %v10562_v40, %v13258_v17 }
 0x83f   : > { %v10549_v28 = vsel %vm1755_vm2, %v4802_v29, %v4803_v2  ;;  %v10552_v43 = vsel %vm1514_vm3, %v4690_v7, %v4691_v35  ;;  %v10555_v39 = vsel %vm800_vm0, %v4882_v54, %v4883_v4  ;;  %v13259_v7 = vld [vmem:[#allocation123_spill] sm:$0xff] }
 0x840   : > { %13256 = vst [vmem:[#allocation46_spill] sm:$0xff] %v10549_v28  ;;  %v4374_v30 = vpop.f32.mrf.mxu2  ;;  %5058 = vrot.lane.b32.xlu1 %v10549_v28, %s6755_s17  ;;  %v3733_v29 = vadd.f32 %v13259_v7, %v3518_v3  ;;  %v13262_v7 = vld [vmem:[#allocation147_spill] sm:$0xff] }
 0x841   : > { %13257 = vst [vmem:[#allocation35_spill] sm:$0xff] %v10555_v39  ;;  %v4375_v50 = vadd.f32 %v4374_v30, %v4160_v8  ;;  %v10566_v36 = vpop.f32.mrf.mxu1 }
 0x842   : > { %v3948_v28 = vadd.f32 %v9980_v60, %v3733_v29  ;;  %v5043_v29 = vpop.permute.xlu2 %5042 }
 0x843   : > { %v4502_v54 = vmax.f32 %v4375_v50, 0.0  ;;  %v5041_v58 = vpop.permute.xlu1 %5040 }
 0x844   : > { %v10571_v52 = vsel %vm2958_vm4, %v10315_v9, %v5041_v58  ;;  %v4163_v3 = vadd.f32 %v10229_v6, %v3948_v28  ;;  %v13263_v6 = vld [vmem:[#allocation104_spill] sm:$0xff] }
 0x845   : > { %13260 = vst [vmem:[#allocation145_spill] sm:$0xff] %v10571_v52  ;;  %v4574_v21 = vsel %vm4541_vm6, %v4502_v54, 0.0  ;;  %6409 = vmatmul.msk.f32.gmra.mxu2 %vm2958_vm4, %v13049_v45  ;;  %5603 = vmatmul.f32.gmra.mxu3 %v10571_v52  ;;  %v3521_v45 = vadd.f32 %v10562_v40, %v13262_v7  ;;  %v13266_v52 = vld [vmem:[#allocation31_spill] sm:$0xff] }
 0x846   : > { %v4693_v8 = vrot.slane %v4574_v21, 3  ;;  %v4805_v30 = vrot.slane %v4574_v21, 4  ;;  %v4885_v17 = vrot.slane %v4574_v21, 5 }
 0x847   : > { %v3736_v28 = vadd.f32 %v13263_v6, %v3521_v45 }
 0x848   : > { %v4377_v50 = vpop.f32.mrf.mxu2  ;;  %v10581_v57 = vsel %vm1755_vm2, %v4803_v2, %v4805_v30  ;;  %v10584_v58 = vsel %vm1514_vm3, %v4691_v35, %v4693_v8  ;;  %v10587_v60 = vsel %vm800_vm0, %v4883_v4, %v4885_v17  ;;  %v10598_v2 = vsel %vm2958_vm4, %v10346_v25, %v5043_v29  ;;  %v5457_v8 = vld [vmem:[%s12157_s5 + $0xf8] sm:$0xff]  ;;  %v13265_v17 = vld [vmem:[#allocation78_spill] sm:$0xff] }
 0x849   : > { %13261 = vst [vmem:[#allocation45_spill] sm:$0xff] %v10581_v57  ;;  %v4378_v54 = vadd.f32 %v4377_v50, %v4163_v3  ;;  %5060 = vrot.lane.b32.xlu2 %v10581_v57, %s6755_s17  ;;  %v10593_v21 = vpop.f32.mrf.mxu1  ;;  %v3951_v35 = vadd.f32 %v9989_v18, %v3736_v28  ;;  %5679 = vmatpush.msra.mxu3 %v5457_v8  ;;  %v13279_v57 = vld [vmem:[#allocation62_spill] sm:$0xff] }
 0x84a   : > { %13264 = vst [vmem:[#allocation34_spill] sm:$0xff] %v10598_v2  ;;  %v3524_v3 = vadd.f32 %v10562_v40, %v13265_v17 }
 0x84b   : > { %v4503_v4 = vmax.f32 %v4378_v54, 0.0  ;;  %v4166_v30 = vadd.f32 %v10253_v37, %v3951_v35 }
 0x84c   : > { %v3739_v45 = vadd.f32 %v9664_v5, %v3524_v3  ;;  %v13269_v3 = vld [vmem:[#allocation95_spill] sm:$0xff] }
 0x84d   : > { %6410 = vmatmul.msk.f32.gmra.mxu2 %vm2958_vm4, %v13055_v22  ;;  %5606 = vmatmul.f32.gmra.mxu3 %v10598_v2  ;;  %v4575_v18 = vsel %vm4530_vm5, %v4503_v4, 0.0 }
 0x84e   : > { %v3954_v54 = vadd.f32 %v9999_v33, %v3739_v45  ;;  %v4695_v6 = vrot.slane %v4575_v18, 3  ;;  %v4807_v28 = vrot.slane %v4575_v18, 4  ;;  %v4887_v8 = vrot.slane %v4575_v18, 5 }
 0x850   : > { %v4380_v50 = vpop.f32.mrf.mxu2  ;;  %v4169_v17 = vadd.f32 %v10272_v55, %v3954_v54  ;;  %v13270_v55 = vld [vmem:[#allocation88_spill] sm:$0xff] }
 0x851   : > { %v4381_v7 = vadd.f32 %v4380_v50, %v4166_v30  ;;  %v10613_v22 = vpop.f32.mrf.mxu1  ;;  %v3527_v50 = vadd.f32 %v10562_v40, %v13269_v3 }
 0x853   : > { %v4504_v29 = vmax.f32 %v4381_v7, 0.0  ;;  %v3742_v7 = vadd.f32 %v13270_v55, %v3527_v50  ;;  %v5456_v50 = vld [vmem:[%s12157_s5 + $0xf0] sm:$0xff] }
 0x854   : > { %5680 = vmatpush.msra.mxu3 %v5456_v50 }
 0x855   : > { %v4696_v2 = vrot.slane %v4504_v29, 3  ;;  %v4808_v37 = vrot.slane %v4504_v29, 4  ;;  %v4888_v35 = vrot.slane %v4504_v29, 5  ;;  %6411 = vmatmul.msk.f32.gmra.mxu2 %vm2958_vm4, %v13266_v52 }
 0x857   : > { %v10620_v4 = vsel %vm1755_vm2, %v4807_v28, %v4808_v37  ;;  %v10623_v5 = vsel %vm1514_vm3, %v4695_v6, %v4696_v2  ;;  %v10626_v30 = vsel %vm800_vm0, %v4887_v8, %v4888_v35  ;;  %v13272_v6 = vld [vmem:[#allocation191_spill] sm:$0xff] }
 0x858   : > { %13267 = vst [vmem:[#allocation43_spill] sm:$0xff] %v10620_v4  ;;  %v4383_v33 = vpop.f32.mrf.mxu2  ;;  %5062 = vrot.lane.b32.xlu0 %v10620_v4, %s6755_s17  ;;  %v3957_v28 = vadd.f32 %v13272_v6, %v3742_v7  ;;  %v13273_v4 = vld [vmem:[#allocation37_spill] sm:$0xff]  ;;  %v13276_v6 = vld [vmem:[#allocation94_spill] sm:$0xff] }
 0x859   : > { %13268 = vst [vmem:[#allocation6_spill] sm:$0xff] %v10626_v30  ;;  %v4384_v18 = vadd.f32 %v4383_v33, %v4169_v17  ;;  %v10632_v52 = vpop.f32.mrf.mxu1 }
 0x85a   : > { %v4172_v55 = vadd.f32 %v10298_v44, %v3957_v28  ;;  %v13277_v28 = vld [vmem:[#allocation129_spill] sm:$0xff] }
 0x85b   : > { %v4505_v45 = vmax.f32 %v4384_v18, 0.0  ;;  %v5045_v29 = vpop.permute.xlu0 %5044  ;;  %v5496_v18 = vld [vmem:[%s12157_s5 + $0x230] sm:$0xff] }
 0x85c   : > { %v10637_v54 = vsel %vm2958_vm4, %v10366_v51, %v5045_v29  ;;  %6027 = vmatpush.msra.mxu1 %v5496_v18  ;;  %v13278_v18 = vld [vmem:[#allocation77_spill] sm:$0xff] }
 0x85d   : > { %13271 = vst [vmem:[#allocation51_spill] sm:$0xff] %v10637_v54  ;;  %v4577_v8 = vsel %vm4541_vm6, %v4505_v45, 0.0  ;;  %6412 = vmatmul.msk.f32.gmra.mxu2 %vm2958_vm4, %v13273_v4  ;;  %5609 = vmatmul.f32.gmra.mxu3 %v10637_v54 }
 0x85e   : > { %v4698_v17 = vrot.slane %v4577_v8, 3  ;;  %v4810_v33 = vrot.slane %v4577_v8, 4  ;;  %v4890_v3 = vrot.slane %v4577_v8, 5  ;;  %v3530_v8 = vadd.f32 %v10562_v40, %v13276_v6  ;;  %v13281_v6 = vld [vmem:[#allocation110_spill] sm:$0xff] }
 0x860   : > { %v4386_v7 = vpop.f32.mrf.mxu2  ;;  %v10653_v4 = vsel %vm1755_vm2, %v4808_v37, %v4810_v33  ;;  %v10656_v45 = vsel %vm1514_vm3, %v4696_v2, %v4698_v17  ;;  %v10659_v29 = vsel %vm800_vm0, %v4888_v35, %v4890_v3  ;;  %v3745_v50 = vadd.f32 %v13277_v28, %v3530_v8  ;;  %v13280_v35 = vld [vmem:[#allocation12_spill] sm:$0xff] }
 0x861   : > { %13274 = vst [vmem:[#allocation50_spill] sm:$0xff] %v10653_v4  ;;  %v4387_v54 = vadd.f32 %v4386_v7, %v4172_v55  ;;  %5064 = vrot.lane.b32.xlu1 %v10653_v4, %s6755_s17  ;;  %v10665_v44 = vpop.f32.mrf.mxu1  ;;  %v3533_v17 = vadd.f32 %v10562_v40, %v13280_v35 }
 0x862   : > { %13275 = vst [vmem:[#allocation47_spill] sm:$0xff] %v10659_v29  ;;  %v3960_v37 = vadd.f32 %v13278_v18, %v3745_v50 }
 0x863   : > { %v4506_v33 = vmax.f32 %v4387_v54, 0.0  ;;  %v3748_v4 = vadd.f32 %v13281_v6, %v3533_v17  ;;  %v5455_v17 = vld [vmem:[%s12157_s5 + $0xe8] sm:$0xff] }
 0x864   : > { %v4175_v2 = vadd.f32 %v10322_v15, %v3960_v37  ;;  %5681 = vmatpush.msra.mxu3 %v5455_v17 }
 0x865   : > { %6413 = vmatmul.msk.f32.gmra.mxu2 %vm2958_vm4, %v13279_v57  ;;  %v4578_v55 = vsel %vm4530_vm5, %v4506_v33, 0.0  ;;  %v13283_v57 = vld [vmem:[#allocation114_spill] sm:$0xff] }
 0x866   : > { %v3963_v15 = vadd.f32 %v13283_v57, %v3748_v4  ;;  %v4700_v50 = vrot.slane %v4578_v55, 3  ;;  %v4812_v18 = vrot.slane %v4578_v55, 4  ;;  %v4892_v37 = vrot.slane %v4578_v55, 5  ;;  %v13287_v57 = vld [vmem:[#allocation162_spill] sm:$0xff] }
 0x868   : > { %v4389_v3 = vpop.f32.mrf.mxu2 }
 0x869   : > { %v4390_v7 = vadd.f32 %v4389_v3, %v4175_v2  ;;  %v10677_v29 = vpop.f32.mrf.mxu1  ;;  %v13284_v3 = vld [vmem:[#allocation99_spill] sm:$0xff] }
 0x86a   : > { %v5047_v8 = vpop.permute.xlu1 %5046 }
 0x86b   : > { %v4507_v28 = vmax.f32 %v4390_v7, 0.0  ;;  %v10681_v54 = vsel %vm2958_vm4, %v10395_v62, %v5047_v8  ;;  %v4178_v7 = vadd.f32 %v10333_v53, %v3963_v15  ;;  %v5049_v8 = vpop.permute.xlu2 %5048  ;;  %v13288_v15 = vld [vmem:[#allocation166_spill] sm:$0xff] }
 0x86c   : > { %13282 = vst [vmem:[#allocation56_spill] sm:$0xff] %v10681_v54  ;;  %5612 = vmatmul.f32.gmra.mxu3 %v10681_v54  ;;  %v3536_v54 = vadd.f32 %v10562_v40, %v13287_v57 }
 0x86d   : > { %v4701_v35 = vrot.slane %v4507_v28, 3  ;;  %v4813_v33 = vrot.slane %v4507_v28, 4  ;;  %v4893_v2 = vrot.slane %v4507_v28, 5  ;;  %6414 = vmatmul.msk.f32.gmra.mxu2 %vm2958_vm4, %v13284_v3 }
 0x86f   : > { %v10692_v6 = vsel %vm1755_vm2, %v4812_v18, %v4813_v33  ;;  %v10695_v4 = vsel %vm1514_vm3, %v4700_v50, %v4701_v35  ;;  %v10698_v55 = vsel %vm800_vm0, %v4892_v37, %v4893_v2  ;;  %v3751_v18 = vadd.f32 %v13288_v15, %v3536_v54  ;;  %v13290_v37 = vld [vmem:[#allocation137_spill] sm:$0xff] }
 0x870   : > { %13285 = vst [vmem:[#allocation55_spill] sm:$0xff] %v10692_v6  ;;  %v4392_v28 = vpop.f32.mrf.mxu2  ;;  %5066 = vrot.lane.b32.xlu2 %v10692_v6, %s6755_s17  ;;  %v10707_v50 = vsel %vm2958_vm4, %v10415_v61, %v5049_v8 }
 0x871   : > { %13286 = vst [vmem:[#allocation2_spill] sm:$0xff] %v10698_v55  ;;  %v4393_v39 = vadd.f32 %v4392_v28, %v4178_v7  ;;  %v4234_v53 = vpop.f32.mrf.mxu1  ;;  %v3966_v17 = vadd.f32 %v13290_v37, %v3751_v18  ;;  %v13293_v18 = vld [vmem:[#allocation106_spill] sm:$0xff] }
 0x872   : > { %13289 = vst [vmem:[#allocation26_spill] sm:$0xff] %v10707_v50 }
 0x873   : > { %v4508_v30 = vmax.f32 %v4393_v39, 0.0  ;;  %v4181_v54 = vadd.f32 %v10353_v26, %v3966_v17  ;;  %v13295_v17 = vld [vmem:[#allocation179_spill] sm:$0xff] }
 0x874   : > { %5615 = vmatmul.f32.gmra.mxu3 %v10707_v50  ;;  %v13294_v50 = vld [vmem:[#allocation96_spill] sm:$0xff] }
 0x875   : > { %v4580_v31 = vsel %vm4541_vm6, %v4508_v30, 0.0  ;;  %6415 = vmatmul.msk.f32.gmra.mxu2 %vm2958_vm4, %v13284_v3  ;;  %v3539_v30 = vadd.f32 %v10562_v40, %v13293_v18  ;;  %v13298_v18 = vld [vmem:[#allocation134_spill] sm:$0xff] }
 0x876   : > { %v4703_v57 = vrot.slane %v4580_v31, 3  ;;  %v4815_v7 = vrot.slane %v4580_v31, 4  ;;  %v4895_v28 = vrot.slane %v4580_v31, 5 }
 0x877   : > { %v3754_v26 = vadd.f32 %v13294_v50, %v3539_v30 }
 0x878   : > { %v4395_v39 = vpop.f32.mrf.mxu2  ;;  %v10717_v53 = vsel %vm1755_vm2, %v4813_v33, %v4815_v7  ;;  %v10720_v8 = vsel %vm1514_vm3, %v4701_v35, %v4703_v57  ;;  %v10723_v15 = vsel %vm800_vm0, %v4893_v2, %v4895_v28  ;;  %v5454_v35 = vld [vmem:[%s12157_s5 + $0xe0] sm:$0xff]  ;;  %v13297_v7 = vld [vmem:[#allocation105_spill] sm:$0xff] }
 0x879   : > { %13291 = vst [vmem:[#allocation82_spill] sm:$0xff] %v10717_v53  ;;  %v4396_v37 = vadd.f32 %v4395_v39, %v4181_v54  ;;  %5068 = vrot.lane.b32.xlu0 %v10717_v53, %s6755_s17  ;;  %v4237_v31 = vpop.f32.mrf.mxu1  ;;  %v3969_v6 = vadd.f32 %v13295_v17, %v3754_v26  ;;  %5682 = vmatpush.msra.mxu3 %v5454_v35  ;;  %v13296_v2 = vld [vmem:[#allocation42_spill] sm:$0xff]  ;;  %v13300_v35 = vld [vmem:[#allocation101_spill] sm:$0xff] }
 0x87a   : > { %13292 = vst [vmem:[#allocation61_spill] sm:$0xff] %v10723_v15  ;;  %v3542_v28 = vadd.f32 %v10562_v40, %v13297_v7 }
 0x87b   : > { %v4509_v33 = vmax.f32 %v4396_v37, 0.0  ;;  %v4184_v57 = vadd.f32 %v13296_v2, %v3969_v6 }
 0x87c   : > { %v3757_v30 = vadd.f32 %v13298_v18, %v3542_v28 }
 0x87d   : > { %6416 = vmatmul.msk.f32.gmra.mxu2 %vm2958_vm4, %v13284_v3  ;;  %v4581_v50 = vsel %vm4530_vm5, %v4509_v33, 0.0 }
 0x87e   : > { %v3972_v53 = vadd.f32 %v13300_v35, %v3757_v30  ;;  %v4705_v6 = vrot.slane %v4581_v50, 3  ;;  %v4817_v2 = vrot.slane %v4581_v50, 4  ;;  %v4897_v7 = vrot.slane %v4581_v50, 5  ;;  %v13303_v50 = vld [vmem:[#allocation14_spill] sm:$0xff] }
 0x87f   : > { %v3545_v30 = vadd.f32 %v10562_v40, %v13303_v50 }
 0x880   : > { %v4398_v54 = vpop.f32.mrf.mxu2 }
 0x881   : > { %v4399_v39 = vadd.f32 %v4398_v54, %v4184_v57  ;;  %v4240_v37 = vpop.f32.mrf.mxu1  ;;  %v4187_v57 = vadd.f32 %v10382_v0, %v3972_v53  ;;  %v13304_v0 = vld [vmem:[#allocation116_spill] sm:$0xff] }
 0x882   : > { %v5051_v31 = vpop.permute.xlu0 %5050  ;;  %v3760_v53 = vadd.f32 %v13304_v0, %v3545_v30  ;;  %v5453_v30 = vld [vmem:[%s12157_s5 + $0xd8] sm:$0xff] }
 0x883   : > { %v4510_v26 = vmax.f32 %v4399_v39, 0.0  ;;  %v10744_v17 = vsel %vm2958_vm4, %v10442_v41, %v5051_v31  ;;  %5683 = vmatpush.msra.mxu3 %v5453_v30 }
 0x884   : > { %13299 = vst [vmem:[#allocation119_spill] sm:$0xff] %v10744_v17  ;;  %5618 = vmatmul.f32.gmra.mxu3 %v10744_v17 }
 0x885   : > { %v4706_v15 = vrot.slane %v4510_v26, 3  ;;  %v4818_v55 = vrot.slane %v4510_v26, 4  ;;  %v4898_v33 = vrot.slane %v4510_v26, 5  ;;  %6417 = vmatmul.msk.f32.gmra.mxu2 %vm2958_vm4, %v13284_v3 }
 0x887   : > { %v10752_v28 = vsel %vm1755_vm2, %v4817_v2, %v4818_v55  ;;  %v10755_v54 = vsel %vm1514_vm3, %v4705_v6, %v4706_v15  ;;  %v10758_v39 = vsel %vm800_vm0, %v4897_v7, %v4898_v33  ;;  %v13306_v2 = vld [vmem:[#allocation132_spill] sm:$0xff] }
 0x888   : > { %13301 = vst [vmem:[#allocation57_spill] sm:$0xff] %v10752_v28  ;;  %v4401_v18 = vpop.f32.mrf.mxu2  ;;  %5070 = vrot.lane.b32.xlu1 %v10752_v28, %s6755_s17  ;;  %v3975_v7 = vadd.f32 %v13306_v2, %v3760_v53 }
 0x889   : > { %13302 = vst [vmem:[#allocation139_spill] sm:$0xff] %v10758_v39  ;;  %v4402_v37 = vadd.f32 %v4401_v18, %v4187_v57  ;;  %v4243_v31 = vpop.f32.mrf.mxu1 }
 0x88a   : > { %v4190_v31 = vadd.f32 %v10402_v20, %v3975_v7  ;;  %v13309_v7 = vld [vmem:[#allocation16_spill] sm:$0xff] }
 0x88b   : > { %v4511_v26 = vmax.f32 %v4402_v37, 0.0  ;;  %v5053_v35 = vpop.permute.xlu1 %5052  ;;  %v374_v37 = vld [vmem:[%s6824_s14 + $0x2f8] sm:$0xff] }
 0x88c   : > { %v10767_v6 = vsel %vm2958_vm4, %v10467_v34, %v5053_v35  ;;  %6324 = vmatmul.msk.f32.gmra.mxu0 %vm415_vm1, %v374_v37  ;;  %v13308_v35 = vld [vmem:[#allocation169_spill] sm:$0xff]  ;;  %v13312_v37 = vld [vmem:[#allocation118_spill] sm:$0xff] }
 0x88d   : > { %13305 = vst [vmem:[#allocation68_spill] sm:$0xff] %v10767_v6  ;;  %v4583_v17 = vsel %vm4541_vm6, %v4511_v26, 0.0  ;;  %5621 = vmatmul.f32.gmra.mxu3 %v10767_v6  ;;  %6418 = vmatmul.msk.f32.gmra.mxu2 %vm2958_vm4, %v13284_v3  ;;  %v3548_v2 = vadd.f32 %v10562_v40, %v13308_v35  ;;  %v5055_v6 = vpop.permute.xlu2 %5054 }
 0x88e   : > { %v4708_v57 = vrot.slane %v4583_v17, 3  ;;  %v4820_v18 = vrot.slane %v4583_v17, 4  ;;  %v4900_v50 = vrot.slane %v4583_v17, 5 }
 0x88f   : > { %v3763_v30 = vadd.f32 %v13309_v7, %v3548_v2 }
 0x890   : > { %v4404_v0 = vpop.f32.mrf.mxu2  ;;  %v10782_v53 = vsel %vm1755_vm2, %v4818_v55, %v4820_v18  ;;  %v10785_v26 = vsel %vm1514_vm3, %v4706_v15, %v4708_v57  ;;  %v10788_v17 = vsel %vm800_vm0, %v4898_v33, %v4900_v50  ;;  %v10797_v55 = vsel %vm2958_vm4, %v10498_v11, %v5055_v6  ;;  %v13311_v15 = vld [vmem:[#allocation25_spill] sm:$0xff]  ;;  %v375_v33 = vld [vmem:[%s6824_s14 + $0x300] sm:$0xff] }
 0x891   : > { %13307 = vst [vmem:[#allocation3_spill] sm:$0xff] %v10782_v53  ;;  %v4405_v28 = vadd.f32 %v4404_v0, %v4190_v31  ;;  %5072 = vrot.lane.b32.xlu2 %v10782_v53, %s6755_s17  ;;  %v4245_v20 = vpop.f32.mrf.mxu1  ;;  %v3978_v57 = vadd.f32 %v13311_v15, %v3763_v30  ;;  %v3551_v31 = vadd.f32 %v10562_v40, %v13312_v37  ;;  %v13314_v30 = vld [vmem:[#allocation148_spill] sm:$0xff] }
 0x892   : > { %13310 = vst [vmem:[#allocation91_spill] sm:$0xff] %v10797_v55 }
 0x893   : > { %v4512_v18 = vmax.f32 %v4405_v28, 0.0  ;;  %v4193_v50 = vadd.f32 %v10422_v27, %v3978_v57  ;;  %v13313_v28 = vld [vmem:[#allocation138_spill] sm:$0xff] }
 0x894   : > { %6325 = vmatmul.msk.f32.gmra.mxu0 %vm415_vm1, %v375_v33  ;;  %v3766_v2 = vadd.f32 %v13313_v28, %v3551_v31 }
 0x895   : > { %5624 = vmatmul.f32.gmra.mxu3 %v10797_v55  ;;  %6419 = vmatmul.msk.f32.gmra.mxu2 %vm2958_vm4, %v13284_v3  ;;  %v4584_v6 = vsel %vm4530_vm5, %v4512_v18, 0.0  ;;  %v5452_v18 = vld [vmem:[%s12157_s5 + $0xd0] sm:$0xff] }
 0x896   : > { %v3981_v15 = vadd.f32 %v13314_v30, %v3766_v2  ;;  %v4710_v55 = vrot.slane %v4584_v6, 3  ;;  %v4822_v53 = vrot.slane %v4584_v6, 4  ;;  %v4902_v27 = vrot.slane %v4584_v6, 5  ;;  %5684 = vmatpush.msra.mxu3 %v5452_v18 }
 0x898   : > { %v4407_v0 = vpop.f32.mrf.mxu2  ;;  %v4196_v37 = vadd.f32 %v10431_v10, %v3981_v15  ;;  %v13316_v10 = vld [vmem:[#allocation117_spill] sm:$0xff]  ;;  %v13319_v15 = vld [vmem:[#allocation108_spill] sm:$0xff] }
 0x899   : > { %v4408_v35 = vadd.f32 %v4407_v0, %v4193_v50  ;;  %v4247_v20 = vpop.f32.mrf.mxu1  ;;  %v376_v50 = vld [vmem:[%s6824_s14 + $0x308] sm:$0xff]  ;;  %v3554_v28 = vadd.f32 %v10562_v40, %v13316_v10 }
 0x89a   : > { %v5495_v10 = vld [vmem:[%s12157_s5 + $0x228] sm:$0xff] }
 0x89b   : > { %v4513_v7 = vmax.f32 %v4408_v35, 0.0  ;;  %6028 = vmatpush.msra.mxu1 %v5495_v10  ;;  %v13324_v10 = vld [vmem:[#allocation125_spill] sm:$0xff] }
 0x89c   : > { %6326 = vmatmul.msk.f32.gmra.mxu0 %vm415_vm1, %v376_v50 }
 0x89d   : > { %v4711_v57 = vrot.slane %v4513_v7, 3  ;;  %v4823_v33 = vrot.slane %v4513_v7, 4  ;;  %v4903_v39 = vrot.slane %v4513_v7, 5  ;;  %6420 = vmatmul.msk.f32.gmra.mxu2 %vm2958_vm4, %v13284_v3 }
 0x89f   : > { %v10820_v31 = vsel %vm1755_vm2, %v4822_v53, %v4823_v33  ;;  %v10824_v0 = vsel %vm1514_vm3, %v4710_v55, %v4711_v57  ;;  %v10827_v6 = vsel %vm800_vm0, %v4902_v27, %v4903_v39  ;;  %v13317_v53 = vld [vmem:[#allocation122_spill] sm:$0xff] }
 0x8a0   : > { %13315 = vst [vmem:[#allocation53_spill] sm:$0xff] %v10820_v31  ;;  %v4410_v35 = vpop.f32.mrf.mxu2  ;;  %5074 = vrot.lane.b32.xlu0 %v10820_v31, %s6755_s17  ;;  %v3769_v20 = vadd.f32 %v13317_v53, %v3554_v28  ;;  %v377_v28 = vld [vmem:[%s6824_s14 + $0x310] sm:$0xff] }
 0x8a1   : > { %v4411_v2 = vadd.f32 %v4410_v35, %v4196_v37 }
 0x8a2   : > { %v3984_v27 = vadd.f32 %v13319_v15, %v3769_v20  ;;  %v13322_v15 = vld [vmem:[#allocation121_spill] sm:$0xff] }
 0x8a3   : > { %v4514_v7 = vmax.f32 %v4411_v2, 0.0  ;;  %v5057_v30 = vpop.permute.xlu0 %5056 }
 0x8a4   : > { %v10836_v55 = vsel %vm2958_vm4, %v10522_v38, %v5057_v30  ;;  %v4199_v2 = vadd.f32 %v10449_v42, %v3984_v27  ;;  %6327 = vmatmul.msk.f32.gmra.mxu0 %vm415_vm1, %v377_v28  ;;  %v13323_v42 = vld [vmem:[#allocation18_spill] sm:$0xff] }
 0x8a5   : > { %13318 = vst [vmem:[#allocation131_spill] sm:$0xff] %v10836_v55  ;;  %v4586_v18 = vsel %vm4541_vm6, %v4514_v7, 0.0  ;;  %5627 = vmatmul.f32.gmra.mxu3 %v10836_v55  ;;  %6421 = vmatmul.msk.f32.gmra.mxu2 %vm2958_vm4, %v13284_v3 }
 0x8a6   : > { %v4713_v50 = vrot.slane %v4586_v18, 3  ;;  %v4825_v37 = vrot.slane %v4586_v18, 4  ;;  %v4905_v35 = vrot.slane %v4586_v18, 5  ;;  %v3557_v18 = vadd.f32 %v10562_v40, %v13322_v15 }
 0x8a8   : > { %v4413_v53 = vpop.f32.mrf.mxu2  ;;  %v10851_v20 = vsel %vm1755_vm2, %v4823_v33, %v4825_v37  ;;  %v10854_v7 = vsel %vm1514_vm3, %v4711_v57, %v4713_v50  ;;  %v10857_v30 = vsel %vm800_vm0, %v4903_v39, %v4905_v35  ;;  %v3772_v27 = vadd.f32 %v13323_v42, %v3557_v18  ;;  %v5451_v57 = vld [vmem:[%s12157_s5 + $0xc8] sm:$0xff]  ;;  %v378_v33 = vld [vmem:[%s6824_s14 + $0x318] sm:$0xff] }
 0x8a9   : > { %13320 = vst [vmem:[#allocation159_spill] sm:$0xff] %v10851_v20  ;;  %v4414_v55 = vadd.f32 %v4413_v53, %v4199_v2  ;;  %5076 = vrot.lane.b32.xlu1 %v10851_v20, %s6755_s17  ;;  %5685 = vmatpush.msra.mxu3 %v5451_v57  ;;  %v13325_v50 = vld [vmem:[#allocation103_spill] sm:$0xff] }
 0x8aa   : > { %13321 = vst [vmem:[#allocation136_spill] sm:$0xff] %v10857_v30  ;;  %v3987_v28 = vadd.f32 %v13324_v10, %v3772_v27  ;;  %v3560_v37 = vadd.f32 %v10562_v40, %v13325_v50  ;;  %v13326_v53 = vld [vmem:[#allocation127_spill] sm:$0xff] }
 0x8ab   : > { %v4515_v31 = vmax.f32 %v4414_v55, 0.0 }
 0x8ac   : > { %v4202_v39 = vadd.f32 %v10474_v48, %v3987_v28  ;;  %6328 = vmatmul.msk.f32.gmra.mxu0 %vm415_vm1, %v378_v33  ;;  %v3775_v15 = vadd.f32 %v13326_v53, %v3560_v37  ;;  %v13328_v48 = vld [vmem:[#allocation141_spill] sm:$0xff] }
 0x8ad   : > { %6422 = vmatmul.msk.f32.gmra.mxu2 %vm2958_vm4, %v13284_v3  ;;  %v4587_v55 = vsel %vm4530_vm5, %v4515_v31, 0.0  ;;  %v379_v31 = vld [vmem:[%s6824_s14 + $0x320] sm:$0xff] }
 0x8ae   : > { %v3990_v10 = vadd.f32 %v13328_v48, %v3775_v15  ;;  %v4715_v28 = vrot.slane %v4587_v55, 3  ;;  %v4827_v57 = vrot.slane %v4587_v55, 4  ;;  %v4907_v33 = vrot.slane %v4587_v55, 5  ;;  %v5061_v55 = vpop.permute.xlu2 %5060  ;;  %v13330_v15 = vld [vmem:[#allocation120_spill] sm:$0xff] }
 0x8b0   : > { %v4416_v35 = vpop.f32.mrf.mxu2 }
 0x8b1   : > { %v4417_v2 = vadd.f32 %v4416_v35, %v4202_v39  ;;  %v4205_v39 = vadd.f32 %v10483_v1, %v3990_v10  ;;  %v3563_v1 = vadd.f32 %v10562_v40, %v13330_v15 }
 0x8b2   : > { %v5059_v18 = vpop.permute.xlu1 %5058 }
 0x8b3   : > { %v4516_v42 = vmax.f32 %v4417_v2, 0.0  ;;  %v10880_v27 = vsel %vm2958_vm4, %v10552_v43, %v5059_v18 }
 0x8b4   : > { %13327 = vst [vmem:[#allocation5_spill] sm:$0xff] %v10880_v27  ;;  %5630 = vmatmul.f32.gmra.mxu3 %v10880_v27  ;;  %6329 = vmatmul.msk.f32.gmra.mxu0 %vm415_vm1, %v379_v31 }
 0x8b5   : > { %v4716_v50 = vrot.slane %v4516_v42, 3  ;;  %v4828_v20 = vrot.slane %v4516_v42, 4  ;;  %v4908_v30 = vrot.slane %v4516_v42, 5  ;;  %6423 = vmatmul.msk.f32.gmra.mxu2 %vm2958_vm4, %v13284_v3  ;;  %v13331_v42 = vld [vmem:[#allocation102_spill] sm:$0xff] }
 0x8b6   : > { %v3778_v48 = vadd.f32 %v13331_v42, %v3563_v1 }
 0x8b7   : > { %v10889_v37 = vsel %vm1755_vm2, %v4827_v57, %v4828_v20  ;;  %v10893_v35 = vsel %vm1514_vm3, %v4715_v28, %v4716_v50  ;;  %v10896_v2 = vsel %vm800_vm0, %v4907_v33, %v4908_v30  ;;  %v10905_v28 = vsel %vm2958_vm4, %v10584_v58, %v5061_v55  ;;  %v13333_v57 = vld [vmem:[#allocation182_spill] sm:$0xff]  ;;  %v380_v55 = vld [vmem:[%s6824_s14 + $0x328] sm:$0xff] }
 0x8b8   : > { %13329 = vst [vmem:[#allocation100_spill] sm:$0xff] %v10889_v37  ;;  %v4419_v53 = vpop.f32.mrf.mxu2  ;;  %5078 = vrot.lane.b32.xlu2 %v10889_v37, %s6755_s17  ;;  %v3993_v33 = vadd.f32 %v13333_v57, %v3778_v48  ;;  %v13336_v57 = vld [vmem:[#allocation174_spill] sm:$0xff] }
 0x8b9   : > { %v4420_v18 = vadd.f32 %v4419_v53, %v4205_v39  ;;  %13332 = vst [vmem:[#allocation163_spill] sm:$0xff] %v10905_v28  ;;  %v5450_v53 = vld [vmem:[%s12157_s5 + $0xc0] sm:$0xff] }
 0x8ba   : > { %v4208_v1 = vadd.f32 %v10505_v16, %v3993_v33  ;;  %5686 = vmatpush.msra.mxu3 %v5450_v53  ;;  %v13337_v16 = vld [vmem:[#allocation155_spill] sm:$0xff]  ;;  %v13338_v53 = vld [vmem:[#allocation152_spill] sm:$0xff] }
 0x8bb   : > { %v4517_v10 = vmax.f32 %v4420_v18, 0.0 }
 0x8bc   : > { %5633 = vmatmul.f32.gmra.mxu3 %v10905_v28  ;;  %6330 = vmatmul.msk.f32.gmra.mxu0 %vm415_vm1, %v380_v55 }
 0x8bd   : > { %v4589_v31 = vsel %vm4541_vm6, %v4517_v10, 0.0  ;;  %6424 = vmatmul.msk.f32.gmra.mxu2 %vm2958_vm4, %v13284_v3 }
 0x8be   : > { %v4718_v27 = vrot.slane %v4589_v31, 3  ;;  %v4830_v15 = vrot.slane %v4589_v31, 4  ;;  %v4910_v39 = vrot.slane %v4589_v31, 5  ;;  %v3566_v31 = vadd.f32 %v10562_v40, %v13336_v57 }
 0x8c0   : > { %v4422_v18 = vpop.f32.mrf.mxu2  ;;  %v10920_v42 = vsel %vm1755_vm2, %v4828_v20, %v4830_v15  ;;  %v10923_v48 = vsel %vm1514_vm3, %v4716_v50, %v4718_v27  ;;  %v10926_v10 = vsel %vm800_vm0, %v4908_v30, %v4910_v39  ;;  %v3781_v33 = vadd.f32 %v13337_v16, %v3566_v31  ;;  %v381_v20 = vld [vmem:[%s6824_s14 + $0x330] sm:$0xff] }
 0x8c1   : > { %13334 = vst [vmem:[#allocation76_spill] sm:$0xff] %v10920_v42  ;;  %v4423_v28 = vadd.f32 %v4422_v18, %v4208_v1  ;;  %5080 = vrot.lane.b32.xlu0 %v10920_v42, %s6755_s17  ;;  %v13339_v30 = vld [vmem:[#allocation128_spill] sm:$0xff]  ;;  %v13340_v18 = vld [vmem:[#allocation142_spill] sm:$0xff] }
 0x8c2   : > { %13335 = vst [vmem:[#allocation150_spill] sm:$0xff] %v10926_v10  ;;  %v3996_v55 = vadd.f32 %v13338_v53, %v3781_v33  ;;  %v3569_v50 = vadd.f32 %v10562_v40, %v13339_v30  ;;  %v385_v10 = vld [vmem:[%s6824_s14 + $0x350] sm:$0xff] }
 0x8c3   : > { %v4518_v37 = vmax.f32 %v4423_v28, 0.0 }
 0x8c4   : > { %v4211_v27 = vadd.f32 %v10529_v23, %v3996_v55  ;;  %6331 = vmatmul.msk.f32.gmra.mxu0 %vm415_vm1, %v381_v20  ;;  %v3784_v57 = vadd.f32 %v13340_v18, %v3569_v50  ;;  %v13342_v23 = vld [vmem:[#allocation135_spill] sm:$0xff]  ;;  %v5449_v50 = vld [vmem:[%s12157_s5 + $0xb8] sm:$0xff] }
 0x8c5   : > { %6425 = vmatmul.msk.f32.gmra.mxu2 %vm2958_vm4, %v13284_v3  ;;  %v4590_v39 = vsel %vm4530_vm5, %v4518_v37, 0.0  ;;  %5687 = vmatpush.msra.mxu3 %v5449_v50 }
 0x8c6   : > { %v3999_v33 = vadd.f32 %v13342_v23, %v3784_v57  ;;  %v4720_v53 = vrot.slane %v4590_v39, 3  ;;  %v4832_v55 = vrot.slane %v4590_v39, 4  ;;  %v4912_v20 = vrot.slane %v4590_v39, 5  ;;  %v10967_v57 = vpop.f32.mrf.mxu3 }
 0x8c7   : > { %13345 = vst [vmem:[#allocation154_spill] sm:$0xff] %v10967_v57 }
 0x8c8   : > { %v4425_v15 = vpop.f32.mrf.mxu2 }
 0x8c9   : > { %v4426_v1 = vadd.f32 %v4425_v15, %v4211_v27  ;;  %v4214_v27 = vadd.f32 %v10537_v46, %v3999_v33  ;;  %v382_v15 = vld [vmem:[%s6824_s14 + $0x338] sm:$0xff]  ;;  %v13347_v33 = vld [vmem:[#allocation63_spill] sm:$0xff] }
 0x8ca   : > { %v5063_v28 = vpop.permute.xlu0 %5062 }
 0x8cb   : > { %v4519_v31 = vmax.f32 %v4426_v1, 0.0  ;;  %v10946_v16 = vsel %vm2958_vm4, %v10623_v5, %v5063_v28  ;;  %v13346_v28 = vld [vmem:[#allocation92_spill] sm:$0xff] }
 0x8cc   : > { %13341 = vst [vmem:[#allocation66_spill] sm:$0xff] %v10946_v16  ;;  %5636 = vmatmul.f32.gmra.mxu3 %v10946_v16  ;;  %6332 = vmatmul.msk.f32.gmra.mxu0 %vm415_vm1, %v382_v15 }
 0x8cd   : > { %v4721_v30 = vrot.slane %v4519_v31, 3  ;;  %v4833_v42 = vrot.slane %v4519_v31, 4  ;;  %v4913_v37 = vrot.slane %v4519_v31, 5  ;;  %6426 = vmatmul.msk.f32.gmra.mxu2 %vm2958_vm4, %v13284_v3  ;;  %v3572_v31 = vadd.f32 %v10562_v40, %v13346_v28 }
 0x8cf   : > { %v10958_v1 = vsel %vm1755_vm2, %v4832_v55, %v4833_v42  ;;  %v10962_v39 = vsel %vm1514_vm3, %v4720_v53, %v4721_v30  ;;  %v10965_v18 = vsel %vm800_vm0, %v4912_v20, %v4913_v37  ;;  %v3787_v55 = vadd.f32 %v13347_v33, %v3572_v31  ;;  %v13349_v20 = vld [vmem:[#allocation146_spill] sm:$0xff] }
 0x8d0   : > { %13343 = vst [vmem:[#allocation7_spill] sm:$0xff] %v10958_v1  ;;  %v4428_v46 = vpop.f32.mrf.mxu2  ;;  %5082 = vrot.lane.b32.xlu1 %v10958_v1, %s6755_s17  ;;  %v383_v31 = vld [vmem:[%s6824_s14 + $0x340] sm:$0xff] }
 0x8d1   : > { %13344 = vst [vmem:[#allocation8_spill] sm:$0xff] %v10965_v18  ;;  %v4429_v23 = vadd.f32 %v4428_v46, %v4214_v27  ;;  %v4002_v16 = vadd.f32 %v13349_v20, %v3787_v55  ;;  %v13351_v20 = vld [vmem:[#allocation109_spill] sm:$0xff] }
 0x8d3   : > { %v4520_v50 = vmax.f32 %v4429_v23, 0.0  ;;  %v5065_v15 = vpop.permute.xlu1 %5064  ;;  %v4217_v23 = vadd.f32 %v10566_v36, %v4002_v16  ;;  %v11000_v36 = vpop.f32.mrf.mxu3  ;;  %v13353_v16 = vld [vmem:[#allocation20_spill] sm:$0xff] }
 0x8d4   : > { %v10976_v53 = vsel %vm2958_vm4, %v10656_v45, %v5065_v15  ;;  %6333 = vmatmul.msk.f32.gmra.mxu0 %vm415_vm1, %v383_v31  ;;  %13352 = vst [vmem:[#allocation9_spill] sm:$0xff] %v11000_v36 }
 0x8d5   : > { %13348 = vst [vmem:[#allocation69_spill] sm:$0xff] %v10976_v53  ;;  %v4592_v57 = vsel %vm4541_vm6, %v4520_v50, 0.0  ;;  %5639 = vmatmul.f32.gmra.mxu3 %v10976_v53  ;;  %6427 = vmatmul.msk.f32.gmra.mxu2 %vm2958_vm4, %v13284_v3  ;;  %v3575_v53 = vadd.f32 %v10562_v40, %v13351_v20 }
 0x8d6   : > { %v4723_v28 = vrot.slane %v4592_v57, 3  ;;  %v4835_v27 = vrot.slane %v4592_v57, 4  ;;  %v4915_v46 = vrot.slane %v4592_v57, 5  ;;  %v5067_v57 = vpop.permute.xlu2 %5066 }
 0x8d7   : > { %v3790_v31 = vadd.f32 %v13353_v16, %v3575_v53  ;;  %v13357_v16 = vld [vmem:[#allocation177_spill] sm:$0xff] }
 0x8d8   : > { %v4431_v33 = vpop.f32.mrf.mxu2  ;;  %v10988_v55 = vsel %vm1755_vm2, %v4833_v42, %v4835_v27  ;;  %v10991_v50 = vsel %vm1514_vm3, %v4721_v30, %v4723_v28  ;;  %v10994_v15 = vsel %vm800_vm0, %v4913_v37, %v4915_v46  ;;  %v11005_v42 = vsel %vm2958_vm4, %v10695_v4, %v5067_v57  ;;  %v13355_v30 = vld [vmem:[#allocation140_spill] sm:$0xff]  ;;  %v384_v46 = vld [vmem:[%s6824_s14 + $0x348] sm:$0xff] }
 0x8d9   : > { %13350 = vst [vmem:[#allocation171_spill] sm:$0xff] %v10988_v55  ;;  %v4432_v1 = vadd.f32 %v4431_v33, %v4217_v23  ;;  %5084 = vrot.lane.b32.xlu2 %v10988_v55, %s6755_s17  ;;  %v4005_v28 = vadd.f32 %v13355_v30, %v3790_v31  ;;  %v5448_v27 = vld [vmem:[%s12157_s5 + $0xb0] sm:$0xff] }
 0x8da   : > { %13354 = vst [vmem:[#allocation80_spill] sm:$0xff] %v11005_v42  ;;  %5688 = vmatpush.msra.mxu3 %v5448_v27  ;;  %v13356_v23 = vld [vmem:[#allocation176_spill] sm:$0xff]  ;;  %v13358_v27 = vld [vmem:[#allocation149_spill] sm:$0xff] }
 0x8db   : > { %v4521_v37 = vmax.f32 %v4432_v1, 0.0  ;;  %v4220_v53 = vadd.f32 %v10593_v21, %v4005_v28  ;;  %v3578_v33 = vadd.f32 %v10562_v40, %v13356_v23  ;;  %v11025_v21 = vpop.f32.mrf.mxu3 }
 0x8dc   : > { %6334 = vmatmul.msk.f32.gmra.mxu0 %vm415_vm1, %v384_v46  ;;  %13359 = vst [vmem:[#allocation165_spill] sm:$0xff] %v11025_v21  ;;  %v5466_v21 = vld [vmem:[%s12157_s5 + $0x140] sm:$0xff] }
 0x8dd   : > { %5642 = vmatmul.f32.gmra.mxu3 %v11005_v42  ;;  %6428 = vmatmul.msk.f32.gmra.mxu2 %vm2958_vm4, %v13284_v3  ;;  %v4593_v20 = vsel %vm4530_vm5, %v4521_v37, 0.0  ;;  %v3793_v31 = vadd.f32 %v13357_v16, %v3578_v33 }
 0x8de   : > { %v4725_v28 = vrot.slane %v4593_v20, 3  ;;  %v4837_v46 = vrot.slane %v4593_v20, 4  ;;  %v4917_v42 = vrot.slane %v4593_v20, 5  ;;  %v13360_v20 = vld [vmem:[#allocation126_spill] sm:$0xff] }
 0x8df   : > { %v4008_v36 = vadd.f32 %v13358_v27, %v3793_v31 }
 0x8e0   : > { %v4434_v1 = vpop.f32.mrf.mxu2 }
 0x8e1   : > { %v4435_v57 = vadd.f32 %v4434_v1, %v4220_v53  ;;  %5122 = vrot.lane.b32.xlu2 %v10159_v63, %s6755_s17  ;;  %v4223_v37 = vadd.f32 %v10613_v22, %v4008_v36  ;;  %v5494_v36 = vld [vmem:[%s12157_s5 + $0x220] sm:$0xff] }
 0x8e2   : > { %6029 = vmatpush.msra.mxu1 %v5494_v36 }
 0x8e3   : > { %v4522_v30 = vmax.f32 %v4435_v57, 0.0  ;;  %v3581_v57 = vadd.f32 %v10562_v40, %v13360_v20  ;;  %v11052_v27 = vpop.f32.mrf.mxu3 }
 0x8e4   : > { %6335 = vmatmul.msk.f32.gmra.mxu0 %vm415_vm1, %v385_v10  ;;  %v5447_v10 = vld [vmem:[%s12157_s5 + $0xa8] sm:$0xff]  ;;  %13362 = vst [vmem:[#allocation11_spill] sm:$0xff] %v11052_v27 }
 0x8e5   : > { %v4726_v55 = vrot.slane %v4522_v30, 3  ;;  %v4838_v23 = vrot.slane %v4522_v30, 4  ;;  %v4918_v18 = vrot.slane %v4522_v30, 5  ;;  %5689 = vmatpush.msra.mxu3 %v5447_v10  ;;  %v5471_v27 = vld [vmem:[%s12157_s5 + $0x168] sm:$0xff] }
 0x8e7   : > { %v11030_v53 = vsel %vm1755_vm2, %v4837_v46, %v4838_v23  ;;  %v11034_v63 = vsel %vm1514_vm3, %v4725_v28, %v4726_v55  ;;  %v11037_v33 = vsel %vm800_vm0, %v4917_v42, %v4918_v18  ;;  %v13361_v42 = vld [vmem:[#allocation67_spill] sm:$0xff]  ;;  %v13364_v46 = vld [vmem:[#allocation74_spill] sm:$0xff] }
 0x8e8   : > { %v4437_v1 = vpop.f32.mrf.mxu2  ;;  %5086 = vrot.lane.b32.xlu0 %v11030_v53, %s6755_s17  ;;  %v3796_v16 = vadd.f32 %v13361_v42, %v3581_v57 }
 0x8e9   : > { %v4438_v22 = vadd.f32 %v4437_v1, %v4223_v37  ;;  %5128 = vrot.lane.b32.xlu2 %v10246_v12, %s6755_s17  ;;  %v386_v12 = vld [vmem:[%s6824_s14 + $0x358] sm:$0xff] }
 0x8ea   : > { %v4011_v37 = vadd.f32 %v13364_v46, %v3796_v16 }
 0x8eb   : > { %v4523_v31 = vmax.f32 %v4438_v22, 0.0  ;;  %v5069_v30 = vpop.permute.xlu0 %5068 }
 0x8ec   : > { %v11056_v28 = vsel %vm2958_vm4, %v10720_v8, %v5069_v30  ;;  %v4226_v22 = vadd.f32 %v10632_v52, %v4011_v37  ;;  %6336 = vmatmul.msk.f32.gmra.mxu0 %vm415_vm1, %v386_v12  ;;  %v13366_v30 = vld [vmem:[#allocation115_spill] sm:$0xff]  ;;  %v387_v12 = vld [vmem:[%s6824_s14 + $0x360] sm:$0xff] }
 0x8ed   : > { %13363 = vst [vmem:[#allocation81_spill] sm:$0xff] %v11056_v28  ;;  %v4595_v1 = vsel %vm4541_vm6, %v4523_v31, 0.0  ;;  %5645 = vmatmul.f32.gmra.mxu3 %v11056_v28  ;;  %v3584_v46 = vadd.f32 %v10562_v40, %v13366_v30 }
 0x8ee   : > { %v4728_v20 = vrot.slane %v4595_v1, 3  ;;  %v4840_v10 = vrot.slane %v4595_v1, 4  ;;  %v4920_v57 = vrot.slane %v4595_v1, 5 }
 0x8f0   : > { %v4440_v36 = vpop.f32.mrf.mxu2  ;;  %5124 = vrot.lane.b32.xlu0 %v10184_v59, %s6755_s17  ;;  %v11068_v42 = vsel %vm1755_vm2, %v4838_v23, %v4840_v10  ;;  %v11071_v16 = vsel %vm1514_vm3, %v4726_v55, %v4728_v20  ;;  %v11074_v31 = vsel %vm800_vm0, %v4918_v18, %v4920_v57  ;;  %v13367_v59 = vld [vmem:[#allocation133_spill] sm:$0xff]  ;;  %v11083_v23 = vpop.f32.mrf.mxu3  ;;  %v13369_v55 = vld [vmem:[#allocation72_spill] sm:$0xff] }
 0x8f1   : > { %13365 = vst [vmem:[#allocation168_spill] sm:$0xff] %v11068_v42  ;;  %v4441_v1 = vadd.f32 %v4440_v36, %v4226_v22  ;;  %5134 = vrot.lane.b32.xlu2 %v10346_v25, %s6755_s17  ;;  %5088 = vrot.lane.b32.xlu1 %v11068_v42, %s6755_s17  ;;  %v3799_v52 = vadd.f32 %v13367_v59, %v3584_v46  ;;  %v13370_v10 = vld [vmem:[#allocation124_spill] sm:$0xff] }
 0x8f2   : > { %13368 = vst [vmem:[#allocation13_spill] sm:$0xff] %v11083_v23  ;;  %v3587_v57 = vadd.f32 %v10562_v40, %v13370_v10  ;;  %v5473_v23 = vld [vmem:[%s12157_s5 + $0x178] sm:$0xff] }
 0x8f3   : > { %v4014_v37 = vadd.f32 %v13369_v55, %v3799_v52  ;;  %v4524_v20 = vmax.f32 %v4441_v1, 0.0  ;;  %5792 = vmatpush.msra.mxu0 %v5473_v23  ;;  %v5470_v23 = vld [vmem:[%s12157_s5 + $0x160] sm:$0xff] }
 0x8f4   : > { %6337 = vmatmul.msk.f32.gmra.mxu0 %vm415_vm1, %v387_v12 }
 0x8f5   : > { %v4229_v18 = vadd.f32 %v10665_v44, %v4014_v37  ;;  %v4596_v25 = vsel %vm4530_vm5, %v4524_v20, 0.0  ;;  %v13371_v44 = vld [vmem:[#allocation144_spill] sm:$0xff]  ;;  %v388_v20 = vld [vmem:[%s6824_s14 + $0x368] sm:$0xff] }
 0x8f6   : > { %v3802_v30 = vadd.f32 %v13371_v44, %v3587_v57  ;;  %v4957_v56 = vrot.slane %v4596_v25, 3  ;;  %v4962_v52 = vrot.slane %v4596_v25, 4  ;;  %v4999_v12 = vrot.slane %v4596_v25, 5 }
 0x8f8   : > { %v4443_v22 = vpop.f32.mrf.mxu2  ;;  %5130 = vrot.lane.b32.xlu0 %v10291_v49, %s6755_s17  ;;  %v13373_v49 = vld [vmem:[#allocation156_spill] sm:$0xff] }
 0x8f9   : > { %v4444_v36 = vadd.f32 %v4443_v22, %v4229_v18  ;;  %5140 = vrot.lane.b32.xlu2 %v10415_v61, %s6755_s17  ;;  %5126 = vrot.lane.b32.xlu1 %v10222_v32, %s6755_s17  ;;  %v4017_v59 = vadd.f32 %v13373_v49, %v3802_v30  ;;  %v5446_v32 = vld [vmem:[%s12157_s5 + $0xa0] sm:$0xff]  ;;  %v11110_v18 = vpop.f32.mrf.mxu3  ;;  %v389_v49 = vld [vmem:[%s6824_s14 + $0x370] sm:$0xff] }
 0x8fa   : > { %v5071_v46 = vpop.permute.xlu1 %5070  ;;  %13374 = vst [vmem:[#allocation172_spill] sm:$0xff] %v11110_v18  ;;  %5690 = vmatpush.msra.mxu3 %v5446_v32  ;;  %v390_v32 = vld [vmem:[%s6824_s14 + $0x378] sm:$0xff]  ;;  %v13423_v18 = vld [vmem:[#allocation150_spill] sm:$0xff] }
 0x8fb   : > { %v4525_v1 = vmax.f32 %v4444_v36, 0.0  ;;  %v11102_v40 = vsel %vm2958_vm4, %v10755_v54, %v5071_v46  ;;  %v4232_v10 = vadd.f32 %v10677_v29, %v4017_v59  ;;  %v5073_v36 = vpop.permute.xlu2 %5072 }
 0x8fc   : > { %13372 = vst [vmem:[#allocation85_spill] sm:$0xff] %v11102_v40  ;;  %5648 = vmatmul.f32.gmra.mxu3 %v11102_v40  ;;  %6338 = vmatmul.msk.f32.gmra.mxu0 %vm415_vm1, %v388_v20  ;;  %v11131_v46 = vsel %vm2958_vm4, %v10785_v26, %v5073_v36  ;;  %v5484_v40 = vld [vmem:[%s12157_s5 + $0x1d0] sm:$0xff] }
 0x8fd   : > { %v4958_v55 = vrot.slane %v4525_v1, 3  ;;  %v4963_v61 = vrot.slane %v4525_v1, 4  ;;  %v5000_v37 = vrot.slane %v4525_v1, 5  ;;  %13377 = vst [vmem:[#allocation173_spill] sm:$0xff] %v11131_v46 }
 0x8ff   : > { %v11115_v57 = vsel %vm1514_vm3, %v4957_v56, %v4958_v55  ;;  %v11118_v22 = vsel %vm1755_vm2, %v4962_v52, %v4963_v61  ;;  %v11121_v25 = vsel %vm800_vm0, %v4999_v12, %v5000_v37 }
 0x900   : > { %13375 = vst [vmem:[#allocation15_spill] sm:$0xff] %v11115_v57  ;;  %v4446_v44 = vpop.f32.mrf.mxu2  ;;  %5136 = vrot.lane.b32.xlu0 %v10366_v51, %s6755_s17 }
 0x901   : > { %13376 = vst [vmem:[#allocation180_spill] sm:$0xff] %v11118_v22  ;;  %v4447_v30 = vadd.f32 %v4446_v44, %v4232_v10  ;;  %5146 = vrot.lane.b32.xlu2 %v10498_v11, %s6755_s17  ;;  %5132 = vrot.lane.b32.xlu1 %v10315_v9, %s6755_s17  ;;  %v11137_v51 = vpop.f32.mrf.mxu3  ;;  %v391_v10 = vld [vmem:[%s6824_s14 + $0x380] sm:$0xff] }
 0x902   : > { %13378 = vst [vmem:[#allocation17_spill] sm:$0xff] %v11137_v51 }
 0x903   : > { %v4526_v29 = vmax.f32 %v4447_v30, 0.0  ;;  %v392_v30 = vld [vmem:[%s6824_s14 + $0x388] sm:$0xff] }
 0x904   : > { %5651 = vmatmul.f32.gmra.mxu3 %v11131_v46  ;;  %6339 = vmatmul.msk.f32.gmra.mxu0 %vm415_vm1, %v389_v49 }
 0x905   : > { %v4598_v1 = vsel %vm4541_vm6, %v4526_v29, 0.0 }
 0x906   : > { %v4960_v59 = vrot.slane %v4598_v1, 3  ;;  %v4965_v56 = vrot.slane %v4598_v1, 4  ;;  %v5002_v11 = vrot.slane %v4598_v1, 5 }
 0x908   : > { %5142 = vrot.lane.b32.xlu0 %v10442_v41, %s6755_s17  ;;  %v11143_v9 = vsel %vm1514_vm3, %v4958_v55, %v4960_v59  ;;  %v11146_v52 = vsel %vm1755_vm2, %v4963_v61, %v4965_v56  ;;  %v11149_v24 = vsel %vm800_vm0, %v5000_v37, %v5002_v11  ;;  %v4449_v12 = vpop.f32.mrf.mxu2  ;;  %v5445_v41 = vld [vmem:[%s12157_s5 + $0x98] sm:$0xff]  ;;  %v393_v59 = vld [vmem:[%s6824_s14 + $0x390] sm:$0xff] }
 0x909   : > { %13379 = vst [vmem:[#allocation143_spill] sm:$0xff] %v11143_v9  ;;  %5152 = vrot.lane.b32.xlu2 %v10584_v58, %s6755_s17  ;;  %5138 = vrot.lane.b32.xlu1 %v10395_v62, %s6755_s17  ;;  %v1094_v55 = vpop.f32.mrf.mxu0  ;;  %v11160_v61 = vpop.f32.mrf.mxu3  ;;  %v5443_v12 = vld [vmem:[%s12157_s5 + $0x88] sm:$0xff] }
 0x90a   : > { %13380 = vst [vmem:[#allocation90_spill] sm:$0xff] %v11146_v52  ;;  %5691 = vmatpush.msra.mxu3 %v5445_v41  ;;  %v394_v41 = vld [vmem:[%s6824_s14 + $0x398] sm:$0xff]  ;;  %v6728_v55 = vpack.i.bf16 %v13284_v3, %v11071_v16 }
 0x90b   : > { %13381 = vst [vmem:[#allocation175_spill] sm:$0xff] %v11149_v24 }
 0x90c   : > { %6340 = vmatmul.msk.f32.gmra.mxu0 %vm415_vm1, %v390_v32  ;;  %13382 = vst [vmem:[#allocation48_spill] sm:$0xff] %v11160_v61 }
 0x910   : > { %5148 = vrot.lane.b32.xlu0 %v10522_v38, %s6755_s17  ;;  %v4452_v37 = vpop.f32.mrf.mxu2 }
 0x911   : > { %5158 = vrot.lane.b32.xlu2 %v10695_v4, %s6755_s17  ;;  %5144 = vrot.lane.b32.xlu1 %v10467_v34, %s6755_s17  ;;  %v1097_v20 = vpop.f32.mrf.mxu0  ;;  %v11181_v34 = vpop.f32.mrf.mxu3  ;;  %v5493_v37 = vld [vmem:[%s12157_s5 + $0x218] sm:$0xff] }
 0x912   : > { %v5075_v62 = vpop.permute.xlu0 %5074  ;;  %13384 = vst [vmem:[#allocation112_spill] sm:$0xff] %v11181_v34  ;;  %6030 = vmatpush.msra.mxu1 %v5493_v37  ;;  %v404_v34 = vld [vmem:[%s6824_s14 + $0x3e8] sm:$0xff] }
 0x913   : > { %v11170_v58 = vsel %vm2958_vm4, %v10824_v0, %v5075_v62 }
 0x914   : > { %13383 = vst [vmem:[#allocation19_spill] sm:$0xff] %v11170_v58  ;;  %5654 = vmatmul.f32.gmra.mxu3 %v11170_v58  ;;  %6341 = vmatmul.msk.f32.gmra.mxu0 %vm415_vm1, %v391_v10 }
 0x918   : > { %5154 = vrot.lane.b32.xlu0 %v10623_v5, %s6755_s17  ;;  %v4455_v38 = vpop.f32.mrf.mxu2  ;;  %v5444_v5 = vld [vmem:[%s12157_s5 + $0x90] sm:$0xff] }
 0x919   : > { %5164 = vrot.lane.b32.xlu2 %v10785_v26, %s6755_s17  ;;  %5150 = vrot.lane.b32.xlu1 %v10552_v43, %s6755_s17  ;;  %v1100_v44 = vpop.f32.mrf.mxu0  ;;  %v5079_v26 = vpop.permute.xlu2 %5078  ;;  %v395_v38 = vld [vmem:[%s6824_s14 + $0x3a0] sm:$0xff] }
 0x91a   : > { %5692 = vmatpush.msra.mxu3 %v5444_v5  ;;  %v11199_v29 = vpop.f32.mrf.mxu3  ;;  %v11203_v1 = vsel %vm2958_vm4, %v10893_v35, %v5079_v26 }
 0x91b   : > { %v5077_v4 = vpop.permute.xlu1 %5076  ;;  %13386 = vst [vmem:[#allocation185_spill] sm:$0xff] %v11199_v29  ;;  %v5486_v29 = vld [vmem:[%s12157_s5 + $0x1e0] sm:$0xff] }
 0x91c   : > { %v11185_v36 = vsel %vm2958_vm4, %v10854_v7, %v5077_v4  ;;  %6342 = vmatmul.msk.f32.gmra.mxu0 %vm415_vm1, %v392_v30  ;;  %13387 = vst [vmem:[#allocation87_spill] sm:$0xff] %v11203_v1  ;;  %5693 = vmatpush.msra.mxu3 %v5443_v12  ;;  %v5442_v30 = vld [vmem:[%s12157_s5 + $0x80] sm:$0xff] }
 0x91d   : > { %13385 = vst [vmem:[#allocation49_spill] sm:$0xff] %v11185_v36  ;;  %5657 = vmatmul.f32.gmra.mxu3 %v11185_v36 }
 0x91e   : > { %5694 = vmatpush.msra.mxu3 %v5442_v30  ;;  %v398_v30 = vld [vmem:[%s6824_s14 + $0x3b8] sm:$0xff] }
 0x920   : > { %5160 = vrot.lane.b32.xlu0 %v10720_v8, %s6755_s17  ;;  %v4458_v43 = vpop.f32.mrf.mxu2  ;;  %v13388_v8 = vld [vmem:[#allocation29_spill] sm:$0xff] }
 0x921   : > { %5170 = vrot.lane.b32.xlu2 %v10893_v35, %s6755_s17  ;;  %5156 = vrot.lane.b32.xlu1 %v10656_v45, %s6755_s17  ;;  %v1103_v49 = vpop.f32.mrf.mxu0  ;;  %v6713_v56 = vpack.i.bf16 %v10991_v50, %v13388_v8  ;;  %v396_v43 = vld [vmem:[%s6824_s14 + $0x3a8] sm:$0xff]  ;;  %v6723_v26 = vpack.i.bf16 %v13388_v8, %v13284_v3 }
 0x922   : > { %v11215_v45 = vpop.f32.mrf.mxu3  ;;  %v6733_v49 = vpack.i.bf16 %v11115_v57, %v13388_v8  ;;  %v402_v57 = vld [vmem:[%s6824_s14 + $0x3d8] sm:$0xff] }
 0x923   : > { %13389 = vst [vmem:[#allocation54_spill] sm:$0xff] %v11215_v45 }
 0x924   : > { %6343 = vmatmul.msk.f32.gmra.mxu0 %vm415_vm1, %v393_v59 }
 0x925   : > { %5660 = vmatmul.f32.gmra.mxu3 %v11203_v1 }
 0x928   : > { %5166 = vrot.lane.b32.xlu0 %v10824_v0, %s6755_s17  ;;  %v4460_v11 = vpop.f32.mrf.mxu2 }
 0x929   : > { %6714 = vrot.lane.b32.xlu2 %v6713_v56, %s6755_s17  ;;  %5162 = vrot.lane.b32.xlu1 %v10755_v54, %s6755_s17  ;;  %v1106_v35 = vpop.f32.mrf.mxu0  ;;  %v13393_v56 = vld [vmem:[#allocation130_spill] sm:$0xff] }
 0x92a   : > { %v11232_v62 = vpop.f32.mrf.mxu3 }
 0x92b   : > { %13390 = vst [vmem:[#allocation178_spill] sm:$0xff] %v11232_v62  ;;  %v403_v62 = vld [vmem:[%s6824_s14 + $0x3e0] sm:$0xff] }
 0x92c   : > { %6344 = vmatmul.msk.f32.gmra.mxu0 %vm415_vm1, %v394_v41 }
 0x930   : > { %5172 = vrot.lane.b32.xlu0 %v10923_v48, %s6755_s17  ;;  %v4462_v0 = vpop.f32.mrf.mxu2 }
 0x931   : > { %6729 = vrot.lane.b32.xlu2 %v6728_v55, %s6755_s17  ;;  %5168 = vrot.lane.b32.xlu1 %v10854_v7, %s6755_s17  ;;  %v1109_v10 = vpop.f32.mrf.mxu0  ;;  %v6718_v7 = vpack.i.bf16 %v11034_v63, %v13388_v8  ;;  %v13395_v55 = vld [vmem:[#allocation28_spill] sm:$0xff] }
 0x932   : > { %v11250_v44 = vpop.f32.mrf.mxu3 }
 0x933   : > { %v5081_v54 = vpop.permute.xlu0 %5080  ;;  %v5085_v32 = vpop.permute.xlu2 %5084  ;;  %13392 = vst [vmem:[#allocation58_spill] sm:$0xff] %v11250_v44  ;;  %v13412_v44 = vld [vmem:[#allocation27_spill] sm:$0xff] }
 0x934   : > { %v11236_v20 = vsel %vm2958_vm4, %v10923_v48, %v5081_v54  ;;  %6345 = vmatmul.msk.f32.gmra.mxu0 %vm415_vm1, %v395_v38  ;;  %v397_v54 = vld [vmem:[%s6824_s14 + $0x3b0] sm:$0xff] }
 0x935   : > { %13391 = vst [vmem:[#allocation167_spill] sm:$0xff] %v11236_v20  ;;  %5663 = vmatmul.f32.gmra.mxu3 %v11236_v20  ;;  %v13419_v20 = vld [vmem:[#allocation38_spill] sm:$0xff] }
 0x938   : > { %6719 = vrot.lane.b32.xlu0 %v6718_v7, %s6755_s17  ;;  %v4464_v4 = vpop.f32.mrf.mxu2  ;;  %v11287_v7 = vsel %vm2958_vm4, %v10991_v50, %v5085_v32  ;;  %v13400_v50 = vld [vmem:[#allocation161_spill] sm:$0xff] }
 0x939   : > { %5184 = vrot.lane.b32.xlu2 %v11143_v9, %s6755_s17  ;;  %5174 = vrot.lane.b32.xlu1 %v10962_v39, %s6755_s17  ;;  %v1112_v5 = vpop.f32.mrf.mxu0  ;;  %13398 = vst [vmem:[#allocation60_spill] sm:$0xff] %v11287_v7 }
 0x93a   : > { %v11275_v37 = vpop.f32.mrf.mxu3  ;;  %v5489_v5 = vld [vmem:[%s12157_s5 + $0x1f8] sm:$0xff] }
 0x93b   : > { %v11248_v48 = vpop.permute.xlu2 %5122  ;;  %13396 = vst [vmem:[#allocation86_spill] sm:$0xff] %v11275_v37  ;;  %5905 = vmatpush.msrb.mxu3 %v5489_v5  ;;  %v5487_v37 = vld [vmem:[%s12157_s5 + $0x1e8] sm:$0xff] }
 0x93c   : > { %6346 = vmatmul.msk.f32.gmra.mxu0 %vm415_vm1, %v396_v43  ;;  %v5358_v9 = vsel %vm2958_vm4, %v13284_v3, %v11248_v48 }
 0x940   : > { %6734 = vrot.lane.b32.xlu0 %v6733_v49, %s6755_s17  ;;  %v4466_v59 = vpop.f32.mrf.mxu2 }
 0x941   : > { %5218 = vrot.lane.b32.xlu2 %v13393_v56, %s6755_s17  ;;  %6724 = vrot.lane.b32.xlu1 %v6723_v26, %s6755_s17  ;;  %v1115_v41 = vpop.f32.mrf.mxu0  ;;  %v399_v59 = vld [vmem:[%s6824_s14 + $0x3c0] sm:$0xff] }
 0x942   : > { %v5083_v11 = vpop.permute.xlu1 %5082  ;;  %v11295_v43 = vpop.f32.mrf.mxu3 }
 0x943   : > { %v5129_v35 = vpop.permute.xlu2 %5128  ;;  %v11267_v12 = vsel %vm2958_vm4, %v10962_v39, %v5083_v11  ;;  %v13397_v39 = vld [vmem:[#allocation36_spill] sm:$0xff]  ;;  %13399 = vst [vmem:[#allocation107_spill] sm:$0xff] %v11295_v43 }
 0x944   : > { %13394 = vst [vmem:[#allocation21_spill] sm:$0xff] %v11267_v12  ;;  %5666 = vmatmul.f32.gmra.mxu3 %v11267_v12  ;;  %v11272_v0 = vsel %vm2958_vm4, %v13395_v55, %v5129_v35  ;;  %6347 = vmatmul.msk.f32.gmra.mxu0 %vm415_vm1, %v397_v54  ;;  %v13402_v35 = vld [vmem:[#allocation59_spill] sm:$0xff]  ;;  %v5492_v12 = vld [vmem:[%s12157_s5 + $0x210] sm:$0xff] }
 0x945   : > { %6031 = vmatpush.msra.mxu1 %v5492_v12 }
 0x948   : > { %2730 = vrot.lane.b32.xlu0 %v13284_v3, %s6755_s17  ;;  %v4468_v10 = vpop.f32.mrf.mxu2 }
 0x949   : > { %5224 = vrot.lane.b32.xlu2 %v13397_v39, %s6755_s17  ;;  %6739 = vrot.lane.b32.xlu1 %v6723_v26, %s6755_s17  ;;  %v1118_v4 = vpop.f32.mrf.mxu0 }
 0x94a   : > { %v11307_v11 = vpop.f32.mrf.mxu3 }
 0x94b   : > { %v11283_v38 = vpop.permute.xlu2 %5134  ;;  %13401 = vst [vmem:[#allocation10_spill] sm:$0xff] %v11307_v11 }
 0x94c   : > { %5669 = vmatmul.f32.gmra.mxu3 %v11287_v7  ;;  %6348 = vmatmul.msk.f32.gmra.mxu0 %vm415_vm1, %v398_v30  ;;  %v5488_v30 = vld [vmem:[%s12157_s5 + $0x1f0] sm:$0xff] }
 0x94d   : > { %5906 = vmatpush.msrb.mxu3 %v5488_v30 }
 0x94f   : > { %5907 = vmatpush.msrb.mxu3 %v5487_v37 }
 0x950   : > { %5220 = vrot.lane.b32.xlu0 %v13395_v55, %s6755_s17  ;;  %v4470_v26 = vpop.f32.mrf.mxu2  ;;  %v13403_v55 = vld [vmem:[#allocation113_spill] sm:$0xff] }
 0x951   : > { %5230 = vrot.lane.b32.xlu2 %v13400_v50, %s6755_s17  ;;  %2950 = vrot.lane.b32.xlu1 %v13388_v8, %s6755_s17  ;;  %v1121_v49 = vpop.f32.mrf.mxu0  ;;  %v400_v26 = vld [vmem:[%s6824_s14 + $0x3c8] sm:$0xff] }
 0x952   : > { %v11327_v49 = vpop.f32.mrf.mxu3  ;;  %5908 = vmatpush.msrb.mxu3 %v5486_v29 }
 0x953   : > { %v11303_v32 = vpop.permute.xlu2 %5140  ;;  %13405 = vst [vmem:[#allocation181_spill] sm:$0xff] %v11327_v49  ;;  %v401_v49 = vld [vmem:[%s6824_s14 + $0x3d0] sm:$0xff] }
 0x954   : > { %6349 = vmatmul.msk.f32.gmra.mxu0 %vm415_vm1, %v399_v59  ;;  %v13406_v59 = vld [vmem:[#allocation52_spill] sm:$0xff] }
 0x958   : > { %5226 = vrot.lane.b32.xlu0 %v13402_v35, %s6755_s17  ;;  %v4472_v41 = vpop.f32.mrf.mxu2 }
 0x959   : > { %5236 = vrot.lane.b32.xlu2 %v10418_v14, %s6755_s17  ;;  %5222 = vrot.lane.b32.xlu1 %v13403_v55, %s6755_s17  ;;  %v1124_v5 = vpop.f32.mrf.mxu0 }
 0x95a   : > { %v5087_v54 = vpop.permute.xlu0 %5086  ;;  %v11350_v43 = vpop.f32.mrf.mxu3 }
 0x95b   : > { %v11315_v10 = vpop.permute.xlu2 %5146  ;;  %v11319_v4 = vsel %vm2958_vm4, %v11034_v63, %v5087_v54  ;;  %v13407_v63 = vld [vmem:[#allocation153_spill] sm:$0xff]  ;;  %13410 = vst [vmem:[#allocation65_spill] sm:$0xff] %v11350_v43  ;;  %v13411_v43 = vld [vmem:[#allocation2_spill] sm:$0xff] }
 0x95c   : > { %13404 = vst [vmem:[#allocation64_spill] sm:$0xff] %v11319_v4  ;;  %5672 = vmatmul.f32.gmra.mxu3 %v11319_v4  ;;  %6350 = vmatmul.msk.f32.gmra.mxu0 %vm415_vm1, %v400_v26  ;;  %v13414_v4 = vld [vmem:[#allocation6_spill] sm:$0xff] }
 0x960   : > { %5232 = vrot.lane.b32.xlu0 %v13406_v59, %s6755_s17  ;;  %v4474_v41 = vpop.f32.mrf.mxu2 }
 0x961   : > { %5242 = vrot.lane.b32.xlu2 %v10501_v19, %s6755_s17  ;;  %5228 = vrot.lane.b32.xlu1 %v13407_v63, %s6755_s17  ;;  %v1127_v26 = vpop.f32.mrf.mxu0  ;;  %v13409_v41 = vld [vmem:[#allocation39_spill] sm:$0xff] }
 0x962   : > { %v5125_v54 = vpop.permute.xlu0 %5124  ;;  %v11368_v48 = vpop.f32.mrf.mxu3 }
 0x963   : > { %v11335_v5 = vpop.permute.xlu2 %5152  ;;  %v5089_v11 = vpop.permute.xlu1 %5088  ;;  %13413 = vst [vmem:[#allocation22_spill] sm:$0xff] %v11368_v48  ;;  %v5359_v37 = vsel %vm2958_vm4, %v13284_v3, %v5125_v54  ;;  %v13415_v48 = vld [vmem:[#allocation35_spill] sm:$0xff]  ;;  %v5462_v3 = vld [vmem:[%s12157_s5 + $0x120] sm:$0xff] }
 0x964   : > { %v11339_v30 = vsel %vm2958_vm4, %v11071_v16, %v5089_v11  ;;  %6351 = vmatmul.msk.f32.gmra.mxu0 %vm415_vm1, %v401_v49 }
 0x965   : > { %13408 = vst [vmem:[#allocation71_spill] sm:$0xff] %v11339_v30  ;;  %5675 = vmatmul.f32.gmra.mxu3 %v11339_v30 }
 0x968   : > { %5238 = vrot.lane.b32.xlu0 %v10445_v13, %s6755_s17 }
 0x969   : > { %5248 = vrot.lane.b32.xlu2 %v10587_v60, %s6755_s17  ;;  %5234 = vrot.lane.b32.xlu1 %v13409_v41, %s6755_s17  ;;  %v1130_v49 = vpop.f32.mrf.mxu0 }
 0x96a   : > { %v5131_v16 = vpop.permute.xlu0 %5130 }
 0x96b   : > { %v11352_v11 = vpop.permute.xlu2 %5158  ;;  %v5127_v26 = vpop.permute.xlu1 %5126 }
 0x96c   : > { %6352 = vmatmul.msk.f32.gmra.mxu0 %vm415_vm1, %v402_v57 }
 0x96d   : > { %5695 = vmatmul.f32.vlgmr.msra.gmra.mxu3 %v5358_v9 }
 0x970   : > { %5244 = vrot.lane.b32.xlu0 %v10525_v47, %s6755_s17 }
 0x971   : > { %5254 = vrot.lane.b32.xlu2 %v13411_v43, %s6755_s17  ;;  %5240 = vrot.lane.b32.xlu1 %v13412_v44, %s6755_s17  ;;  %v1133_v57 = vpop.f32.mrf.mxu0 }
 0x972   : > { %v11370_v9 = vpop.permute.xlu0 %5136 }
 0x973   : > { %v11372_v49 = vpop.permute.xlu2 %5164  ;;  %v5133_v30 = vpop.permute.xlu1 %5132 }
 0x974   : > { %6353 = vmatmul.msk.f32.gmra.mxu0 %vm415_vm1, %v403_v62  ;;  %v11392_v62 = vpop.f32.mrf.mxu3 }
 0x975   : > { %5698 = vmatmul.f32.gmra.mxu3 %v5359_v37  ;;  %v5360_v37 = vsel %vm2958_vm4, %v13393_v56, %v5127_v26  ;;  %13416 = vst [vmem:[#allocation70_spill] sm:$0xff] %v11392_v62  ;;  %v13417_v56 = vld [vmem:[#allocation61_spill] sm:$0xff]  ;;  %v13418_v26 = vld [vmem:[#allocation47_spill] sm:$0xff] }
 0x978   : > { %5250 = vrot.lane.b32.xlu0 %v13414_v4, %s6755_s17 }
 0x979   : > { %5260 = vrot.lane.b32.xlu2 %v10788_v17, %s6755_s17  ;;  %5246 = vrot.lane.b32.xlu1 %v13415_v48, %s6755_s17  ;;  %v1136_v57 = vpop.f32.mrf.mxu0 }
 0x97a   : > { %v11384_v45 = vpop.permute.xlu0 %5142 }
 0x97b   : > { %v11386_v7 = vpop.permute.xlu2 %5170  ;;  %v11388_v54 = vpop.permute.xlu1 %5138 }
 0x97c   : > { %6354 = vmatmul.msk.f32.gmra.mxu0 %vm415_vm1, %v404_v34  ;;  %v405_v34 = vld [vmem:[%s6824_s14 + $0x3f0] sm:$0xff]  ;;  %v11419_v1 = vpop.f32.mrf.mxu3 }
 0x97d   : > { %5701 = vmatmul.f32.gmra.mxu3 %v5360_v37  ;;  %13420 = vst [vmem:[#allocation188_spill] sm:$0xff] %v11419_v1 }
 0x980   : > { %5256 = vrot.lane.b32.xlu0 %v13417_v56, %s6755_s17 }
 0x981   : > { %5266 = vrot.lane.b32.xlu2 %v10896_v2, %s6755_s17  ;;  %5252 = vrot.lane.b32.xlu1 %v13418_v26, %s6755_s17  ;;  %v1139_v12 = vpop.f32.mrf.mxu0 }
 0x982   : > { %v11408_v37 = vpop.permute.xlu0 %5148  ;;  %v13421_v12 = vld [vmem:[#allocation139_spill] sm:$0xff] }
 0x983   : > { %v11410_v57 = vpop.permute.xlu2 %6714  ;;  %v11412_v62 = vpop.permute.xlu1 %5144 }
 0x984   : > { %v6716_v29 = vunpack.i.l.bf16 %v11410_v57  ;;  %6355 = vmatmul.msk.f32.gmra.mxu0 %vm415_vm1, %v405_v34  ;;  %v406_v34 = vld [vmem:[%s6824_s14 + $0x3f8] sm:$0xff]  ;;  %v11438_v36 = vpop.f32.mrf.mxu3 }
 0x985   : > { %5704 = vmatmul.f32.gmra.mxu3 %v11272_v0  ;;  %13422 = vst [vmem:[#allocation157_spill] sm:$0xff] %v11438_v36 }
 0x986   : > { %v3175_v61 = vsel %vm2958_vm4, %v13419_v20, %v6716_v29  ;;  %v5362_v29 = vsel %vm2958_vm4, %v13403_v55, %v5131_v16  ;;  %v13424_v16 = vld [vmem:[#allocation136_spill] sm:$0xff] }
 0x987   : > { %4248 = vmatmul.f32.gmra.mxu1 %v3175_v61  ;;  %v5485_v61 = vld [vmem:[%s12157_s5 + $0x1d8] sm:$0xff] }
 0x988   : > { %5262 = vrot.lane.b32.xlu0 %v10827_v6, %s6755_s17  ;;  %5909 = vmatpush.msrb.mxu3 %v5485_v61  ;;  %v5363_v61 = vsel %vm2958_vm4, %v13397_v39, %v5133_v30 }
 0x989   : > { %5272 = vrot.lane.b32.xlu2 %v10994_v15, %s6755_s17  ;;  %5258 = vrot.lane.b32.xlu1 %v13421_v12, %s6755_s17  ;;  %v1142_v1 = vpop.f32.mrf.mxu0 }
 0x98a   : > { %v11428_v0 = vpop.permute.xlu0 %5154  ;;  %5910 = vmatpush.msrb.mxu3 %v5484_v40  ;;  %v5467_v40 = vld [vmem:[%s12157_s5 + $0x148] sm:$0xff] }
 0x98b   : > { %v11430_v51 = vpop.permute.xlu1 %5150 }
 0x98c   : > { %6356 = vmatmul.msk.f32.gmra.mxu0 %vm415_vm1, %v406_v34  ;;  %v11453_v36 = vpop.f32.mrf.mxu3  ;;  %v13426_v34 = vld [vmem:[#allocation8_spill] sm:$0xff] }
 0x98d   : > { %5707 = vmatmul.f32.gmra.mxu3 %v5362_v29  ;;  %13425 = vst [vmem:[#allocation73_spill] sm:$0xff] %v11453_v36  ;;  %v5364_v36 = vsel %vm2958_vm4, %v13402_v35, %v11283_v38  ;;  %v5469_v38 = vld [vmem:[%s12157_s5 + $0x158] sm:$0xff] }
 0x990   : > { %5268 = vrot.lane.b32.xlu0 %v13423_v18, %s6755_s17 }
 0x991   : > { %5316 = vrot.lane.b32.xlu2 %v11146_v52, %s6755_s17  ;;  %5264 = vrot.lane.b32.xlu1 %v13424_v16, %s6755_s17  ;;  %v1145_v58 = vpop.f32.mrf.mxu0 }
 0x992   : > { %v11447_v1 = vpop.permute.xlu0 %5160  ;;  %v5472_v58 = vld [vmem:[%s12157_s5 + $0x170] sm:$0xff] }
 0x993   : > { %v11449_v29 = vpop.permute.xlu1 %5156  ;;  %5793 = vmatpush.msra.mxu0 %v5472_v58 }
 0x995   : > { %5710 = vmatmul.f32.gmra.mxu3 %v5363_v61  ;;  %5794 = vmatpush.msra.mxu0 %v5471_v27 }
 0x997   : > { %5795 = vmatpush.msra.mxu0 %v5470_v23  ;;  %v5365_v23 = vsel %vm2958_vm4, %v13407_v63, %v11370_v9  ;;  %v5464_v9 = vld [vmem:[%s12157_s5 + $0x130] sm:$0xff] }
 0x998   : > { %5314 = vrot.lane.b32.xlu0 %v11118_v22, %s6755_s17 }
 0x999   : > { %5278 = vrot.lane.b32.xlu2 %v11121_v25, %s6755_s17  ;;  %5270 = vrot.lane.b32.xlu1 %v13426_v34, %s6755_s17  ;;  %v1148_v46 = vpop.f32.mrf.mxu0 }
 0x99a   : > { %v11467_v30 = vpop.permute.xlu0 %5166  ;;  %v11488_v46 = vpop.f32.mrf.mxu3  ;;  %5796 = vmatpush.msra.mxu0 %v5469_v38  ;;  %v5465_v38 = vld [vmem:[%s12157_s5 + $0x138] sm:$0xff] }
 0x99b   : > { %v11469_v61 = vpop.permute.xlu1 %5162  ;;  %13427 = vst [vmem:[#allocation183_spill] sm:$0xff] %v11488_v46 }
 0x99d   : > { %5713 = vmatmul.f32.gmra.mxu3 %v5364_v36  ;;  %v5468_v36 = vld [vmem:[%s12157_s5 + $0x150] sm:$0xff] }
 0x99e   : > { %5797 = vmatpush.msra.mxu0 %v5468_v36 }
 0x9a0   : > { %5276 = vrot.lane.b32.xlu0 %v11074_v31, %s6755_s17  ;;  %5798 = vmatpush.msra.mxu0 %v5467_v40  ;;  %v5463_v40 = vld [vmem:[%s12157_s5 + $0x128] sm:$0xff] }
 0x9a1   : > { %5274 = vrot.lane.b32.xlu1 %v11037_v33, %s6755_s17  ;;  %v1151_v46 = vpop.f32.mrf.mxu0 }
 0x9a2   : > { %v11495_v58 = vpop.permute.xlu0 %5172  ;;  %5799 = vmatpush.msra.mxu0 %v5466_v21  ;;  %v11513_v28 = vpop.f32.mrf.mxu3 }
 0x9a3   : > { %v11497_v27 = vpop.permute.xlu1 %5168  ;;  %13428 = vst [vmem:[#allocation79_spill] sm:$0xff] %v11513_v28 }
 0x9a4   : > { %5800 = vmatpush.msra.mxu0 %v5465_v38  ;;  %v5483_v38 = vld [vmem:[%s12157_s5 + $0x1c8] sm:$0xff] }
 0x9a5   : > { %5716 = vmatmul.f32.gmra.mxu3 %v5365_v23  ;;  %v5366_v23 = vsel %vm2958_vm4, %v13400_v50, %v11388_v54  ;;  %v5460_v54 = vld [vmem:[%s12157_s5 + $0x110] sm:$0xff] }
 0x9a6   : > { %5801 = vmatpush.msra.mxu0 %v5464_v9  ;;  %5911 = vmatpush.msrb.mxu3 %v5483_v38  ;;  %v5367_v38 = vsel %vm2958_vm4, %v13406_v59, %v11303_v32  ;;  %v11568_v32 = vpop.permute.xlu2 %6729 }
 0x9a8   : > { %5320 = vrot.lane.b32.xlu0 %v13388_v8, %s6755_s17  ;;  %5802 = vmatpush.msra.mxu0 %v5463_v40 }
 0x9a9   : > { %5318 = vrot.lane.b32.xlu1 %v13388_v8, %s6755_s17  ;;  %v1154_v28 = vpop.f32.mrf.mxu0 }
 0x9aa   : > { %v11520_v46 = vpop.permute.xlu0 %6719  ;;  %5803 = vmatpush.msra.mxu0 %v5462_v3  ;;  %v5461_v28 = vld [vmem:[%s12157_s5 + $0x118] sm:$0xff]  ;;  %v11547_v9 = vpop.f32.mrf.mxu3  ;;  %v5491_v3 = vld [vmem:[%s12157_s5 + $0x208] sm:$0xff] }
 0x9ab   : > { %v6721_v21 = vunpack.i.l.bf16 %v11520_v46  ;;  %v11523_v36 = vpop.permute.xlu1 %5174  ;;  %13429 = vst [vmem:[#allocation23_spill] sm:$0xff] %v11547_v9  ;;  %6032 = vmatpush.msra.mxu1 %v5491_v3  ;;  %v5490_v9 = vld [vmem:[%s12157_s5 + $0x200] sm:$0xff] }
 0x9ac   : > { %5804 = vmatpush.msra.mxu0 %v5461_v28  ;;  %v5458_v28 = vld [vmem:[%s12157_s5 + $0x100] sm:$0xff] }
 0x9ad   : > { %5719 = vmatmul.f32.gmra.mxu3 %v5366_v23  ;;  %v3176_v52 = vsel %vm2958_vm4, %v13419_v20, %v6721_v21  ;;  %6033 = vmatpush.msra.mxu1 %v5490_v9  ;;  %v5482_v9 = vld [vmem:[%s12157_s5 + $0x1c0] sm:$0xff] }
 0x9ae   : > { %4250 = vmatmul.f32.gmra.mxu1 %v3176_v52  ;;  %v5459_v52 = vld [vmem:[%s12157_s5 + $0x108] sm:$0xff]  ;;  %5805 = vmatpush.msra.mxu0 %v5460_v54  ;;  %v6732_v54 = vunpack.i.h.bf16 %v11568_v32 }
 0x9af   : > { %5912 = vmatpush.msrb.mxu3 %v5482_v9 }
 0x9b0   : > { %5806 = vmatpush.msra.mxu0 %v5459_v52 }
 0x9b1   : > { %5280 = vrot.lane.b32.xlu1 %v11149_v24, %s6755_s17  ;;  %v1157_v22 = vpop.f32.mrf.mxu0 }
 0x9b2   : > { %v11570_v22 = vpop.permute.xlu0 %6734  ;;  %5807 = vmatpush.msra.mxu0 %v5458_v28  ;;  %v11577_v42 = vpop.f32.mrf.mxu3 }
 0x9b3   : > { %v6725_v21 = vpop.permute.xlu1 %6724  ;;  %v6736_v3 = vunpack.i.l.bf16 %v11570_v22  ;;  %13430 = vst [vmem:[#allocation84_spill] sm:$0xff] %v11577_v42 }
 0x9b4   : > { %v6727_v40 = vunpack.i.h.bf16 %v6725_v21  ;;  %v6726_v23 = vunpack.i.l.bf16 %v6725_v21 }
 0x9b5   : > { %5722 = vmatmul.f32.gmra.mxu3 %v5367_v38  ;;  %v3178_v52 = vsel %vm2958_vm4, %v13419_v20, %v6736_v3  ;;  %v11595_v3 = vpop.permute.xlu2 %5184 }
 0x9b6   : > { %v3103_v24 = vsel %vm2958_vm4, %v13388_v8, %v6726_v23  ;;  %v3177_v21 = vsel %vm2958_vm4, %v13419_v20, %v6727_v40  ;;  %v5368_v23 = vsel %vm2958_vm4, %v13409_v41, %v11384_v45 }
 0x9b7   : > { %3847 = vmatmul.f32.vlgmr.msrb.gmra.mxu0 %v3103_v24  ;;  %4252 = vmatmul.f32.gmra.mxu1 %v3177_v21  ;;  %v3104_v24 = vsel %vm2958_vm4, %v13388_v8, %v6732_v54  ;;  %v5369_v21 = vsel %vm2958_vm4, %v10418_v14, %v11412_v62  ;;  %v5370_v62 = vsel %vm2958_vm4, %v10445_v13, %v11315_v10 }
 0x9b8   : > { %v5371_v10 = vsel %vm2958_vm4, %v13412_v44, %v11408_v37  ;;  %v5480_v37 = vld [vmem:[%s12157_s5 + $0x1b0] sm:$0xff] }
 0x9b9   : > { %v1159_v38 = vpop.f32.mrf.mxu0 }
 0x9ba   : > { %v11593_v42 = vpop.f32.mrf.mxu3  ;;  %v2731_v9 = vpop.permute.xlu0 %2730 }
 0x9bb   : > { %v6740_v40 = vpop.permute.xlu1 %6739 }
 0x9bc   : > { %v6742_v28 = vunpack.i.h.bf16 %v6740_v40  ;;  %v6741_v45 = vunpack.i.l.bf16 %v6740_v40 }
 0x9bd   : > { %5725 = vmatmul.f32.gmra.mxu3 %v5368_v23 }
 0x9be   : > { %v3105_v23 = vsel %vm2958_vm4, %v13388_v8, %v6741_v45  ;;  %v3179_v38 = vsel %vm2958_vm4, %v13419_v20, %v6742_v28 }
 0x9bf   : > { %3849 = vmatmul.f32.gmra.mxu0 %v3104_v24  ;;  %4254 = vmatmul.f32.gmra.mxu1 %v3178_v52  ;;  %v3106_v52 = vsel %vm2958_vm4, %v13388_v8, %v2731_v9 }
 0x9c1   : > { %v1161_v54 = vpop.f32.mrf.mxu0 }
 0x9c3   : > { %v2951_v24 = vpop.permute.xlu1 %2950 }
 0x9c4   : > { %v3180_v40 = vsel %vm2958_vm4, %v13419_v20, %v2951_v24  ;;  %v5221_v24 = vpop.permute.xlu0 %5220 }
 0x9c5   : > { %5728 = vmatmul.f32.gmra.mxu3 %v5369_v21  ;;  %v5481_v21 = vld [vmem:[%s12157_s5 + $0x1b8] sm:$0xff] }
 0x9c6   : > { %5913 = vmatpush.msrb.mxu3 %v5481_v21 }
 0x9c7   : > { %3851 = vmatmul.f32.gmra.mxu0 %v3105_v23  ;;  %4256 = vmatmul.f32.gmra.mxu1 %v3179_v38  ;;  %v11604_v45 = vpop.f32.mrf.mxu3  ;;  %v5219_v23 = vpop.permute.xlu2 %5218  ;;  %v13431_v38 = vld [vmem:[#allocation189_spill] sm:$0xff] }
 0x9c8   : > { %v5390_v54 = vsel %vm2958_vm4, %v13431_v38, %v5219_v23  ;;  %5914 = vmatpush.msrb.mxu3 %v5480_v37 }
 0x9c9   : > { %v1163_v28 = vpop.f32.mrf.mxu0 }
 0x9cc   : > { %v5227_v37 = vpop.permute.xlu0 %5226 }
 0x9cd   : > { %5731 = vmatmul.f32.gmra.mxu3 %v5370_v62  ;;  %v5372_v62 = vsel %vm2958_vm4, %v10501_v19, %v11430_v51  ;;  %v5373_v51 = vsel %vm2958_vm4, %v10525_v47, %v11335_v5  ;;  %v5479_v5 = vld [vmem:[%s12157_s5 + $0x1a8] sm:$0xff] }
 0x9ce   : > { %5915 = vmatpush.msrb.mxu3 %v5479_v5 }
 0x9cf   : > { %3853 = vmatmul.f32.gmra.mxu0 %v3106_v52  ;;  %4258 = vmatmul.f32.gmra.mxu1 %v3180_v40  ;;  %v11614_v9 = vpop.f32.mrf.mxu3  ;;  %v13433_v40 = vld [vmem:[#allocation83_spill] sm:$0xff] }
 0x9d0   : > { %13432 = vst [vmem:[#allocation190_spill] sm:$0xff] %v11614_v9  ;;  %v5391_v28 = vsel %vm2958_vm4, %v13433_v40, %v5221_v24 }
 0x9d1   : > { %v1165_v8 = vpop.f32.mrf.mxu0 }
 0x9d5   : > { %5734 = vmatmul.f32.gmra.mxu3 %v5371_v10  ;;  %v13434_v10 = vld [vmem:[#allocation184_spill] sm:$0xff] }
 0x9d7   : > { %5808 = vmatmul.f32.vlgmr.msra.gmra.mxu0 %v5390_v54  ;;  %6429 = vmatmul.msk.f32.vlgmr.msra.gmra.mxu1 %vm2958_vm4, %v13403_v55  ;;  %v5223_v55 = vpop.permute.xlu1 %5222  ;;  %v5225_v54 = vpop.permute.xlu2 %5224 }
 0x9d8   : > { %v5392_v8 = vsel %vm2958_vm4, %v13434_v10, %v5223_v55 }
 0x9d9   : > { %v1167_v52 = vpop.f32.mrf.mxu0 }
 0x9dd   : > { %5737 = vmatmul.f32.gmra.mxu3 %v5372_v62  ;;  %v13435_v62 = vld [vmem:[#allocation158_spill] sm:$0xff] }
 0x9de   : > { %v5393_v52 = vsel %vm2958_vm4, %v13435_v62, %v5225_v54  ;;  %v13438_v62 = vld [vmem:[#allocation75_spill] sm:$0xff] }
 0x9df   : > { %v11626_v21 = vpop.f32.mrf.mxu3  ;;  %5811 = vmatmul.f32.gmra.mxu0 %v5391_v28  ;;  %6430 = vmatmul.msk.f32.gmra.mxu1 %vm2958_vm4, %v13397_v39  ;;  %v5374_v39 = vsel %vm2958_vm4, %v13415_v48, %v11428_v0  ;;  %v5375_v0 = vsel %vm2958_vm4, %v10587_v60, %v11449_v29  ;;  %v13436_v28 = vld [vmem:[#allocation98_spill] sm:$0xff] }
 0x9e0   : > { %v5394_v55 = vsel %vm2958_vm4, %v13436_v28, %v5227_v37  ;;  %v5478_v29 = vld [vmem:[%s12157_s5 + $0x1a0] sm:$0xff]  ;;  %v13439_v28 = vld [vmem:[#allocation160_spill] sm:$0xff] }
 0x9e1   : > { %v1169_v23 = vpop.f32.mrf.mxu0  ;;  %5916 = vmatpush.msrb.mxu3 %v5478_v29 }
 0x9e2   : > { %v5229_v23 = vpop.permute.xlu1 %5228 }
 0x9e5   : > { %5740 = vmatmul.f32.gmra.mxu3 %v5373_v51 }
 0x9e7   : > { %5814 = vmatmul.f32.gmra.mxu0 %v5392_v8  ;;  %6431 = vmatmul.msk.f32.gmra.mxu1 %vm2958_vm4, %v13402_v35  ;;  %v13437_v8 = vld [vmem:[#allocation151_spill] sm:$0xff] }
 0x9e8   : > { %v11637_v38 = vpop.f32.mrf.mxu3  ;;  %v5395_v54 = vsel %vm2958_vm4, %v13437_v8, %v5229_v23 }
 0x9e9   : > { %v1171_v24 = vpop.f32.mrf.mxu0 }
 0x9ea   : > { %v5235_v23 = vpop.permute.xlu1 %5234 }
 0x9ed   : > { %5743 = vmatmul.f32.gmra.mxu3 %v5374_v39  ;;  %v5231_v39 = vpop.permute.xlu2 %5230 }
 0x9ef   : > { %5817 = vmatmul.f32.gmra.mxu0 %v5393_v52  ;;  %6432 = vmatmul.msk.f32.gmra.mxu1 %vm2958_vm4, %v13407_v63  ;;  %v5376_v63 = vsel %vm2958_vm4, %v13414_v4, %v11352_v11  ;;  %v5377_v11 = vsel %vm2958_vm4, %v13418_v26, %v11447_v1  ;;  %v5396_v52 = vsel %vm2958_vm4, %v13438_v62, %v5231_v39  ;;  %v5477_v1 = vld [vmem:[%s12157_s5 + $0x198] sm:$0xff] }
 0x9f0   : > { %v11649_v35 = vpop.f32.mrf.mxu3  ;;  %5917 = vmatpush.msrb.mxu3 %v5477_v1 }
 0x9f1   : > { %v1173_v40 = vpop.f32.mrf.mxu0 }
 0x9f5   : > { %5746 = vmatmul.f32.gmra.mxu3 %v5375_v0  ;;  %v5378_v0 = vsel %vm2958_vm4, %v13411_v43, %v11469_v61  ;;  %v5379_v61 = vsel %vm2958_vm4, %v13417_v56, %v11372_v49  ;;  %v5237_v8 = vpop.permute.xlu2 %5236  ;;  %v5476_v49 = vld [vmem:[%s12157_s5 + $0x190] sm:$0xff] }
 0x9f6   : > { %5918 = vmatpush.msrb.mxu3 %v5476_v49  ;;  %v13445_v49 = vld [vmem:[#allocation40_spill] sm:$0xff] }
 0x9f7   : > { %5820 = vmatmul.f32.gmra.mxu0 %v5394_v55  ;;  %6433 = vmatmul.msk.f32.gmra.mxu1 %vm2958_vm4, %v13400_v50 }
 0x9f8   : > { %v11658_v51 = vpop.f32.mrf.mxu3 }
 0x9f9   : > { %v1175_v10 = vpop.f32.mrf.mxu0 }
 0x9fd   : > { %5749 = vmatmul.f32.gmra.mxu3 %v5376_v63  ;;  %v13440_v63 = vld [vmem:[#allocation170_spill] sm:$0xff]  ;;  %v5243_v1 = vpop.permute.xlu2 %5242 }
 0x9fe   : > { %v5398_v10 = vsel %vm2958_vm4, %v13440_v63, %v5235_v23  ;;  %v13444_v23 = vld [vmem:[#allocation30_spill] sm:$0xff] }
 0x9ff   : > { %5823 = vmatmul.f32.gmra.mxu0 %v5395_v54  ;;  %6434 = vmatmul.msk.f32.gmra.mxu1 %vm2958_vm4, %v13406_v59  ;;  %v5233_v59 = vpop.permute.xlu0 %5232  ;;  %v13441_v54 = vld [vmem:[#allocation164_spill] sm:$0xff] }
 0xa00   : > { %v11670_v50 = vpop.f32.mrf.mxu3  ;;  %v5397_v55 = vsel %vm2958_vm4, %v13439_v28, %v5233_v59  ;;  %v5399_v39 = vsel %vm2958_vm4, %v13441_v54, %v5237_v8 }
 0xa01   : > { %v1177_v5 = vpop.f32.mrf.mxu0 }
 0xa04   : > { %v4249_v24 = vpop.f32.mrf.mxu1 }
 0xa05   : > { %5752 = vmatmul.f32.gmra.mxu3 %v5377_v11  ;;  %v13442_v11 = vld [vmem:[#allocation33_spill] sm:$0xff] }
 0xa07   : > { %5826 = vmatmul.f32.gmra.mxu0 %v5396_v52  ;;  %6435 = vmatmul.msk.f32.gmra.mxu1 %vm2958_vm4, %v13409_v41  ;;  %v5239_v24 = vpop.permute.xlu0 %5238  ;;  %v5241_v52 = vpop.permute.xlu1 %5240 }
 0xa08   : > { %v11679_v37 = vpop.f32.mrf.mxu3  ;;  %v5400_v5 = vsel %vm2958_vm4, %v13442_v11, %v5239_v24 }
 0xa09   : > { %v1179_v40 = vpop.f32.mrf.mxu0 }
 0xa0d   : > { %5755 = vmatmul.f32.gmra.mxu3 %v5378_v0  ;;  %v13443_v0 = vld [vmem:[#allocation41_spill] sm:$0xff] }
 0xa0e   : > { %v5401_v40 = vsel %vm2958_vm4, %v13443_v0, %v5241_v52 }
 0xa0f   : > { %5829 = vmatmul.f32.gmra.mxu0 %v5397_v55  ;;  %6436 = vmatmul.msk.f32.gmra.mxu1 %vm2958_vm4, %v10418_v14  ;;  %v5380_v14 = vsel %vm2958_vm4, %v13421_v12, %v11467_v30  ;;  %v5381_v30 = vsel %vm2958_vm4, %v10788_v17, %v11497_v27  ;;  %v5475_v27 = vld [vmem:[%s12157_s5 + $0x188] sm:$0xff]  ;;  %v5247_v24 = vpop.permute.xlu1 %5246 }
 0xa10   : > { %v11691_v41 = vpop.f32.mrf.mxu3  ;;  %5919 = vmatpush.msrb.mxu3 %v5475_v27 }
 0xa15   : > { %5758 = vmatmul.f32.gmra.mxu3 %v5379_v61  ;;  %v5402_v61 = vsel %vm2958_vm4, %v13444_v23, %v5243_v1 }
 0xa17   : > { %5832 = vmatmul.f32.gmra.mxu0 %v5398_v10  ;;  %6437 = vmatmul.msk.f32.gmra.mxu1 %vm2958_vm4, %v10445_v13 }
 0xa18   : > { %v11700_v29 = vpop.f32.mrf.mxu3 }
 0xa1d   : > { %5761 = vmatmul.f32.gmra.mxu3 %v5380_v14  ;;  %v5384_v14 = vsel %vm2958_vm4, %v10896_v2, %v11523_v36 }
 0xa1f   : > { %5835 = vmatmul.f32.gmra.mxu0 %v5399_v39  ;;  %6438 = vmatmul.msk.f32.gmra.mxu1 %vm2958_vm4, %v13412_v44  ;;  %v5382_v44 = vsel %vm2958_vm4, %v10827_v6, %v11386_v7  ;;  %v5383_v7 = vsel %vm2958_vm4, %v13424_v16, %v11495_v58  ;;  %v5474_v58 = vld [vmem:[%s12157_s5 + $0x180] sm:$0xff] }
 0xa20   : > { %v11712_v13 = vpop.f32.mrf.mxu3  ;;  %5920 = vmatpush.msrb.mxu3 %v5474_v58 }
 0xa25   : > { %5764 = vmatmul.f32.gmra.mxu3 %v5381_v30 }
 0xa27   : > { %5838 = vmatmul.f32.gmra.mxu0 %v5400_v5  ;;  %6439 = vmatmul.msk.f32.gmra.mxu1 %vm2958_vm4, %v10501_v19  ;;  %v13446_v5 = vld [vmem:[#allocation46_spill] sm:$0xff] }
 0xa28   : > { %v11721_v62 = vpop.f32.mrf.mxu3  ;;  %v5404_v52 = vsel %vm2958_vm4, %v13446_v5, %v5247_v24  ;;  %v13451_v24 = vld [vmem:[#allocation44_spill] sm:$0xff]  ;;  %v13454_v5 = vld [vmem:[#allocation57_spill] sm:$0xff] }
 0xa2b   : > { %v4251_v59 = vpop.f32.mrf.mxu1 }
 0xa2d   : > { %5767 = vmatmul.f32.gmra.mxu3 %v5382_v44 }
 0xa2f   : > { %5841 = vmatmul.f32.gmra.mxu0 %v5401_v40  ;;  %6440 = vmatmul.msk.f32.gmra.mxu1 %vm2958_vm4, %v10525_v47  ;;  %v5245_v47 = vpop.permute.xlu0 %5244  ;;  %v13447_v40 = vld [vmem:[#allocation45_spill] sm:$0xff] }
 0xa30   : > { %v11733_v19 = vpop.f32.mrf.mxu3  ;;  %v5403_v54 = vsel %vm2958_vm4, %v13445_v49, %v5245_v47 }
 0xa34   : > { %v3848_v28 = vpop.f32.mrf.mxu0  ;;  %v4253_v55 = vpop.f32.mrf.mxu1 }
 0xa35   : > { %5770 = vmatmul.f32.gmra.mxu3 %v5383_v7  ;;  %v13448_v7 = vld [vmem:[#allocation43_spill] sm:$0xff] }
 0xa37   : > { %5844 = vmatmul.f32.gmra.mxu0 %v5402_v61  ;;  %6441 = vmatmul.msk.f32.gmra.mxu1 %vm2958_vm4, %v13415_v48  ;;  %v6717_v48 = vunpack.i.h.bf16 %v11410_v57  ;;  %v5249_v57 = vpop.permute.xlu2 %5248  ;;  %v6737_v61 = vunpack.i.h.bf16 %v11570_v22  ;;  %v13450_v22 = vld [vmem:[#allocation55_spill] sm:$0xff] }
 0xa38   : > { %v11742_v63 = vpop.f32.mrf.mxu3  ;;  %v5405_v1 = vsel %vm2958_vm4, %v13447_v40, %v5249_v57  ;;  %v13455_v57 = vld [vmem:[#allocation32_spill] sm:$0xff]  ;;  %v13457_v40 = vld [vmem:[#allocation145_spill] sm:$0xff] }
 0xa39   : > { %v5385_v11 = vsel %vm2958_vm4, %v13423_v18, %v6717_v48 }
 0xa3c   : > { %v3850_v10 = vpop.f32.mrf.mxu0  ;;  %v4255_v8 = vpop.f32.mrf.mxu1 }
 0xa3d   : > { %5773 = vmatmul.f32.gmra.mxu3 %v5384_v14  ;;  %v13449_v10 = vld [vmem:[#allocation50_spill] sm:$0xff] }
 0xa3f   : > { %5847 = vmatmul.f32.gmra.mxu0 %v5403_v54  ;;  %6442 = vmatmul.msk.f32.gmra.mxu1 %vm2958_vm4, %v10587_v60  ;;  %v6722_v60 = vunpack.i.h.bf16 %v11520_v46  ;;  %v5251_v46 = vpop.permute.xlu0 %5250  ;;  %v5255_v58 = vpop.permute.xlu2 %5254 }
 0xa40   : > { %v11755_v39 = vpop.f32.mrf.mxu3  ;;  %v5406_v23 = vsel %vm2958_vm4, %v13448_v7, %v5251_v46  ;;  %v5408_v49 = vsel %vm2958_vm4, %v13450_v22, %v5255_v58  ;;  %v13462_v58 = vld [vmem:[#allocation100_spill] sm:$0xff] }
 0xa41   : > { %v5386_v0 = vsel %vm2958_vm4, %v13426_v34, %v6722_v60 }
 0xa44   : > { %v3852_v30 = vpop.f32.mrf.mxu0  ;;  %v4257_v36 = vpop.f32.mrf.mxu1 }
 0xa45   : > { %5776 = vmatmul.f32.gmra.mxu3 %v5385_v11  ;;  %v13453_v11 = vld [vmem:[#allocation4_spill] sm:$0xff] }
 0xa47   : > { %5850 = vmatmul.f32.gmra.mxu0 %v5404_v52  ;;  %6443 = vmatmul.msk.f32.gmra.mxu1 %vm2958_vm4, %v13414_v4  ;;  %v6731_v4 = vunpack.i.l.bf16 %v11568_v32  ;;  %v5388_v32 = vsel %vm2958_vm4, %v11037_v33, %v6737_v61  ;;  %v5257_v48 = vpop.permute.xlu0 %5256  ;;  %v5261_v60 = vpop.permute.xlu2 %5260 }
 0xa48   : > { %v11764_v59 = vpop.f32.mrf.mxu3 }
 0xa49   : > { %v5387_v55 = vsel %vm2958_vm4, %v10994_v15, %v6731_v4 }
 0xa4c   : > { %v3854_v44 = vpop.f32.mrf.mxu0  ;;  %v4259_v27 = vpop.f32.mrf.mxu1 }
 0xa4d   : > { %5779 = vmatmul.f32.gmra.mxu3 %v5386_v0  ;;  %v13456_v44 = vld [vmem:[#allocation3_spill] sm:$0xff] }
 0xa4f   : > { %5853 = vmatmul.f32.gmra.mxu0 %v5405_v1  ;;  %6444 = vmatmul.msk.f32.gmra.mxu1 %vm2958_vm4, %v13418_v26  ;;  %v5253_v26 = vpop.permute.xlu1 %5252  ;;  %v5263_v0 = vpop.permute.xlu0 %5262  ;;  %v13458_v1 = vld [vmem:[#allocation53_spill] sm:$0xff] }
 0xa50   : > { %v11773_v28 = vpop.f32.mrf.mxu3  ;;  %v5407_v8 = vsel %vm2958_vm4, %v13449_v10, %v5253_v26 }
 0xa54   : > { %v11829_v46 = vpop.f32.mrf.mxu0 }
 0xa55   : > { %5782 = vmatmul.f32.gmra.mxu3 %v5387_v55  ;;  %v11831_v55 = vpop.f32.mrf.mxu1 }
 0xa57   : > { %5856 = vmatmul.f32.gmra.mxu0 %v5406_v23  ;;  %6445 = vmatmul.msk.f32.gmra.mxu1 %vm2958_vm4, %v13411_v43  ;;  %v5389_v43 = vsel %vm2958_vm4, %v11074_v31, %v11595_v3  ;;  %v5259_v36 = vpop.permute.xlu1 %5258  ;;  %v13460_v23 = vld [vmem:[#allocation159_spill] sm:$0xff] }
 0xa58   : > { %v11782_v47 = vpop.f32.mrf.mxu3 }
 0xa5d   : > { %5785 = vmatmul.f32.gmra.mxu3 %v5388_v32  ;;  %v5267_v32 = vpop.permute.xlu2 %5266  ;;  %v11842_v10 = vpop.f32.mrf.mxu1 }
 0xa5f   : > { %5859 = vmatmul.f32.gmra.mxu0 %v5407_v8  ;;  %6446 = vmatmul.msk.f32.gmra.mxu1 %vm2958_vm4, %v13417_v56  ;;  %v13452_v56 = vld [vmem:[#allocation82_spill] sm:$0xff]  ;;  %v5265_v7 = vpop.permute.xlu1 %5264  ;;  %v13461_v8 = vld [vmem:[#allocation51_spill] sm:$0xff] }
 0xa60   : > { %v11790_v14 = vpop.f32.mrf.mxu3  ;;  %v5409_v30 = vsel %vm2958_vm4, %v13452_v56, %v5257_v48  ;;  %v5413_v61 = vsel %vm2958_vm4, %v13460_v23, %v5265_v7  ;;  %v13464_v56 = vld [vmem:[#allocation76_spill] sm:$0xff] }
 0xa61   : > { %v13469_v23 = vld [vmem:[#allocation68_spill] sm:$0xff] }
 0xa65   : > { %5788 = vmatmul.f32.gmra.mxu3 %v5389_v43  ;;  %v5414_v43 = vsel %vm2958_vm4, %v13462_v58, %v5267_v32  ;;  %v11853_v48 = vpop.f32.mrf.mxu1 }
 0xa67   : > { %5862 = vmatmul.f32.gmra.mxu0 %v5408_v49  ;;  %6447 = vmatmul.msk.f32.gmra.mxu1 %vm2958_vm4, %v13421_v12  ;;  %v5410_v12 = vsel %vm2958_vm4, %v13454_v5, %v5259_v36  ;;  %v5269_v49 = vpop.permute.xlu0 %5268  ;;  %v13466_v5 = vld [vmem:[#allocation7_spill] sm:$0xff] }
 0xa68   : > { %v11799_v54 = vpop.f32.mrf.mxu3 }
 0xa6d   : > { %5921 = vmatmul.f32.vlgmr.msrb.gmra.mxu3 %v13451_v24  ;;  %v13463_v24 = vld [vmem:[#allocation56_spill] sm:$0xff] }
 0xa6f   : > { %5865 = vmatmul.f32.gmra.mxu0 %v5409_v30  ;;  %6448 = vmatmul.msk.f32.gmra.mxu1 %vm2958_vm4, %v10788_v17  ;;  %v5411_v17 = vsel %vm2958_vm4, %v13456_v44, %v5261_v60  ;;  %v5415_v30 = vsel %vm2958_vm4, %v13464_v56, %v5269_v49  ;;  %v13470_v49 = vld [vmem:[#allocation91_spill] sm:$0xff] }
 0xa70   : > { %v11806_v3 = vpop.f32.mrf.mxu3 }
 0xa75   : > { %5924 = vmatmul.f32.gmra.mxu3 %v13453_v11  ;;  %v5271_v11 = vpop.permute.xlu1 %5270 }
 0xa77   : > { %5868 = vmatmul.f32.gmra.mxu0 %v5410_v12  ;;  %6449 = vmatmul.msk.f32.gmra.mxu1 %vm2958_vm4, %v10827_v6  ;;  %v5412_v6 = vsel %vm2958_vm4, %v13458_v1, %v5263_v0  ;;  %v5416_v12 = vsel %vm2958_vm4, %v13466_v5, %v5271_v11  ;;  %v13468_v0 = vld [vmem:[#allocation171_spill] sm:$0xff]  ;;  %v11878_v1 = vpop.permute.xlu0 %5314 }
 0xa78   : > { %v11813_v52 = vpop.f32.mrf.mxu3 }
 0xa7d   : > { %5927 = vmatmul.f32.gmra.mxu3 %v13455_v57  ;;  %v11867_v57 = vpop.f32.mrf.mxu1 }
 0xa7f   : > { %5871 = vmatmul.f32.gmra.mxu0 %v5411_v17  ;;  %6450 = vmatmul.msk.f32.gmra.mxu1 %vm2958_vm4, %v13424_v16  ;;  %v13459_v16 = vld [vmem:[#allocation34_spill] sm:$0xff]  ;;  %v5273_v17 = vpop.permute.xlu2 %5272 }
 0xa80   : > { %v11820_v27 = vpop.f32.mrf.mxu3 }
 0xa85   : > { %5930 = vmatmul.f32.gmra.mxu3 %v13457_v40  ;;  %v5417_v40 = vsel %vm2958_vm4, %v13468_v0, %v5273_v17  ;;  %v13474_v17 = vld [vmem:[#allocation180_spill] sm:$0xff]  ;;  %v13475_v0 = vld [vmem:[#allocation99_spill] sm:$0xff] }
 0xa87   : > { %5874 = vmatmul.f32.gmra.mxu0 %v5412_v6  ;;  %6451 = vmatmul.msk.f32.gmra.mxu1 %vm2958_vm4, %v10896_v2  ;;  %v11840_v2 = vpop.f32.mrf.mxu0 }
 0xa88   : > { %v11827_v4 = vpop.f32.mrf.mxu3 }
 0xa8d   : > { %5933 = vmatmul.f32.gmra.mxu3 %v13459_v16  ;;  %v11884_v16 = vpop.f32.mrf.mxu1 }
 0xa8f   : > { %5877 = vmatmul.f32.gmra.mxu0 %v5413_v61  ;;  %6452 = vmatmul.msk.f32.gmra.mxu1 %vm2958_vm4, %v13423_v18  ;;  %v11851_v18 = vpop.f32.mrf.mxu0 }
 0xa90   : > { %v11838_v26 = vpop.f32.mrf.mxu3 }
 0xa95   : > { %5936 = vmatmul.f32.gmra.mxu3 %v13461_v8  ;;  %v5277_v8 = vpop.permute.xlu0 %5276 }
 0xa97   : > { %5880 = vmatmul.f32.gmra.mxu0 %v5414_v43  ;;  %6453 = vmatmul.msk.f32.gmra.mxu1 %vm2958_vm4, %v13426_v34  ;;  %v13465_v34 = vld [vmem:[#allocation26_spill] sm:$0xff]  ;;  %v11865_v60 = vpop.f32.mrf.mxu0  ;;  %v11897_v43 = vpop.f32.mrf.mxu1 }
 0xa98   : > { %v11849_v22 = vpop.f32.mrf.mxu3 }
 0xa9d   : > { %5939 = vmatmul.f32.gmra.mxu3 %v13463_v24  ;;  %v13471_v24 = vld [vmem:[#allocation168_spill] sm:$0xff] }
 0xa9e   : > { %v5419_v56 = vsel %vm2958_vm4, %v13471_v24, %v5277_v8 }
 0xa9f   : > { %5883 = vmatmul.f32.gmra.mxu0 %v5415_v30  ;;  %6454 = vmatmul.msk.f32.gmra.mxu1 %vm2958_vm4, %v10994_v15  ;;  %v13467_v15 = vld [vmem:[#allocation119_spill] sm:$0xff]  ;;  %v11882_v7 = vpop.f32.mrf.mxu0  ;;  %v11910_v5 = vpop.f32.mrf.mxu1 }
 0xaa0   : > { %v11860_v36 = vpop.f32.mrf.mxu3 }
 0xaa5   : > { %5942 = vmatmul.f32.gmra.mxu3 %v13465_v34 }
 0xaa7   : > { %5886 = vmatmul.f32.gmra.mxu0 %v5416_v12  ;;  %6455 = vmatmul.msk.f32.gmra.mxu1 %vm2958_vm4, %v11037_v33  ;;  %v5275_v33 = vpop.permute.xlu1 %5274  ;;  %v11895_v58 = vpop.f32.mrf.mxu0  ;;  %v13473_v12 = vld [vmem:[#allocation131_spill] sm:$0xff] }
 0xaa8   : > { %v11871_v44 = vpop.f32.mrf.mxu3  ;;  %v5418_v61 = vsel %vm2958_vm4, %v11030_v53, %v5275_v33  ;;  %v13472_v53 = vld [vmem:[#allocation175_spill] sm:$0xff]  ;;  %v11924_v24 = vpop.f32.mrf.mxu1 }
 0xaad   : > { %5945 = vmatmul.f32.gmra.mxu3 %v13467_v15 }
 0xaaf   : > { %5889 = vmatmul.f32.gmra.mxu0 %v5417_v40  ;;  %6456 = vmatmul.msk.f32.gmra.mxu1 %vm2958_vm4, %v11074_v31  ;;  %v11893_v31 = vpop.permute.xlu2 %5316  ;;  %v11908_v34 = vpop.f32.mrf.mxu0 }
 0xab0   : > { %v11880_v6 = vpop.f32.mrf.mxu3 }
 0xab5   : > { %5948 = vmatmul.f32.gmra.mxu3 %v13469_v23  ;;  %v13476_v23 = vld [vmem:[#allocation5_spill] sm:$0xff] }
 0xab7   : > { %5892 = vmatmul.f32.gmra.mxu0 %v5418_v61  ;;  %6457 = vmatmul.msk.f32.gmra.mxu1 %vm2958_vm4, %v11121_v25  ;;  %v11906_v25 = vpop.permute.xlu1 %5318  ;;  %v5279_v11 = vpop.permute.xlu2 %5278  ;;  %v13477_v61 = vld [vmem:[#allocation90_spill] sm:$0xff] }
 0xab8   : > { %v11891_v32 = vpop.f32.mrf.mxu3  ;;  %v5420_v15 = vsel %vm2958_vm4, %v13474_v17, %v5279_v11  ;;  %v13481_v17 = vld [vmem:[#allocation66_spill] sm:$0xff] }
 0xabd   : > { %5951 = vmatmul.f32.gmra.mxu3 %v13470_v49  ;;  %v11922_v49 = vpop.f32.mrf.mxu0 }
 0xabf   : > { %5895 = vmatmul.f32.gmra.mxu0 %v5419_v56  ;;  %6458 = vmatmul.msk.f32.gmra.mxu1 %vm2958_vm4, %v13472_v53  ;;  %v5281_v33 = vpop.permute.xlu1 %5280  ;;  %v13479_v53 = vld [vmem:[#allocation163_spill] sm:$0xff] }
 0xac0   : > { %v11904_v30 = vpop.f32.mrf.mxu3  ;;  %v5421_v8 = vsel %vm2958_vm4, %v13477_v61, %v5281_v33 }
 0xac5   : > { %5954 = vmatmul.f32.gmra.mxu3 %v13473_v12  ;;  %v11936_v12 = vld [vmem:[%s12158_s6] ss:$0 sm:$0xff] }
 0xac6   : > { %v5677_v61 = vadd.f32 %v11936_v12, %v11637_v38  ;;  %v13485_v38 = vld [vmem:[#allocation9_spill] sm:$0xff] }
 0xac7   : > { %5898 = vmatmul.f32.gmra.mxu0 %v5420_v15  ;;  %6459 = vmatmul.msk.f32.gmra.mxu1 %vm2958_vm4, %v13475_v0  ;;  %v5674_v15 = vadd.f32 %v11936_v12, %v11626_v21 }
 0xac8   : > { %v11917_v40 = vpop.f32.mrf.mxu3 }
 0xacd   : > { %5957 = vmatmul.f32.gmra.mxu3 %v13476_v23 }
 0xacf   : > { %5901 = vmatmul.f32.gmra.mxu0 %v5421_v8  ;;  %6460 = vmatmul.msk.f32.gmra.mxu1 %vm2958_vm4, %v13475_v0  ;;  %v13482_v0 = vld [vmem:[#allocation69_spill] sm:$0xff] }
 0xad0   : > { %v11928_v56 = vpop.f32.mrf.mxu3 }
 0xad1   : > { %13478 = vst [vmem:[#allocation89_spill] sm:$0xff] %v11928_v56 }
 0xad5   : > { %5960 = vmatmul.f32.gmra.mxu3 %v13479_v53 }
 0xad8   : > { %v11931_v11 = vpop.f32.mrf.mxu3 }
 0xad9   : > { %13480 = vst [vmem:[#allocation186_spill] sm:$0xff] %v11931_v11  ;;  %v13483_v11 = vld [vmem:[#allocation154_spill] sm:$0xff] }
 0xada   : > { %v5584_v9 = vadd.f32 %v11936_v12, %v13483_v11  ;;  %v5587_v11 = vadd.f32 %v11936_v12, %v13485_v38 }
 0xadc   : > { %v5697_v56 = vadd.f32 %v11649_v35, %v5584_v9  ;;  %v5700_v35 = vadd.f32 %v11658_v51, %v5587_v11  ;;  %v5833_v51 = vpop.f32.mrf.mxu0  ;;  %v13489_v11 = vld [vmem:[#allocation11_spill] sm:$0xff] }
 0xadd   : > { %5963 = vmatmul.f32.gmra.mxu3 %v13481_v17  ;;  %v13484_v17 = vld [vmem:[#allocation80_spill] sm:$0xff] }
 0xade   : > { %v5810_v21 = vadd.f32 %v11829_v46, %v5697_v56  ;;  %v13486_v46 = vld [vmem:[#allocation81_spill] sm:$0xff]  ;;  %v5813_v56 = vadd.f32 %v11840_v2, %v5700_v35 }
 0xae0   : > { %v5786_v33 = vpop.f32.mrf.mxu3 }
 0xae1   : > { %v11941_v23 = vadd.f32 %v5786_v33, %v5674_v15 }
 0xae5   : > { %5966 = vmatmul.f32.gmra.mxu3 %v13482_v0 }
 0xae8   : > { %v5789_v8 = vpop.f32.mrf.mxu3 }
 0xae9   : > { %v11946_v53 = vadd.f32 %v5789_v8, %v5677_v61  ;;  %v13487_v8 = vld [vmem:[#allocation165_spill] sm:$0xff] }
 0xaed   : > { %5969 = vmatmul.f32.gmra.mxu3 %v13484_v17  ;;  %v5590_v17 = vadd.f32 %v11936_v12, %v13487_v8  ;;  %v13491_v8 = vld [vmem:[#allocation13_spill] sm:$0xff] }
 0xaf0   : > { %v5922_v15 = vpop.f32.mrf.mxu3 }
 0xaf1   : > { %v5923_v33 = vadd.f32 %v5922_v15, %v5810_v21  ;;  %v5703_v15 = vadd.f32 %v11670_v50, %v5590_v17  ;;  %v13490_v50 = vld [vmem:[#allocation173_spill] sm:$0xff]  ;;  %v5596_v17 = vadd.f32 %v11936_v12, %v13491_v8 }
 0xaf3   : > { %v6036_v9 = vadd.f32 %v11831_v55, %v5923_v33  ;;  %v13488_v55 = vld [vmem:[#allocation85_spill] sm:$0xff]  ;;  %v5816_v33 = vadd.f32 %v11851_v18, %v5703_v15 }
 0xaf5   : > { %6132 = vst.msk [vmem:[%s11957_s26] sm:$0xff] %vm6131_vm7, %v6036_v9  ;;  %5972 = vmatmul.f32.gmra.mxu3 %v13486_v46  ;;  %v5593_v9 = vadd.f32 %v11936_v12, %v13489_v11  ;;  %v6059_v46 = vpop.f32.mrf.mxu1 }
 0xaf8   : > { %v5925_v0 = vpop.f32.mrf.mxu3 }
 0xaf9   : > { %v5926_v61 = vadd.f32 %v5925_v0, %v5813_v56  ;;  %v5836_v0 = vpop.f32.mrf.mxu0 }
 0xafb   : > { %v6039_v21 = vadd.f32 %v11842_v10, %v5926_v61  ;;  %v5706_v10 = vadd.f32 %v11679_v37, %v5593_v9  ;;  %v13492_v37 = vld [vmem:[#allocation19_spill] sm:$0xff] }
 0xafd   : > { %6133 = vst.msk [vmem:[%s11957_s26 + $0x8] sm:$0xff] %vm6131_vm7, %v6039_v21  ;;  %5975 = vmatmul.f32.gmra.mxu3 %v13488_v55  ;;  %v5819_v56 = vadd.f32 %v11865_v60, %v5706_v10  ;;  %v6062_v15 = vpop.f32.mrf.mxu1 }
 0xb00   : > { %v5928_v38 = vpop.f32.mrf.mxu3 }
 0xb01   : > { %v5929_v2 = vadd.f32 %v5928_v38, %v5816_v33  ;;  %v5839_v38 = vpop.f32.mrf.mxu0 }
 0xb03   : > { %v6042_v35 = vadd.f32 %v11853_v48, %v5929_v2  ;;  %v5709_v48 = vadd.f32 %v11691_v41, %v5596_v17  ;;  %v13493_v2 = vld [vmem:[#allocation172_spill] sm:$0xff]  ;;  %v13494_v41 = vld [vmem:[#allocation49_spill] sm:$0xff] }
 0xb04   : > { %v5599_v11 = vadd.f32 %v11936_v12, %v13493_v2 }
 0xb05   : > { %6134 = vst.msk [vmem:[%s11957_s26 + $0x10] sm:$0xff] %vm6131_vm7, %v6042_v35  ;;  %5978 = vmatmul.f32.gmra.mxu3 %v13490_v50  ;;  %v5822_v55 = vadd.f32 %v11882_v7, %v5709_v48  ;;  %v6065_v10 = vpop.f32.mrf.mxu1 }
 0xb08   : > { %v5931_v18 = vpop.f32.mrf.mxu3 }
 0xb09   : > { %v5932_v61 = vadd.f32 %v5931_v18, %v5819_v56  ;;  %v13495_v56 = vld [vmem:[#allocation17_spill] sm:$0xff]  ;;  %v5842_v8 = vpop.f32.mrf.mxu0 }
 0xb0a   : > { %v5602_v18 = vadd.f32 %v11936_v12, %v13495_v56 }
 0xb0b   : > { %v6045_v21 = vadd.f32 %v11867_v57, %v5932_v61  ;;  %v5712_v57 = vadd.f32 %v11700_v29, %v5599_v11  ;;  %v13496_v29 = vld [vmem:[#allocation87_spill] sm:$0xff] }
 0xb0d   : > { %6135 = vst.msk [vmem:[%s11957_s26 + $0x18] sm:$0xff] %vm6131_vm7, %v6045_v21  ;;  %5981 = vmatmul.f32.gmra.mxu3 %v13492_v37  ;;  %v5825_v35 = vadd.f32 %v11895_v58, %v5712_v57  ;;  %v6068_v48 = vpop.f32.mrf.mxu1  ;;  %v13497_v37 = vld [vmem:[#allocation48_spill] sm:$0xff] }
 0xb10   : > { %v5934_v33 = vpop.f32.mrf.mxu3 }
 0xb11   : > { %v5935_v60 = vadd.f32 %v5934_v33, %v5822_v55  ;;  %v5605_v55 = vadd.f32 %v11936_v12, %v13497_v37  ;;  %v13503_v37 = vld [vmem:[#allocation54_spill] sm:$0xff] }
 0xb13   : > { %v6048_v9 = vadd.f32 %v11884_v16, %v5935_v60  ;;  %v5715_v16 = vadd.f32 %v11712_v13, %v5602_v18  ;;  %v13498_v13 = vld [vmem:[#allocation167_spill] sm:$0xff]  ;;  %v5845_v60 = vpop.f32.mrf.mxu0  ;;  %v13501_v18 = vld [vmem:[#allocation185_spill] sm:$0xff] }
 0xb15   : > { %6136 = vst.msk [vmem:[%s11957_s26 + $0x20] sm:$0xff] %vm6131_vm7, %v6048_v9  ;;  %5984 = vmatmul.f32.gmra.mxu3 %v13494_v41  ;;  %v5828_v17 = vadd.f32 %v11908_v34, %v5715_v16  ;;  %v13499_v9 = vld [vmem:[#allocation112_spill] sm:$0xff] }
 0xb16   : > { %v5608_v57 = vadd.f32 %v11936_v12, %v13499_v9 }
 0xb18   : > { %v5937_v7 = vpop.f32.mrf.mxu3 }
 0xb19   : > { %v5938_v50 = vadd.f32 %v5937_v7, %v5825_v35  ;;  %v6071_v35 = vpop.f32.mrf.mxu1 }
 0xb1b   : > { %v6051_v61 = vadd.f32 %v11897_v43, %v5938_v50  ;;  %v5718_v43 = vadd.f32 %v11721_v62, %v5605_v55  ;;  %v13500_v62 = vld [vmem:[#allocation21_spill] sm:$0xff]  ;;  %v5848_v50 = vpop.f32.mrf.mxu0  ;;  %v5614_v55 = vadd.f32 %v11936_v12, %v13503_v37 }
 0xb1d   : > { %6137 = vst.msk [vmem:[%s11957_s26 + $0x28] sm:$0xff] %vm6131_vm7, %v6051_v61  ;;  %5987 = vmatmul.f32.gmra.mxu3 %v13496_v29  ;;  %v5831_v2 = vadd.f32 %v11922_v49, %v5718_v43  ;;  %v5611_v61 = vadd.f32 %v11936_v12, %v13501_v18  ;;  %v5727_v43 = vadd.f32 %v11755_v39, %v5614_v55  ;;  %v13508_v18 = vld [vmem:[#allocation15_spill] sm:$0xff] }
 0xb1f   : > { %v5724_v29 = vadd.f32 %v11742_v63, %v5611_v61  ;;  %v5840_v63 = vadd.f32 %v5839_v38, %v5727_v43  ;;  %v13507_v38 = vld [vmem:[#allocation58_spill] sm:$0xff]  ;;  %v5424_v43 = vsel %vm2958_vm4, %v13419_v20, %v11906_v25 }
 0xb20   : > { %v5940_v21 = vpop.f32.mrf.mxu3 }
 0xb21   : > { %v5941_v58 = vadd.f32 %v5940_v21, %v5828_v17  ;;  %v5837_v17 = vadd.f32 %v5836_v0, %v5724_v29  ;;  %v13505_v0 = vld [vmem:[#allocation178_spill] sm:$0xff] }
 0xb23   : > { %v6054_v33 = vadd.f32 %v11910_v5, %v5941_v58  ;;  %v5721_v5 = vadd.f32 %v11733_v19, %v5608_v57  ;;  %v6074_v19 = vpop.f32.mrf.mxu1 }
 0xb25   : > { %6138 = vst.msk [vmem:[%s11957_s26 + $0x30] sm:$0xff] %vm6131_vm7, %v6054_v33  ;;  %5990 = vmatmul.f32.gmra.mxu3 %v13498_v13  ;;  %v5834_v7 = vadd.f32 %v5833_v51, %v5721_v5  ;;  %v5851_v51 = vpop.f32.mrf.mxu0 }
 0xb28   : > { %v5943_v34 = vpop.f32.mrf.mxu3 }
 0xb29   : > { %v5944_v11 = vadd.f32 %v5943_v34, %v5831_v2 }
 0xb2b   : > { %v6057_v41 = vadd.f32 %v11924_v24, %v5944_v11  ;;  %v13502_v24 = vld [vmem:[#allocation60_spill] sm:$0xff]  ;;  %v6077_v13 = vpop.f32.mrf.mxu1  ;;  %v5617_v11 = vadd.f32 %v11936_v12, %v13505_v0 }
 0xb2d   : > { %6139 = vst.msk [vmem:[%s11957_s26 + $0x38] sm:$0xff] %vm6131_vm7, %v6057_v41  ;;  %5993 = vmatmul.f32.gmra.mxu3 %v13500_v62  ;;  %v5854_v57 = vpop.f32.mrf.mxu0  ;;  %v5730_v41 = vadd.f32 %v11764_v59, %v5617_v11 }
 0xb2f   : > { %v5843_v39 = vadd.f32 %v5842_v8, %v5730_v41 }
 0xb30   : > { %v5946_v56 = vpop.f32.mrf.mxu3 }
 0xb31   : > { %v5947_v49 = vadd.f32 %v5946_v56, %v5834_v7  ;;  %v5620_v56 = vadd.f32 %v11936_v12, %v13507_v38 }
 0xb33   : > { %v6060_v16 = vadd.f32 %v6059_v46, %v5947_v49  ;;  %v13504_v46 = vld [vmem:[#allocation64_spill] sm:$0xff]  ;;  %v6080_v7 = vpop.f32.mrf.mxu1  ;;  %v5733_v61 = vadd.f32 %v11773_v28, %v5620_v56 }
 0xb35   : > { %6140 = vst.msk [vmem:[%s11957_s26 + $0x40] sm:$0xff] %vm6131_vm7, %v6060_v16  ;;  %5996 = vmatmul.f32.gmra.mxu3 %v13502_v24  ;;  %v5857_v59 = vpop.f32.mrf.mxu0  ;;  %v5846_v16 = vadd.f32 %v5845_v60, %v5733_v61  ;;  %v13509_v24 = vld [vmem:[#allocation86_spill] sm:$0xff]  ;;  %v13514_v61 = vld [vmem:[#allocation65_spill] sm:$0xff] }
 0xb38   : > { %v5949_v21 = vpop.f32.mrf.mxu3 }
 0xb39   : > { %v5950_v58 = vadd.f32 %v5949_v21, %v5837_v17  ;;  %v5623_v17 = vadd.f32 %v11936_v12, %v13509_v24 }
 0xb3b   : > { %v6063_v33 = vadd.f32 %v6062_v15, %v5950_v58  ;;  %v13506_v15 = vld [vmem:[#allocation71_spill] sm:$0xff]  ;;  %v6083_v58 = vpop.f32.mrf.mxu1 }
 0xb3d   : > { %6141 = vst.msk [vmem:[%s11957_s26 + $0x48] sm:$0xff] %vm6131_vm7, %v6063_v33  ;;  %5999 = vmatmul.f32.gmra.mxu3 %v13504_v46  ;;  %v5860_v55 = vpop.f32.mrf.mxu0  ;;  %v13511_v46 = vld [vmem:[#allocation107_spill] sm:$0xff] }
 0xb40   : > { %v5952_v2 = vpop.f32.mrf.mxu3 }
 0xb41   : > { %v5953_v34 = vadd.f32 %v5952_v2, %v5840_v63 }
 0xb43   : > { %v6066_v9 = vadd.f32 %v6065_v10, %v5953_v34  ;;  %v5422_v10 = vsel %vm2958_vm4, %v13508_v18, %v11878_v1  ;;  %v5736_v1 = vadd.f32 %v11782_v47, %v5623_v17  ;;  %v6086_v47 = vpop.f32.mrf.mxu1  ;;  %v13515_v17 = vld [vmem:[#allocation22_spill] sm:$0xff] }
 0xb45   : > { %6142 = vst.msk [vmem:[%s11957_s26 + $0x50] sm:$0xff] %vm6131_vm7, %v6066_v9  ;;  %6002 = vmatmul.f32.gmra.mxu3 %v13506_v15  ;;  %v5849_v28 = vadd.f32 %v5848_v50, %v5736_v1  ;;  %v5321_v50 = vpop.permute.xlu0 %5320  ;;  %v5863_v11 = vpop.f32.mrf.mxu0  ;;  %v13512_v9 = vld [vmem:[#allocation10_spill] sm:$0xff] }
 0xb46   : > { %v5425_v25 = vsel %vm2958_vm4, %v13419_v20, %v5321_v50  ;;  %v5629_v41 = vadd.f32 %v11936_v12, %v13512_v9  ;;  %v13518_v9 = vld [vmem:[#allocation157_spill] sm:$0xff] }
 0xb48   : > { %v5955_v5 = vpop.f32.mrf.mxu3 }
 0xb49   : > { %v5956_v62 = vadd.f32 %v5955_v5, %v5843_v39 }
 0xb4b   : > { %v6069_v49 = vadd.f32 %v6068_v48, %v5956_v62  ;;  %v13510_v48 = vld [vmem:[#allocation143_spill] sm:$0xff]  ;;  %v13513_v62 = vld [vmem:[#allocation181_spill] sm:$0xff] }
 0xb4c   : > { %v5423_v37 = vsel %vm2958_vm4, %v13510_v48, %v11893_v31  ;;  %v5632_v38 = vadd.f32 %v11936_v12, %v13513_v62  ;;  %v13519_v62 = vld [vmem:[#allocation73_spill] sm:$0xff] }
 0xb4d   : > { %6143 = vst.msk [vmem:[%s11957_s26 + $0x58] sm:$0xff] %vm6131_vm7, %v6069_v49  ;;  %6005 = vmatmul.f32.gmra.mxu3 %v5422_v10  ;;  %v5866_v49 = vpop.f32.mrf.mxu0 }
 0xb4e   : > { %v5745_v20 = vadd.f32 %v11806_v3, %v5632_v38  ;;  %v5650_v38 = vadd.f32 %v11936_v12, %v13519_v62 }
 0xb50   : > { %v5958_v8 = vpop.f32.mrf.mxu3 }
 0xb51   : > { %v5959_v29 = vadd.f32 %v5958_v8, %v5846_v16 }
 0xb53   : > { %v6072_v21 = vadd.f32 %v6071_v35, %v5959_v29  ;;  %v5626_v35 = vadd.f32 %v11936_v12, %v13511_v46 }
 0xb55   : > { %6144 = vst.msk [vmem:[%s11957_s26 + $0x60] sm:$0xff] %vm6131_vm7, %v6072_v21  ;;  %6008 = vmatmul.f32.gmra.mxu3 %v5423_v37  ;;  %v5739_v31 = vadd.f32 %v11790_v14, %v5626_v35  ;;  %v5869_v29 = vpop.f32.mrf.mxu0 }
 0xb57   : > { %v5852_v2 = vadd.f32 %v5851_v51, %v5739_v31  ;;  %v6089_v51 = vpop.f32.mrf.mxu1 }
 0xb58   : > { %v5961_v60 = vpop.f32.mrf.mxu3 }
 0xb59   : > { %v5962_v33 = vadd.f32 %v5961_v60, %v5849_v28  ;;  %v13516_v60 = vld [vmem:[#allocation70_spill] sm:$0xff] }
 0xb5b   : > { %v6075_v63 = vadd.f32 %v6074_v19, %v5962_v33  ;;  %v5742_v19 = vadd.f32 %v11799_v54, %v5629_v41  ;;  %v5641_v33 = vadd.f32 %v11936_v12, %v13516_v60  ;;  %v5647_v41 = vadd.f32 %v11936_v12, %v13518_v9 }
 0xb5d   : > { %6145 = vst.msk [vmem:[%s11957_s26 + $0x68] sm:$0xff] %vm6131_vm7, %v6075_v63  ;;  %6011 = vmatmul.f32.gmra.mxu3 %v5424_v43  ;;  %v5855_v14 = vadd.f32 %v5854_v57, %v5742_v19  ;;  %v5635_v57 = vadd.f32 %v11936_v12, %v13514_v61  ;;  %v5754_v43 = vadd.f32 %v11827_v4, %v5641_v33 }
 0xb5f   : > { %v6092_v10 = vpop.f32.mrf.mxu1  ;;  %v5748_v8 = vadd.f32 %v11813_v52, %v5635_v57  ;;  %v5867_v35 = vadd.f32 %v5866_v49, %v5754_v43  ;;  %v5763_v49 = vadd.f32 %v11860_v36, %v5650_v38 }
 0xb60   : > { %v5964_v34 = vpop.f32.mrf.mxu3 }
 0xb61   : > { %v5965_v0 = vadd.f32 %v5964_v34, %v5852_v2 }
 0xb63   : > { %v6078_v15 = vadd.f32 %v6077_v13, %v5965_v0  ;;  %v5858_v13 = vadd.f32 %v5857_v59, %v5745_v20  ;;  %v5638_v59 = vadd.f32 %v11936_v12, %v13515_v17 }
 0xb65   : > { %6146 = vst.msk [vmem:[%s11957_s26 + $0x70] sm:$0xff] %vm6131_vm7, %v6078_v15  ;;  %6014 = vmatmul.f32.gmra.mxu3 %v5425_v25  ;;  %v5751_v37 = vadd.f32 %v11820_v27, %v5638_v59 }
 0xb67   : > { %v6095_v48 = vpop.f32.mrf.mxu1  ;;  %v5864_v1 = vadd.f32 %v5863_v11, %v5751_v37 }
 0xb68   : > { %v5967_v39 = vpop.f32.mrf.mxu3 }
 0xb69   : > { %v5968_v5 = vadd.f32 %v5967_v39, %v5855_v14  ;;  %v5760_v14 = vadd.f32 %v11849_v22, %v5647_v41  ;;  %v5668_v41 = vadd.f32 %v11936_v12, %v11604_v45 }
 0xb6b   : > { %v6081_v56 = vadd.f32 %v6080_v7, %v5968_v5  ;;  %v5861_v7 = vadd.f32 %v5860_v55, %v5748_v8 }
 0xb6d   : > { %6147 = vst.msk [vmem:[%s11957_s26 + $0x78] sm:$0xff] %vm6131_vm7, %v6081_v56 }
 0xb6f   : > { %v6098_v46 = vpop.f32.mrf.mxu1 }
 0xb70   : > { %v5970_v54 = vpop.f32.mrf.mxu3 }
 0xb71   : > { %v5971_v18 = vadd.f32 %v5970_v54, %v5858_v13 }
 0xb73   : > { %v6084_v16 = vadd.f32 %v6083_v58, %v5971_v18  ;;  %v5872_v58 = vpop.f32.mrf.mxu0  ;;  %v13520_v18 = vld [vmem:[#allocation183_spill] sm:$0xff] }
 0xb75   : > { %6148 = vst.msk [vmem:[%s11957_s26 + $0x80] sm:$0xff] %vm6131_vm7, %v6084_v16 }
 0xb77   : > { %v6101_v11 = vpop.f32.mrf.mxu1 }
 0xb78   : > { %v5973_v24 = vpop.f32.mrf.mxu3 }
 0xb79   : > { %v5974_v3 = vadd.f32 %v5973_v24, %v5861_v7  ;;  %v13521_v24 = vld [vmem:[#allocation79_spill] sm:$0xff] }
 0xb7b   : > { %v6087_v21 = vadd.f32 %v6086_v47, %v5974_v3  ;;  %v5875_v31 = vpop.f32.mrf.mxu0  ;;  %v13517_v47 = vld [vmem:[#allocation188_spill] sm:$0xff]  ;;  %v5656_v3 = vadd.f32 %v11936_v12, %v13521_v24 }
 0xb7c   : > { %v5644_v2 = vadd.f32 %v11936_v12, %v13517_v47  ;;  %v5876_v13 = vadd.f32 %v5875_v31, %v5763_v49 }
 0xb7d   : > { %6149 = vst.msk [vmem:[%s11957_s26 + $0x88] sm:$0xff] %vm6131_vm7, %v6087_v21  ;;  %v5769_v59 = vadd.f32 %v11880_v6, %v5656_v3 }
 0xb7e   : > { %v5757_v34 = vadd.f32 %v11838_v26, %v5644_v2 }
 0xb7f   : > { %v6104_v5 = vpop.f32.mrf.mxu1 }
 0xb80   : > { %v5976_v52 = vpop.f32.mrf.mxu3  ;;  %v5870_v0 = vadd.f32 %v5869_v29, %v5757_v34  ;;  %v5665_v34 = vadd.f32 %v11936_v12, %v11593_v42 }
 0xb81   : > { %v5977_v28 = vadd.f32 %v5976_v52, %v5864_v1 }
 0xb83   : > { %v6090_v55 = vadd.f32 %v6089_v51, %v5977_v28  ;;  %v5878_v19 = vpop.f32.mrf.mxu0  ;;  %v5873_v51 = vadd.f32 %v5872_v58, %v5760_v14  ;;  %v13522_v58 = vld [vmem:[#allocation23_spill] sm:$0xff]  ;;  %v13524_v14 = vld [vmem:[#allocation89_spill] sm:$0xff] }
 0xb84   : > { %v5659_v52 = vadd.f32 %v11936_v12, %v13522_v58 }
 0xb85   : > { %6150 = vst.msk [vmem:[%s11957_s26 + $0x90] sm:$0xff] %vm6131_vm7, %v6090_v55 }
 0xb86   : > { %v5772_v60 = vadd.f32 %v11891_v32, %v5659_v52 }
 0xb87   : > { %v6107_v57 = vpop.f32.mrf.mxu1 }
 0xb88   : > { %v5979_v63 = vpop.f32.mrf.mxu3 }
 0xb89   : > { %v5980_v27 = vadd.f32 %v5979_v63, %v5867_v35 }
 0xb8b   : > { %v6093_v50 = vadd.f32 %v6092_v10, %v5980_v27  ;;  %v5881_v20 = vpop.f32.mrf.mxu0  ;;  %v5653_v10 = vadd.f32 %v11936_v12, %v13520_v18 }
 0xb8d   : > { %6151 = vst.msk [vmem:[%s11957_s26 + $0x98] sm:$0xff] %vm6131_vm7, %v6093_v50  ;;  %v5766_v16 = vadd.f32 %v11871_v44, %v5653_v10 }
 0xb8f   : > { %v5879_v8 = vadd.f32 %v5878_v19, %v5766_v16  ;;  %v6110_v21 = vpop.f32.mrf.mxu1 }
 0xb90   : > { %v5982_v4 = vpop.f32.mrf.mxu3 }
 0xb91   : > { %v5983_v25 = vadd.f32 %v5982_v4, %v5870_v0 }
 0xb93   : > { %v6096_v15 = vadd.f32 %v6095_v48, %v5983_v25  ;;  %v5884_v29 = vpop.f32.mrf.mxu0  ;;  %v5882_v48 = vadd.f32 %v5881_v20, %v5769_v59 }
 0xb94   : > { %v5885_v33 = vadd.f32 %v5884_v29, %v5772_v60 }
 0xb95   : > { %6152 = vst.msk [vmem:[%s11957_s26 + $0xa0] sm:$0xff] %vm6131_vm7, %v6096_v15 }
 0xb97   : > { %v6113_v55 = vpop.f32.mrf.mxu1 }
 0xb98   : > { %v5985_v39 = vpop.f32.mrf.mxu3 }
 0xb99   : > { %v5986_v26 = vadd.f32 %v5985_v39, %v5873_v51  ;;  %v5781_v51 = vadd.f32 %v13524_v14, %v5668_v41 }
 0xb9b   : > { %v6099_v56 = vadd.f32 %v6098_v46, %v5986_v26  ;;  %v5887_v1 = vpop.f32.mrf.mxu0  ;;  %v13523_v46 = vld [vmem:[#allocation84_spill] sm:$0xff] }
 0xb9c   : > { %v5662_v35 = vadd.f32 %v11936_v12, %v13523_v46 }
 0xb9d   : > { %6153 = vst.msk [vmem:[%s11957_s26 + $0xa8] sm:$0xff] %vm6131_vm7, %v6099_v56  ;;  %v13526_v56 = vld [vmem:[#allocation186_spill] sm:$0xff] }
 0xb9e   : > { %v5775_v31 = vadd.f32 %v11904_v30, %v5662_v35 }
 0xb9f   : > { %v6116_v50 = vpop.f32.mrf.mxu1 }
 0xba0   : > { %v5988_v54 = vpop.f32.mrf.mxu3  ;;  %v5888_v47 = vadd.f32 %v5887_v1, %v5775_v31 }
 0xba1   : > { %v5989_v22 = vadd.f32 %v5988_v54, %v5876_v13 }
 0xba3   : > { %v6102_v61 = vadd.f32 %v6101_v11, %v5989_v22  ;;  %v5890_v27 = vpop.f32.mrf.mxu0  ;;  %v5778_v11 = vadd.f32 %v11917_v40, %v5665_v34 }
 0xba5   : > { %6154 = vst.msk [vmem:[%s11957_s26 + $0xb0] sm:$0xff] %vm6131_vm7, %v6102_v61  ;;  %v5891_v25 = vadd.f32 %v5890_v27, %v5778_v11 }
 0xba7   : > { %v6119_v19 = vpop.f32.mrf.mxu1 }
 0xba8   : > { %v5991_v36 = vpop.f32.mrf.mxu3 }
 0xba9   : > { %v5992_v7 = vadd.f32 %v5991_v36, %v5879_v8 }
 0xbab   : > { %v6105_v17 = vadd.f32 %v6104_v5, %v5992_v7  ;;  %v5893_v4 = vpop.f32.mrf.mxu0  ;;  %v13525_v5 = vld [vmem:[#allocation190_spill] sm:$0xff] }
 0xbac   : > { %v5894_v42 = vadd.f32 %v5893_v4, %v5781_v51  ;;  %v5671_v62 = vadd.f32 %v11936_v12, %v13525_v5 }
 0xbad   : > { %6155 = vst.msk [vmem:[%s11957_s26 + $0xb8] sm:$0xff] %vm6131_vm7, %v6105_v17 }
 0xbae   : > { %v5784_v49 = vadd.f32 %v13526_v56, %v5671_v62 }
 0xbaf   : > { %v6122_v45 = vpop.f32.mrf.mxu1 }
 0xbb0   : > { %v5994_v37 = vpop.f32.mrf.mxu3 }
 0xbb1   : > { %v5995_v44 = vadd.f32 %v5994_v37, %v5882_v48 }
 0xbb3   : > { %v6108_v28 = vadd.f32 %v6107_v57, %v5995_v44  ;;  %v5896_v39 = vpop.f32.mrf.mxu0 }
 0xbb4   : > { %v5897_v20 = vadd.f32 %v5896_v39, %v5784_v49 }
 0xbb5   : > { %6156 = vst.msk [vmem:[%s11957_s26 + $0xc0] sm:$0xff] %vm6131_vm7, %v6108_v28 }
 0xbb7   : > { %v6125_v10 = vpop.f32.mrf.mxu1 }
 0xbb8   : > { %v5997_v6 = vpop.f32.mrf.mxu3 }
 0xbb9   : > { %v5998_v43 = vadd.f32 %v5997_v6, %v5885_v33 }
 0xbbb   : > { %v6111_v63 = vadd.f32 %v6110_v21, %v5998_v43  ;;  %v5899_v22 = vpop.f32.mrf.mxu0 }
 0xbbc   : > { %v5900_v61 = vadd.f32 %v5899_v22, %v11941_v23 }
 0xbbd   : > { %6157 = vst.msk [vmem:[%s11957_s26 + $0xc8] sm:$0xff] %vm6131_vm7, %v6111_v63 }
 0xbbf   : > { %v6128_v7 = vpop.f32.mrf.mxu1 }
 0xbc0   : > { %v6000_v2 = vpop.f32.mrf.mxu3 }
 0xbc1   : > { %v6001_v32 = vadd.f32 %v6000_v2, %v5888_v47 }
 0xbc3   : > { %v6114_v0 = vadd.f32 %v6113_v55, %v6001_v32  ;;  %v5902_v8 = vpop.f32.mrf.mxu0 }
 0xbc4   : > { %v5903_v29 = vadd.f32 %v5902_v8, %v11946_v53 }
 0xbc5   : > { %6158 = vst.msk [vmem:[%s11957_s26 + $0xd0] sm:$0xff] %vm6131_vm7, %v6114_v0 }
 0xbc8   : > { %v6003_v9 = vpop.f32.mrf.mxu3 }
 0xbc9   : > { %v6004_v30 = vadd.f32 %v6003_v9, %v5891_v25 }
 0xbcb   : > { %v6117_v15 = vadd.f32 %v6116_v50, %v6004_v30 }
 0xbcd   : > { %6159 = vst.msk [vmem:[%s11957_s26 + $0xd8] sm:$0xff] %vm6131_vm7, %v6117_v15 }
 0xbd0   : > { %v6006_v40 = vpop.f32.mrf.mxu3 }
 0xbd1   : > { %v6007_v26 = vadd.f32 %v6006_v40, %v5894_v42 }
 0xbd3   : > { %v6120_v38 = vadd.f32 %v6119_v19, %v6007_v26 }
 0xbd5   : > { %6160 = vst.msk [vmem:[%s11957_s26 + $0xe0] sm:$0xff] %vm6131_vm7, %v6120_v38 }
 0xbd8   : > { %v6009_v13 = vpop.f32.mrf.mxu3 }
 0xbd9   : > { %v6010_v54 = vadd.f32 %v6009_v13, %v5897_v20 }
 0xbdb   : > { %v6123_v18 = vadd.f32 %v6122_v45, %v6010_v54 }
 0xbdd   : > { %6161 = vst.msk [vmem:[%s11957_s26 + $0xe8] sm:$0xff] %vm6131_vm7, %v6123_v18 }
 0xbe0   : > { %v6012_v57 = vpop.f32.mrf.mxu3 }
 0xbe1   : > { %v6013_v12 = vadd.f32 %v6012_v57, %v5900_v61 }
 0xbe3   : > { %v6126_v16 = vadd.f32 %v6125_v10, %v6013_v12 }
 0xbe5   : > { %6162 = vst.msk [vmem:[%s11957_s26 + $0xf0] sm:$0xff] %vm6131_vm7, %v6126_v16 }
 0xbe8   : > { %v6015_v36 = vpop.f32.mrf.mxu3 }
 0xbe9   : > { %v6016_v24 = vadd.f32 %v6015_v36, %v5903_v29 }
 0xbeb   : > { %v6129_v3 = vadd.f32 %v6128_v7, %v6016_v24 }
 0xbed   : > { %6163 = vst.msk [vmem:[%s11957_s26 + $0xf8] sm:$0xff] %vm6131_vm7, %v6129_v3 }
 0xbee PF: > { %s17_s24 = sadd.s32 1, %s6753_s24  }
 0xbef   : > { %p14_p4 = scmp.ge.s32.totalorder %s17_s24, 4  }
 0xbf1   :  { %16 = sbr.rel (!%p14_p4) target bundleno = 1 (0x1), region = 78 }

</bundles_post_ra>
